<compile_context>
chip_gen: v6e
topology: v6e:2x2x1
jax: 0.10.0
libtpu: 0.0.40
codegen_flags: <defaults>
</compile_context>

<pallas_src>
import functools

import jax
import jax.numpy as jnp
import numpy as np
from jax import lax
from jax.experimental import pallas as pl
from jax.experimental.pallas import tpu as pltpu

_SLOPE = 0.2  # LeakyReLU negative slope


def _round_up(v, m):
    return ((v + m - 1) // m) * m


def _lane_shift(a, off, size):
    """s[:, i] = a[:, (i + off) % size] along the last (lane) axis, static off.

    Equivalent to pltpu.roll(a, shift=(-off) % size, axis=1); written as two
    static lane slices + one lane concat (a Mosaic lowering already proven in
    the previous version of this kernel).
    """
    k = off % size
    if k == 0:
        return a
    return jnp.concatenate([a[:, k:], a[:, :k]], axis=1)


# ---------------------------------------------------------------------------
# Fused kernel: whole ResidualDenseBlock for one batch element per grid step.
# ---------------------------------------------------------------------------
def _rdb_kernel(x_ref, w_ref, b_ref, o_ref, act_ref, *, C, D, Dpad, H, W, slope):
    HW = H * W
    R = C * Dpad

    # ---- load x into the depth-padded, channels-first VMEM activation buffer.
    # act layout: (C, Dpad, H*W); depth rows dz=0 and dz>D are kept at zero and
    # implement the conv's depth zero-padding for every layer.
    act_ref[...] = jnp.zeros_like(act_ref)
    act_ref[:, pl.ds(1, D), :] = x_ref[...].reshape(C, D, HW).astype(jnp.float32)

    # ---- hoisted (kh, kw) boundary-validity masks over the flattened plane.
    pos = lax.broadcasted_iota(jnp.int32, (1, HW), 1)
    if W & (W - 1) == 0:
        col = pos & (W - 1)                  # pos % W (power-of-two fast path)
    else:
        col = pos % W                        # TODO(synk): vector int mod for non-pow2 W
    masks = {}
    for kh in range(3):
        for kw in range(3):
            conds = []
            if kh == 0:
                conds.append(pos >= W)               # h-1 >= 0
            if kh == 2:
                conds.append(pos < (H - 1) * W)      # h+1 <= H-1
            if kw == 0:
                conds.append(col >= 1)               # w-1 >= 0
            if kw == 2:
                conds.append(col <= W - 2)           # w+1 <= W-1
            m = None
            for c in conds:
                m = c if m is None else (m & c)
            masks[(kh, kw)] = m                      # None for the center tap

    # ---- three conv layers; activations never leave VMEM.
    for layer in range(3):
        a = act_ref[...].reshape(R, HW)              # (C*Dpad, H*W), lane-dense
        acc = jnp.zeros((R, HW), jnp.float32)
        for kh in range(3):
            for kw in range(3):
                off = (kh - 1) * W + (kw - 1)
                s = _lane_shift(a, off, HW)
                m = masks[(kh, kw)]
                if m is not None:
                    s = jnp.where(m, s, 0.0)
                # the 3 depth taps are folded into the (R, R) block weight.
                acc = acc + jnp.dot(w_ref[(layer * 3 + kh) * 3 + kw], s,
                                    preferred_element_type=jnp.float32)
        acc = acc + b_ref[layer]                     # bias (zero on halo rows)
        acc = jnp.where(acc >= 0, acc, slope * acc)  # LeakyReLU(0.2)
        act_ref[...] = acc.reshape(C, Dpad, HW)      # halo rows stay exactly zero

    # ---- residual add + the single HBM writeback.
    out = act_ref[:, pl.ds(1, D), :] + x_ref[...].reshape(C, D, HW).astype(jnp.float32)
    o_ref[...] = out.reshape(1, C, D, HW).astype(o_ref.dtype)


# ---------------------------------------------------------------------------
# Wrapper
# ---------------------------------------------------------------------------
def _build_block_weights(params, D, Dpad):
    """Fold the 3 depth taps of each conv into block-structured matrices.

    Returns:
      wbig: (27, C*Dpad, C*Dpad) f32, index = layer*9 + kh*3 + kw, where
            wbig[idx][o*Dpad + p, i*Dpad + q] = w[l][o, i, kd, kh, kw] for
            q = p + kd - 1 and interior p in [1, D]; zero elsewhere, so halo
            depth rows never produce non-zero output.
      bvec: (3, C*Dpad, 1) f32 bias, zero on halo rows.
    """
    C = params[0][0].shape[0]
    R = C * Dpad

    S = np.zeros((3, Dpad, Dpad), np.float32)
    for kd in range(3):
        for p in range(1, D + 1):
            S[kd, p, p + kd - 1] = 1.0
    S = jnp.asarray(S)

    interior = np.zeros((Dpad,), np.float32)
    interior[1:D + 1] = 1.0
    interior = jnp.asarray(interior)

    wbs, bvs = [], []
    for w, b in params:
        wb = jnp.einsum('oidhw,dpq->hwopiq', w.astype(jnp.float32), S)
        wbs.append(wb.reshape(9, R, R))
        bvs.append((b.astype(jnp.float32)[:, None] * interior[None, :]).reshape(R, 1))
    return jnp.concatenate(wbs, axis=0), jnp.stack(bvs)


def residual_dense_block_forward(x_ncdhw, params):
    N, C, D, H, W = x_ncdhw.shape
    HW = H * W
    Dpad = _round_up(D + 2, 8)          # depth + halo, rounded to sublane tile
    R = C * Dpad

    wbig, bvec = _build_block_weights(params, D, Dpad)
    x2 = x_ncdhw.reshape(N, C, D, HW)   # free reshape, stays channels-first

    kernel = functools.partial(_rdb_kernel, C=C, D=D, Dpad=Dpad, H=H, W=W,
                               slope=_SLOPE)
    out = pl.pallas_call(
        kernel,
        out_shape=jax.ShapeDtypeStruct((N, C, D, HW), x_ncdhw.dtype),
        grid_spec=pltpu.PrefetchScalarGridSpec(
            num_scalar_prefetch=0,
            # one batch element per step; >=2 steps keeps both v7x TCs busy.
            grid=(N,),
            in_specs=[
                pl.BlockSpec((1, C, D, HW), lambda n: (n, 0, 0, 0)),
                # grid-invariant weights/bias: single-buffered to save VMEM.
                pl.BlockSpec((27, R, R), lambda n: (0, 0, 0),
                             pipeline_mode=pl.Buffered(1)),
                pl.BlockSpec((3, R, 1), lambda n: (0, 0, 0),
                             pipeline_mode=pl.Buffered(1)),
            ],
            out_specs=pl.BlockSpec((1, C, D, HW), lambda n: (n, 0, 0, 0)),
            scratch_shapes=[pltpu.VMEM((C, Dpad, HW), jnp.float32)],
        ),
        compiler_params=pltpu.CompilerParams(
            dimension_semantics=("parallel",),
        ),
    )(x2, wbig, bvec)
    return out.reshape(N, C, D, H, W)


# ---------------------------------------------------------------------------
# Pure-JAX reference (XLA conv) for correctness checking
# ---------------------------------------------------------------------------
def reference_forward(x, params):
    out = x
    for w, b in params:
        out = lax.conv_general_dilated(
            out, w, window_strides=(1, 1, 1),
            padding=((1, 1), (1, 1), (1, 1)),
            dimension_numbers=("NCDHW", "OIDHW", "NCDHW"))
        out = out + b.reshape(1, -1, 1, 1, 1)
        out = jnp.where(out >= 0, out, _SLOPE * out)
    return x + out


def make_params(key, channels):
    params = []
    fan_in = channels * 27
    bound = 1.0 / (fan_in ** 0.5)
    for _ in range(3):
        key, kw, kb = jax.random.split(key, 3)
        w = jax.random.uniform(kw, (channels, channels, 3, 3, 3),
                               jnp.float32, -bound, bound)
        bb = jax.random.uniform(kb, (channels,), jnp.float32, -bound, bound)
        params.append((w, bb))
    return params


if __name__ == "__main__":
    key = jax.random.PRNGKey(0)
    kx, kp = jax.random.split(key)

    N, C, D, H, W = 2, 4, 8, 16, 16
    x = jax.random.normal(kx, (N, C, D, H, W), jnp.float32)
    params = make_params(kp, C)

    fwd = jax.jit(residual_dense_block_forward)
    out = jax.block_until_ready(fwd(x, params))
    assert out.shape == (N, C, D, H, W), out.shape

    ref = jax.block_until_ready(reference_forward(x, params))
    np.testing.assert_allclose(np.asarray(out), np.asarray(ref),
                               rtol=1e-3, atol=1e-3)

    print("KERNEL_OK")
</pallas_src>

<mosaic_0001>
module attributes {stable_mosaic.version = 11 : i64} {
  func.func @_rdb_kernel(%arg0: i32, %arg1: memref<1x4x8x256xf32, #tpu.memory_space<vmem>>, %arg2: memref<27x64x64xf32, #tpu.memory_space<vmem>>, %arg3: memref<3x64x1xf32, #tpu.memory_space<vmem>>, %arg4: memref<1x4x8x256xf32, #tpu.memory_space<vmem>>, %arg5: memref<4x16x256xf32, #tpu.memory_space<vmem>>) attributes {dimension_semantics = [#tpu.dimension_semantics<parallel>], iteration_bounds = array<i64: 2>, scalar_prefetch = 0 : i64, scratch_operands = 1 : i64, tpu.core_type = #tpu.core_type<tc>, window_params = [{transform_indices = @transform_0, window_bounds = array<i64: 1, 4, 8, 256>}, {pipeline_mode = #tpu.pipeline_mode<synchronous>, transform_indices = @transform_1, window_bounds = array<i64: 27, 64, 64>}, {pipeline_mode = #tpu.pipeline_mode<synchronous>, transform_indices = @transform_2, window_bounds = array<i64: 3, 64, 1>}, {transform_indices = @transform_3, window_bounds = array<i64: 1, 4, 8, 256>}]} {
    %cst = arith.constant 0.000000e+00 : f32
    %0 = vector.broadcast %cst : f32 to vector<4x16x256xf32>
    %c0 = arith.constant 0 : index
    %c0_0 = arith.constant 0 : index
    %c0_1 = arith.constant 0 : index
    %1 = vector.load %arg5[%c0, %c0_0, %c0_1] : memref<4x16x256xf32, #tpu.memory_space<vmem>>, vector<4x16x256xf32>
    tpu.vector_store %arg5[%c0, %c0_0, %c0_1], %0 {strides = array<i32>} : memref<4x16x256xf32, #tpu.memory_space<vmem>>, vector<4x16x256xf32>,
    %c0_2 = arith.constant 0 : index
    %c0_3 = arith.constant 0 : index
    %c0_4 = arith.constant 0 : index
    %c0_5 = arith.constant 0 : index
    %2 = vector.load %arg1[%c0_2, %c0_3, %c0_4, %c0_5] : memref<1x4x8x256xf32, #tpu.memory_space<vmem>>, vector<1x4x8x256xf32>
    %3 = vector.shape_cast %2 : vector<1x4x8x256xf32> to vector<4x8x256xf32>
    %c0_6 = arith.constant 0 : index
    %c1 = arith.constant 1 : index
    %c0_7 = arith.constant 0 : index
    %4 = vector.load %arg5[%c0_6, %c1, %c0_7] : memref<4x16x256xf32, #tpu.memory_space<vmem>>, vector<4x8x256xf32>
    tpu.vector_store %arg5[%c0_6, %c1, %c0_7], %3 {strides = array<i32>} : memref<4x16x256xf32, #tpu.memory_space<vmem>>, vector<4x8x256xf32>,
    %5 = tpu.iota {dimensions = array<i32: 1>} : vector<1x256xi32>
    %c15_i32 = arith.constant 15 : i32
    %6 = vector.broadcast %c15_i32 : i32 to vector<1x256xi32>
    %7 = arith.andi %5, %6 : vector<1x256xi32>
    %c16_i32 = arith.constant 16 : i32
    %8 = vector.broadcast %c16_i32 : i32 to vector<1x256xi32>
    %9 = arith.cmpi sge, %5, %8 : vector<1x256xi32>
    %c1_i32 = arith.constant 1 : i32
    %10 = vector.broadcast %c1_i32 : i32 to vector<1x256xi32>
    %11 = arith.cmpi sge, %7, %10 : vector<1x256xi32>
    %12 = arith.andi %9, %11 : vector<1x256xi1>
    %c16_i32_8 = arith.constant 16 : i32
    %13 = vector.broadcast %c16_i32_8 : i32 to vector<1x256xi32>
    %14 = arith.cmpi sge, %5, %13 : vector<1x256xi32>
    %c16_i32_9 = arith.constant 16 : i32
    %15 = vector.broadcast %c16_i32_9 : i32 to vector<1x256xi32>
    %16 = arith.cmpi sge, %5, %15 : vector<1x256xi32>
    %c14_i32 = arith.constant 14 : i32
    %17 = vector.broadcast %c14_i32 : i32 to vector<1x256xi32>
    %18 = arith.cmpi sle, %7, %17 : vector<1x256xi32>
    %19 = arith.andi %16, %18 : vector<1x256xi1>
    %c1_i32_10 = arith.constant 1 : i32
    %20 = vector.broadcast %c1_i32_10 : i32 to vector<1x256xi32>
    %21 = arith.cmpi sge, %7, %20 : vector<1x256xi32>
    %c14_i32_11 = arith.constant 14 : i32
    %22 = vector.broadcast %c14_i32_11 : i32 to vector<1x256xi32>
    %23 = arith.cmpi sle, %7, %22 : vector<1x256xi32>
    %c240_i32 = arith.constant 240 : i32
    %24 = vector.broadcast %c240_i32 : i32 to vector<1x256xi32>
    %25 = arith.cmpi slt, %5, %24 : vector<1x256xi32>
    %c1_i32_12 = arith.constant 1 : i32
    %26 = vector.broadcast %c1_i32_12 : i32 to vector<1x256xi32>
    %27 = arith.cmpi sge, %7, %26 : vector<1x256xi32>
    %28 = arith.andi %25, %27 : vector<1x256xi1>
    %c240_i32_13 = arith.constant 240 : i32
    %29 = vector.broadcast %c240_i32_13 : i32 to vector<1x256xi32>
    %30 = arith.cmpi slt, %5, %29 : vector<1x256xi32>
    %c240_i32_14 = arith.constant 240 : i32
    %31 = vector.broadcast %c240_i32_14 : i32 to vector<1x256xi32>
    %32 = arith.cmpi slt, %5, %31 : vector<1x256xi32>
    %c14_i32_15 = arith.constant 14 : i32
    %33 = vector.broadcast %c14_i32_15 : i32 to vector<1x256xi32>
    %34 = arith.cmpi sle, %7, %33 : vector<1x256xi32>
    %35 = arith.andi %32, %34 : vector<1x256xi1>
    %c0_16 = arith.constant 0 : index
    %c0_17 = arith.constant 0 : index
    %c0_18 = arith.constant 0 : index
    %36 = vector.load %arg5[%c0_16, %c0_17, %c0_18] : memref<4x16x256xf32, #tpu.memory_space<vmem>>, vector<4x16x256xf32>
    %37 = vector.shape_cast %36 : vector<4x16x256xf32> to vector<64x256xf32>
    %cst_19 = arith.constant 0.000000e+00 : f32
    %38 = vector.broadcast %cst_19 : f32 to vector<64x256xf32>
    %39 = vector.extract_strided_slice %37 {offsets = [0, 239], sizes = [64, 17], strides = [1, 1]} : vector<64x256xf32> to vector<64x17xf32>
    %40 = vector.extract_strided_slice %37 {offsets = [0, 0], sizes = [64, 239], strides = [1, 1]} : vector<64x256xf32> to vector<64x239xf32>
    %41 = tpu.concatenate %39, %40 in 1 : vector<64x17xf32>, vector<64x239xf32> -> vector<64x256xf32>
    %cst_20 = arith.constant 0.000000e+00 : f32
    %42 = vector.shape_cast %12 : vector<1x256xi1> to vector<1x256xi1>
    %43 = vector.broadcast %42 : vector<1x256xi1> to vector<64x256xi1>
    %44 = vector.broadcast %cst_20 : f32 to vector<64x256xf32>
    %45 = arith.select %43, %41, %44 : vector<64x256xi1>, vector<64x256xf32>
    %c0_21 = arith.constant 0 : index
    %c0_22 = arith.constant 0 : index
    %c0_23 = arith.constant 0 : index
    %46 = vector.load %arg2[%c0_21, %c0_22, %c0_23] : memref<27x64x64xf32, #tpu.memory_space<vmem>>, vector<1x64x64xf32>
    %47 = vector.shape_cast %46 : vector<1x64x64xf32> to vector<64x64xf32>
    %cst_24 = arith.constant dense<0.000000e+00> : vector<64x256xf32>
    %48 = tpu.matmul %47, %45, %cst_24 {dimension_numbers = #tpu.dot_dimension_numbers<[1], [0], [0], [1], [0, 0, 1, 1], [], []>} : vector<64x64xf32>, vector<64x256xf32>, vector<64x256xf32> -> vector<64x256xf32>
    %49 = arith.addf %38, %48 : vector<64x256xf32>
    %50 = vector.extract_strided_slice %37 {offsets = [0, 240], sizes = [64, 16], strides = [1, 1]} : vector<64x256xf32> to vector<64x16xf32>
    %51 = vector.extract_strided_slice %37 {offsets = [0, 0], sizes = [64, 240], strides = [1, 1]} : vector<64x256xf32> to vector<64x240xf32>
    %52 = tpu.concatenate %50, %51 in 1 : vector<64x16xf32>, vector<64x240xf32> -> vector<64x256xf32>
    %cst_25 = arith.constant 0.000000e+00 : f32
    %53 = vector.shape_cast %14 : vector<1x256xi1> to vector<1x256xi1>
    %54 = vector.broadcast %53 : vector<1x256xi1> to vector<64x256xi1>
    %55 = vector.broadcast %cst_25 : f32 to vector<64x256xf32>
    %56 = arith.select %54, %52, %55 : vector<64x256xi1>, vector<64x256xf32>
    %c1_26 = arith.constant 1 : index
    %c0_27 = arith.constant 0 : index
    %c0_28 = arith.constant 0 : index
    %57 = vector.load %arg2[%c1_26, %c0_27, %c0_28] : memref<27x64x64xf32, #tpu.memory_space<vmem>>, vector<1x64x64xf32>
    %58 = vector.shape_cast %57 : vector<1x64x64xf32> to vector<64x64xf32>
    %cst_29 = arith.constant dense<0.000000e+00> : vector<64x256xf32>
    %59 = tpu.matmul %58, %56, %cst_29 {dimension_numbers = #tpu.dot_dimension_numbers<[1], [0], [0], [1], [0, 0, 1, 1], [], []>} : vector<64x64xf32>, vector<64x256xf32>, vector<64x256xf32> -> vector<64x256xf32>
    %60 = arith.addf %49, %59 : vector<64x256xf32>
    %61 = vector.extract_strided_slice %37 {offsets = [0, 241], sizes = [64, 15], strides = [1, 1]} : vector<64x256xf32> to vector<64x15xf32>
    %62 = vector.extract_strided_slice %37 {offsets = [0, 0], sizes = [64, 241], strides = [1, 1]} : vector<64x256xf32> to vector<64x241xf32>
    %63 = tpu.concatenate %61, %62 in 1 : vector<64x15xf32>, vector<64x241xf32> -> vector<64x256xf32>
    %cst_30 = arith.constant 0.000000e+00 : f32
    %64 = vector.shape_cast %19 : vector<1x256xi1> to vector<1x256xi1>
    %65 = vector.broadcast %64 : vector<1x256xi1> to vector<64x256xi1>
    %66 = vector.broadcast %cst_30 : f32 to vector<64x256xf32>
    %67 = arith.select %65, %63, %66 : vector<64x256xi1>, vector<64x256xf32>
    %c2 = arith.constant 2 : index
    %c0_31 = arith.constant 0 : index
    %c0_32 = arith.constant 0 : index
    %68 = vector.load %arg2[%c2, %c0_31, %c0_32] : memref<27x64x64xf32, #tpu.memory_space<vmem>>, vector<1x64x64xf32>
    %69 = vector.shape_cast %68 : vector<1x64x64xf32> to vector<64x64xf32>
    %cst_33 = arith.constant dense<0.000000e+00> : vector<64x256xf32>
    %70 = tpu.matmul %69, %67, %cst_33 {dimension_numbers = #tpu.dot_dimension_numbers<[1], [0], [0], [1], [0, 0, 1, 1], [], []>} : vector<64x64xf32>, vector<64x256xf32>, vector<64x256xf32> -> vector<64x256xf32>
    %71 = arith.addf %60, %70 : vector<64x256xf32>
    %72 = vector.extract_strided_slice %37 {offsets = [0, 255], sizes = [64, 1], strides = [1, 1]} : vector<64x256xf32> to vector<64x1xf32>
    %73 = vector.extract_strided_slice %37 {offsets = [0, 0], sizes = [64, 255], strides = [1, 1]} : vector<64x256xf32> to vector<64x255xf32>
    %74 = tpu.concatenate %72, %73 in 1 : vector<64x1xf32>, vector<64x255xf32> -> vector<64x256xf32>
    %cst_34 = arith.constant 0.000000e+00 : f32
    %75 = vector.shape_cast %21 : vector<1x256xi1> to vector<1x256xi1>
    %76 = vector.broadcast %75 : vector<1x256xi1> to vector<64x256xi1>
    %77 = vector.broadcast %cst_34 : f32 to vector<64x256xf32>
    %78 = arith.select %76, %74, %77 : vector<64x256xi1>, vector<64x256xf32>
    %c3 = arith.constant 3 : index
    %c0_35 = arith.constant 0 : index
    %c0_36 = arith.constant 0 : index
    %79 = vector.load %arg2[%c3, %c0_35, %c0_36] : memref<27x64x64xf32, #tpu.memory_space<vmem>>, vector<1x64x64xf32>
    %80 = vector.shape_cast %79 : vector<1x64x64xf32> to vector<64x64xf32>
    %cst_37 = arith.constant dense<0.000000e+00> : vector<64x256xf32>
    %81 = tpu.matmul %80, %78, %cst_37 {dimension_numbers = #tpu.dot_dimension_numbers<[1], [0], [0], [1], [0, 0, 1, 1], [], []>} : vector<64x64xf32>, vector<64x256xf32>, vector<64x256xf32> -> vector<64x256xf32>
    %82 = arith.addf %71, %81 : vector<64x256xf32>
    %c4 = arith.constant 4 : index
    %c0_38 = arith.constant 0 : index
    %c0_39 = arith.constant 0 : index
    %83 = vector.load %arg2[%c4, %c0_38, %c0_39] : memref<27x64x64xf32, #tpu.memory_space<vmem>>, vector<1x64x64xf32>
    %84 = vector.shape_cast %83 : vector<1x64x64xf32> to vector<64x64xf32>
    %cst_40 = arith.constant dense<0.000000e+00> : vector<64x256xf32>
    %85 = tpu.matmul %84, %37, %cst_40 {dimension_numbers = #tpu.dot_dimension_numbers<[1], [0], [0], [1], [0, 0, 1, 1], [], []>} : vector<64x64xf32>, vector<64x256xf32>, vector<64x256xf32> -> vector<64x256xf32>
    %86 = arith.addf %82, %85 : vector<64x256xf32>
    %87 = vector.extract_strided_slice %37 {offsets = [0, 1], sizes = [64, 255], strides = [1, 1]} : vector<64x256xf32> to vector<64x255xf32>
    %88 = vector.extract_strided_slice %37 {offsets = [0, 0], sizes = [64, 1], strides = [1, 1]} : vector<64x256xf32> to vector<64x1xf32>
    %89 = tpu.concatenate %87, %88 in 1 : vector<64x255xf32>, vector<64x1xf32> -> vector<64x256xf32>
    %cst_41 = arith.constant 0.000000e+00 : f32
    %90 = vector.shape_cast %23 : vector<1x256xi1> to vector<1x256xi1>
    %91 = vector.broadcast %90 : vector<1x256xi1> to vector<64x256xi1>
    %92 = vector.broadcast %cst_41 : f32 to vector<64x256xf32>
    %93 = arith.select %91, %89, %92 : vector<64x256xi1>, vector<64x256xf32>
    %c5 = arith.constant 5 : index
    %c0_42 = arith.constant 0 : index
    %c0_43 = arith.constant 0 : index
    %94 = vector.load %arg2[%c5, %c0_42, %c0_43] : memref<27x64x64xf32, #tpu.memory_space<vmem>>, vector<1x64x64xf32>
    %95 = vector.shape_cast %94 : vector<1x64x64xf32> to vector<64x64xf32>
    %cst_44 = arith.constant dense<0.000000e+00> : vector<64x256xf32>
    %96 = tpu.matmul %95, %93, %cst_44 {dimension_numbers = #tpu.dot_dimension_numbers<[1], [0], [0], [1], [0, 0, 1, 1], [], []>} : vector<64x64xf32>, vector<64x256xf32>, vector<64x256xf32> -> vector<64x256xf32>
    %97 = arith.addf %86, %96 : vector<64x256xf32>
    %98 = vector.extract_strided_slice %37 {offsets = [0, 15], sizes = [64, 241], strides = [1, 1]} : vector<64x256xf32> to vector<64x241xf32>
    %99 = vector.extract_strided_slice %37 {offsets = [0, 0], sizes = [64, 15], strides = [1, 1]} : vector<64x256xf32> to vector<64x15xf32>
    %100 = tpu.concatenate %98, %99 in 1 : vector<64x241xf32>, vector<64x15xf32> -> vector<64x256xf32>
    %cst_45 = arith.constant 0.000000e+00 : f32
    %101 = vector.shape_cast %28 : vector<1x256xi1> to vector<1x256xi1>
    %102 = vector.broadcast %101 : vector<1x256xi1> to vector<64x256xi1>
    %103 = vector.broadcast %cst_45 : f32 to vector<64x256xf32>
    %104 = arith.select %102, %100, %103 : vector<64x256xi1>, vector<64x256xf32>
    %c6 = arith.constant 6 : index
    %c0_46 = arith.constant 0 : index
    %c0_47 = arith.constant 0 : index
    %105 = vector.load %arg2[%c6, %c0_46, %c0_47] : memref<27x64x64xf32, #tpu.memory_space<vmem>>, vector<1x64x64xf32>
    %106 = vector.shape_cast %105 : vector<1x64x64xf32> to vector<64x64xf32>
    %cst_48 = arith.constant dense<0.000000e+00> : vector<64x256xf32>
    %107 = tpu.matmul %106, %104, %cst_48 {dimension_numbers = #tpu.dot_dimension_numbers<[1], [0], [0], [1], [0, 0, 1, 1], [], []>} : vector<64x64xf32>, vector<64x256xf32>, vector<64x256xf32> -> vector<64x256xf32>
    %108 = arith.addf %97, %107 : vector<64x256xf32>
    %109 = vector.extract_strided_slice %37 {offsets = [0, 16], sizes = [64, 240], strides = [1, 1]} : vector<64x256xf32> to vector<64x240xf32>
    %110 = vector.extract_strided_slice %37 {offsets = [0, 0], sizes = [64, 16], strides = [1, 1]} : vector<64x256xf32> to vector<64x16xf32>
    %111 = tpu.concatenate %109, %110 in 1 : vector<64x240xf32>, vector<64x16xf32> -> vector<64x256xf32>
    %cst_49 = arith.constant 0.000000e+00 : f32
    %112 = vector.shape_cast %30 : vector<1x256xi1> to vector<1x256xi1>
    %113 = vector.broadcast %112 : vector<1x256xi1> to vector<64x256xi1>
    %114 = vector.broadcast %cst_49 : f32 to vector<64x256xf32>
    %115 = arith.select %113, %111, %114 : vector<64x256xi1>, vector<64x256xf32>
    %c7 = arith.constant 7 : index
    %c0_50 = arith.constant 0 : index
    %c0_51 = arith.constant 0 : index
    %116 = vector.load %arg2[%c7, %c0_50, %c0_51] : memref<27x64x64xf32, #tpu.memory_space<vmem>>, vector<1x64x64xf32>
    %117 = vector.shape_cast %116 : vector<1x64x64xf32> to vector<64x64xf32>
    %cst_52 = arith.constant dense<0.000000e+00> : vector<64x256xf32>
    %118 = tpu.matmul %117, %115, %cst_52 {dimension_numbers = #tpu.dot_dimension_numbers<[1], [0], [0], [1], [0, 0, 1, 1], [], []>} : vector<64x64xf32>, vector<64x256xf32>, vector<64x256xf32> -> vector<64x256xf32>
    %119 = arith.addf %108, %118 : vector<64x256xf32>
    %120 = vector.extract_strided_slice %37 {offsets = [0, 17], sizes = [64, 239], strides = [1, 1]} : vector<64x256xf32> to vector<64x239xf32>
    %121 = vector.extract_strided_slice %37 {offsets = [0, 0], sizes = [64, 17], strides = [1, 1]} : vector<64x256xf32> to vector<64x17xf32>
    %122 = tpu.concatenate %120, %121 in 1 : vector<64x239xf32>, vector<64x17xf32> -> vector<64x256xf32>
    %cst_53 = arith.constant 0.000000e+00 : f32
    %123 = vector.shape_cast %35 : vector<1x256xi1> to vector<1x256xi1>
    %124 = vector.broadcast %123 : vector<1x256xi1> to vector<64x256xi1>
    %125 = vector.broadcast %cst_53 : f32 to vector<64x256xf32>
    %126 = arith.select %124, %122, %125 : vector<64x256xi1>, vector<64x256xf32>
    %c8 = arith.constant 8 : index
    %c0_54 = arith.constant 0 : index
    %c0_55 = arith.constant 0 : index
    %127 = vector.load %arg2[%c8, %c0_54, %c0_55] : memref<27x64x64xf32, #tpu.memory_space<vmem>>, vector<1x64x64xf32>
    %128 = vector.shape_cast %127 : vector<1x64x64xf32> to vector<64x64xf32>
    %cst_56 = arith.constant dense<0.000000e+00> : vector<64x256xf32>
    %129 = tpu.matmul %128, %126, %cst_56 {dimension_numbers = #tpu.dot_dimension_numbers<[1], [0], [0], [1], [0, 0, 1, 1], [], []>} : vector<64x64xf32>, vector<64x256xf32>, vector<64x256xf32> -> vector<64x256xf32>
    %130 = arith.addf %119, %129 : vector<64x256xf32>
    %c0_57 = arith.constant 0 : index
    %c0_58 = arith.constant 0 : index
    %c0_59 = arith.constant 0 : index
    %131 = vector.load %arg3[%c0_57, %c0_58, %c0_59] : memref<3x64x1xf32, #tpu.memory_space<vmem>>, vector<1x64x1xf32>
    %132 = vector.shape_cast %131 : vector<1x64x1xf32> to vector<64x1xf32>
    %133 = vector.broadcast %132 : vector<64x1xf32> to vector<64x256xf32>
    %134 = arith.addf %130, %133 : vector<64x256xf32>
    %cst_60 = arith.constant 0.000000e+00 : f32
    %135 = vector.broadcast %cst_60 : f32 to vector<64x256xf32>
    %136 = arith.cmpf oge, %134, %135 : vector<64x256xf32>
    %cst_61 = arith.constant 2.000000e-01 : f32
    %137 = vector.broadcast %cst_61 : f32 to vector<64x256xf32>
    %138 = arith.mulf %137, %134 : vector<64x256xf32>
    %139 = arith.select %136, %134, %138 : vector<64x256xi1>, vector<64x256xf32>
    %140 = vector.shape_cast %139 : vector<64x256xf32> to vector<4x16x256xf32>
    %c0_62 = arith.constant 0 : index
    %c0_63 = arith.constant 0 : index
    %c0_64 = arith.constant 0 : index
    %141 = vector.load %arg5[%c0_62, %c0_63, %c0_64] : memref<4x16x256xf32, #tpu.memory_space<vmem>>, vector<4x16x256xf32>
    tpu.vector_store %arg5[%c0_62, %c0_63, %c0_64], %140 {strides = array<i32>} : memref<4x16x256xf32, #tpu.memory_space<vmem>>, vector<4x16x256xf32>,
    %c0_65 = arith.constant 0 : index
    %c0_66 = arith.constant 0 : index
    %c0_67 = arith.constant 0 : index
    %142 = vector.load %arg5[%c0_65, %c0_66, %c0_67] : memref<4x16x256xf32, #tpu.memory_space<vmem>>, vector<4x16x256xf32>
    %143 = vector.shape_cast %142 : vector<4x16x256xf32> to vector<64x256xf32>
    %cst_68 = arith.constant 0.000000e+00 : f32
    %144 = vector.broadcast %cst_68 : f32 to vector<64x256xf32>
    %145 = vector.extract_strided_slice %143 {offsets = [0, 239], sizes = [64, 17], strides = [1, 1]} : vector<64x256xf32> to vector<64x17xf32>
    %146 = vector.extract_strided_slice %143 {offsets = [0, 0], sizes = [64, 239], strides = [1, 1]} : vector<64x256xf32> to vector<64x239xf32>
    %147 = tpu.concatenate %145, %146 in 1 : vector<64x17xf32>, vector<64x239xf32> -> vector<64x256xf32>
    %cst_69 = arith.constant 0.000000e+00 : f32
    %148 = vector.shape_cast %12 : vector<1x256xi1> to vector<1x256xi1>
    %149 = vector.broadcast %148 : vector<1x256xi1> to vector<64x256xi1>
    %150 = vector.broadcast %cst_69 : f32 to vector<64x256xf32>
    %151 = arith.select %149, %147, %150 : vector<64x256xi1>, vector<64x256xf32>
    %c9 = arith.constant 9 : index
    %c0_70 = arith.constant 0 : index
    %c0_71 = arith.constant 0 : index
    %152 = vector.load %arg2[%c9, %c0_70, %c0_71] : memref<27x64x64xf32, #tpu.memory_space<vmem>>, vector<1x64x64xf32>
    %153 = vector.shape_cast %152 : vector<1x64x64xf32> to vector<64x64xf32>
    %cst_72 = arith.constant dense<0.000000e+00> : vector<64x256xf32>
    %154 = tpu.matmul %153, %151, %cst_72 {dimension_numbers = #tpu.dot_dimension_numbers<[1], [0], [0], [1], [0, 0, 1, 1], [], []>} : vector<64x64xf32>, vector<64x256xf32>, vector<64x256xf32> -> vector<64x256xf32>
    %155 = arith.addf %144, %154 : vector<64x256xf32>
    %156 = vector.extract_strided_slice %143 {offsets = [0, 240], sizes = [64, 16], strides = [1, 1]} : vector<64x256xf32> to vector<64x16xf32>
    %157 = vector.extract_strided_slice %143 {offsets = [0, 0], sizes = [64, 240], strides = [1, 1]} : vector<64x256xf32> to vector<64x240xf32>
    %158 = tpu.concatenate %156, %157 in 1 : vector<64x16xf32>, vector<64x240xf32> -> vector<64x256xf32>
    %cst_73 = arith.constant 0.000000e+00 : f32
    %159 = vector.shape_cast %14 : vector<1x256xi1> to vector<1x256xi1>
    %160 = vector.broadcast %159 : vector<1x256xi1> to vector<64x256xi1>
    %161 = vector.broadcast %cst_73 : f32 to vector<64x256xf32>
    %162 = arith.select %160, %158, %161 : vector<64x256xi1>, vector<64x256xf32>
    %c10 = arith.constant 10 : index
    %c0_74 = arith.constant 0 : index
    %c0_75 = arith.constant 0 : index
    %163 = vector.load %arg2[%c10, %c0_74, %c0_75] : memref<27x64x64xf32, #tpu.memory_space<vmem>>, vector<1x64x64xf32>
    %164 = vector.shape_cast %163 : vector<1x64x64xf32> to vector<64x64xf32>
    %cst_76 = arith.constant dense<0.000000e+00> : vector<64x256xf32>
    %165 = tpu.matmul %164, %162, %cst_76 {dimension_numbers = #tpu.dot_dimension_numbers<[1], [0], [0], [1], [0, 0, 1, 1], [], []>} : vector<64x64xf32>, vector<64x256xf32>, vector<64x256xf32> -> vector<64x256xf32>
    %166 = arith.addf %155, %165 : vector<64x256xf32>
    %167 = vector.extract_strided_slice %143 {offsets = [0, 241], sizes = [64, 15], strides = [1, 1]} : vector<64x256xf32> to vector<64x15xf32>
    %168 = vector.extract_strided_slice %143 {offsets = [0, 0], sizes = [64, 241], strides = [1, 1]} : vector<64x256xf32> to vector<64x241xf32>
    %169 = tpu.concatenate %167, %168 in 1 : vector<64x15xf32>, vector<64x241xf32> -> vector<64x256xf32>
    %cst_77 = arith.constant 0.000000e+00 : f32
    %170 = vector.shape_cast %19 : vector<1x256xi1> to vector<1x256xi1>
    %171 = vector.broadcast %170 : vector<1x256xi1> to vector<64x256xi1>
    %172 = vector.broadcast %cst_77 : f32 to vector<64x256xf32>
    %173 = arith.select %171, %169, %172 : vector<64x256xi1>, vector<64x256xf32>
    %c11 = arith.constant 11 : index
    %c0_78 = arith.constant 0 : index
    %c0_79 = arith.constant 0 : index
    %174 = vector.load %arg2[%c11, %c0_78, %c0_79] : memref<27x64x64xf32, #tpu.memory_space<vmem>>, vector<1x64x64xf32>
    %175 = vector.shape_cast %174 : vector<1x64x64xf32> to vector<64x64xf32>
    %cst_80 = arith.constant dense<0.000000e+00> : vector<64x256xf32>
    %176 = tpu.matmul %175, %173, %cst_80 {dimension_numbers = #tpu.dot_dimension_numbers<[1], [0], [0], [1], [0, 0, 1, 1], [], []>} : vector<64x64xf32>, vector<64x256xf32>, vector<64x256xf32> -> vector<64x256xf32>
    %177 = arith.addf %166, %176 : vector<64x256xf32>
    %178 = vector.extract_strided_slice %143 {offsets = [0, 255], sizes = [64, 1], strides = [1, 1]} : vector<64x256xf32> to vector<64x1xf32>
    %179 = vector.extract_strided_slice %143 {offsets = [0, 0], sizes = [64, 255], strides = [1, 1]} : vector<64x256xf32> to vector<64x255xf32>
    %180 = tpu.concatenate %178, %179 in 1 : vector<64x1xf32>, vector<64x255xf32> -> vector<64x256xf32>
    %cst_81 = arith.constant 0.000000e+00 : f32
    %181 = vector.shape_cast %21 : vector<1x256xi1> to vector<1x256xi1>
    %182 = vector.broadcast %181 : vector<1x256xi1> to vector<64x256xi1>
    %183 = vector.broadcast %cst_81 : f32 to vector<64x256xf32>
    %184 = arith.select %182, %180, %183 : vector<64x256xi1>, vector<64x256xf32>
    %c12 = arith.constant 12 : index
    %c0_82 = arith.constant 0 : index
    %c0_83 = arith.constant 0 : index
    %185 = vector.load %arg2[%c12, %c0_82, %c0_83] : memref<27x64x64xf32, #tpu.memory_space<vmem>>, vector<1x64x64xf32>
    %186 = vector.shape_cast %185 : vector<1x64x64xf32> to vector<64x64xf32>
    %cst_84 = arith.constant dense<0.000000e+00> : vector<64x256xf32>
    %187 = tpu.matmul %186, %184, %cst_84 {dimension_numbers = #tpu.dot_dimension_numbers<[1], [0], [0], [1], [0, 0, 1, 1], [], []>} : vector<64x64xf32>, vector<64x256xf32>, vector<64x256xf32> -> vector<64x256xf32>
    %188 = arith.addf %177, %187 : vector<64x256xf32>
    %c13 = arith.constant 13 : index
    %c0_85 = arith.constant 0 : index
    %c0_86 = arith.constant 0 : index
    %189 = vector.load %arg2[%c13, %c0_85, %c0_86] : memref<27x64x64xf32, #tpu.memory_space<vmem>>, vector<1x64x64xf32>
    %190 = vector.shape_cast %189 : vector<1x64x64xf32> to vector<64x64xf32>
    %cst_87 = arith.constant dense<0.000000e+00> : vector<64x256xf32>
    %191 = tpu.matmul %190, %143, %cst_87 {dimension_numbers = #tpu.dot_dimension_numbers<[1], [0], [0], [1], [0, 0, 1, 1], [], []>} : vector<64x64xf32>, vector<64x256xf32>, vector<64x256xf32> -> vector<64x256xf32>
    %192 = arith.addf %188, %191 : vector<64x256xf32>
    %193 = vector.extract_strided_slice %143 {offsets = [0, 1], sizes = [64, 255], strides = [1, 1]} : vector<64x256xf32> to vector<64x255xf32>
    %194 = vector.extract_strided_slice %143 {offsets = [0, 0], sizes = [64, 1], strides = [1, 1]} : vector<64x256xf32> to vector<64x1xf32>
    %195 = tpu.concatenate %193, %194 in 1 : vector<64x255xf32>, vector<64x1xf32> -> vector<64x256xf32>
    %cst_88 = arith.constant 0.000000e+00 : f32
    %196 = vector.shape_cast %23 : vector<1x256xi1> to vector<1x256xi1>
    %197 = vector.broadcast %196 : vector<1x256xi1> to vector<64x256xi1>
    %198 = vector.broadcast %cst_88 : f32 to vector<64x256xf32>
    %199 = arith.select %197, %195, %198 : vector<64x256xi1>, vector<64x256xf32>
    %c14 = arith.constant 14 : index
    %c0_89 = arith.constant 0 : index
    %c0_90 = arith.constant 0 : index
    %200 = vector.load %arg2[%c14, %c0_89, %c0_90] : memref<27x64x64xf32, #tpu.memory_space<vmem>>, vector<1x64x64xf32>
    %201 = vector.shape_cast %200 : vector<1x64x64xf32> to vector<64x64xf32>
    %cst_91 = arith.constant dense<0.000000e+00> : vector<64x256xf32>
    %202 = tpu.matmul %201, %199, %cst_91 {dimension_numbers = #tpu.dot_dimension_numbers<[1], [0], [0], [1], [0, 0, 1, 1], [], []>} : vector<64x64xf32>, vector<64x256xf32>, vector<64x256xf32> -> vector<64x256xf32>
    %203 = arith.addf %192, %202 : vector<64x256xf32>
    %204 = vector.extract_strided_slice %143 {offsets = [0, 15], sizes = [64, 241], strides = [1, 1]} : vector<64x256xf32> to vector<64x241xf32>
    %205 = vector.extract_strided_slice %143 {offsets = [0, 0], sizes = [64, 15], strides = [1, 1]} : vector<64x256xf32> to vector<64x15xf32>
    %206 = tpu.concatenate %204, %205 in 1 : vector<64x241xf32>, vector<64x15xf32> -> vector<64x256xf32>
    %cst_92 = arith.constant 0.000000e+00 : f32
    %207 = vector.shape_cast %28 : vector<1x256xi1> to vector<1x256xi1>
    %208 = vector.broadcast %207 : vector<1x256xi1> to vector<64x256xi1>
    %209 = vector.broadcast %cst_92 : f32 to vector<64x256xf32>
    %210 = arith.select %208, %206, %209 : vector<64x256xi1>, vector<64x256xf32>
    %c15 = arith.constant 15 : index
    %c0_93 = arith.constant 0 : index
    %c0_94 = arith.constant 0 : index
    %211 = vector.load %arg2[%c15, %c0_93, %c0_94] : memref<27x64x64xf32, #tpu.memory_space<vmem>>, vector<1x64x64xf32>
    %212 = vector.shape_cast %211 : vector<1x64x64xf32> to vector<64x64xf32>
    %cst_95 = arith.constant dense<0.000000e+00> : vector<64x256xf32>
    %213 = tpu.matmul %212, %210, %cst_95 {dimension_numbers = #tpu.dot_dimension_numbers<[1], [0], [0], [1], [0, 0, 1, 1], [], []>} : vector<64x64xf32>, vector<64x256xf32>, vector<64x256xf32> -> vector<64x256xf32>
    %214 = arith.addf %203, %213 : vector<64x256xf32>
    %215 = vector.extract_strided_slice %143 {offsets = [0, 16], sizes = [64, 240], strides = [1, 1]} : vector<64x256xf32> to vector<64x240xf32>
    %216 = vector.extract_strided_slice %143 {offsets = [0, 0], sizes = [64, 16], strides = [1, 1]} : vector<64x256xf32> to vector<64x16xf32>
    %217 = tpu.concatenate %215, %216 in 1 : vector<64x240xf32>, vector<64x16xf32> -> vector<64x256xf32>
    %cst_96 = arith.constant 0.000000e+00 : f32
    %218 = vector.shape_cast %30 : vector<1x256xi1> to vector<1x256xi1>
    %219 = vector.broadcast %218 : vector<1x256xi1> to vector<64x256xi1>
    %220 = vector.broadcast %cst_96 : f32 to vector<64x256xf32>
    %221 = arith.select %219, %217, %220 : vector<64x256xi1>, vector<64x256xf32>
    %c16 = arith.constant 16 : index
    %c0_97 = arith.constant 0 : index
    %c0_98 = arith.constant 0 : index
    %222 = vector.load %arg2[%c16, %c0_97, %c0_98] : memref<27x64x64xf32, #tpu.memory_space<vmem>>, vector<1x64x64xf32>
    %223 = vector.shape_cast %222 : vector<1x64x64xf32> to vector<64x64xf32>
    %cst_99 = arith.constant dense<0.000000e+00> : vector<64x256xf32>
    %224 = tpu.matmul %223, %221, %cst_99 {dimension_numbers = #tpu.dot_dimension_numbers<[1], [0], [0], [1], [0, 0, 1, 1], [], []>} : vector<64x64xf32>, vector<64x256xf32>, vector<64x256xf32> -> vector<64x256xf32>
    %225 = arith.addf %214, %224 : vector<64x256xf32>
    %226 = vector.extract_strided_slice %143 {offsets = [0, 17], sizes = [64, 239], strides = [1, 1]} : vector<64x256xf32> to vector<64x239xf32>
    %227 = vector.extract_strided_slice %143 {offsets = [0, 0], sizes = [64, 17], strides = [1, 1]} : vector<64x256xf32> to vector<64x17xf32>
    %228 = tpu.concatenate %226, %227 in 1 : vector<64x239xf32>, vector<64x17xf32> -> vector<64x256xf32>
    %cst_100 = arith.constant 0.000000e+00 : f32
    %229 = vector.shape_cast %35 : vector<1x256xi1> to vector<1x256xi1>
    %230 = vector.broadcast %229 : vector<1x256xi1> to vector<64x256xi1>
    %231 = vector.broadcast %cst_100 : f32 to vector<64x256xf32>
    %232 = arith.select %230, %228, %231 : vector<64x256xi1>, vector<64x256xf32>
    %c17 = arith.constant 17 : index
    %c0_101 = arith.constant 0 : index
    %c0_102 = arith.constant 0 : index
    %233 = vector.load %arg2[%c17, %c0_101, %c0_102] : memref<27x64x64xf32, #tpu.memory_space<vmem>>, vector<1x64x64xf32>
    %234 = vector.shape_cast %233 : vector<1x64x64xf32> to vector<64x64xf32>
    %cst_103 = arith.constant dense<0.000000e+00> : vector<64x256xf32>
    %235 = tpu.matmul %234, %232, %cst_103 {dimension_numbers = #tpu.dot_dimension_numbers<[1], [0], [0], [1], [0, 0, 1, 1], [], []>} : vector<64x64xf32>, vector<64x256xf32>, vector<64x256xf32> -> vector<64x256xf32>
    %236 = arith.addf %225, %235 : vector<64x256xf32>
    %c1_104 = arith.constant 1 : index
    %c0_105 = arith.constant 0 : index
    %c0_106 = arith.constant 0 : index
    %237 = vector.load %arg3[%c1_104, %c0_105, %c0_106] : memref<3x64x1xf32, #tpu.memory_space<vmem>>, vector<1x64x1xf32>
    %238 = vector.shape_cast %237 : vector<1x64x1xf32> to vector<64x1xf32>
    %239 = vector.broadcast %238 : vector<64x1xf32> to vector<64x256xf32>
    %240 = arith.addf %236, %239 : vector<64x256xf32>
    %cst_107 = arith.constant 0.000000e+00 : f32
    %241 = vector.broadcast %cst_107 : f32 to vector<64x256xf32>
    %242 = arith.cmpf oge, %240, %241 : vector<64x256xf32>
    %cst_108 = arith.constant 2.000000e-01 : f32
    %243 = vector.broadcast %cst_108 : f32 to vector<64x256xf32>
    %244 = arith.mulf %243, %240 : vector<64x256xf32>
    %245 = arith.select %242, %240, %244 : vector<64x256xi1>, vector<64x256xf32>
    %246 = vector.shape_cast %245 : vector<64x256xf32> to vector<4x16x256xf32>
    %c0_109 = arith.constant 0 : index
    %c0_110 = arith.constant 0 : index
    %c0_111 = arith.constant 0 : index
    %247 = vector.load %arg5[%c0_109, %c0_110, %c0_111] : memref<4x16x256xf32, #tpu.memory_space<vmem>>, vector<4x16x256xf32>
    tpu.vector_store %arg5[%c0_109, %c0_110, %c0_111], %246 {strides = array<i32>} : memref<4x16x256xf32, #tpu.memory_space<vmem>>, vector<4x16x256xf32>,
    %c0_112 = arith.constant 0 : index
    %c0_113 = arith.constant 0 : index
    %c0_114 = arith.constant 0 : index
    %248 = vector.load %arg5[%c0_112, %c0_113, %c0_114] : memref<4x16x256xf32, #tpu.memory_space<vmem>>, vector<4x16x256xf32>
    %249 = vector.shape_cast %248 : vector<4x16x256xf32> to vector<64x256xf32>
    %cst_115 = arith.constant 0.000000e+00 : f32
    %250 = vector.broadcast %cst_115 : f32 to vector<64x256xf32>
    %251 = vector.extract_strided_slice %249 {offsets = [0, 239], sizes = [64, 17], strides = [1, 1]} : vector<64x256xf32> to vector<64x17xf32>
    %252 = vector.extract_strided_slice %249 {offsets = [0, 0], sizes = [64, 239], strides = [1, 1]} : vector<64x256xf32> to vector<64x239xf32>
    %253 = tpu.concatenate %251, %252 in 1 : vector<64x17xf32>, vector<64x239xf32> -> vector<64x256xf32>
    %cst_116 = arith.constant 0.000000e+00 : f32
    %254 = vector.shape_cast %12 : vector<1x256xi1> to vector<1x256xi1>
    %255 = vector.broadcast %254 : vector<1x256xi1> to vector<64x256xi1>
    %256 = vector.broadcast %cst_116 : f32 to vector<64x256xf32>
    %257 = arith.select %255, %253, %256 : vector<64x256xi1>, vector<64x256xf32>
    %c18 = arith.constant 18 : index
    %c0_117 = arith.constant 0 : index
    %c0_118 = arith.constant 0 : index
    %258 = vector.load %arg2[%c18, %c0_117, %c0_118] : memref<27x64x64xf32, #tpu.memory_space<vmem>>, vector<1x64x64xf32>
    %259 = vector.shape_cast %258 : vector<1x64x64xf32> to vector<64x64xf32>
    %cst_119 = arith.constant dense<0.000000e+00> : vector<64x256xf32>
    %260 = tpu.matmul %259, %257, %cst_119 {dimension_numbers = #tpu.dot_dimension_numbers<[1], [0], [0], [1], [0, 0, 1, 1], [], []>} : vector<64x64xf32>, vector<64x256xf32>, vector<64x256xf32> -> vector<64x256xf32>
    %261 = arith.addf %250, %260 : vector<64x256xf32>
    %262 = vector.extract_strided_slice %249 {offsets = [0, 240], sizes = [64, 16], strides = [1, 1]} : vector<64x256xf32> to vector<64x16xf32>
    %263 = vector.extract_strided_slice %249 {offsets = [0, 0], sizes = [64, 240], strides = [1, 1]} : vector<64x256xf32> to vector<64x240xf32>
    %264 = tpu.concatenate %262, %263 in 1 : vector<64x16xf32>, vector<64x240xf32> -> vector<64x256xf32>
    %cst_120 = arith.constant 0.000000e+00 : f32
    %265 = vector.shape_cast %14 : vector<1x256xi1> to vector<1x256xi1>
    %266 = vector.broadcast %265 : vector<1x256xi1> to vector<64x256xi1>
    %267 = vector.broadcast %cst_120 : f32 to vector<64x256xf32>
    %268 = arith.select %266, %264, %267 : vector<64x256xi1>, vector<64x256xf32>
    %c19 = arith.constant 19 : index
    %c0_121 = arith.constant 0 : index
    %c0_122 = arith.constant 0 : index
    %269 = vector.load %arg2[%c19, %c0_121, %c0_122] : memref<27x64x64xf32, #tpu.memory_space<vmem>>, vector<1x64x64xf32>
    %270 = vector.shape_cast %269 : vector<1x64x64xf32> to vector<64x64xf32>
    %cst_123 = arith.constant dense<0.000000e+00> : vector<64x256xf32>
    %271 = tpu.matmul %270, %268, %cst_123 {dimension_numbers = #tpu.dot_dimension_numbers<[1], [0], [0], [1], [0, 0, 1, 1], [], []>} : vector<64x64xf32>, vector<64x256xf32>, vector<64x256xf32> -> vector<64x256xf32>
    %272 = arith.addf %261, %271 : vector<64x256xf32>
    %273 = vector.extract_strided_slice %249 {offsets = [0, 241], sizes = [64, 15], strides = [1, 1]} : vector<64x256xf32> to vector<64x15xf32>
    %274 = vector.extract_strided_slice %249 {offsets = [0, 0], sizes = [64, 241], strides = [1, 1]} : vector<64x256xf32> to vector<64x241xf32>
    %275 = tpu.concatenate %273, %274 in 1 : vector<64x15xf32>, vector<64x241xf32> -> vector<64x256xf32>
    %cst_124 = arith.constant 0.000000e+00 : f32
    %276 = vector.shape_cast %19 : vector<1x256xi1> to vector<1x256xi1>
    %277 = vector.broadcast %276 : vector<1x256xi1> to vector<64x256xi1>
    %278 = vector.broadcast %cst_124 : f32 to vector<64x256xf32>
    %279 = arith.select %277, %275, %278 : vector<64x256xi1>, vector<64x256xf32>
    %c20 = arith.constant 20 : index
    %c0_125 = arith.constant 0 : index
    %c0_126 = arith.constant 0 : index
    %280 = vector.load %arg2[%c20, %c0_125, %c0_126] : memref<27x64x64xf32, #tpu.memory_space<vmem>>, vector<1x64x64xf32>
    %281 = vector.shape_cast %280 : vector<1x64x64xf32> to vector<64x64xf32>
    %cst_127 = arith.constant dense<0.000000e+00> : vector<64x256xf32>
    %282 = tpu.matmul %281, %279, %cst_127 {dimension_numbers = #tpu.dot_dimension_numbers<[1], [0], [0], [1], [0, 0, 1, 1], [], []>} : vector<64x64xf32>, vector<64x256xf32>, vector<64x256xf32> -> vector<64x256xf32>
    %283 = arith.addf %272, %282 : vector<64x256xf32>
    %284 = vector.extract_strided_slice %249 {offsets = [0, 255], sizes = [64, 1], strides = [1, 1]} : vector<64x256xf32> to vector<64x1xf32>
    %285 = vector.extract_strided_slice %249 {offsets = [0, 0], sizes = [64, 255], strides = [1, 1]} : vector<64x256xf32> to vector<64x255xf32>
    %286 = tpu.concatenate %284, %285 in 1 : vector<64x1xf32>, vector<64x255xf32> -> vector<64x256xf32>
    %cst_128 = arith.constant 0.000000e+00 : f32
    %287 = vector.shape_cast %21 : vector<1x256xi1> to vector<1x256xi1>
    %288 = vector.broadcast %287 : vector<1x256xi1> to vector<64x256xi1>
    %289 = vector.broadcast %cst_128 : f32 to vector<64x256xf32>
    %290 = arith.select %288, %286, %289 : vector<64x256xi1>, vector<64x256xf32>
    %c21 = arith.constant 21 : index
    %c0_129 = arith.constant 0 : index
    %c0_130 = arith.constant 0 : index
    %291 = vector.load %arg2[%c21, %c0_129, %c0_130] : memref<27x64x64xf32, #tpu.memory_space<vmem>>, vector<1x64x64xf32>
    %292 = vector.shape_cast %291 : vector<1x64x64xf32> to vector<64x64xf32>
    %cst_131 = arith.constant dense<0.000000e+00> : vector<64x256xf32>
    %293 = tpu.matmul %292, %290, %cst_131 {dimension_numbers = #tpu.dot_dimension_numbers<[1], [0], [0], [1], [0, 0, 1, 1], [], []>} : vector<64x64xf32>, vector<64x256xf32>, vector<64x256xf32> -> vector<64x256xf32>
    %294 = arith.addf %283, %293 : vector<64x256xf32>
    %c22 = arith.constant 22 : index
    %c0_132 = arith.constant 0 : index
    %c0_133 = arith.constant 0 : index
    %295 = vector.load %arg2[%c22, %c0_132, %c0_133] : memref<27x64x64xf32, #tpu.memory_space<vmem>>, vector<1x64x64xf32>
    %296 = vector.shape_cast %295 : vector<1x64x64xf32> to vector<64x64xf32>
    %cst_134 = arith.constant dense<0.000000e+00> : vector<64x256xf32>
    %297 = tpu.matmul %296, %249, %cst_134 {dimension_numbers = #tpu.dot_dimension_numbers<[1], [0], [0], [1], [0, 0, 1, 1], [], []>} : vector<64x64xf32>, vector<64x256xf32>, vector<64x256xf32> -> vector<64x256xf32>
    %298 = arith.addf %294, %297 : vector<64x256xf32>
    %299 = vector.extract_strided_slice %249 {offsets = [0, 1], sizes = [64, 255], strides = [1, 1]} : vector<64x256xf32> to vector<64x255xf32>
    %300 = vector.extract_strided_slice %249 {offsets = [0, 0], sizes = [64, 1], strides = [1, 1]} : vector<64x256xf32> to vector<64x1xf32>
    %301 = tpu.concatenate %299, %300 in 1 : vector<64x255xf32>, vector<64x1xf32> -> vector<64x256xf32>
    %cst_135 = arith.constant 0.000000e+00 : f32
    %302 = vector.shape_cast %23 : vector<1x256xi1> to vector<1x256xi1>
    %303 = vector.broadcast %302 : vector<1x256xi1> to vector<64x256xi1>
    %304 = vector.broadcast %cst_135 : f32 to vector<64x256xf32>
    %305 = arith.select %303, %301, %304 : vector<64x256xi1>, vector<64x256xf32>
    %c23 = arith.constant 23 : index
    %c0_136 = arith.constant 0 : index
    %c0_137 = arith.constant 0 : index
    %306 = vector.load %arg2[%c23, %c0_136, %c0_137] : memref<27x64x64xf32, #tpu.memory_space<vmem>>, vector<1x64x64xf32>
    %307 = vector.shape_cast %306 : vector<1x64x64xf32> to vector<64x64xf32>
    %cst_138 = arith.constant dense<0.000000e+00> : vector<64x256xf32>
    %308 = tpu.matmul %307, %305, %cst_138 {dimension_numbers = #tpu.dot_dimension_numbers<[1], [0], [0], [1], [0, 0, 1, 1], [], []>} : vector<64x64xf32>, vector<64x256xf32>, vector<64x256xf32> -> vector<64x256xf32>
    %309 = arith.addf %298, %308 : vector<64x256xf32>
    %310 = vector.extract_strided_slice %249 {offsets = [0, 15], sizes = [64, 241], strides = [1, 1]} : vector<64x256xf32> to vector<64x241xf32>
    %311 = vector.extract_strided_slice %249 {offsets = [0, 0], sizes = [64, 15], strides = [1, 1]} : vector<64x256xf32> to vector<64x15xf32>
    %312 = tpu.concatenate %310, %311 in 1 : vector<64x241xf32>, vector<64x15xf32> -> vector<64x256xf32>
    %cst_139 = arith.constant 0.000000e+00 : f32
    %313 = vector.shape_cast %28 : vector<1x256xi1> to vector<1x256xi1>
    %314 = vector.broadcast %313 : vector<1x256xi1> to vector<64x256xi1>
    %315 = vector.broadcast %cst_139 : f32 to vector<64x256xf32>
    %316 = arith.select %314, %312, %315 : vector<64x256xi1>, vector<64x256xf32>
    %c24 = arith.constant 24 : index
    %c0_140 = arith.constant 0 : index
    %c0_141 = arith.constant 0 : index
    %317 = vector.load %arg2[%c24, %c0_140, %c0_141] : memref<27x64x64xf32, #tpu.memory_space<vmem>>, vector<1x64x64xf32>
    %318 = vector.shape_cast %317 : vector<1x64x64xf32> to vector<64x64xf32>
    %cst_142 = arith.constant dense<0.000000e+00> : vector<64x256xf32>
    %319 = tpu.matmul %318, %316, %cst_142 {dimension_numbers = #tpu.dot_dimension_numbers<[1], [0], [0], [1], [0, 0, 1, 1], [], []>} : vector<64x64xf32>, vector<64x256xf32>, vector<64x256xf32> -> vector<64x256xf32>
    %320 = arith.addf %309, %319 : vector<64x256xf32>
    %321 = vector.extract_strided_slice %249 {offsets = [0, 16], sizes = [64, 240], strides = [1, 1]} : vector<64x256xf32> to vector<64x240xf32>
    %322 = vector.extract_strided_slice %249 {offsets = [0, 0], sizes = [64, 16], strides = [1, 1]} : vector<64x256xf32> to vector<64x16xf32>
    %323 = tpu.concatenate %321, %322 in 1 : vector<64x240xf32>, vector<64x16xf32> -> vector<64x256xf32>
    %cst_143 = arith.constant 0.000000e+00 : f32
    %324 = vector.shape_cast %30 : vector<1x256xi1> to vector<1x256xi1>
    %325 = vector.broadcast %324 : vector<1x256xi1> to vector<64x256xi1>
    %326 = vector.broadcast %cst_143 : f32 to vector<64x256xf32>
    %327 = arith.select %325, %323, %326 : vector<64x256xi1>, vector<64x256xf32>
    %c25 = arith.constant 25 : index
    %c0_144 = arith.constant 0 : index
    %c0_145 = arith.constant 0 : index
    %328 = vector.load %arg2[%c25, %c0_144, %c0_145] : memref<27x64x64xf32, #tpu.memory_space<vmem>>, vector<1x64x64xf32>
    %329 = vector.shape_cast %328 : vector<1x64x64xf32> to vector<64x64xf32>
    %cst_146 = arith.constant dense<0.000000e+00> : vector<64x256xf32>
    %330 = tpu.matmul %329, %327, %cst_146 {dimension_numbers = #tpu.dot_dimension_numbers<[1], [0], [0], [1], [0, 0, 1, 1], [], []>} : vector<64x64xf32>, vector<64x256xf32>, vector<64x256xf32> -> vector<64x256xf32>
    %331 = arith.addf %320, %330 : vector<64x256xf32>
    %332 = vector.extract_strided_slice %249 {offsets = [0, 17], sizes = [64, 239], strides = [1, 1]} : vector<64x256xf32> to vector<64x239xf32>
    %333 = vector.extract_strided_slice %249 {offsets = [0, 0], sizes = [64, 17], strides = [1, 1]} : vector<64x256xf32> to vector<64x17xf32>
    %334 = tpu.concatenate %332, %333 in 1 : vector<64x239xf32>, vector<64x17xf32> -> vector<64x256xf32>
    %cst_147 = arith.constant 0.000000e+00 : f32
    %335 = vector.shape_cast %35 : vector<1x256xi1> to vector<1x256xi1>
    %336 = vector.broadcast %335 : vector<1x256xi1> to vector<64x256xi1>
    %337 = vector.broadcast %cst_147 : f32 to vector<64x256xf32>
    %338 = arith.select %336, %334, %337 : vector<64x256xi1>, vector<64x256xf32>
    %c26 = arith.constant 26 : index
    %c0_148 = arith.constant 0 : index
    %c0_149 = arith.constant 0 : index
    %339 = vector.load %arg2[%c26, %c0_148, %c0_149] : memref<27x64x64xf32, #tpu.memory_space<vmem>>, vector<1x64x64xf32>
    %340 = vector.shape_cast %339 : vector<1x64x64xf32> to vector<64x64xf32>
    %cst_150 = arith.constant dense<0.000000e+00> : vector<64x256xf32>
    %341 = tpu.matmul %340, %338, %cst_150 {dimension_numbers = #tpu.dot_dimension_numbers<[1], [0], [0], [1], [0, 0, 1, 1], [], []>} : vector<64x64xf32>, vector<64x256xf32>, vector<64x256xf32> -> vector<64x256xf32>
    %342 = arith.addf %331, %341 : vector<64x256xf32>
    %c2_151 = arith.constant 2 : index
    %c0_152 = arith.constant 0 : index
    %c0_153 = arith.constant 0 : index
    %343 = vector.load %arg3[%c2_151, %c0_152, %c0_153] : memref<3x64x1xf32, #tpu.memory_space<vmem>>, vector<1x64x1xf32>
    %344 = vector.shape_cast %343 : vector<1x64x1xf32> to vector<64x1xf32>
    %345 = vector.broadcast %344 : vector<64x1xf32> to vector<64x256xf32>
    %346 = arith.addf %342, %345 : vector<64x256xf32>
    %cst_154 = arith.constant 0.000000e+00 : f32
    %347 = vector.broadcast %cst_154 : f32 to vector<64x256xf32>
    %348 = arith.cmpf oge, %346, %347 : vector<64x256xf32>
    %cst_155 = arith.constant 2.000000e-01 : f32
    %349 = vector.broadcast %cst_155 : f32 to vector<64x256xf32>
    %350 = arith.mulf %349, %346 : vector<64x256xf32>
    %351 = arith.select %348, %346, %350 : vector<64x256xi1>, vector<64x256xf32>
    %352 = vector.shape_cast %351 : vector<64x256xf32> to vector<4x16x256xf32>
    %c0_156 = arith.constant 0 : index
    %c0_157 = arith.constant 0 : index
    %c0_158 = arith.constant 0 : index
    %353 = vector.load %arg5[%c0_156, %c0_157, %c0_158] : memref<4x16x256xf32, #tpu.memory_space<vmem>>, vector<4x16x256xf32>
    tpu.vector_store %arg5[%c0_156, %c0_157, %c0_158], %352 {strides = array<i32>} : memref<4x16x256xf32, #tpu.memory_space<vmem>>, vector<4x16x256xf32>,
    %c0_159 = arith.constant 0 : index
    %c1_160 = arith.constant 1 : index
    %c0_161 = arith.constant 0 : index
    %354 = vector.load %arg5[%c0_159, %c1_160, %c0_161] : memref<4x16x256xf32, #tpu.memory_space<vmem>>, vector<4x8x256xf32>
    %c0_162 = arith.constant 0 : index
    %c0_163 = arith.constant 0 : index
    %c0_164 = arith.constant 0 : index
    %c0_165 = arith.constant 0 : index
    %355 = vector.load %arg1[%c0_162, %c0_163, %c0_164, %c0_165] : memref<1x4x8x256xf32, #tpu.memory_space<vmem>>, vector<1x4x8x256xf32>
    %356 = vector.shape_cast %355 : vector<1x4x8x256xf32> to vector<4x8x256xf32>
    %357 = arith.addf %354, %356 : vector<4x8x256xf32>
    %358 = vector.shape_cast %357 : vector<4x8x256xf32> to vector<1x4x8x256xf32>
    %c0_166 = arith.constant 0 : index
    %c0_167 = arith.constant 0 : index
    %c0_168 = arith.constant 0 : index
    %c0_169 = arith.constant 0 : index
    %359 = vector.load %arg4[%c0_166, %c0_167, %c0_168, %c0_169] : memref<1x4x8x256xf32, #tpu.memory_space<vmem>>, vector<1x4x8x256xf32>
    tpu.vector_store %arg4[%c0_166, %c0_167, %c0_168, %c0_169], %358 {strides = array<i32>} : memref<1x4x8x256xf32, #tpu.memory_space<vmem>>, vector<1x4x8x256xf32>,
    return
  }
  func.func @transform_0(%arg0: i32) -> (i32, i32, i32, i32) {
    %c0_i32 = arith.constant 0 : i32
    %c0_i32_0 = arith.constant 0 : i32
    %c0_i32_1 = arith.constant 0 : i32
    %c0_i32_2 = arith.constant 0 : i32
    return %arg0, %c0_i32, %c0_i32_0, %c0_i32_1 : i32, i32, i32, i32
  }
  func.func @transform_1(%arg0: i32) -> (i32, i32, i32) {
    %c0_i32 = arith.constant 0 : i32
    %c0_i32_0 = arith.constant 0 : i32
    %c0_i32_1 = arith.constant 0 : i32
    %c0_i32_2 = arith.constant 0 : i32
    return %c0_i32, %c0_i32_0, %c0_i32_1 : i32, i32, i32
  }
  func.func @transform_2(%arg0: i32) -> (i32, i32, i32) {
    %c0_i32 = arith.constant 0 : i32
    %c0_i32_0 = arith.constant 0 : i32
    %c0_i32_1 = arith.constant 0 : i32
    %c0_i32_2 = arith.constant 0 : i32
    return %c0_i32, %c0_i32_0, %c0_i32_1 : i32, i32, i32
  }
  func.func @transform_3(%arg0: i32) -> (i32, i32, i32, i32) {
    %c0_i32 = arith.constant 0 : i32
    %c0_i32_0 = arith.constant 0 : i32
    %c0_i32_1 = arith.constant 0 : i32
    %c0_i32_2 = arith.constant 0 : i32
    return %arg0, %c0_i32, %c0_i32_0, %c0_i32_1 : i32, i32, i32, i32
  }
}

</mosaic_0001>

<bundles_post_ra>
// kernel: residual_dense_block_forward.1
= control target key start
LH: loop header
LB: loop body
LE: loop exit
PB: predicated region body
PF: predicated region fallthrough
CT: control target
= control target key end

     0   :  { %s8207_s12 = smov 0   ;;  %s13038_s0 = inlined_call_operand.vmem [shape: f32[2,4,8,256], index: 0, kind: input, shape index: {}]   ;;  %s13039_s1 = inlined_call_operand.vmem [shape: f32[27,64,64], index: 1, kind: input, shape index: {}]   ;;  %s13040_s2 = inlined_call_operand.vmem [shape: f32[3,64,1], index: 2, kind: input, shape index: {}]   ;;  %s13041_s3 = inlined_call_operand.vmem [shape: f32[2,4,8,256], index: 3, kind: output, shape index: {}]  }
   0x1 LB: > { %s7344_s13 = sadd.s32 4294967295, %s8175_s12   ;;  %p7348_p0 = scmp.ge.s32.totalorder %s8175_s12, 1  ;;  %s8175_s12 = sphi %s8207_s12, %s13_s12  }
   0x2   : > { %p137_p1 = scmp.lt.s32.totalorder %s8175_s12, 3 }
   0x4   : > { %p138_p2 = pnand %p7348_p0, %p137_p1 }
   0x6   : > { %141 = sbr.rel (%p138_p2) target bundleno = 1816 (0x718), region = 32 }
   0xb   : > { %p8215_p3 = scmp.lt.s32.totalorder %s7344_s13, 1  ;;  %v13045_v0 = vmov 0.0   ;;  %s8178_s19 = smov 16   ;;  %v235_v33 = vlaneseq  ;;  %vm429_vm0 = vcmask 130048   ;;  %vm13088_vm3 = vcmask 138240  }
   0xc   : > { %186 = vst [vmem:[#allocation2 + $0x28] sm:$0xff] %v13045_v0  ;;  %171 = vst [vmem:[#allocation2 + $0x30] sm:$0xff] %v13045_v0  ;;  %604 = vmatprep.mubr.f32.mxu1 %v13045_v0  ;;  %580 = vmatprep.mubr.f32.mxu0 %v13045_v0  ;;  %s8179_s20 = smov 17   ;;  %s8180_s21 = smov 15   ;;  %vm491_vm4 = vcmask 523264   ;;  %vm806_vm8 = vcmask 121856  }
   0xd   : > { %172 = vst [vmem:[#allocation2] sm:$0xff] %v13045_v0  ;;  %173 = vst [vmem:[#allocation2 + $0x58] sm:$0xff] %v13045_v0  ;;  %s13476_s13 = smov (!%p8215_p3, %s7344_s13), 1  ;;  %s8181_s22 = smov 1   ;;  %v8405_v36 = vand.u32 127, %v235_v33  ;;  %v7354_v33 = vld [vmem:[%s13039_s1 + $0x48] sm:$0xff] }
   0xe   : > { %174 = vst [vmem:[#allocation2 + $0x18] sm:$0xff] %v13045_v0  ;;  %175 = vst [vmem:[#allocation2 + $0x50] sm:$0xff] %v13045_v0  ;;  %s8131_s15 = sshll.u32 %s13476_s13, 6  ;;  %s8182_s23 = smov 127   ;;  %vm13044_vm11 = vcmask 7168   ;;  %vm13042_vm12 = vcmask 1039360  }
   0xf   : > { %176 = vst [vmem:[#allocation2 + $0x68] sm:$0xff] %v13045_v0  ;;  %177 = vst [vmem:[#allocation2 + $0x8] sm:$0xff] %v13045_v0  ;;  %s8247_s18 = scalar_lea.vmem %s13038_s0, %s8131_s15  ;;  %vm13089_vm1 = vcmp.ge.s32.totalorder %v8405_v36, 16  ;;  %v8461_v59 = vadd.s32 128, %v8405_v36  ;;  %s8183_s24 = smov 113   ;;  %v238_v62 = vand.u32 15, %v8405_v36 }
  0x10   : > { %178 = vst [vmem:[#allocation2 + $0x48] sm:$0xff] %v13045_v0  ;;  %179 = vst [vmem:[#allocation2 + $0x40] sm:$0xff] %v13045_v0  ;;  %v194_v1 = vld [vmem:[%s8247_s18 + $0x38] sm:$0xff]  ;;  %v193_v2 = vld [vmem:[%s8247_s18 + $0x30] sm:$0xff]  ;;  %s8184_s17 = smov 112   ;;  %s8185_s27 = smov 111  }
  0x11   : > { %180 = vst [vmem:[#allocation2 + $0x20] sm:$0xff] %v13045_v0  ;;  %181 = vst [vmem:[#allocation2 + $0x10] sm:$0xff] %v13045_v0  ;;  %v192_v3 = vld [vmem:[%s8247_s18 + $0x28] sm:$0xff]  ;;  %v210_v4 = vrot.slane %v194_v1, 7  ;;  %v209_v5 = vrot.slane %v193_v2, 7  ;;  %v191_v7 = vld [vmem:[%s8247_s18 + $0x20] sm:$0xff] }
  0x12   : > { %182 = vst [vmem:[#allocation2 + $0x38] sm:$0xff] %v13045_v0  ;;  %183 = vst [vmem:[#allocation2 + $0x60] sm:$0xff] %v13045_v0  ;;  %v208_v6 = vrot.slane %v192_v3, 7  ;;  %v190_v8 = vld [vmem:[%s8247_s18 + $0x18] sm:$0xff]  ;;  %v189_v9 = vld [vmem:[%s8247_s18 + $0x10] sm:$0xff]  ;;  %v207_v10 = vrot.slane %v191_v7, 7 }
  0x13   : > { %184 = vst [vmem:[#allocation2 + $0x70] sm:$0xff] %v13045_v0  ;;  %185 = vst [vmem:[#allocation2 + $0x78] sm:$0xff] %v13045_v0  ;;  %v206_v11 = vrot.slane %v190_v8, 7  ;;  %v205_v12 = vrot.slane %v189_v9, 7  ;;  %v188_v13 = vld [vmem:[%s8247_s18 + $0x8] sm:$0xff]  ;;  %v187_v14 = vld [vmem:[%s8247_s18] sm:$0xff] }
  0x14   : > { %234 = vst [vmem:[#allocation2 + $0x28] sm:$0x1] %v210_v4  ;;  %232 = vst [vmem:[#allocation2 + $0x70] sm:$0xfe] %v210_v4  ;;  %v204_v15 = vrot.slane %v188_v13, 7  ;;  %v203_v16 = vrot.slane %v187_v14, 7 }
  0x15   : > { %233 = vst [vmem:[#allocation2 + $0x78] sm:$0x1] %v209_v5  ;;  %231 = vst [vmem:[#allocation2 + $0x60] sm:$0xfe] %v209_v5  ;;  %v239_v2 = vand.u32 15, %v8461_v59  ;;  %vm8483_vm2 = vcmp.ge.s32.totalorder %v238_v62, 1 }
  0x16   : > { %230 = vst [vmem:[#allocation2 + $0x38] sm:$0x1] %v208_v6  ;;  %228 = vst [vmem:[#allocation2 + $0x20] sm:$0xfe] %v208_v6  ;;  %v13115_v5 = vmov 0  ;;  %v7357_v8 = vld [vmem:[%s13039_s1 + $0x60] sm:$0xff] }
  0x17   : > { %229 = vst [vmem:[#allocation2 + $0x10] sm:$0x1] %v207_v10  ;;  %227 = vst [vmem:[#allocation2 + $0x40] sm:$0xfe] %v207_v10  ;;  %v13116_v5 = vsel %vm8483_vm2, 4294967295, %v13115_v5  ;;  %v7353_v9 = vld [vmem:[%s13039_s1 + $0x40] sm:$0xff] }
  0x18   : > { %226 = vst [vmem:[#allocation2 + $0x48] sm:$0x1] %v206_v11  ;;  %224 = vst [vmem:[#allocation2 + $0x68] sm:$0xfe] %v206_v11  ;;  %vm8495_vm5 = vcmp.ge.s32.totalorder %v239_v2, 1  ;;  %v13118_v10 = vmov 0 }
  0x19   : > { %225 = vst [vmem:[#allocation2 + $0x8] sm:$0x1] %v205_v12  ;;  %223 = vst [vmem:[#allocation2 + $0x50] sm:$0xfe] %v205_v12  ;;  %v13119_v10 = vsel %vm8495_vm5, 4294967295, %v13118_v10  ;;  %v13121_v13 = vmov 0 }
  0x1a   : > { %222 = vst [vmem:[#allocation2 + $0x18] sm:$0x1] %v204_v15  ;;  %220 = vst [vmem:[#allocation2] sm:$0xfe] %v204_v15  ;;  %vm8535_vm7 = vcmp.le.s32.totalorder %v238_v62, 14  ;;  %vm8552_vm9 = vcmp.le.s32.totalorder %v239_v2, 14 }
  0x1b   : > { %221 = vst [vmem:[#allocation2 + $0x58] sm:$0x1] %v203_v16  ;;  %219 = vst [vmem:[#allocation2 + $0x30] sm:$0xfe] %v203_v16  ;;  %v8257_v17 = vld [vmem:[#allocation2 + $0x28] sm:$0xff]  ;;  %v8259_v18 = vld [vmem:[#allocation2 + $0x70] sm:$0xff] }
  0x1c   : > { %403 = vrot.lane.b32.xlu0 %v8257_v17, %s8178_s19  ;;  %401 = vrot.lane.b32.xlu1 %v8259_v18, %s8178_s19  ;;  %v8265_v19 = vld [vmem:[#allocation2 + $0x78] sm:$0xff]  ;;  %v8267_v20 = vld [vmem:[#allocation2 + $0x60] sm:$0xff]  ;;  %13113 = vst [vmem:[#allocation3_spill] sm:$0xff] %v8405_v36  ;;  %13114 = vst [vmem:[#allocation4_spill] sm:$0xff] %v8461_v59  ;;  %vm13068_vm13 = vcmp.lt.s32.totalorder %v8461_v59, 240  ;;  %vm13043_vm14 = vcmask 924672  }
  0x1d   : > { %v8273_v21 = vld [vmem:[#allocation2 + $0x38] sm:$0xff]  ;;  %v8281_v23 = vld [vmem:[#allocation2 + $0x20] sm:$0xff]  ;;  %13117 = vst [vmem:[#allocation5_spill] sm:$0xff] %v13116_v5  ;;  %13120 = vst [vmem:[#allocation6_spill] sm:$0xff] %v13119_v10 }
  0x1e   : > { %v8275_v22 = vld [vmem:[#allocation2 + $0x10] sm:$0xff]  ;;  %v8283_v24 = vld [vmem:[#allocation2 + $0x40] sm:$0xff]  ;;  %vm8511_vm6 = vmand %vm13089_vm1, %vm8483_vm2 }
  0x1f   : > { %v8289_v25 = vld [vmem:[#allocation2 + $0x48] sm:$0xff]  ;;  %v13122_v13 = vsel %vm8511_vm6, 4294967295, %v13121_v13  ;;  %vm8567_vm10 = vmand %vm13089_vm1, %vm8535_vm7 }
  0x20   : > { %427 = vrot.lane.b32.xlu0 %v8265_v19, %s8178_s19  ;;  %425 = vrot.lane.b32.xlu1 %v8267_v20, %s8178_s19  ;;  %v8291_v26 = vld [vmem:[#allocation2 + $0x8] sm:$0xff]  ;;  %v8299_v28 = vld [vmem:[#allocation2 + $0x50] sm:$0xff]  ;;  %13123 = vst [vmem:[#allocation7_spill] sm:$0xff] %v13122_v13  ;;  %vm8952_vm15 = vmand %vm13068_vm13, %vm8495_vm5 }
  0x21   : > { %v8297_v27 = vld [vmem:[#allocation2 + $0x68] sm:$0xff]  ;;  %v8305_v29 = vld [vmem:[#allocation2 + $0x18] sm:$0xff]  ;;  %v8313_v31 = vld [vmem:[#allocation2] sm:$0xff] }
  0x22   : > { %v8307_v30 = vld [vmem:[#allocation2 + $0x58] sm:$0xff]  ;;  %v8315_v32 = vld [vmem:[#allocation2 + $0x30] sm:$0xff]  ;;  %v7358_v16 = vld [vmem:[%s13039_s1 + $0x68] sm:$0xff] }
  0x24   : > { %399 = vrot.lane.b32.xlu0 %v8273_v21, %s8178_s19  ;;  %423 = vrot.lane.b32.xlu1 %v8275_v22, %s8178_s19 }
  0x28   : > { %397 = vrot.lane.b32.xlu0 %v8281_v23, %s8178_s19  ;;  %421 = vrot.lane.b32.xlu1 %v8283_v24, %s8178_s19 }
  0x2c   : > { %395 = vrot.lane.b32.xlu0 %v8289_v25, %s8178_s19  ;;  %419 = vrot.lane.b32.xlu1 %v8291_v26, %s8178_s19 }
  0x30   : > { %393 = vrot.lane.b32.xlu0 %v8297_v27, %s8178_s19  ;;  %417 = vrot.lane.b32.xlu1 %v8299_v28, %s8178_s19 }
  0x34   : > { %391 = vrot.lane.b32.xlu0 %v8305_v29, %s8178_s19  ;;  %415 = vrot.lane.b32.xlu1 %v8307_v30, %s8178_s19 }
  0x38   : > { %389 = vrot.lane.b32.xlu0 %v8313_v31, %s8178_s19  ;;  %413 = vrot.lane.b32.xlu1 %v8315_v32, %s8178_s19 }
  0x3c   : > { %294 = vrot.lane.b32.xlu0 %v8257_v17, %s8179_s20  ;;  %326 = vrot.lane.b32.xlu1 %v8265_v19, %s8179_s20 }
  0x40   : > { %292 = vrot.lane.b32.xlu0 %v8259_v18, %s8179_s20  ;;  %324 = vrot.lane.b32.xlu1 %v8267_v20, %s8179_s20 }
  0x44   : > { %780 = vrot.lane.b32.xlu0 %v8257_v17, %s8180_s21  ;;  %804 = vrot.lane.b32.xlu1 %v8265_v19, %s8180_s21 }
  0x48   : > { %290 = vrot.lane.b32.xlu0 %v8273_v21, %s8179_s20  ;;  %322 = vrot.lane.b32.xlu1 %v8275_v22, %s8179_s20 }
  0x4c   : > { %778 = vrot.lane.b32.xlu0 %v8259_v18, %s8180_s21  ;;  %802 = vrot.lane.b32.xlu1 %v8267_v20, %s8180_s21 }
  0x50   : > { %288 = vrot.lane.b32.xlu0 %v8281_v23, %s8179_s20  ;;  %320 = vrot.lane.b32.xlu1 %v8283_v24, %s8179_s20 }
  0x54   : > { %776 = vrot.lane.b32.xlu0 %v8273_v21, %s8180_s21  ;;  %800 = vrot.lane.b32.xlu1 %v8275_v22, %s8180_s21 }
  0x58   : > { %286 = vrot.lane.b32.xlu0 %v8289_v25, %s8179_s20  ;;  %318 = vrot.lane.b32.xlu1 %v8291_v26, %s8179_s20 }
  0x5c   : > { %774 = vrot.lane.b32.xlu0 %v8281_v23, %s8180_s21  ;;  %798 = vrot.lane.b32.xlu1 %v8283_v24, %s8180_s21 }
  0x60   : > { %284 = vrot.lane.b32.xlu0 %v8297_v27, %s8179_s20  ;;  %316 = vrot.lane.b32.xlu1 %v8299_v28, %s8179_s20 }
  0x64   : > { %772 = vrot.lane.b32.xlu0 %v8289_v25, %s8180_s21  ;;  %796 = vrot.lane.b32.xlu1 %v8291_v26, %s8180_s21 }
  0x68   : > { %282 = vrot.lane.b32.xlu0 %v8305_v29, %s8179_s20  ;;  %314 = vrot.lane.b32.xlu1 %v8307_v30, %s8179_s20 }
  0x6c   : > { %770 = vrot.lane.b32.xlu0 %v8297_v27, %s8180_s21  ;;  %794 = vrot.lane.b32.xlu1 %v8299_v28, %s8180_s21 }
  0x70   : > { %280 = vrot.lane.b32.xlu0 %v8313_v31, %s8179_s20  ;;  %312 = vrot.lane.b32.xlu1 %v8315_v32, %s8179_s20 }
  0x74   : > { %768 = vrot.lane.b32.xlu0 %v8305_v29, %s8180_s21  ;;  %792 = vrot.lane.b32.xlu1 %v8307_v30, %s8180_s21 }
  0x78   : > { %766 = vrot.lane.b32.xlu0 %v8313_v31, %s8180_s21  ;;  %790 = vrot.lane.b32.xlu1 %v8315_v32, %s8180_s21 }
  0x7c   : > { %1035 = vrot.lane.b32.xlu0 %v8257_v17, %s8181_s22  ;;  %1059 = vrot.lane.b32.xlu1 %v8265_v19, %s8181_s22 }
  0x80   : > { %1033 = vrot.lane.b32.xlu0 %v8259_v18, %s8181_s22  ;;  %1057 = vrot.lane.b32.xlu1 %v8267_v20, %s8181_s22 }
  0x84   : > { %1031 = vrot.lane.b32.xlu0 %v8273_v21, %s8181_s22  ;;  %1055 = vrot.lane.b32.xlu1 %v8275_v22, %s8181_s22 }
  0x88   : > { %1029 = vrot.lane.b32.xlu0 %v8281_v23, %s8181_s22  ;;  %1053 = vrot.lane.b32.xlu1 %v8283_v24, %s8181_s22 }
  0x8c   : > { %1027 = vrot.lane.b32.xlu0 %v8289_v25, %s8181_s22  ;;  %1051 = vrot.lane.b32.xlu1 %v8291_v26, %s8181_s22 }
  0x8e   : > { %v404_v34 = vpop.permute.xlu0 %403  ;;  %v402_v35 = vpop.permute.xlu1 %401 }
  0x90   : > { %1025 = vrot.lane.b32.xlu0 %v8297_v27, %s8181_s22  ;;  %1049 = vrot.lane.b32.xlu1 %v8299_v28, %s8181_s22 }
  0x92   : > { %v428_v37 = vpop.permute.xlu0 %427  ;;  %v426_v38 = vpop.permute.xlu1 %425 }
  0x93   : > { %v437_v39 = vsel %vm429_vm0, %v428_v37, %v404_v34  ;;  %v461_v40 = vsel %vm429_vm0, %v404_v34, %v428_v37  ;;  %v436_v41 = vsel %vm429_vm0, %v426_v38, %v402_v35  ;;  %v460_v44 = vsel %vm429_vm0, %v402_v35, %v426_v38 }
  0x94   : > { %532 = vmatprep.subr.mxu0 %v437_v39  ;;  %8133 = vmatprep.subr.mxu1 %v437_v39  ;;  %v13124_v37 = vmov 0 }
  0x95   : > { %1023 = vrot.lane.b32.xlu0 %v8305_v29, %s8181_s22  ;;  %1047 = vrot.lane.b32.xlu1 %v8307_v30, %s8181_s22  ;;  %v13125_v37 = vsel %vm8535_vm7, 4294967295, %v13124_v37 }
  0x96   : > { %7361 = vmatpush1.msk.msra.mxu0 %vm13089_vm1, %v461_v40  ;;  %8141 = vmatpush1.msk.msra.mxu1 %vm13089_vm1, %v461_v40  ;;  %v400_v42 = vpop.permute.xlu0 %399  ;;  %v424_v43 = vpop.permute.xlu1 %423  ;;  %13126 = vst [vmem:[#allocation8_spill] sm:$0xff] %v13125_v37  ;;  %v7359_v40 = vld [vmem:[%s13039_s1 + $0x70] sm:$0xff] }
  0x97   : > { %534 = vmatprep.subr.mxu0 %v436_v41  ;;  %8134 = vmatprep.subr.mxu1 %v436_v41  ;;  %v435_v45 = vsel %vm429_vm0, %v424_v43, %v400_v42  ;;  %v459_v46 = vsel %vm429_vm0, %v400_v42, %v424_v43  ;;  %v7355_v41 = vld [vmem:[%s13039_s1 + $0x50] sm:$0xff]  ;;  %v13127_v42 = vmov 0 }
  0x98   : > { %7362 = vmatpush1.msk.msra.mxu0 %vm13089_vm1, %v460_v44  ;;  %8142 = vmatpush1.msk.msra.mxu1 %vm13089_vm1, %v460_v44  ;;  %v13128_v42 = vsel %vm8552_vm9, 4294967295, %v13127_v42 }
  0x99   : > { %536 = vmatprep.subr.mxu0 %v435_v45  ;;  %8135 = vmatprep.subr.mxu1 %v435_v45  ;;  %13129 = vst [vmem:[#allocation9_spill] sm:$0xff] %v13128_v42  ;;  %v13130_v45 = vmov 0 }
  0x9a   : > { %1021 = vrot.lane.b32.xlu0 %v8313_v31, %s8181_s22  ;;  %1045 = vrot.lane.b32.xlu1 %v8315_v32, %s8181_s22  ;;  %v398_v47 = vpop.permute.xlu0 %397  ;;  %v422_v48 = vpop.permute.xlu1 %421  ;;  %v13131_v45 = vsel %vm8567_vm10, 4294967295, %v13130_v45 }
  0x9b   : > { %7363 = vmatpush1.msk.msra.mxu0 %vm13089_vm1, %v459_v46  ;;  %8143 = vmatpush1.msk.msra.mxu1 %vm13089_vm1, %v459_v46  ;;  %v434_v49 = vsel %vm429_vm0, %v422_v48, %v398_v47  ;;  %v458_v50 = vsel %vm429_vm0, %v398_v47, %v422_v48  ;;  %13132 = vst [vmem:[#allocation10_spill] sm:$0xff] %v13131_v45  ;;  %v7360_v48 = vld [vmem:[%s13039_s1 + $0x78] sm:$0xff] }
  0x9c   : > { %538 = vmatprep.subr.mxu0 %v434_v49  ;;  %8136 = vmatprep.subr.mxu1 %v434_v49  ;;  %v7356_v49 = vld [vmem:[%s13039_s1 + $0x58] sm:$0xff] }
  0x9d   : > { %7364 = vmatpush1.msk.msra.mxu0 %vm13089_vm1, %v458_v50  ;;  %8144 = vmatpush1.msk.msra.mxu1 %vm13089_vm1, %v458_v50 }
  0x9e   : > { %1466 = vrot.lane.b32.xlu0 %v8265_v19, %s8182_s23  ;;  %1468 = vrot.lane.b32.xlu1 %v8257_v17, %s8182_s23  ;;  %v396_v51 = vpop.permute.xlu0 %395  ;;  %v420_v52 = vpop.permute.xlu1 %419 }
  0x9f   : > { %v433_v53 = vsel %vm429_vm0, %v420_v52, %v396_v51  ;;  %v457_v54 = vsel %vm429_vm0, %v396_v51, %v420_v52 }
  0xa0   : > { %540 = vmatprep.subr.mxu0 %v433_v53  ;;  %8137 = vmatprep.subr.mxu1 %v433_v53 }
  0xa1   : > { %7365 = vmatpush1.msk.msra.mxu0 %vm13089_vm1, %v457_v54  ;;  %8145 = vmatpush1.msk.msra.mxu1 %vm13089_vm1, %v457_v54 }
  0xa2   : > { %1462 = vrot.lane.b32.xlu0 %v8267_v20, %s8182_s23  ;;  %1464 = vrot.lane.b32.xlu1 %v8259_v18, %s8182_s23  ;;  %v394_v55 = vpop.permute.xlu0 %393  ;;  %v418_v56 = vpop.permute.xlu1 %417 }
  0xa3   : > { %v432_v57 = vsel %vm429_vm0, %v418_v56, %v394_v55  ;;  %v456_v58 = vsel %vm429_vm0, %v394_v55, %v418_v56 }
  0xa4   : > { %542 = vmatprep.subr.mxu0 %v432_v57  ;;  %8138 = vmatprep.subr.mxu1 %v432_v57 }
  0xa5   : > { %7366 = vmatpush1.msk.msra.mxu0 %vm13089_vm1, %v456_v58  ;;  %8146 = vmatpush1.msk.msra.mxu1 %vm13089_vm1, %v456_v58 }
  0xa6   : > { %1721 = vrot.lane.b32.xlu0 %v8265_v19, %s8183_s24  ;;  %1723 = vrot.lane.b32.xlu1 %v8257_v17, %s8183_s24  ;;  %v392_v60 = vpop.permute.xlu0 %391  ;;  %v416_v61 = vpop.permute.xlu1 %415 }
  0xa7   : > { %v431_v63 = vsel %vm429_vm0, %v416_v61, %v392_v60  ;;  %v455_v1 = vsel %vm429_vm0, %v392_v60, %v416_v61 }
  0xa8   : > { %544 = vmatprep.subr.mxu0 %v431_v63  ;;  %8139 = vmatprep.subr.mxu1 %v431_v63 }
  0xa9   : > { %7367 = vmatpush1.msk.msra.mxu0 %vm13089_vm1, %v455_v1  ;;  %8147 = vmatpush1.msk.msra.mxu1 %vm13089_vm1, %v455_v1 }
  0xaa   : > { %1458 = vrot.lane.b32.xlu0 %v8275_v22, %s8182_s23  ;;  %1460 = vrot.lane.b32.xlu1 %v8273_v21, %s8182_s23  ;;  %v390_v3 = vpop.permute.xlu0 %389  ;;  %v414_v4 = vpop.permute.xlu1 %413 }
  0xab   : > { %v430_v6 = vsel %vm429_vm0, %v414_v4, %v390_v3  ;;  %v454_v7 = vsel %vm429_vm0, %v390_v3, %v414_v4 }
  0xac   : > { %546 = vmatprep.subr.mxu0 %v430_v6  ;;  %8140 = vmatprep.subr.mxu1 %v430_v6 }
  0xad   : > { %7368 = vmatpush1.msk.msra.mxu0 %vm13089_vm1, %v454_v7  ;;  %8148 = vmatpush1.msk.msra.mxu1 %vm13089_vm1, %v454_v7 }
  0xae   : > { %1717 = vrot.lane.b32.xlu0 %v8267_v20, %s8183_s24  ;;  %1719 = vrot.lane.b32.xlu1 %v8259_v18, %s8183_s24  ;;  %v295_v11 = vpop.permute.xlu0 %294  ;;  %v327_v12 = vpop.permute.xlu1 %326 }
  0xaf   : > { %v360_v14 = vsel %vm13088_vm3, %v295_v11, %v327_v12  ;;  %v336_v15 = vsel %vm13088_vm3, %v327_v12, %v295_v11  ;;  %7373 = vmatmul.mubr.msk.f32.vlgmr.msra.gmra.mxu1 %vm491_vm4, %v7357_v8  ;;  %7369 = vmatmul.mubr.msk.f32.vlgmr.msra.gmra.mxu0 %vm491_vm4, %v7353_v9 }
  0xb0   : > { %7377 = vmatprep.subr.msk.mxu1 %vm8495_vm5, %v336_v15  ;;  %610 = vmatprep.mubr.f32.mxu1 %v13045_v0 }
  0xb1   : > { %7378 = vmatpush1.msk.msra.mxu1 %vm8511_vm6, %v360_v14  ;;  %586 = vmatprep.mubr.f32.mxu0 %v13045_v0 }
  0xb2   : > { %1454 = vrot.lane.b32.xlu0 %v8283_v24, %s8182_s23  ;;  %1456 = vrot.lane.b32.xlu1 %v8281_v23, %s8182_s23  ;;  %v293_v34 = vpop.permute.xlu0 %292  ;;  %v325_v35 = vpop.permute.xlu1 %324 }
  0xb3   : > { %v359_v38 = vsel %vm13088_vm3, %v293_v34, %v325_v35  ;;  %v335_v39 = vsel %vm13088_vm3, %v325_v35, %v293_v34  ;;  %7374 = vmatmul.mubr.msk.f32.gmra.mxu1 %vm491_vm4, %v7358_v16  ;;  %7370 = vmatmul.mubr.msk.f32.gmra.mxu0 %vm491_vm4, %v7354_v33 }
  0xb4   : > { %7379 = vmatprep.subr.msk.mxu1 %vm8495_vm5, %v335_v39  ;;  %616 = vmatprep.mubr.f32.mxu1 %v13045_v0 }
  0xb5   : > { %7380 = vmatpush1.msk.msra.mxu1 %vm8511_vm6, %v359_v38  ;;  %592 = vmatprep.mubr.f32.mxu0 %v13045_v0 }
  0xb6   : > { %1713 = vrot.lane.b32.xlu0 %v8275_v22, %s8183_s24  ;;  %1715 = vrot.lane.b32.xlu1 %v8273_v21, %s8183_s24  ;;  %v781_v43 = vpop.permute.xlu0 %780  ;;  %v805_v44 = vpop.permute.xlu1 %804 }
  0xb7   : > { %v838_v46 = vsel %vm806_vm8, %v781_v43, %v805_v44  ;;  %v814_v47 = vsel %vm806_vm8, %v805_v44, %v781_v43  ;;  %7375 = vmatmul.mubr.msk.f32.gmra.mxu1 %vm491_vm4, %v7359_v40  ;;  %7371 = vmatmul.mubr.msk.f32.gmra.mxu0 %vm491_vm4, %v7355_v41 }
  0xb8   : > { %7409 = vmatprep.subr.msk.mxu0 %vm8552_vm9, %v814_v47  ;;  %622 = vmatprep.mubr.f32.mxu1 %v13045_v0 }
  0xb9   : > { %7410 = vmatpush1.msk.msra.mxu0 %vm8567_vm10, %v838_v46  ;;  %598 = vmatprep.mubr.f32.mxu0 %v13045_v0 }
  0xba   : > { %1450 = vrot.lane.b32.xlu0 %v8291_v26, %s8182_s23  ;;  %1452 = vrot.lane.b32.xlu1 %v8289_v25, %s8182_s23  ;;  %v291_v50 = vpop.permute.xlu0 %290  ;;  %v323_v51 = vpop.permute.xlu1 %322 }
  0xbb   : > { %v358_v52 = vsel %vm13088_vm3, %v291_v50, %v323_v51  ;;  %v334_v53 = vsel %vm13088_vm3, %v323_v51, %v291_v50  ;;  %7376 = vmatmul.mubr.msk.f32.gmra.mxu1 %vm491_vm4, %v7360_v48  ;;  %7372 = vmatmul.mubr.msk.f32.gmra.mxu0 %vm491_vm4, %v7356_v49 }
  0xbc   : > { %7381 = vmatprep.subr.msk.mxu1 %vm8495_vm5, %v334_v53  ;;  %717 = vmatprep.mubr.f32.mxu1 %v13045_v0 }
  0xbd   : > { %7382 = vmatpush1.msk.msra.mxu1 %vm8511_vm6, %v358_v52  ;;  %956 = vmatprep.mubr.f32.mxu0 %v13045_v0 }
  0xbe   : > { %1709 = vrot.lane.b32.xlu0 %v8283_v24, %s8183_s24  ;;  %1711 = vrot.lane.b32.xlu1 %v8281_v23, %s8183_s24  ;;  %v779_v54 = vpop.permute.xlu0 %778  ;;  %v803_v55 = vpop.permute.xlu1 %802 }
  0xbf   : > { %v837_v56 = vsel %vm806_vm8, %v779_v54, %v803_v55  ;;  %v813_v57 = vsel %vm806_vm8, %v803_v55, %v779_v54  ;;  %v381_v55 = vld [vmem:[%s13039_s1] sm:$0xff] }
  0xc0   : > { %7411 = vmatprep.subr.msk.mxu0 %vm8552_vm9, %v813_v57 }
  0xc1   : > { %7412 = vmatpush1.msk.msra.mxu0 %vm8567_vm10, %v837_v56 }
  0xc2   : > { %1446 = vrot.lane.b32.xlu0 %v8299_v28, %s8182_s23  ;;  %1448 = vrot.lane.b32.xlu1 %v8297_v27, %s8182_s23  ;;  %v289_v58 = vpop.permute.xlu0 %288  ;;  %v321_v60 = vpop.permute.xlu1 %320 }
  0xc3   : > { %v357_v61 = vsel %vm13088_vm3, %v289_v58, %v321_v60  ;;  %v333_v62 = vsel %vm13088_vm3, %v321_v60, %v289_v58 }
  0xc4   : > { %7383 = vmatprep.subr.msk.mxu1 %vm8495_vm5, %v333_v62 }
  0xc5   : > { %7384 = vmatpush1.msk.msra.mxu1 %vm8511_vm6, %v357_v61  ;;  %v382_v61 = vld [vmem:[%s13039_s1 + $0x8] sm:$0xff] }
  0xc6   : > { %1705 = vrot.lane.b32.xlu0 %v8291_v26, %s8183_s24  ;;  %1707 = vrot.lane.b32.xlu1 %v8289_v25, %s8183_s24  ;;  %v777_v63 = vpop.permute.xlu0 %776  ;;  %v801_v1 = vpop.permute.xlu1 %800 }
  0xc7   : > { %v836_v2 = vsel %vm806_vm8, %v777_v63, %v801_v1  ;;  %v812_v3 = vsel %vm806_vm8, %v801_v1, %v777_v63 }
  0xc8   : > { %7413 = vmatprep.subr.msk.mxu0 %vm8552_vm9, %v812_v3  ;;  %v7401_v3 = vld [vmem:[%s13039_s1 + $0x80] sm:$0xff] }
  0xc9   : > { %7414 = vmatpush1.msk.msra.mxu0 %vm8567_vm10, %v836_v2 }
  0xca   : > { %1442 = vrot.lane.b32.xlu0 %v8307_v30, %s8182_s23  ;;  %1444 = vrot.lane.b32.xlu1 %v8305_v29, %s8182_s23  ;;  %v287_v4 = vpop.permute.xlu0 %286  ;;  %v319_v6 = vpop.permute.xlu1 %318 }
  0xcb   : > { %v356_v7 = vsel %vm13088_vm3, %v287_v4, %v319_v6  ;;  %v332_v8 = vsel %vm13088_vm3, %v319_v6, %v287_v4  ;;  %v383_v4 = vld [vmem:[%s13039_s1 + $0x10] sm:$0xff] }
  0xcc   : > { %7385 = vmatprep.subr.msk.mxu1 %vm8495_vm5, %v332_v8 }
  0xcd   : > { %7386 = vmatpush1.msk.msra.mxu1 %vm8511_vm6, %v356_v7 }
  0xce   : > { %1701 = vrot.lane.b32.xlu0 %v8299_v28, %s8183_s24  ;;  %1703 = vrot.lane.b32.xlu1 %v8297_v27, %s8183_s24  ;;  %v775_v9 = vpop.permute.xlu0 %774  ;;  %v799_v11 = vpop.permute.xlu1 %798 }
  0xcf   : > { %v835_v12 = vsel %vm806_vm8, %v775_v9, %v799_v11  ;;  %v811_v14 = vsel %vm806_vm8, %v799_v11, %v775_v9  ;;  %v7402_v11 = vld [vmem:[%s13039_s1 + $0x88] sm:$0xff] }
  0xd0   : > { %7415 = vmatprep.subr.msk.mxu0 %vm8552_vm9, %v811_v14 }
  0xd1   : > { %7416 = vmatpush1.msk.msra.mxu0 %vm8567_vm10, %v835_v12  ;;  %v384_v12 = vld [vmem:[%s13039_s1 + $0x18] sm:$0xff] }
  0xd2   : > { %1438 = vrot.lane.b32.xlu0 %v8315_v32, %s8182_s23  ;;  %1440 = vrot.lane.b32.xlu1 %v8313_v31, %s8182_s23  ;;  %v285_v15 = vpop.permute.xlu0 %284  ;;  %v317_v16 = vpop.permute.xlu1 %316 }
  0xd3   : > { %v355_v33 = vsel %vm13088_vm3, %v285_v15, %v317_v16  ;;  %v331_v34 = vsel %vm13088_vm3, %v317_v16, %v285_v15 }
  0xd4   : > { %7387 = vmatprep.subr.msk.mxu1 %vm8495_vm5, %v331_v34  ;;  %v7403_v34 = vld [vmem:[%s13039_s1 + $0x90] sm:$0xff] }
  0xd5   : > { %7388 = vmatpush1.msk.msra.mxu1 %vm8511_vm6, %v355_v33 }
  0xd6   : > { %1697 = vrot.lane.b32.xlu0 %v8307_v30, %s8183_s24  ;;  %1699 = vrot.lane.b32.xlu1 %v8305_v29, %s8183_s24  ;;  %v773_v35 = vpop.permute.xlu0 %772  ;;  %v797_v38 = vpop.permute.xlu1 %796 }
  0xd7   : > { %v834_v39 = vsel %vm806_vm8, %v773_v35, %v797_v38  ;;  %v810_v40 = vsel %vm806_vm8, %v797_v38, %v773_v35  ;;  %v385_v35 = vld [vmem:[%s13039_s1 + $0x20] sm:$0xff] }
  0xd8   : > { %7417 = vmatprep.subr.msk.mxu0 %vm8552_vm9, %v810_v40 }
  0xd9   : > { %7418 = vmatpush1.msk.msra.mxu0 %vm8567_vm10, %v834_v39 }
  0xda   : > { %1693 = vrot.lane.b32.xlu0 %v8315_v32, %s8183_s24  ;;  %1695 = vrot.lane.b32.xlu1 %v8313_v31, %s8183_s24  ;;  %v283_v41 = vpop.permute.xlu0 %282  ;;  %v315_v43 = vpop.permute.xlu1 %314 }
  0xdb   : > { %v354_v44 = vsel %vm13088_vm3, %v283_v41, %v315_v43  ;;  %v330_v46 = vsel %vm13088_vm3, %v315_v43, %v283_v41  ;;  %v7404_v43 = vld [vmem:[%s13039_s1 + $0x98] sm:$0xff] }
  0xdc   : > { %7389 = vmatprep.subr.msk.mxu1 %vm8495_vm5, %v330_v46 }
  0xdd   : > { %7390 = vmatpush1.msk.msra.mxu1 %vm8511_vm6, %v354_v44 }
  0xde   : > { %1976 = vrot.lane.b32.xlu0 %v8265_v19, %s8184_s17  ;;  %1978 = vrot.lane.b32.xlu1 %v8257_v17, %s8184_s17  ;;  %v771_v47 = vpop.permute.xlu0 %770  ;;  %v795_v48 = vpop.permute.xlu1 %794 }
  0xdf   : > { %v833_v49 = vsel %vm806_vm8, %v771_v47, %v795_v48  ;;  %v809_v50 = vsel %vm806_vm8, %v795_v48, %v771_v47 }
  0xe0   : > { %7419 = vmatprep.subr.msk.mxu0 %vm8552_vm9, %v809_v50 }
  0xe1   : > { %7420 = vmatpush1.msk.msra.mxu0 %vm8567_vm10, %v833_v49  ;;  %v386_v49 = vld [vmem:[%s13039_s1 + $0x28] sm:$0xff] }
  0xe2   : > { %1972 = vrot.lane.b32.xlu0 %v8267_v20, %s8184_s17  ;;  %1974 = vrot.lane.b32.xlu1 %v8259_v18, %s8184_s17  ;;  %v281_v51 = vpop.permute.xlu0 %280  ;;  %v313_v52 = vpop.permute.xlu1 %312 }
  0xe3   : > { %v353_v53 = vsel %vm13088_vm3, %v281_v51, %v313_v52  ;;  %v329_v54 = vsel %vm13088_vm3, %v313_v52, %v281_v51 }
  0xe4   : > { %7391 = vmatprep.subr.msk.mxu1 %vm8495_vm5, %v329_v54 }
  0xe5   : > { %7392 = vmatpush1.msk.msra.mxu1 %vm8511_vm6, %v353_v53 }
  0xe6   : > { %2231 = vrot.lane.b32.xlu0 %v8265_v19, %s8185_s27  ;;  %2233 = vrot.lane.b32.xlu1 %v8257_v17, %s8185_s27  ;;  %v769_v56 = vpop.permute.xlu0 %768  ;;  %v793_v57 = vpop.permute.xlu1 %792 }
  0xe7   : > { %v832_v58 = vsel %vm806_vm8, %v769_v56, %v793_v57  ;;  %v808_v60 = vsel %vm806_vm8, %v793_v57, %v769_v56  ;;  %7393 = vmatmul.mubr.msk.f32.vlgmr.msra.gmra.mxu1 %vm491_vm4, %v381_v55  ;;  %v387_v57 = vld [vmem:[%s13039_s1 + $0x30] sm:$0xff] }
  0xe8   : > { %7421 = vmatprep.subr.msk.mxu0 %vm8552_vm9, %v808_v60  ;;  %723 = vmatprep.mubr.f32.mxu1 %v13045_v0 }
  0xe9   : > { %7422 = vmatpush1.msk.msra.mxu0 %vm8567_vm10, %v832_v58 }
  0xea   : > { %1968 = vrot.lane.b32.xlu0 %v8275_v22, %s8184_s17  ;;  %1970 = vrot.lane.b32.xlu1 %v8273_v21, %s8184_s17  ;;  %v767_v62 = vpop.permute.xlu0 %766  ;;  %v791_v63 = vpop.permute.xlu1 %790 }
  0xeb   : > { %v831_v1 = vsel %vm806_vm8, %v767_v62, %v791_v63  ;;  %v807_v2 = vsel %vm806_vm8, %v791_v63, %v767_v62  ;;  %7394 = vmatmul.mubr.msk.f32.gmra.mxu1 %vm491_vm4, %v382_v61  ;;  %v7408_v62 = vld [vmem:[%s13039_s1 + $0xb8] sm:$0xff] }
  0xec   : > { %7423 = vmatprep.subr.msk.mxu0 %vm8552_vm9, %v807_v2  ;;  %729 = vmatprep.mubr.f32.mxu1 %v13045_v0 }
  0xed   : > { %7424 = vmatpush1.msk.msra.mxu0 %vm8567_vm10, %v831_v1  ;;  %v7433_v1 = vld [vmem:[%s13039_s1 + $0xc0] sm:$0xff] }
  0xee   : > { %2227 = vrot.lane.b32.xlu0 %v8267_v20, %s8185_s27  ;;  %2229 = vrot.lane.b32.xlu1 %v8259_v18, %s8185_s27  ;;  %v1036_v6 = vpop.permute.xlu0 %1035  ;;  %v1060_v7 = vpop.permute.xlu1 %1059 }
  0xef   : > { %v1093_v8 = vsel %vm13044_vm11, %v1036_v6, %v1060_v7  ;;  %7425 = vmatmul.mubr.msk.f32.vlgmr.msra.gmra.mxu0 %vm491_vm4, %v7401_v3  ;;  %v1069_v9 = vsel %vm13044_vm11, %v1060_v7, %v1036_v6  ;;  %7395 = vmatmul.mubr.msk.f32.gmra.mxu1 %vm491_vm4, %v383_v4  ;;  %v7434_v7 = vld [vmem:[%s13039_s1 + $0xc8] sm:$0xff] }
  0xf0   : > { %7441 = vmatprep.subr.msk.mxu1 %vm8495_vm5, %v1069_v9  ;;  %962 = vmatprep.mubr.f32.mxu0 %v13045_v0 }
  0xf1   : > { %7442 = vmatpush1.msk.msra.mxu1 %vm8483_vm2, %v1093_v8  ;;  %735 = vmatprep.mubr.f32.mxu1 %v13045_v0  ;;  %v7466_v8 = vld [vmem:[%s13039_s1 + $0x108] sm:$0xff] }
  0xf2   : > { %1964 = vrot.lane.b32.xlu0 %v8283_v24, %s8184_s17  ;;  %1966 = vrot.lane.b32.xlu1 %v8281_v23, %s8184_s17  ;;  %v1034_v14 = vpop.permute.xlu0 %1033  ;;  %v1058_v15 = vpop.permute.xlu1 %1057 }
  0xf3   : > { %v1092_v16 = vsel %vm13044_vm11, %v1034_v14, %v1058_v15  ;;  %7426 = vmatmul.mubr.msk.f32.gmra.mxu0 %vm491_vm4, %v7402_v11  ;;  %v1068_v33 = vsel %vm13044_vm11, %v1058_v15, %v1034_v14  ;;  %7396 = vmatmul.mubr.msk.f32.gmra.mxu1 %vm491_vm4, %v384_v12  ;;  %v7435_v15 = vld [vmem:[%s13039_s1 + $0xd0] sm:$0xff] }
  0xf4   : > { %7443 = vmatprep.subr.msk.mxu1 %vm8495_vm5, %v1068_v33  ;;  %968 = vmatprep.mubr.f32.mxu0 %v13045_v0 }
  0xf5   : > { %7444 = vmatpush1.msk.msra.mxu1 %vm8483_vm2, %v1092_v16  ;;  %741 = vmatprep.mubr.f32.mxu1 %v13045_v0  ;;  %v7467_v16 = vld [vmem:[%s13039_s1 + $0x110] sm:$0xff] }
  0xf6   : > { %2223 = vrot.lane.b32.xlu0 %v8275_v22, %s8185_s27  ;;  %2225 = vrot.lane.b32.xlu1 %v8273_v21, %s8185_s27  ;;  %v1032_v38 = vpop.permute.xlu0 %1031  ;;  %v1056_v39 = vpop.permute.xlu1 %1055 }
  0xf7   : > { %v1091_v40 = vsel %vm13044_vm11, %v1032_v38, %v1056_v39  ;;  %7427 = vmatmul.mubr.msk.f32.gmra.mxu0 %vm491_vm4, %v7403_v34  ;;  %v1067_v41 = vsel %vm13044_vm11, %v1056_v39, %v1032_v38  ;;  %7397 = vmatmul.mubr.msk.f32.gmra.mxu1 %vm491_vm4, %v385_v35  ;;  %v7436_v38 = vld [vmem:[%s13039_s1 + $0xd8] sm:$0xff] }
  0xf8   : > { %7445 = vmatprep.subr.msk.mxu1 %vm8495_vm5, %v1067_v41  ;;  %974 = vmatprep.mubr.f32.mxu0 %v13045_v0 }
  0xf9   : > { %7446 = vmatpush1.msk.msra.mxu1 %vm8483_vm2, %v1091_v40  ;;  %1325 = vmatprep.subr.mxu0 %v8257_v17  ;;  %v7405_v17 = vld [vmem:[%s13039_s1 + $0xa0] sm:$0xff] }
  0xfa   : > { %1960 = vrot.lane.b32.xlu0 %v8291_v26, %s8184_s17  ;;  %1962 = vrot.lane.b32.xlu1 %v8289_v25, %s8184_s17  ;;  %v1030_v44 = vpop.permute.xlu0 %1029  ;;  %v1054_v46 = vpop.permute.xlu1 %1053 }
  0xfb   : > { %v1090_v47 = vsel %vm13044_vm11, %v1030_v44, %v1054_v46  ;;  %7428 = vmatmul.mubr.msk.f32.gmra.mxu0 %vm491_vm4, %v7404_v43  ;;  %v1066_v48 = vsel %vm13044_vm11, %v1054_v46, %v1030_v44  ;;  %747 = vmatprep.mubr.f32.mxu1 %v13045_v0  ;;  %v7437_v44 = vld [vmem:[%s13039_s1 + $0xe0] sm:$0xff] }
  0xfc   : > { %7447 = vmatprep.subr.msk.mxu1 %vm8495_vm5, %v1066_v48  ;;  %980 = vmatprep.mubr.f32.mxu0 %v13045_v0 }
  0xfd   : > { %7448 = vmatpush1.msk.msra.mxu1 %vm8483_vm2, %v1090_v47  ;;  %1326 = vmatpush1.msra.mxu0 %v8265_v19  ;;  %v7406_v19 = vld [vmem:[%s13039_s1 + $0xa8] sm:$0xff]  ;;  %v7469_v47 = vld [vmem:[%s13039_s1 + $0x120] sm:$0xff] }
  0xfe   : > { %2219 = vrot.lane.b32.xlu0 %v8283_v24, %s8185_s27  ;;  %2221 = vrot.lane.b32.xlu1 %v8281_v23, %s8185_s27  ;;  %v1028_v50 = vpop.permute.xlu0 %1027  ;;  %v1052_v51 = vpop.permute.xlu1 %1051 }
  0xff   : > { %v1089_v52 = vsel %vm13044_vm11, %v1028_v50, %v1052_v51  ;;  %7429 = vmatmul.mubr.msk.f32.gmra.mxu0 %vm491_vm4, %v7405_v17  ;;  %v1065_v53 = vsel %vm13044_vm11, %v1052_v51, %v1028_v50  ;;  %7398 = vmatmul.mubr.msk.f32.gmra.mxu1 %vm491_vm4, %v386_v49  ;;  %v7438_v51 = vld [vmem:[%s13039_s1 + $0xe8] sm:$0xff] }
 0x100   : > { %7449 = vmatprep.subr.msk.mxu1 %vm8495_vm5, %v1065_v53  ;;  %1327 = vmatprep.subr.mxu0 %v8259_v18 }
 0x101   : > { %7450 = vmatpush1.msk.msra.mxu1 %vm8483_vm2, %v1089_v52  ;;  %986 = vmatprep.mubr.f32.mxu0 %v13045_v0  ;;  %v7470_v52 = vld [vmem:[%s13039_s1 + $0x128] sm:$0xff] }
 0x102   : > { %1956 = vrot.lane.b32.xlu0 %v8299_v28, %s8184_s17  ;;  %1958 = vrot.lane.b32.xlu1 %v8297_v27, %s8184_s17  ;;  %v1026_v54 = vpop.permute.xlu0 %1025  ;;  %v1050_v55 = vpop.permute.xlu1 %1049 }
 0x103   : > { %v1088_v56 = vsel %vm13044_vm11, %v1026_v54, %v1050_v55  ;;  %1328 = vmatpush1.msra.mxu0 %v8267_v20  ;;  %v1064_v18 = vsel %vm13044_vm11, %v1050_v55, %v1026_v54  ;;  %753 = vmatprep.mubr.f32.mxu1 %v13045_v0 }
 0x104   : > { %7430 = vmatmul.mubr.msk.f32.gmra.mxu0 %vm491_vm4, %v7406_v19  ;;  %7451 = vmatprep.subr.msk.mxu1 %vm8495_vm5, %v1064_v18  ;;  %v7471_v18 = vld [vmem:[%s13039_s1 + $0x130] sm:$0xff] }
 0x105   : > { %1329 = vmatprep.subr.mxu0 %v8273_v21  ;;  %7452 = vmatpush1.msk.msra.mxu1 %vm8483_vm2, %v1088_v56  ;;  %v7407_v21 = vld [vmem:[%s13039_s1 + $0xb0] sm:$0xff] }
 0x106   : > { %2215 = vrot.lane.b32.xlu0 %v8291_v26, %s8185_s27  ;;  %2217 = vrot.lane.b32.xlu1 %v8289_v25, %s8185_s27  ;;  %v7439_v56 = vld [vmem:[%s13039_s1 + $0xf0] sm:$0xff] }
 0x107   : > { %1330 = vmatpush1.msra.mxu0 %v8275_v22  ;;  %v1024_v20 = vpop.permute.xlu0 %1023  ;;  %7399 = vmatmul.mubr.msk.f32.gmra.mxu1 %vm491_vm4, %v387_v57  ;;  %v1048_v58 = vpop.permute.xlu1 %1047  ;;  %v388_v22 = vld [vmem:[%s13039_s1 + $0x38] sm:$0xff] }
 0x108   : > { %1331 = vmatprep.subr.mxu0 %v8281_v23  ;;  %992 = vmatprep.mubr.f32.mxu0 %v13045_v0  ;;  %v1063_v60 = vsel %vm13044_vm11, %v1048_v58, %v1024_v20  ;;  %v1087_v61 = vsel %vm13044_vm11, %v1024_v20, %v1048_v58 }
 0x109   : > { %1332 = vmatpush1.msra.mxu0 %v8283_v24  ;;  %7453 = vmatprep.subr.msk.mxu1 %vm8495_vm5, %v1063_v60  ;;  %v7440_v60 = vld [vmem:[%s13039_s1 + $0xf8] sm:$0xff] }
 0x10a   : > { %1952 = vrot.lane.b32.xlu0 %v8307_v30, %s8184_s17  ;;  %1954 = vrot.lane.b32.xlu1 %v8305_v29, %s8184_s17 }
 0x10b   : > { %7431 = vmatmul.mubr.msk.f32.gmra.mxu0 %vm491_vm4, %v7407_v21  ;;  %1333 = vmatprep.subr.mxu0 %v8289_v25 }
 0x10c   : > { %759 = vmatprep.mubr.f32.mxu1 %v13045_v0  ;;  %7454 = vmatpush1.msk.msra.mxu1 %vm8483_vm2, %v1087_v61  ;;  %v1022_v23 = vpop.permute.xlu0 %1021  ;;  %v1046_v24 = vpop.permute.xlu1 %1045  ;;  %v7472_v61 = vld [vmem:[%s13039_s1 + $0x138] sm:$0xff] }
 0x10d   : > { %1334 = vmatpush1.msra.mxu0 %v8291_v26  ;;  %7400 = vmatmul.mubr.msk.f32.gmra.mxu1 %vm491_vm4, %v388_v22  ;;  %v1062_v25 = vsel %vm13044_vm11, %v1046_v24, %v1022_v23  ;;  %v1086_v63 = vsel %vm13044_vm11, %v1022_v23, %v1046_v24  ;;  %vm9164_vm11 = vmand %vm13068_vm13, %vm8552_vm9 }
 0x10e   : > { %1335 = vmatprep.subr.mxu0 %v8297_v27  ;;  %998 = vmatprep.mubr.f32.mxu0 %v13045_v0 }
 0x10f   : > { %1336 = vmatpush1.msra.mxu0 %v8299_v28  ;;  %2211 = vrot.lane.b32.xlu0 %v8299_v28, %s8185_s27 }
 0x110   : > { %2213 = vrot.lane.b32.xlu1 %v8297_v27, %s8185_s27  ;;  %7432 = vmatmul.mubr.msk.f32.gmra.mxu0 %vm491_vm4, %v7408_v62  ;;  %v1467_v26 = vpop.permute.xlu0 %1466  ;;  %v1469_v2 = vpop.permute.xlu1 %1468  ;;  %v7465_v27 = vld [vmem:[%s13039_s1 + $0x100] sm:$0xff] }
 0x111   : > { %7455 = vmatprep.subr.msk.mxu1 %vm8495_vm5, %v1062_v25  ;;  %1337 = vmatprep.subr.mxu0 %v8305_v29  ;;  %v1510_v28 = vsel %vm13042_vm12, %v1469_v2, %v1467_v26  ;;  %v1478_v6 = vsel %vm13042_vm12, %v1467_v26, %v1469_v2 }
 0x112   : > { %7456 = vmatpush1.msk.msra.mxu1 %vm8483_vm2, %v1086_v63  ;;  %1211 = vmatprep.mubr.f32.mxu1 %v13045_v0 }
 0x113   : > { %1338 = vmatpush1.msra.mxu0 %v8307_v30  ;;  %7457 = vmatmul.mubr.msk.f32.vlgmr.msra.gmra.mxu1 %vm491_vm4, %v7433_v1 }
 0x114   : > { %1339 = vmatprep.subr.mxu0 %v8313_v31  ;;  %1373 = vmatprep.mubr.f32.mxu0 %v13045_v0  ;;  %v1463_v3 = vpop.permute.xlu0 %1462  ;;  %v1465_v4 = vpop.permute.xlu1 %1464 }
 0x115   : > { %1340 = vmatpush1.msra.mxu0 %v8315_v32  ;;  %1948 = vrot.lane.b32.xlu0 %v8315_v32, %s8184_s17  ;;  %v1509_v9 = vsel %vm13042_vm12, %v1465_v4, %v1463_v3  ;;  %v1477_v14 = vsel %vm13042_vm12, %v1463_v3, %v1465_v4 }
 0x116   : > { %1950 = vrot.lane.b32.xlu1 %v8313_v31, %s8184_s17  ;;  %7473 = vmatmul.mubr.msk.f32.vlgmr.msra.gmra.mxu0 %vm491_vm4, %v7465_v27 }
 0x117   : > { %7489 = vmatprep.subr.msk.mxu1 %vm8552_vm9, %v1510_v28  ;;  %1217 = vmatprep.mubr.f32.mxu1 %v13045_v0 }
 0x118   : > { %7490 = vmatpush1.msk.msra.mxu1 %vm8535_vm7, %v1478_v6  ;;  %1379 = vmatprep.mubr.f32.mxu0 %v13045_v0  ;;  %v1722_v11 = vpop.permute.xlu0 %1721  ;;  %v1724_v12 = vpop.permute.xlu1 %1723 }
 0x119   : > { %7458 = vmatmul.mubr.msk.f32.gmra.mxu1 %vm491_vm4, %v7434_v7  ;;  %2207 = vrot.lane.b32.xlu0 %v8307_v30, %s8185_s27  ;;  %v1765_v30 = vsel %vm13043_vm14, %v1724_v12, %v1722_v11  ;;  %v1733_v35 = vsel %vm13043_vm14, %v1722_v11, %v1724_v12  ;;  %v2465_v11 = vld [vmem:[%s13040_s2 + $0x38] sm:$0xff] }
 0x11a   : > { %2209 = vrot.lane.b32.xlu1 %v8305_v29, %s8185_s27  ;;  %7474 = vmatmul.mubr.msk.f32.gmra.mxu0 %vm491_vm4, %v7466_v8  ;;  %v13133_v29 = vmov 0 }
 0x11b   : > { %7491 = vmatprep.subr.msk.mxu1 %vm8552_vm9, %v1509_v9  ;;  %1223 = vmatprep.mubr.f32.mxu1 %v13045_v0  ;;  %v13134_v29 = vsel %vm8952_vm15, 4294967295, %v13133_v29  ;;  %v8186_v9 = vmov 0  }
 0x11c   : > { %7492 = vmatpush1.msk.msra.mxu1 %vm8535_vm7, %v1477_v14  ;;  %1385 = vmatprep.mubr.f32.mxu0 %v13045_v0  ;;  %13135 = vst [vmem:[#allocation11_spill] sm:$0xff] %v13134_v29  ;;  %v1459_v33 = vpop.permute.xlu0 %1458  ;;  %v1461_v34 = vpop.permute.xlu1 %1460 }
 0x11d   : > { %7459 = vmatmul.mubr.msk.f32.gmra.mxu1 %vm491_vm4, %v7435_v15  ;;  %2203 = vrot.lane.b32.xlu0 %v8315_v32, %s8185_s27  ;;  %v1508_v39 = vsel %vm13042_vm12, %v1461_v34, %v1459_v33  ;;  %v7468_v32 = vld [vmem:[%s13039_s1 + $0x118] sm:$0xff] }
 0x11e   : > { %2205 = vrot.lane.b32.xlu1 %v8313_v31, %s8185_s27  ;;  %7475 = vmatmul.mubr.msk.f32.gmra.mxu0 %vm491_vm4, %v7467_v16  ;;  %v1476_v31 = vsel %vm13042_vm12, %v1459_v33, %v1461_v34 }
 0x11f   : > { %7521 = vmatprep.subr.msk.mxu0 %vm8952_vm15, %v1765_v30  ;;  %1229 = vmatprep.mubr.f32.mxu1 %v13045_v0  ;;  %v2462_v30 = vld [vmem:[%s13040_s2 + $0x20] sm:$0xff] }
 0x120   : > { %7522 = vmatpush1.msk.msra.mxu0 %vm8483_vm2, %v1733_v35  ;;  %1391 = vmatprep.mubr.f32.mxu0 %v13045_v0  ;;  %v1718_v40 = vpop.permute.xlu0 %1717  ;;  %v1720_v41 = vpop.permute.xlu1 %1719 }
 0x121   : > { %7460 = vmatmul.mubr.msk.f32.gmra.mxu1 %vm491_vm4, %v7436_v38  ;;  %7493 = vmatprep.subr.msk.mxu1 %vm8552_vm9, %v1508_v39  ;;  %v1764_v43 = vsel %vm13043_vm14, %v1720_v41, %v1718_v40  ;;  %v1732_v46 = vsel %vm13043_vm14, %v1718_v40, %v1720_v41  ;;  %v7481_v39 = vld [vmem:[%s13039_s1 + $0x140] sm:$0xff]  ;;  %v2460_v40 = vld [vmem:[%s13040_s2 + $0x10] sm:$0xff] }
 0x122   : > { %7476 = vmatmul.mubr.msk.f32.gmra.mxu0 %vm491_vm4, %v7468_v32  ;;  %1235 = vmatprep.mubr.f32.mxu1 %v13045_v0 }
 0x123   : > { %7494 = vmatpush1.msk.msra.mxu1 %vm8535_vm7, %v1476_v31  ;;  %1397 = vmatprep.mubr.f32.mxu0 %v13045_v0 }
 0x124   : > { %7523 = vmatprep.subr.msk.mxu0 %vm8952_vm15, %v1764_v43  ;;  %v1455_v48 = vpop.permute.xlu0 %1454  ;;  %v1457_v17 = vpop.permute.xlu1 %1456  ;;  %8167 = vset.pattern.permute.xlu0 %v8186_v9 }
 0x125   : > { %7461 = vmatmul.mubr.msk.f32.gmra.mxu1 %vm491_vm4, %v7437_v44  ;;  %7524 = vmatpush1.msk.msra.mxu0 %vm8483_vm2, %v1732_v46  ;;  %v1475_v49 = vsel %vm13042_vm12, %v1455_v48, %v1457_v17  ;;  %v1507_v50 = vsel %vm13042_vm12, %v1457_v17, %v1455_v48  ;;  %v7482_v44 = vld [vmem:[%s13039_s1 + $0x148] sm:$0xff] }
 0x126   : > { %7477 = vmatmul.mubr.msk.f32.gmra.mxu0 %vm491_vm4, %v7469_v47  ;;  %1241 = vmatprep.mubr.f32.mxu1 %v13045_v0 }
 0x127   : > { %1403 = vmatprep.mubr.f32.mxu0 %v13045_v0  ;;  %7495 = vmatprep.subr.msk.mxu1 %vm8552_vm9, %v1507_v50  ;;  %v7513_v50 = vld [vmem:[%s13039_s1 + $0x180] sm:$0xff] }
 0x128   : > { %7496 = vmatpush1.msk.msra.mxu1 %vm8535_vm7, %v1475_v49  ;;  %v1714_v53 = vpop.permute.xlu0 %1713  ;;  %v1716_v19 = vpop.permute.xlu1 %1715  ;;  %8168 = vset.pattern.permute.xlu1 %v8186_v9  ;;  %v7483_v49 = vld [vmem:[%s13039_s1 + $0x150] sm:$0xff] }
 0x129   : > { %7462 = vmatmul.mubr.msk.f32.gmra.mxu1 %vm491_vm4, %v7438_v51  ;;  %v1731_v54 = vsel %vm13043_vm14, %v1714_v53, %v1716_v19  ;;  %v1763_v55 = vsel %vm13043_vm14, %v1716_v19, %v1714_v53  ;;  %2503 = vperm.xlu0 %8167, %v2465_v11   ;;  %v2458_v51 = vld [vmem:[%s13040_s2] sm:$0xff] }
 0x12a   : > { %7478 = vmatmul.mubr.msk.f32.gmra.mxu0 %vm491_vm4, %v7470_v52  ;;  %1247 = vmatprep.mubr.f32.mxu1 %v13045_v0  ;;  %v2464_v52 = vld [vmem:[%s13040_s2 + $0x30] sm:$0xff] }
 0x12b   : > { %1409 = vmatprep.mubr.f32.mxu0 %v13045_v0  ;;  %7525 = vmatprep.subr.msk.mxu0 %vm8952_vm15, %v1763_v55 }
 0x12c   : > { %7526 = vmatpush1.msk.msra.mxu0 %vm8483_vm2, %v1731_v54  ;;  %v1451_v57 = vpop.permute.xlu0 %1450  ;;  %v1453_v20 = vpop.permute.xlu1 %1452  ;;  %2498 = vperm.xlu1 %8168, %v2464_v52  }
 0x12d   : > { %7463 = vmatmul.mubr.msk.f32.gmra.mxu1 %vm491_vm4, %v7439_v56  ;;  %v1474_v58 = vsel %vm13042_vm12, %v1451_v57, %v1453_v20  ;;  %v1506_v21 = vsel %vm13042_vm12, %v1453_v20, %v1451_v57  ;;  %2488 = vperm.xlu0 %8167, %v2462_v30   ;;  %v7484_v56 = vld [vmem:[%s13039_s1 + $0x158] sm:$0xff] }
 0x12e   : > { %7479 = vmatmul.mubr.msk.f32.gmra.mxu0 %vm491_vm4, %v7471_v18  ;;  %1253 = vmatprep.mubr.f32.mxu1 %v13045_v0  ;;  %v7514_v18 = vld [vmem:[%s13039_s1 + $0x188] sm:$0xff] }
 0x12f   : > { %1415 = vmatprep.mubr.f32.mxu0 %v13045_v0  ;;  %7497 = vmatprep.subr.msk.mxu1 %vm8552_vm9, %v1506_v21 }
 0x130   : > { %7498 = vmatpush1.msk.msra.mxu1 %vm8535_vm7, %v1474_v58  ;;  %v1710_v22 = vpop.permute.xlu0 %1709  ;;  %v1712_v23 = vpop.permute.xlu1 %1711  ;;  %v2463_v58 = vld [vmem:[%s13040_s2 + $0x28] sm:$0xff] }
 0x131   : > { %7464 = vmatmul.mubr.msk.f32.gmra.mxu1 %vm491_vm4, %v7440_v60  ;;  %v1730_v24 = vsel %vm13043_vm14, %v1710_v22, %v1712_v23  ;;  %v1762_v62 = vsel %vm13043_vm14, %v1712_v23, %v1710_v22  ;;  %2478 = vperm.xlu0 %8167, %v2460_v40   ;;  %v7515_v22 = vld [vmem:[%s13039_s1 + $0x190] sm:$0xff]  ;;  %v13136_v23 = vmov 0 }
 0x132   : > { %7480 = vmatmul.mubr.msk.f32.gmra.mxu0 %vm491_vm4, %v7472_v61  ;;  %7527 = vmatprep.subr.msk.mxu0 %vm8952_vm15, %v1762_v62  ;;  %v7485_v61 = vld [vmem:[%s13039_s1 + $0x160] sm:$0xff]  ;;  %v13137_v23 = vsel %vm9164_vm11, 4294967295, %v13136_v23 }
 0x133   : > { %7528 = vmatpush1.msk.msra.mxu0 %vm8483_vm2, %v1730_v24  ;;  %1628 = vmatprep.mubr.f32.mxu1 %v13045_v0  ;;  %13138 = vst [vmem:[#allocation12_spill] sm:$0xff] %v13137_v23 }
 0x134   : > { %v1447_v25 = vpop.permute.xlu0 %1446  ;;  %v1449_v63 = vpop.permute.xlu1 %1448  ;;  %1883 = vmatprep.mubr.f32.mxu0 %v13045_v0  ;;  %2493 = vperm.xlu1 %8168, %v2463_v58  }
 0x135   : > { %v1473_v26 = vsel %vm13042_vm12, %v1447_v25, %v1449_v63  ;;  %v1505_v1 = vsel %vm13042_vm12, %v1449_v63, %v1447_v25  ;;  %2468 = vperm.xlu0 %8167, %v2458_v51  }
 0x136   : > { %7499 = vmatprep.subr.msk.mxu1 %vm8552_vm9, %v1505_v1  ;;  %v7516_v1 = vld [vmem:[%s13039_s1 + $0x198] sm:$0xff] }
 0x137   : > { %7500 = vmatpush1.msk.msra.mxu1 %vm8535_vm7, %v1473_v26  ;;  %v7486_v26 = vld [vmem:[%s13039_s1 + $0x168] sm:$0xff] }
 0x138   : > { %v1706_v2 = vpop.permute.xlu0 %1705  ;;  %v1708_v27 = vpop.permute.xlu1 %1707 }
 0x139   : > { %v1729_v28 = vsel %vm13043_vm14, %v1706_v2, %v1708_v27  ;;  %v1761_v3 = vsel %vm13043_vm14, %v1708_v27, %v1706_v2  ;;  %v2461_v2 = vld [vmem:[%s13040_s2 + $0x18] sm:$0xff] }
 0x13a   : > { %7529 = vmatprep.subr.msk.mxu0 %vm8952_vm15, %v1761_v3  ;;  %2483 = vperm.xlu1 %8168, %v2461_v2   ;;  %v7545_v2 = vld [vmem:[%s13039_s1 + $0x1c0] sm:$0xff] }
 0x13b   : > { %7530 = vmatpush1.msk.msra.mxu0 %vm8483_vm2, %v1729_v28 }
 0x13c   : > { %v1443_v4 = vpop.permute.xlu0 %1442  ;;  %v1445_v6 = vpop.permute.xlu1 %1444 }
 0x13d   : > { %v1472_v7 = vsel %vm13042_vm12, %v1443_v4, %v1445_v6  ;;  %v1504_v8 = vsel %vm13042_vm12, %v1445_v6, %v1443_v4  ;;  %v7487_v6 = vld [vmem:[%s13039_s1 + $0x170] sm:$0xff] }
 0x13e   : > { %7501 = vmatprep.subr.msk.mxu1 %vm8552_vm9, %v1504_v8  ;;  %v2459_v8 = vld [vmem:[%s13040_s2 + $0x8] sm:$0xff] }
 0x13f   : > { %7502 = vmatpush1.msk.msra.mxu1 %vm8535_vm7, %v1472_v7  ;;  %v7517_v7 = vld [vmem:[%s13039_s1 + $0x1a0] sm:$0xff]  ;;  %2473 = vperm.xlu1 %8168, %v2459_v8  }
 0x140   : > { %v1702_v12 = vpop.permute.xlu0 %1701  ;;  %v1704_v14 = vpop.permute.xlu1 %1703 }
 0x141   : > { %v1728_v15 = vsel %vm13043_vm14, %v1702_v12, %v1704_v14  ;;  %v1760_v16 = vsel %vm13043_vm14, %v1704_v14, %v1702_v12 }
 0x142   : > { %7531 = vmatprep.subr.msk.mxu0 %vm8952_vm15, %v1760_v16  ;;  %v7518_v16 = vld [vmem:[%s13039_s1 + $0x1a8] sm:$0xff] }
 0x143   : > { %7532 = vmatpush1.msk.msra.mxu0 %vm8483_vm2, %v1728_v15  ;;  %v7488_v15 = vld [vmem:[%s13039_s1 + $0x178] sm:$0xff] }
 0x144   : > { %v1439_v33 = vpop.permute.xlu0 %1438  ;;  %v1441_v34 = vpop.permute.xlu1 %1440 }
 0x145   : > { %v1471_v35 = vsel %vm13042_vm12, %v1439_v33, %v1441_v34  ;;  %v1503_v38 = vsel %vm13042_vm12, %v1441_v34, %v1439_v33  ;;  %vm1980_vm12 = vcmask 916480  }
 0x146   : > { %7503 = vmatprep.subr.msk.mxu1 %vm8552_vm9, %v1503_v38  ;;  %v7519_v38 = vld [vmem:[%s13039_s1 + $0x1b0] sm:$0xff] }
 0x147   : > { %7504 = vmatpush1.msk.msra.mxu1 %vm8535_vm7, %v1471_v35 }
 0x148   : > { %v1698_v32 = vpop.permute.xlu0 %1697  ;;  %7505 = vmatmul.mubr.msk.f32.vlgmr.msra.gmra.mxu1 %vm491_vm4, %v7481_v39  ;;  %v1700_v31 = vpop.permute.xlu1 %1699 }
 0x149   : > { %v1727_v41 = vsel %vm13043_vm14, %v1698_v32, %v1700_v31  ;;  %v1759_v43 = vsel %vm13043_vm14, %v1700_v31, %v1698_v32  ;;  %1634 = vmatprep.mubr.f32.mxu1 %v13045_v0 }
 0x14a   : > { %7533 = vmatprep.subr.msk.mxu0 %vm8952_vm15, %v1759_v43 }
 0x14b   : > { %7534 = vmatpush1.msk.msra.mxu0 %vm8483_vm2, %v1727_v41  ;;  %v7520_v41 = vld [vmem:[%s13039_s1 + $0x1b8] sm:$0xff] }
 0x14c   : > { %v1694_v46 = vpop.permute.xlu0 %1693  ;;  %7506 = vmatmul.mubr.msk.f32.gmra.mxu1 %vm491_vm4, %v7482_v44  ;;  %v1696_v47 = vpop.permute.xlu1 %1695 }
 0x14d   : > { %v1726_v48 = vsel %vm13043_vm14, %v1694_v46, %v1696_v47  ;;  %v1758_v17 = vsel %vm13043_vm14, %v1696_v47, %v1694_v46  ;;  %1640 = vmatprep.mubr.f32.mxu1 %v13045_v0  ;;  %vm13069_vm14 = vcmask 908288  }
 0x14e   : > { %7535 = vmatprep.subr.msk.mxu0 %vm8952_vm15, %v1758_v17 }
 0x14f   : > { %7536 = vmatpush1.msk.msra.mxu0 %vm8483_vm2, %v1726_v48 }
 0x150   : > { %v1977_v53 = vpop.permute.xlu0 %1976  ;;  %7507 = vmatmul.mubr.msk.f32.gmra.mxu1 %vm491_vm4, %v7483_v49  ;;  %7537 = vmatmul.mubr.msk.f32.vlgmr.msra.gmra.mxu0 %vm491_vm4, %v7513_v50  ;;  %v1979_v19 = vpop.permute.xlu1 %1978 }
 0x151   : > { %v2020_v54 = vsel %vm1980_vm12, %v1979_v19, %v1977_v53  ;;  %1646 = vmatprep.mubr.f32.mxu1 %v13045_v0  ;;  %1889 = vmatprep.mubr.f32.mxu0 %v13045_v0  ;;  %v1988_v55 = vsel %vm1980_vm12, %v1977_v53, %v1979_v19 }
 0x152   : > { %7553 = vmatprep.subr.msk.mxu1 %vm13068_vm13, %v2020_v54 }
 0x153   : > { %2091 = vmatpush1.msra.mxu1 %v1988_v55 }
 0x154   : > { %v1973_v57 = vpop.permute.xlu0 %1972  ;;  %7508 = vmatmul.mubr.msk.f32.gmra.mxu1 %vm491_vm4, %v7484_v56  ;;  %7538 = vmatmul.mubr.msk.f32.gmra.mxu0 %vm491_vm4, %v7514_v18  ;;  %v1975_v20 = vpop.permute.xlu1 %1974 }
 0x155   : > { %v2019_v21 = vsel %vm1980_vm12, %v1975_v20, %v1973_v57  ;;  %1652 = vmatprep.mubr.f32.mxu1 %v13045_v0  ;;  %1895 = vmatprep.mubr.f32.mxu0 %v13045_v0  ;;  %v1987_v60 = vsel %vm1980_vm12, %v1973_v57, %v1975_v20 }
 0x156   : > { %7554 = vmatprep.subr.msk.mxu1 %vm13068_vm13, %v2019_v21 }
 0x157   : > { %2093 = vmatpush1.msra.mxu1 %v1987_v60 }
 0x158   : > { %v2232_v24 = vpop.permute.xlu0 %2231  ;;  %7509 = vmatmul.mubr.msk.f32.gmra.mxu1 %vm491_vm4, %v7485_v61  ;;  %7539 = vmatmul.mubr.msk.f32.gmra.mxu0 %vm491_vm4, %v7515_v22  ;;  %v2234_v62 = vpop.permute.xlu1 %2233 }
 0x159   : > { %v2243_v25 = vsel %vm13069_vm14, %v2232_v24, %v2234_v62  ;;  %v2275_v63 = vsel %vm13069_vm14, %v2234_v62, %v2232_v24  ;;  %1658 = vmatprep.mubr.f32.mxu1 %v13045_v0  ;;  %1901 = vmatprep.mubr.f32.mxu0 %v13045_v0 }
 0x15a   : > { %7577 = vmatprep.subr.msk.mxu0 %vm9164_vm11, %v2275_v63 }
 0x15b   : > { %7578 = vmatpush1.msk.msra.mxu0 %vm8535_vm7, %v2243_v25 }
 0x15c   : > { %v1969_v27 = vpop.permute.xlu0 %1968  ;;  %7510 = vmatmul.mubr.msk.f32.gmra.mxu1 %vm491_vm4, %v7486_v26  ;;  %7540 = vmatmul.mubr.msk.f32.gmra.mxu0 %vm491_vm4, %v7516_v1  ;;  %v1971_v28 = vpop.permute.xlu1 %1970 }
 0x15d   : > { %v2018_v3 = vsel %vm1980_vm12, %v1971_v28, %v1969_v27  ;;  %1664 = vmatprep.mubr.f32.mxu1 %v13045_v0  ;;  %1907 = vmatprep.mubr.f32.mxu0 %v13045_v0  ;;  %v1986_v4 = vsel %vm1980_vm12, %v1969_v27, %v1971_v28 }
 0x15e   : > { %7555 = vmatprep.subr.msk.mxu1 %vm13068_vm13, %v2018_v3 }
 0x15f   : > { %2095 = vmatpush1.msra.mxu1 %v1986_v4 }
 0x160   : > { %v2228_v9 = vpop.permute.xlu0 %2227  ;;  %7511 = vmatmul.mubr.msk.f32.gmra.mxu1 %vm491_vm4, %v7487_v6  ;;  %7541 = vmatmul.mubr.msk.f32.gmra.mxu0 %vm491_vm4, %v7517_v7  ;;  %v2230_v11 = vpop.permute.xlu1 %2229  ;;  %v7546_v7 = vld [vmem:[%s13039_s1 + $0x1c8] sm:$0xff] }
 0x161   : > { %v2242_v12 = vsel %vm13069_vm14, %v2228_v9, %v2230_v11  ;;  %v2274_v14 = vsel %vm13069_vm14, %v2230_v11, %v2228_v9  ;;  %1670 = vmatprep.mubr.f32.mxu1 %v13045_v0  ;;  %1913 = vmatprep.mubr.f32.mxu0 %v13045_v0 }
 0x162   : > { %7579 = vmatprep.subr.msk.mxu0 %vm9164_vm11, %v2274_v14 }
 0x163   : > { %7580 = vmatpush1.msk.msra.mxu0 %vm8535_vm7, %v2242_v12 }
 0x164   : > { %v1965_v30 = vpop.permute.xlu0 %1964  ;;  %7512 = vmatmul.mubr.msk.f32.gmra.mxu1 %vm491_vm4, %v7488_v15  ;;  %7542 = vmatmul.mubr.msk.f32.gmra.mxu0 %vm491_vm4, %v7518_v16  ;;  %v1967_v33 = vpop.permute.xlu1 %1966  ;;  %v7547_v16 = vld [vmem:[%s13039_s1 + $0x1d0] sm:$0xff] }
 0x165   : > { %v2017_v34 = vsel %vm1980_vm12, %v1967_v33, %v1965_v30  ;;  %1919 = vmatprep.mubr.f32.mxu0 %v13045_v0  ;;  %v1985_v35 = vsel %vm1980_vm12, %v1965_v30, %v1967_v33  ;;  %2138 = vmatprep.mubr.f32.mxu1 %v13045_v0  ;;  %v7569_v30 = vld [vmem:[%s13039_s1 + $0x200] sm:$0xff] }
 0x166   : > { %7556 = vmatprep.subr.msk.mxu1 %vm13068_vm13, %v2017_v34 }
 0x167   : > { %2097 = vmatpush1.msra.mxu1 %v1985_v35  ;;  %v7548_v35 = vld [vmem:[%s13039_s1 + $0x1d8] sm:$0xff] }
 0x168   : > { %v2224_v39 = vpop.permute.xlu0 %2223  ;;  %7543 = vmatmul.mubr.msk.f32.gmra.mxu0 %vm491_vm4, %v7519_v38  ;;  %v2226_v32 = vpop.permute.xlu1 %2225  ;;  %v7570_v38 = vld [vmem:[%s13039_s1 + $0x208] sm:$0xff] }
 0x169   : > { %v2241_v31 = vsel %vm13069_vm14, %v2224_v39, %v2226_v32  ;;  %v2273_v40 = vsel %vm13069_vm14, %v2226_v32, %v2224_v39  ;;  %1925 = vmatprep.mubr.f32.mxu0 %v13045_v0 }
 0x16a   : > { %7581 = vmatprep.subr.msk.mxu0 %vm9164_vm11, %v2273_v40  ;;  %v7571_v40 = vld [vmem:[%s13039_s1 + $0x210] sm:$0xff] }
 0x16b   : > { %7582 = vmatpush1.msk.msra.mxu0 %vm8535_vm7, %v2241_v31  ;;  %v7549_v31 = vld [vmem:[%s13039_s1 + $0x1e0] sm:$0xff] }
 0x16c   : > { %v1961_v43 = vpop.permute.xlu0 %1960  ;;  %7544 = vmatmul.mubr.msk.f32.gmra.mxu0 %vm491_vm4, %v7520_v41  ;;  %v1963_v44 = vpop.permute.xlu1 %1962 }
 0x16d   : > { %v2016_v46 = vsel %vm1980_vm12, %v1963_v44, %v1961_v43  ;;  %v1984_v47 = vsel %vm1980_vm12, %v1961_v43, %v1963_v44  ;;  %2393 = vmatprep.mubr.f32.mxu0 %v13045_v0  ;;  %v7550_v44 = vld [vmem:[%s13039_s1 + $0x1e8] sm:$0xff] }
 0x16e   : > { %7557 = vmatprep.subr.msk.mxu1 %vm13068_vm13, %v2016_v46  ;;  %v7572_v46 = vld [vmem:[%s13039_s1 + $0x218] sm:$0xff] }
 0x16f   : > { %2099 = vmatpush1.msra.mxu1 %v1984_v47  ;;  %v9274_v25 = vpop.f32.mrf.mxu1  ;;  %v582_v8 = vpop.f32.mrf.mxu0 }
 0x170   : > { %v2220_v48 = vpop.permute.xlu0 %2219  ;;  %v2222_v17 = vpop.permute.xlu1 %2221 }
 0x171   : > { %v2240_v49 = vsel %vm13069_vm14, %v2220_v48, %v2222_v17  ;;  %v2272_v50 = vsel %vm13069_vm14, %v2222_v17, %v2220_v48  ;;  %v9283_v28 = vpop.f32.mrf.mxu1  ;;  %v9312_v33 = vpop.f32.mrf.mxu0  ;;  %v7551_v17 = vld [vmem:[%s13039_s1 + $0x1f0] sm:$0xff] }
 0x172   : > { %7583 = vmatprep.subr.msk.mxu0 %vm9164_vm11, %v2272_v50 }
 0x173   : > { %7584 = vmatpush1.msk.msra.mxu0 %vm8535_vm7, %v2240_v49  ;;  %v9296_v11 = vpop.f32.mrf.mxu1  ;;  %v588_v39 = vpop.f32.mrf.mxu0  ;;  %v7573_v49 = vld [vmem:[%s13039_s1 + $0x220] sm:$0xff] }
 0x174   : > { %v1957_v51 = vpop.permute.xlu0 %1956  ;;  %v1959_v52 = vpop.permute.xlu1 %1958 }
 0x175   : > { %v2015_v53 = vsel %vm1980_vm12, %v1959_v52, %v1957_v51  ;;  %v1983_v19 = vsel %vm1980_vm12, %v1957_v51, %v1959_v52  ;;  %v9314_v34 = vpop.f32.mrf.mxu1  ;;  %v9338_v41 = vpop.f32.mrf.mxu0  ;;  %v7552_v52 = vld [vmem:[%s13039_s1 + $0x1f8] sm:$0xff] }
 0x176   : > { %7558 = vmatprep.subr.msk.mxu1 %vm13068_vm13, %v2015_v53  ;;  %13139 = vst [vmem:[#allocation13_spill] sm:$0xff] %v9314_v34  ;;  %v7574_v53 = vld [vmem:[%s13039_s1 + $0x228] sm:$0xff] }
 0x177   : > { %2101 = vmatpush1.msra.mxu1 %v1983_v19  ;;  %v9326_v32 = vpop.f32.mrf.mxu1  ;;  %v594_v47 = vpop.f32.mrf.mxu0 }
 0x178   : > { %v2216_v54 = vpop.permute.xlu0 %2215  ;;  %v2218_v55 = vpop.permute.xlu1 %2217 }
 0x179   : > { %v2239_v56 = vsel %vm13069_vm14, %v2216_v54, %v2218_v55  ;;  %v2271_v18 = vsel %vm13069_vm14, %v2218_v55, %v2216_v54  ;;  %v9340_v43 = vpop.f32.mrf.mxu1  ;;  %v9364_v50 = vpop.f32.mrf.mxu0 }
 0x17a   : > { %7585 = vmatprep.subr.msk.mxu0 %vm9164_vm11, %v2271_v18  ;;  %13140 = vst [vmem:[#allocation14_spill] sm:$0xff] %v9340_v43 }
 0x17b   : > { %7586 = vmatpush1.msk.msra.mxu0 %vm8535_vm7, %v2239_v56  ;;  %v9352_v48 = vpop.f32.mrf.mxu1  ;;  %v600_v19 = vpop.f32.mrf.mxu0  ;;  %v7575_v56 = vld [vmem:[%s13039_s1 + $0x230] sm:$0xff] }
 0x17c   : > { %v1953_v57 = vpop.permute.xlu0 %1952  ;;  %v1955_v20 = vpop.permute.xlu1 %1954 }
 0x17d   : > { %v2014_v58 = vsel %vm1980_vm12, %v1955_v20, %v1953_v57  ;;  %v1982_v21 = vsel %vm1980_vm12, %v1953_v57, %v1955_v20  ;;  %v9366_v51 = vpop.f32.mrf.mxu1  ;;  %v9387_v57 = vpop.f32.mrf.mxu0 }
 0x17e   : > { %7559 = vmatprep.subr.msk.mxu1 %vm13068_vm13, %v2014_v58  ;;  %13141 = vst [vmem:[#allocation15_spill] sm:$0xff] %v9366_v51 }
 0x17f   : > { %2103 = vmatpush1.msra.mxu1 %v1982_v21  ;;  %v7576_v21 = vld [vmem:[%s13039_s1 + $0x238] sm:$0xff] }
 0x181   : > { %v2212_v60 = vpop.permute.xlu0 %2211 }
 0x182   : > { %v2214_v61 = vpop.permute.xlu1 %2213 }
 0x183   : > { %v2238_v22 = vsel %vm13069_vm14, %v2212_v60, %v2214_v61  ;;  %v2270_v24 = vsel %vm13069_vm14, %v2214_v61, %v2212_v60 }
 0x184   : > { %7587 = vmatprep.subr.msk.mxu0 %vm9164_vm11, %v2270_v24 }
 0x185   : > { %7588 = vmatpush1.msk.msra.mxu0 %vm8535_vm7, %v2238_v22 }
 0x187   : > { %v1949_v62 = vpop.permute.xlu0 %1948 }
 0x188   : > { %v1951_v63 = vpop.permute.xlu1 %1950 }
 0x189   : > { %v2013_v26 = vsel %vm1980_vm12, %v1951_v63, %v1949_v62  ;;  %v1981_v1 = vsel %vm1980_vm12, %v1949_v62, %v1951_v63 }
 0x18a   : > { %7560 = vmatprep.subr.msk.mxu1 %vm13068_vm13, %v2013_v26 }
 0x18b   : > { %2105 = vmatpush1.msra.mxu1 %v1981_v1  ;;  %v2208_v27 = vpop.permute.xlu0 %2207 }
 0x18c   : > { %7561 = vmatmul.mubr.msk.f32.vlgmr.msra.gmra.mxu1 %vm491_vm4, %v7545_v2  ;;  %v2210_v3 = vpop.permute.xlu1 %2209 }
 0x18d   : > { %v2237_v4 = vsel %vm13069_vm14, %v2208_v27, %v2210_v3  ;;  %v2269_v6 = vsel %vm13069_vm14, %v2210_v3, %v2208_v27  ;;  %2144 = vmatprep.mubr.f32.mxu1 %v13045_v0 }
 0x18e   : > { %7589 = vmatprep.subr.msk.mxu0 %vm9164_vm11, %v2269_v6 }
 0x18f   : > { %7590 = vmatpush1.msk.msra.mxu0 %vm8535_vm7, %v2237_v4  ;;  %v2204_v9 = vpop.permute.xlu0 %2203 }
 0x190   : > { %7562 = vmatmul.mubr.msk.f32.gmra.mxu1 %vm491_vm4, %v7546_v7  ;;  %v2206_v12 = vpop.permute.xlu1 %2205 }
 0x191   : > { %v2236_v14 = vsel %vm13069_vm14, %v2204_v9, %v2206_v12  ;;  %v2268_v15 = vsel %vm13069_vm14, %v2206_v12, %v2204_v9  ;;  %2150 = vmatprep.mubr.f32.mxu1 %v13045_v0 }
 0x192   : > { %7591 = vmatprep.subr.msk.mxu0 %vm9164_vm11, %v2268_v15 }
 0x193   : > { %7592 = vmatpush1.msk.msra.mxu0 %vm8535_vm7, %v2236_v14 }
 0x194   : > { %7563 = vmatmul.mubr.msk.f32.gmra.mxu1 %vm491_vm4, %v7547_v16  ;;  %7593 = vmatmul.mubr.msk.f32.vlgmr.msra.gmra.mxu0 %vm491_vm4, %v7569_v30 }
 0x195   : > { %2156 = vmatprep.mubr.f32.mxu1 %v13045_v0  ;;  %2399 = vmatprep.mubr.f32.mxu0 %v13045_v0 }
 0x198   : > { %7564 = vmatmul.mubr.msk.f32.gmra.mxu1 %vm491_vm4, %v7548_v35  ;;  %7594 = vmatmul.mubr.msk.f32.gmra.mxu0 %vm491_vm4, %v7570_v38 }
 0x199   : > { %2162 = vmatprep.mubr.f32.mxu1 %v13045_v0  ;;  %2405 = vmatprep.mubr.f32.mxu0 %v13045_v0 }
 0x19c   : > { %7565 = vmatmul.mubr.msk.f32.gmra.mxu1 %vm491_vm4, %v7549_v31  ;;  %7595 = vmatmul.mubr.msk.f32.gmra.mxu0 %vm491_vm4, %v7571_v40 }
 0x19d   : > { %2168 = vmatprep.mubr.f32.mxu1 %v13045_v0  ;;  %2411 = vmatprep.mubr.f32.mxu0 %v13045_v0 }
 0x1a0   : > { %7566 = vmatmul.mubr.msk.f32.gmra.mxu1 %vm491_vm4, %v7550_v44  ;;  %7596 = vmatmul.mubr.msk.f32.gmra.mxu0 %vm491_vm4, %v7572_v46 }
 0x1a1   : > { %2174 = vmatprep.mubr.f32.mxu1 %v13045_v0  ;;  %2417 = vmatprep.mubr.f32.mxu0 %v13045_v0 }
 0x1a4   : > { %7567 = vmatmul.mubr.msk.f32.gmra.mxu1 %vm491_vm4, %v7551_v17  ;;  %7597 = vmatmul.mubr.msk.f32.gmra.mxu0 %vm491_vm4, %v7573_v49 }
 0x1a5   : > { %2180 = vmatprep.mubr.f32.mxu1 %v13045_v0  ;;  %2423 = vmatprep.mubr.f32.mxu0 %v13045_v0 }
 0x1a7   : > { %v719_v54 = vpop.f32.mrf.mxu1 }
 0x1a8   : > { %7568 = vmatmul.mubr.msk.f32.gmra.mxu1 %vm491_vm4, %v7552_v52  ;;  %7598 = vmatmul.mubr.msk.f32.gmra.mxu0 %vm491_vm4, %v7574_v53  ;;  %v720_v55 = vadd.f32 %v719_v54, %v582_v8 }
 0x1a9   : > { %2429 = vmatprep.mubr.f32.mxu0 %v13045_v0  ;;  %v9384_v18 = vpop.f32.mrf.mxu1  ;;  %2900 = vmatprep.mubr.f32.mxu1 %v13045_v0 }
 0x1ab   : > { %v725_v20 = vpop.f32.mrf.mxu1 }
 0x1ac   : > { %7599 = vmatmul.mubr.msk.f32.gmra.mxu0 %vm491_vm4, %v7575_v56  ;;  %v726_v58 = vadd.f32 %v725_v20, %v588_v39 }
 0x1ad   : > { %2435 = vmatprep.mubr.f32.mxu0 %v13045_v0  ;;  %v9394_v60 = vpop.f32.mrf.mxu1 }
 0x1af   : > { %v958_v61 = vpop.f32.mrf.mxu0  ;;  %v731_v22 = vpop.f32.mrf.mxu1 }
 0x1b0   : > { %7600 = vmatmul.mubr.msk.f32.gmra.mxu0 %vm491_vm4, %v7576_v21  ;;  %v9397_v24 = vadd.f32 %v958_v61, %v720_v55  ;;  %v732_v62 = vadd.f32 %v731_v22, %v594_v47 }
 0x1b1   : > { %v9399_v63 = vpop.f32.mrf.mxu0  ;;  %v9401_v26 = vpop.f32.mrf.mxu1  ;;  %3037 = vmatprep.mubr.f32.mxu0 %v13045_v0 }
 0x1b3   : > { %v964_v1 = vpop.f32.mrf.mxu0  ;;  %v737_v2 = vpop.f32.mrf.mxu1 }
 0x1b4   : > { %v1007_v27 = vadd.f32 %v964_v1, %v726_v58  ;;  %v738_v3 = vadd.f32 %v737_v2, %v600_v19 }
 0x1b5   : > { %v9404_v4 = vpop.f32.mrf.mxu0  ;;  %v9406_v6 = vpop.f32.mrf.mxu1 }
 0x1b7   : > { %v970_v7 = vpop.f32.mrf.mxu0  ;;  %v743_v8 = vpop.f32.mrf.mxu1 }
 0x1b8   : > { %v1009_v9 = vadd.f32 %v970_v7, %v732_v62  ;;  %v744_v30 = vadd.f32 %v743_v8, %v9274_v25 }
 0x1b9   : > { %v9408_v12 = vpop.f32.mrf.mxu0  ;;  %v9410_v15 = vpop.f32.mrf.mxu1 }
 0x1bb   : > { %v976_v14 = vpop.f32.mrf.mxu0 }
 0x1bc   : > { %v1011_v16 = vadd.f32 %v976_v14, %v738_v3 }
 0x1bd   : > { %v9413_v35 = vpop.f32.mrf.mxu0 }
 0x1bf   : > { %v982_v38 = vpop.f32.mrf.mxu0  ;;  %v749_v39 = vpop.f32.mrf.mxu1 }
 0x1c0   : > { %v1013_v31 = vadd.f32 %v982_v38, %v744_v30  ;;  %v750_v40 = vadd.f32 %v749_v39, %v9296_v11 }
 0x1c1   : > { %v9416_v44 = vpop.f32.mrf.mxu0  ;;  %v9418_v46 = vpop.f32.mrf.mxu1 }
 0x1c2   : > { %13142 = vst [vmem:[#allocation16_spill] sm:$0xff] %v9418_v46 }
 0x1c4   : > { %v988_v47 = vpop.f32.mrf.mxu0 }
 0x1c5   : > { %v1015_v17 = vadd.f32 %v988_v47, %v750_v40 }
 0x1c6   : > { %v9420_v52 = vpop.f32.mrf.mxu0 }
 0x1c7   : > { %v755_v49 = vpop.f32.mrf.mxu1  ;;  %13143 = vst [vmem:[#allocation17_spill] sm:$0xff] %v9420_v52 }
 0x1c8   : > { %v756_v53 = vadd.f32 %v755_v49, %v9326_v32 }
 0x1c9   : > { %v9423_v19 = vpop.f32.mrf.mxu1 }
 0x1ca   : > { %13144 = vst [vmem:[#allocation18_spill] sm:$0xff] %v9423_v19 }
 0x1cb   : > { %v994_v25 = vpop.f32.mrf.mxu0 }
 0x1cc   : > { %v1017_v54 = vadd.f32 %v994_v25, %v756_v53 }
 0x1cd   : > { %v761_v55 = vpop.f32.mrf.mxu1  ;;  %v9425_v56 = vpop.f32.mrf.mxu0 }
 0x1ce   : > { %13145 = vst [vmem:[#allocation19_spill] sm:$0xff] %v9425_v56  ;;  %v762_v11 = vadd.f32 %v761_v55, %v9352_v48 }
 0x1cf   : > { %v9428_v20 = vpop.f32.mrf.mxu1 }
 0x1d0   : > { %13146 = vst [vmem:[#allocation20_spill] sm:$0xff] %v9428_v20  ;;  %v1000_v58 = vpop.f32.mrf.mxu0 }
 0x1d1   : > { %v1019_v21 = vadd.f32 %v1000_v58, %v762_v11 }
 0x1d2   : > { %v9430_v61 = vpop.f32.mrf.mxu0 }
 0x1d3   : > { %13147 = vst [vmem:[#allocation21_spill] sm:$0xff] %v9430_v61  ;;  %v9432_v22 = vpop.f32.mrf.mxu1 }
 0x1d5   : > { %v9434_v62 = vpop.f32.mrf.mxu1 }
 0x1d6   : > { %v9436_v32 = vpop.f32.mrf.mxu0 }
 0x1d8   : > { %v9438_v1 = vpop.f32.mrf.mxu0 }
 0x1d9   : > { %v1219_v2 = vpop.f32.mrf.mxu1 }
 0x1da   : > { %v1262_v3 = vadd.f32 %v1219_v2, %v1007_v27  ;;  %v1381_v7 = vpop.f32.mrf.mxu0 }
 0x1db   : > { %v9440_v8 = vpop.f32.mrf.mxu1 }
 0x1dc   : > { %v9442_v48 = vadd.f32 %v1381_v7, %v1262_v3  ;;  %v9444_v14 = vpop.f32.mrf.mxu0 }
 0x1dd   : > { %v1225_v30 = vpop.f32.mrf.mxu1 }
 0x1de   : > { %v1264_v38 = vadd.f32 %v1225_v30, %v1009_v9  ;;  %v1387_v39 = vpop.f32.mrf.mxu0 }
 0x1df   : > { %v9446_v40 = vpop.f32.mrf.mxu1 }
 0x1e0   : > { %v9448_v47 = vadd.f32 %v1387_v39, %v1264_v38  ;;  %v9450_v49 = vpop.f32.mrf.mxu0 }
 0x1e1   : > { %v1231_v53 = vpop.f32.mrf.mxu1 }
 0x1e2   : > { %v1266_v25 = vadd.f32 %v1231_v53, %v1011_v16  ;;  %v1393_v55 = vpop.f32.mrf.mxu0 }
 0x1e3   : > { %v9452_v27 = vpop.f32.mrf.mxu1 }
 0x1e4   : > { %v9454_v11 = vadd.f32 %v1393_v55, %v1266_v25  ;;  %v9456_v58 = vpop.f32.mrf.mxu0 }
 0x1e5   : > { %v1237_v2 = vpop.f32.mrf.mxu1 }
 0x1e6   : > { %v1268_v3 = vadd.f32 %v1237_v2, %v1013_v31  ;;  %v1399_v7 = vpop.f32.mrf.mxu0 }
 0x1e7   : > { %v9458_v9 = vpop.f32.mrf.mxu1 }
 0x1e8   : > { %13148 = vst [vmem:[#allocation22_spill] sm:$0xff] %v9458_v9  ;;  %v1430_v30 = vadd.f32 %v1399_v7, %v1268_v3  ;;  %v9460_v0 = vpop.f32.mrf.mxu0 }
 0x1e9   : > { %13149 = vst [vmem:[#allocation23_spill] sm:$0xff] %v9460_v0  ;;  %v1243_v38 = vpop.f32.mrf.mxu1 }
 0x1ea   : > { %v1270_v39 = vadd.f32 %v1243_v38, %v1015_v17  ;;  %v1405_v23 = vpop.f32.mrf.mxu0 }
 0x1eb   : > { %v9462_v59 = vpop.f32.mrf.mxu1 }
 0x1ec   : > { %13150 = vst [vmem:[#allocation24_spill] sm:$0xff] %v9462_v59  ;;  %v1432_v16 = vadd.f32 %v1405_v23, %v1270_v39  ;;  %v9464_v53 = vpop.f32.mrf.mxu0 }
 0x1ed   : > { %13151 = vst [vmem:[#allocation25_spill] sm:$0xff] %v9464_v53  ;;  %v1249_v25 = vpop.f32.mrf.mxu1 }
 0x1ee   : > { %v1272_v55 = vadd.f32 %v1249_v25, %v1017_v54  ;;  %v1411_v29 = vpop.f32.mrf.mxu0 }
 0x1ef   : > { %v9466_v37 = vpop.f32.mrf.mxu1 }
 0x1f0   : > { %13152 = vst [vmem:[#allocation26_spill] sm:$0xff] %v9466_v37  ;;  %v1434_v31 = vadd.f32 %v1411_v29, %v1272_v55  ;;  %v9468_v2 = vpop.f32.mrf.mxu0 }
 0x1f1   : > { %13153 = vst [vmem:[#allocation27_spill] sm:$0xff] %v9468_v2  ;;  %v1255_v5 = vpop.f32.mrf.mxu1 }
 0x1f2   : > { %v1274_v3 = vadd.f32 %v1255_v5, %v1019_v21  ;;  %v1417_v7 = vpop.f32.mrf.mxu0 }
 0x1f3   : > { %v9470_v42 = vpop.f32.mrf.mxu1 }
 0x1f4   : > { %v1436_v45 = vadd.f32 %v1417_v7, %v1274_v3  ;;  %13154 = vst [vmem:[#allocation28_spill] sm:$0xff] %v9470_v42  ;;  %v9474_v23 = vpop.f32.mrf.mxu0 }
 0x1f5   : > { %13155 = vst [vmem:[#allocation29_spill] sm:$0xff] %v9474_v23 }
 0x208   : > { %v1630_v17 = vpop.f32.mrf.mxu1 }
 0x20a   : > { %v1632_v38 = vpop.f32.mrf.mxu1 }
 0x20c   : > { %v9472_v13 = vpop.f32.mrf.mxu1 }
 0x20e   : > { %v9476_v39 = vpop.f32.mrf.mxu1 }
 0x210   : > { %v9478_v54 = vpop.f32.mrf.mxu1  ;;  %v1885_v25 = vpop.f32.mrf.mxu0 }
 0x212   : > { %v9480_v29 = vpop.f32.mrf.mxu1  ;;  %v1887_v55 = vpop.f32.mrf.mxu0 }
 0x214   : > { %v9482_v10 = vpop.f32.mrf.mxu1  ;;  %v1891_v5 = vpop.f32.mrf.mxu0 }
 0x216   : > { %v9484_v21 = vpop.f32.mrf.mxu1  ;;  %v9486_v3 = vpop.f32.mrf.mxu0 }
 0x218   : > { %v1654_v7 = vpop.f32.mrf.mxu1  ;;  %v9488_v36 = vpop.f32.mrf.mxu0 }
 0x219   : > { %v1685_v42 = vadd.f32 %v1654_v7, %v1430_v30 }
 0x21a   : > { %v9490_v23 = vpop.f32.mrf.mxu1  ;;  %v9492_v61 = vpop.f32.mrf.mxu0 }
 0x21b   : > { %13156 = vst [vmem:[#allocation30_spill] sm:$0xff] %v9490_v23 }
 0x21c   : > { %v1660_v20 = vpop.f32.mrf.mxu1  ;;  %v9494_v51 = vpop.f32.mrf.mxu0 }
 0x21d   : > { %v1687_v2 = vadd.f32 %v1660_v20, %v1432_v16 }
 0x21e   : > { %v9496_v37 = vpop.f32.mrf.mxu1  ;;  %v9498_v56 = vpop.f32.mrf.mxu0 }
 0x21f   : > { %13157 = vst [vmem:[#allocation31_spill] sm:$0xff] %v9496_v37 }
 0x220   : > { %v1666_v19 = vpop.f32.mrf.mxu1  ;;  %v1909_v43 = vpop.f32.mrf.mxu0 }
 0x221   : > { %v1689_v53 = vadd.f32 %v1666_v19, %v1434_v31  ;;  %v9500_v59 = vadd.f32 %v1909_v43, %v1685_v42  ;;  %v722_v42 = vadd.f32 %v9384_v18, %v9312_v33  ;;  %v9518_v43 = vpop.permute.xlu0 %2503  ;;  %v9531_v33 = vpop.permute.xlu1 %2498 }
 0x222   : > { %v9502_v52 = vpop.f32.mrf.mxu1  ;;  %v9504_v30 = vpop.f32.mrf.mxu0  ;;  %13159 = vst [vmem:[#allocation33_spill] sm:$0xff] %v9518_v43 }
 0x223   : > { %v1006_v31 = vadd.f32 %v9399_v63, %v722_v42 }
 0x224   : > { %v1672_v7 = vpop.f32.mrf.mxu1  ;;  %v1915_v46 = vpop.f32.mrf.mxu0 }
 0x225   : > { %v1691_v34 = vadd.f32 %v1672_v7, %v1436_v45  ;;  %v9506_v23 = vadd.f32 %v1915_v46, %v1687_v2  ;;  %v728_v45 = vadd.f32 %v9394_v60, %v9338_v41  ;;  %v1260_v46 = vadd.f32 %v9432_v22, %v9397_v24  ;;  %v9527_v2 = vpop.permute.xlu0 %2488 }
 0x226   : > { %v9508_v0 = vpop.f32.mrf.mxu0 }
 0x227   : > { %v1422_v18 = vadd.f32 %v9436_v32, %v1260_v46 }
 0x228   : > { %v1921_v20 = vpop.f32.mrf.mxu0 }
 0x229   : > { %v9510_v16 = vadd.f32 %v1921_v20, %v1689_v53  ;;  %v9525_v53 = vpop.f32.mrf.mxu1  ;;  %v1677_v20 = vadd.f32 %v1630_v17, %v1422_v18  ;;  %v9536_v24 = vpop.permute.xlu0 %2478 }
 0x22a   : > { %v9512_v37 = vpop.f32.mrf.mxu0 }
 0x22b   : > { %v1932_v42 = vadd.f32 %v1885_v25, %v1677_v20 }
 0x22c   : > { %v1927_v9 = vpop.f32.mrf.mxu0 }
 0x22d   : > { %v9514_v19 = vadd.f32 %v1927_v9, %v1691_v34  ;;  %v1261_v34 = vadd.f32 %v9434_v62, %v1006_v31  ;;  %v1008_v9 = vadd.f32 %v9404_v4, %v728_v45  ;;  %v9540_v62 = vpop.permute.xlu1 %2493 }
 0x22e   : > { %v9538_v43 = vpop.f32.mrf.mxu0 }
 0x22f   : > { %13158 = vst [vmem:[#allocation32_spill] sm:$0xff] %v9514_v19  ;;  %v1423_v63 = vadd.f32 %v9438_v1, %v1261_v34  ;;  %v1263_v60 = vadd.f32 %v9440_v8, %v1008_v9  ;;  %v1679_v1 = vadd.f32 %v9472_v13, %v9442_v48  ;;  %v2469_v34 = vpop.permute.xlu0 %2468 }
 0x231   : > { %v1678_v22 = vadd.f32 %v1632_v38, %v1423_v63  ;;  %v1425_v19 = vadd.f32 %v9444_v14, %v1263_v60  ;;  %v1934_v25 = vadd.f32 %v1891_v5, %v1679_v1  ;;  %v9549_v14 = vpop.permute.xlu1 %2483 }
 0x233   : > { %v1933_v4 = vadd.f32 %v1887_v55, %v1678_v22  ;;  %v1680_v8 = vadd.f32 %v9476_v39, %v1425_v19  ;;  %v734_v55 = vadd.f32 %v9401_v26, %v9364_v50 }
 0x235   : > { %v1010_v50 = vadd.f32 %v9408_v12, %v734_v55 }
 0x24c   : > { %v2140_v7 = vpop.f32.mrf.mxu1 }
 0x24d   : > { %v2187_v31 = vadd.f32 %v2140_v7, %v1932_v42  ;;  %v1935_v7 = vadd.f32 %v9486_v3, %v1680_v8  ;;  %v2474_v42 = vpop.permute.xlu1 %2473 }
 0x24e   : > { %v2142_v41 = vpop.f32.mrf.mxu1 }
 0x24f   : > { %v2188_v17 = vadd.f32 %v2142_v41, %v1933_v4 }
 0x250   : > { %v2146_v45 = vpop.f32.mrf.mxu1 }
 0x251   : > { %v2189_v60 = vadd.f32 %v2146_v45, %v1934_v25 }
 0x252   : > { %v2148_v9 = vpop.f32.mrf.mxu1 }
 0x253   : > { %v2190_v41 = vadd.f32 %v2148_v9, %v1935_v7 }
 0x254   : > { %v2395_v32 = vpop.f32.mrf.mxu0  ;;  %v2152_v1 = vpop.f32.mrf.mxu1 }
 0x255   : > { %v2442_v46 = vadd.f32 %v2395_v32, %v2187_v31  ;;  %v1265_v31 = vadd.f32 %v9446_v40, %v1010_v50 }
 0x256   : > { %v2397_v38 = vpop.f32.mrf.mxu0  ;;  %v2154_v25 = vpop.f32.mrf.mxu1 }
 0x257   : > { %v2506_v18 = vadd.f32 %v2469_v34, %v2442_v46  ;;  %v2443_v63 = vadd.f32 %v2397_v38, %v2188_v17  ;;  %v1427_v12 = vadd.f32 %v9450_v49, %v1265_v31  ;;  %v1681_v17 = vadd.f32 %v9478_v54, %v9448_v47 }
 0x258   : > { %v2401_v20 = vpop.f32.mrf.mxu0  ;;  %v740_v49 = vadd.f32 %v9406_v6, %v9387_v57 }
 0x259   : > { %vm2522_vm13 = vcmp.ge.f32.partialorder %v2506_v18, 0.0  ;;  %v2538_v13 = vmul.f32 0.2, %v2506_v18  ;;  %v2507_v48 = vadd.f32 %v2469_v34, %v2443_v63  ;;  %v2444_v22 = vadd.f32 %v2401_v20, %v2189_v60  ;;  %v2158_v20 = vpop.f32.mrf.mxu1 }
 0x25a   : > { %v2403_v39 = vpop.f32.mrf.mxu0  ;;  %v1682_v40 = vadd.f32 %v9480_v29, %v1427_v12  ;;  %v1936_v34 = vadd.f32 %v9488_v36, %v1681_v17  ;;  %v1012_v63 = vadd.f32 %v9413_v35, %v740_v49  ;;  %v1683_v60 = vadd.f32 %v9482_v10, %v9454_v11  ;;  %v13162_v12 = vld [vmem:[#allocation30_spill] sm:$0xff] }
 0x25b   : > { %v9551_v19 = vsel %vm2522_vm13, %v2506_v18, %v2538_v13  ;;  %vm2523_vm14 = vcmp.ge.f32.partialorder %v2507_v48, 0.0  ;;  %v2539_v5 = vmul.f32 0.2, %v2507_v48  ;;  %v2445_v3 = vadd.f32 %v2403_v39, %v2190_v41  ;;  %v2160_v39 = vpop.f32.mrf.mxu1 }
 0x25c   : > { %2739 = vrot.lane.b32.xlu0 %v9551_v19, %s8178_s19  ;;  %v2508_v4 = vadd.f32 %v2474_v42, %v2444_v22  ;;  %v2407_v8 = vpop.f32.mrf.mxu0  ;;  %v1937_v47 = vadd.f32 %v9492_v61, %v1682_v40  ;;  %v2191_v54 = vadd.f32 %v2152_v1, %v1936_v34  ;;  %v1267_v6 = vadd.f32 %v9452_v27, %v1012_v63  ;;  %v13164_v40 = vld [vmem:[#allocation16_spill] sm:$0xff] }
 0x25d   : > { %v9556_v26 = vsel %vm2523_vm14, %v2507_v48, %v2539_v5  ;;  %v2509_v45 = vadd.f32 %v2474_v42, %v2445_v3  ;;  %v2164_v31 = vpop.f32.mrf.mxu1 }
 0x25e   : > { %2715 = vrot.lane.b32.xlu1 %v9556_v26, %s8178_s19  ;;  %v2540_v32 = vmul.f32 0.2, %v2508_v4  ;;  %vm2524_vm13 = vcmp.ge.f32.partialorder %v2508_v4, 0.0  ;;  %v2409_v18 = vpop.f32.mrf.mxu0  ;;  %v2192_v29 = vadd.f32 %v2154_v25, %v1937_v47  ;;  %v2446_v36 = vadd.f32 %v2407_v8, %v2191_v54  ;;  %v13163_v8 = vld [vmem:[#allocation13_spill] sm:$0xff] }
 0x25f   : > { %v2541_v46 = vmul.f32 0.2, %v2509_v45  ;;  %vm2525_vm14 = vcmp.ge.f32.partialorder %v2509_v45, 0.0  ;;  %v1429_v35 = vadd.f32 %v9456_v58, %v1267_v6  ;;  %v746_v58 = vadd.f32 %v9410_v15, %v9283_v28  ;;  %v13160_v15 = vld [vmem:[#allocation22_spill] sm:$0xff] }
 0x260   : > { %2642 = vrot.lane.b32.xlu0 %v9551_v19, %s8179_s20  ;;  %v9574_v38 = vsel %vm2524_vm13, %v2508_v4, %v2540_v32  ;;  %v2447_v55 = vadd.f32 %v2409_v18, %v2192_v29  ;;  %v2510_v57 = vadd.f32 %v9536_v24, %v2446_v36  ;;  %v2413_v48 = vpop.f32.mrf.mxu0  ;;  %v752_v34 = vadd.f32 %v13164_v40, %v13163_v8  ;;  %v13165_v36 = vld [vmem:[#allocation17_spill] sm:$0xff]  ;;  %v13176_v8 = vld [vmem:[#allocation15_spill] sm:$0xff]  ;;  %v13177_v40 = vld [vmem:[#allocation20_spill] sm:$0xff] }
 0x261   : > { %v9581_v9 = vsel %vm2525_vm14, %v2509_v45, %v2541_v46  ;;  %v1684_v27 = vadd.f32 %v9484_v21, %v1429_v35  ;;  %v1014_v50 = vadd.f32 %v9416_v44, %v746_v58  ;;  %v13161_v44 = vld [vmem:[#allocation23_spill] sm:$0xff]  ;;  %v2166_v46 = vpop.f32.mrf.mxu1  ;;  %v2195_v49 = vadd.f32 %v2164_v31, %v9500_v59  ;;  %v13166_v59 = vld [vmem:[#allocation24_spill] sm:$0xff]  ;;  %v13170_v58 = vld [vmem:[#allocation18_spill] sm:$0xff] }
 0x262   : > { %2610 = vrot.lane.b32.xlu1 %v9556_v26, %s8179_s20  ;;  %v2511_v61 = vadd.f32 %v9536_v24, %v2447_v55  ;;  %v2542_v7 = vmul.f32 0.2, %v2510_v57  ;;  %vm2526_vm13 = vcmp.ge.f32.partialorder %v2510_v57, 0.0  ;;  %v1938_v24 = vadd.f32 %v9494_v51, %v1683_v60  ;;  %v2415_v22 = vpop.f32.mrf.mxu0 }
 0x263   : > { %v1939_v10 = vadd.f32 %v9498_v56, %v1684_v27  ;;  %v1269_v56 = vadd.f32 %v13160_v15, %v1014_v50  ;;  %v1016_v63 = vadd.f32 %v13165_v36, %v752_v34  ;;  %v764_v34 = vadd.f32 %v13177_v40, %v13176_v8  ;;  %v13179_v36 = vld [vmem:[#allocation21_spill] sm:$0xff] }
 0x264   : > { %3110 = vrot.lane.b32.xlu0 %v9551_v19, %s8180_s21  ;;  %v2543_v13 = vmul.f32 0.2, %v2511_v61  ;;  %vm2527_vm14 = vcmp.ge.f32.partialorder %v2511_v61, 0.0  ;;  %v9606_v41 = vsel %vm2526_vm13, %v2510_v57, %v2542_v7  ;;  %v2193_v11 = vadd.f32 %v2158_v20, %v1938_v24  ;;  %v2419_v1 = vpop.f32.mrf.mxu0  ;;  %v2170_v7 = vpop.f32.mrf.mxu1  ;;  %v13167_v20 = vld [vmem:[#allocation25_spill] sm:$0xff] }
 0x265   : > { %v2194_v21 = vadd.f32 %v2160_v39, %v1939_v10  ;;  %v1431_v45 = vadd.f32 %v13161_v44, %v1269_v56  ;;  %v2450_v29 = vadd.f32 %v2419_v1, %v2195_v49  ;;  %v1271_v57 = vadd.f32 %v13166_v59, %v1016_v63  ;;  %v13169_v39 = vld [vmem:[#allocation14_spill] sm:$0xff] }
 0x266   : > { %3086 = vrot.lane.b32.xlu1 %v9556_v26, %s8180_s21  ;;  %v9613_v5 = vsel %vm2527_vm14, %v2511_v61, %v2543_v13  ;;  %v2448_v51 = vadd.f32 %v2413_v48, %v2193_v11  ;;  %v2421_v54 = vpop.f32.mrf.mxu0  ;;  %v13168_v48 = vld [vmem:[#allocation31_spill] sm:$0xff]  ;;  %v2172_v24 = vpop.f32.mrf.mxu1  ;;  %v758_v10 = vadd.f32 %v13170_v58, %v13169_v39  ;;  %v1020_v63 = vadd.f32 %v13179_v36, %v764_v34 }
 0x267   : > { %v2449_v3 = vadd.f32 %v2415_v22, %v2194_v21  ;;  %v1686_v17 = vadd.f32 %v13162_v12, %v1431_v45  ;;  %v1433_v35 = vadd.f32 %v13167_v20, %v1271_v57  ;;  %v2197_v22 = vadd.f32 %v2170_v7, %v9506_v23  ;;  %v13173_v23 = vld [vmem:[#allocation26_spill] sm:$0xff]  ;;  %v13174_v45 = vld [vmem:[#allocation27_spill] sm:$0xff] }
 0x268   : > { %2741 = vrot.lane.b32.xlu0 %v9574_v38, %s8178_s19  ;;  %v2512_v28 = vadd.f32 %v9549_v14, %v2448_v51  ;;  %v2425_v13 = vpop.f32.mrf.mxu0  ;;  %v2176_v44 = vpop.f32.mrf.mxu1 }
 0x269   : > { %v2513_v42 = vadd.f32 %v9549_v14, %v2449_v3  ;;  %v1941_v25 = vadd.f32 %v9504_v30, %v1686_v17  ;;  %v2514_v30 = vadd.f32 %v9527_v2, %v2450_v29  ;;  %v1688_v27 = vadd.f32 %v13168_v48, %v1433_v35 }
 0x26a   : > { %2717 = vrot.lane.b32.xlu1 %v9581_v9, %s8178_s19  ;;  %v2544_v4 = vmul.f32 0.2, %v2512_v28  ;;  %vm2528_vm13 = vcmp.ge.f32.partialorder %v2512_v28, 0.0  ;;  %v2427_v51 = vpop.f32.mrf.mxu0  ;;  %v2452_v3 = vadd.f32 %v2425_v13, %v2197_v22  ;;  %v2199_v49 = vadd.f32 %v2176_v44, %v9510_v16  ;;  %v13180_v16 = vld [vmem:[#allocation28_spill] sm:$0xff]  ;;  %v13183_v22 = vld [vmem:[#allocation33_spill] sm:$0xff] }
 0x26b   : > { %v2545_v32 = vmul.f32 0.2, %v2513_v42  ;;  %vm2529_vm14 = vcmp.ge.f32.partialorder %v2513_v42, 0.0  ;;  %v2196_v18 = vadd.f32 %v2166_v46, %v1941_v25  ;;  %v2546_v61 = vmul.f32 0.2, %v2514_v30  ;;  %v2178_v46 = vpop.f32.mrf.mxu1 }
 0x26c   : > { %2644 = vrot.lane.b32.xlu0 %v9574_v38, %s8179_s20  ;;  %v9635_v14 = vsel %vm2528_vm13, %v2512_v28, %v2544_v4  ;;  %vm2530_vm13 = vcmp.ge.f32.partialorder %v2514_v30, 0.0  ;;  %v1943_v11 = vadd.f32 %v9508_v0, %v1688_v27  ;;  %v13172_v28 = vld [vmem:[#allocation19_spill] sm:$0xff]  ;;  %v2516_v0 = vadd.f32 %v9540_v62, %v2452_v3  ;;  %v2431_v12 = vpop.f32.mrf.mxu0  ;;  %v13182_v27 = vld [vmem:[#allocation32_spill] sm:$0xff] }
 0x26d   : > { %v9643_v47 = vsel %vm2529_vm14, %v2513_v42, %v2545_v32  ;;  %v2451_v55 = vadd.f32 %v2421_v54, %v2196_v18  ;;  %v1018_v15 = vadd.f32 %v13172_v28, %v758_v10  ;;  %v2454_v29 = vadd.f32 %v2431_v12, %v2199_v49 }
 0x26e   : > { %2612 = vrot.lane.b32.xlu1 %v9581_v9, %s8179_s20  ;;  %v2198_v50 = vadd.f32 %v2172_v24, %v1943_v11  ;;  %v2548_v31 = vmul.f32 0.2, %v2516_v0  ;;  %v2433_v18 = vpop.f32.mrf.mxu0 }
 0x26f   : > { %v2515_v6 = vadd.f32 %v9527_v2, %v2451_v55  ;;  %v9665_v2 = vsel %vm2530_vm13, %v2514_v30, %v2546_v61  ;;  %v1273_v42 = vadd.f32 %v13173_v23, %v1018_v15  ;;  %vm2532_vm13 = vcmp.ge.f32.partialorder %v2516_v0, 0.0  ;;  %v13181_v61 = vld [vmem:[#allocation29_spill] sm:$0xff] }
 0x270   : > { %3112 = vrot.lane.b32.xlu0 %v9574_v38, %s8180_s21  ;;  %v2453_v56 = vadd.f32 %v2427_v51, %v2198_v50  ;;  %v1275_v30 = vadd.f32 %v13180_v16, %v1020_v63  ;;  %v2437_v35 = vpop.f32.mrf.mxu0 }
 0x271   : > { %v2547_v60 = vmul.f32 0.2, %v2515_v6  ;;  %vm2531_vm14 = vcmp.ge.f32.partialorder %v2515_v6, 0.0  ;;  %v1435_v32 = vadd.f32 %v13174_v45, %v1273_v42 }
 0x272   : > { %3088 = vrot.lane.b32.xlu1 %v9581_v9, %s8180_s21  ;;  %v2517_v4 = vadd.f32 %v9540_v62, %v2453_v56  ;;  %v9695_v62 = vsel %vm2532_vm13, %v2516_v0, %v2548_v31  ;;  %v1437_v7 = vadd.f32 %v13181_v61, %v1275_v30  ;;  %v2439_v58 = vpop.f32.mrf.mxu0 }
 0x273   : > { %v9673_v21 = vsel %vm2531_vm14, %v2515_v6, %v2547_v60  ;;  %v1690_v17 = vadd.f32 %v9502_v52, %v1435_v32  ;;  %13175 = vst [vmem:[#allocation23_spill] sm:$0xff] %v9695_v62  ;;  %v2182_v6 = vpop.f32.mrf.mxu1 }
 0x274   : > { %3362 = vrot.lane.b32.xlu0 %v9574_v38, %s8181_s22  ;;  %13171 = vst [vmem:[#allocation22_spill] sm:$0xff] %v9673_v21  ;;  %v2549_v1 = vmul.f32 0.2, %v2517_v4  ;;  %vm2533_vm14 = vcmp.ge.f32.partialorder %v2517_v4, 0.0  ;;  %v1692_v60 = vadd.f32 %v9525_v53, %v1437_v7  ;;  %v2201_v24 = vadd.f32 %v2182_v6, %v13182_v27 }
 0x275   : > { %v1945_v25 = vadd.f32 %v9512_v37, %v1690_v17  ;;  %v2518_v37 = vadd.f32 %v9531_v33, %v2454_v29  ;;  %v2184_v13 = vpop.f32.mrf.mxu1 }
 0x276   : > { %3338 = vrot.lane.b32.xlu1 %v9581_v9, %s8181_s22  ;;  %v9703_v54 = vsel %vm2533_vm14, %v2517_v4, %v2549_v1  ;;  %v1947_v48 = vadd.f32 %v9538_v43, %v1692_v60  ;;  %v2456_v11 = vadd.f32 %v2437_v35, %v2201_v24 }
 0x277   : > { %13178 = vst [vmem:[#allocation30_spill] sm:$0xff] %v9703_v54  ;;  %v2200_v52 = vadd.f32 %v2178_v46, %v1945_v25  ;;  %v2550_v57 = vmul.f32 0.2, %v2518_v37  ;;  %vm2534_vm13 = vcmp.ge.f32.partialorder %v2518_v37, 0.0 }
 0x278   : > { %2743 = vrot.lane.b32.xlu0 %v9606_v41, %s8178_s19  ;;  %v2202_v10 = vadd.f32 %v2184_v13, %v1947_v48  ;;  %v2520_v51 = vadd.f32 %v13183_v22, %v2456_v11 }
 0x279   : > { %v2455_v55 = vadd.f32 %v2433_v18, %v2200_v52 }
 0x27a   : > { %2719 = vrot.lane.b32.xlu1 %v9613_v5, %s8178_s19  ;;  %v2457_v53 = vadd.f32 %v2439_v58, %v2202_v10  ;;  %v2552_v50 = vmul.f32 0.2, %v2520_v51 }
 0x27b   : > { %v2519_v59 = vadd.f32 %v9531_v33, %v2455_v55  ;;  %v9725_v33 = vsel %vm2534_vm13, %v2518_v37, %v2550_v57  ;;  %vm2536_vm13 = vcmp.ge.f32.partialorder %v2520_v51, 0.0 }
 0x27c   : > { %2646 = vrot.lane.b32.xlu0 %v9606_v41, %s8179_s20  ;;  %v2521_v43 = vadd.f32 %v13183_v22, %v2457_v53  ;;  %v9749_v28 = vsel %vm2536_vm13, %v2520_v51, %v2552_v50  ;;  %vm13207_vm13 = vcmask 7168  }
 0x27d   : > { %v2551_v20 = vmul.f32 0.2, %v2519_v59  ;;  %vm2535_vm14 = vcmp.ge.f32.partialorder %v2519_v59, 0.0 }
 0x27e   : > { %2614 = vrot.lane.b32.xlu1 %v9613_v5, %s8179_s20  ;;  %v2553_v3 = vmul.f32 0.2, %v2521_v43 }
 0x27f   : > { %v9731_v39 = vsel %vm2535_vm14, %v2519_v59, %v2551_v20  ;;  %vm2537_vm14 = vcmp.ge.f32.partialorder %v2521_v43, 0.0 }
 0x280   : > { %3114 = vrot.lane.b32.xlu0 %v9606_v41, %s8180_s21  ;;  %v9753_v15 = vsel %vm2537_vm14, %v2521_v43, %v2553_v3  ;;  %vm13208_vm14 = vmmov %vm13207_vm13 }
 0x282   : > { %3090 = vrot.lane.b32.xlu1 %v9613_v5, %s8180_s21 }
 0x284   : > { %3364 = vrot.lane.b32.xlu0 %v9606_v41, %s8181_s22 }
 0x286   : > { %3340 = vrot.lane.b32.xlu1 %v9613_v5, %s8181_s22 }
 0x288   : > { %2745 = vrot.lane.b32.xlu0 %v9635_v14, %s8178_s19 }
 0x28a   : > { %2721 = vrot.lane.b32.xlu1 %v9643_v47, %s8178_s19 }
 0x28c   : > { %2648 = vrot.lane.b32.xlu0 %v9635_v14, %s8179_s20 }
 0x28e   : > { %2616 = vrot.lane.b32.xlu1 %v9643_v47, %s8179_s20 }
 0x290   : > { %3116 = vrot.lane.b32.xlu0 %v9635_v14, %s8180_s21 }
 0x292   : > { %3092 = vrot.lane.b32.xlu1 %v9643_v47, %s8180_s21 }
 0x294   : > { %3366 = vrot.lane.b32.xlu0 %v9635_v14, %s8181_s22 }
 0x296   : > { %3342 = vrot.lane.b32.xlu1 %v9643_v47, %s8181_s22 }
 0x298   : > { %2747 = vrot.lane.b32.xlu0 %v9665_v2, %s8178_s19 }
 0x29a   : > { %2723 = vrot.lane.b32.xlu1 %v9673_v21, %s8178_s19 }
 0x29c   : > { %2650 = vrot.lane.b32.xlu0 %v9665_v2, %s8179_s20 }
 0x29e   : > { %2618 = vrot.lane.b32.xlu1 %v9673_v21, %s8179_s20 }
 0x2a0   : > { %3118 = vrot.lane.b32.xlu0 %v9665_v2, %s8180_s21 }
 0x2a2   : > { %3094 = vrot.lane.b32.xlu1 %v9673_v21, %s8180_s21 }
 0x2a4   : > { %3368 = vrot.lane.b32.xlu0 %v9665_v2, %s8181_s22 }
 0x2a6   : > { %3344 = vrot.lane.b32.xlu1 %v9673_v21, %s8181_s22 }
 0x2a8   : > { %2749 = vrot.lane.b32.xlu0 %v9695_v62, %s8178_s19 }
 0x2aa   : > { %2725 = vrot.lane.b32.xlu1 %v9703_v54, %s8178_s19 }
 0x2ac   : > { %2652 = vrot.lane.b32.xlu0 %v9695_v62, %s8179_s20 }
 0x2ae   : > { %2620 = vrot.lane.b32.xlu1 %v9703_v54, %s8179_s20 }
 0x2b0   : > { %3120 = vrot.lane.b32.xlu0 %v9695_v62, %s8180_s21 }
 0x2b2   : > { %3096 = vrot.lane.b32.xlu1 %v9703_v54, %s8180_s21 }
 0x2b4   : > { %3370 = vrot.lane.b32.xlu0 %v9695_v62, %s8181_s22 }
 0x2b6   : > { %3346 = vrot.lane.b32.xlu1 %v9703_v54, %s8181_s22 }
 0x2b8   : > { %2751 = vrot.lane.b32.xlu0 %v9725_v33, %s8178_s19 }
 0x2ba   : > { %2727 = vrot.lane.b32.xlu1 %v9731_v39, %s8178_s19 }
 0x2bc   : > { %2654 = vrot.lane.b32.xlu0 %v9725_v33, %s8179_s20 }
 0x2be   : > { %2622 = vrot.lane.b32.xlu1 %v9731_v39, %s8179_s20 }
 0x2c0   : > { %3122 = vrot.lane.b32.xlu0 %v9725_v33, %s8180_s21 }
 0x2c2   : > { %3098 = vrot.lane.b32.xlu1 %v9731_v39, %s8180_s21 }
 0x2c4   : > { %3372 = vrot.lane.b32.xlu0 %v9725_v33, %s8181_s22 }
 0x2c6   : > { %3348 = vrot.lane.b32.xlu1 %v9731_v39, %s8181_s22 }
 0x2c8   : > { %2753 = vrot.lane.b32.xlu0 %v9749_v28, %s8178_s19 }
 0x2ca   : > { %2729 = vrot.lane.b32.xlu1 %v9753_v15, %s8178_s19 }
 0x2cc   : > { %2656 = vrot.lane.b32.xlu0 %v9749_v28, %s8179_s20 }
 0x2ce   : > { %v9759_v56 = vpop.permute.xlu0 %2739  ;;  %3336 = vrot.lane.b32.xlu1 %v9556_v26, %s8181_s22 }
 0x2d0   : > { %3124 = vrot.lane.b32.xlu0 %v9749_v28, %s8180_s21  ;;  %v9765_v0 = vpop.permute.xlu1 %2715 }
 0x2d2   : > { %v9767_v23 = vpop.permute.xlu0 %2642  ;;  %3776 = vrot.lane.b32.xlu1 %v9749_v28, %s8182_s23 }
 0x2d4   : > { %3374 = vrot.lane.b32.xlu0 %v9749_v28, %s8181_s22  ;;  %v9773_v42 = vpop.permute.xlu1 %2610 }
 0x2d6   : > { %v9775_v4 = vpop.permute.xlu0 %3110  ;;  %3772 = vrot.lane.b32.xlu1 %v9725_v33, %s8182_s23 }
 0x2d8   : > { %3360 = vrot.lane.b32.xlu0 %v9551_v19, %s8181_s22  ;;  %v9781_v31 = vpop.permute.xlu1 %3086 }
 0x2da   : > { %4026 = vrot.lane.b32.xlu1 %v9749_v28, %s8183_s24  ;;  %v9785_v44 = vpop.permute.xlu0 %2741 }
 0x2dc   : > { %3774 = vrot.lane.b32.xlu0 %v9731_v39, %s8182_s23  ;;  %v9789_v45 = vpop.permute.xlu1 %2717 }
 0x2de   : > { %3768 = vrot.lane.b32.xlu1 %v9695_v62, %s8182_s23  ;;  %v9793_v32 = vpop.permute.xlu0 %2644 }
 0x2e0   : > { %3770 = vrot.lane.b32.xlu0 %v9703_v54, %s8182_s23  ;;  %v9797_v1 = vpop.permute.xlu1 %2612 }
 0x2e2   : > { %4022 = vrot.lane.b32.xlu1 %v9725_v33, %s8183_s24  ;;  %v9801_v12 = vpop.permute.xlu0 %3112 }
 0x2e4   : > { %4024 = vrot.lane.b32.xlu0 %v9731_v39, %s8183_s24  ;;  %v9805_v17 = vpop.permute.xlu1 %3088 }
 0x2e6   : > { %2624 = vrot.lane.b32.xlu1 %v9753_v15, %s8179_s20  ;;  %v9809_v46 = vpop.permute.xlu0 %3362 }
 0x2e7   : > { %13184 = vst [vmem:[#allocation13_spill] sm:$0xff] %v9809_v46 }
 0x2e8   : > { %3766 = vrot.lane.b32.xlu0 %v9673_v21, %s8182_s23  ;;  %v9813_v8 = vpop.permute.xlu1 %3338 }
 0x2e9   : > { %13185 = vst [vmem:[#allocation16_spill] sm:$0xff] %v9813_v8 }
 0x2ea   : > { %3100 = vrot.lane.b32.xlu1 %v9753_v15, %s8180_s21  ;;  %v9817_v40 = vpop.permute.xlu0 %2743 }
 0x2ec   : > { %4020 = vrot.lane.b32.xlu0 %v9703_v54, %s8183_s24  ;;  %v9821_v34 = vpop.permute.xlu1 %2719 }
 0x2ee   : > { %3764 = vrot.lane.b32.xlu1 %v9665_v2, %s8182_s23  ;;  %v9825_v25 = vpop.permute.xlu0 %2646 }
 0x2f0   : > { %3762 = vrot.lane.b32.xlu0 %v9643_v47, %s8182_s23  ;;  %v9829_v49 = vpop.permute.xlu1 %2614 }
 0x2f2   : > { %4018 = vrot.lane.b32.xlu1 %v9695_v62, %s8183_s24  ;;  %v9833_v18 = vpop.permute.xlu0 %3114 }
 0x2f4   : > { %4016 = vrot.lane.b32.xlu0 %v9673_v21, %s8183_s24  ;;  %v9837_v52 = vpop.permute.xlu1 %3090 }
 0x2f6   : > { %3760 = vrot.lane.b32.xlu1 %v9635_v14, %s8182_s23  ;;  %v9841_v29 = vpop.permute.xlu0 %3364 }
 0x2f7   : > { %13186 = vst [vmem:[#allocation17_spill] sm:$0xff] %v9841_v29 }
 0x2f8   : > { %3758 = vrot.lane.b32.xlu0 %v9613_v5, %s8182_s23  ;;  %v9845_v36 = vpop.permute.xlu1 %3340 }
 0x2f9   : > { %13187 = vst [vmem:[#allocation24_spill] sm:$0xff] %v9845_v36 }
 0x2fa   : > { %4014 = vrot.lane.b32.xlu1 %v9665_v2, %s8183_s24  ;;  %v9849_v63 = vpop.permute.xlu0 %2745 }
 0x2fc   : > { %4012 = vrot.lane.b32.xlu0 %v9643_v47, %s8183_s24  ;;  %v9853_v55 = vpop.permute.xlu1 %2721 }
 0x2fe   : > { %3756 = vrot.lane.b32.xlu1 %v9606_v41, %s8182_s23  ;;  %v9857_v37 = vpop.permute.xlu0 %2648 }
 0x300   : > { %3754 = vrot.lane.b32.xlu0 %v9581_v9, %s8182_s23  ;;  %v9861_v16 = vpop.permute.xlu1 %2616 }
 0x302   : > { %4010 = vrot.lane.b32.xlu1 %v9635_v14, %s8183_s24  ;;  %v9865_v30 = vpop.permute.xlu0 %3116 }
 0x304   : > { %4008 = vrot.lane.b32.xlu0 %v9613_v5, %s8183_s24  ;;  %v9869_v59 = vpop.permute.xlu1 %3092 }
 0x306   : > { %3752 = vrot.lane.b32.xlu1 %v9574_v38, %s8182_s23  ;;  %v9873_v57 = vpop.permute.xlu0 %3366 }
 0x307   : > { %13188 = vst [vmem:[#allocation25_spill] sm:$0xff] %v9873_v57 }
 0x308   : > { %3750 = vrot.lane.b32.xlu0 %v9556_v26, %s8182_s23  ;;  %v9877_v6 = vpop.permute.xlu1 %3342 }
 0x309   : > { %13189 = vst [vmem:[#allocation31_spill] sm:$0xff] %v9877_v6 }
 0x30a   : > { %3350 = vrot.lane.b32.xlu1 %v9753_v15, %s8181_s22  ;;  %v9881_v61 = vpop.permute.xlu0 %2747 }
 0x30c   : > { %4004 = vrot.lane.b32.xlu0 %v9581_v9, %s8183_s24  ;;  %v9885_v7 = vpop.permute.xlu1 %2723 }
 0x30e   : > { %4006 = vrot.lane.b32.xlu1 %v9606_v41, %s8183_s24  ;;  %v9889_v20 = vpop.permute.xlu0 %2650 }
 0x310   : > { %4000 = vrot.lane.b32.xlu0 %v9556_v26, %s8183_s24  ;;  %v9893_v35 = vpop.permute.xlu1 %2618 }
 0x312   : > { %3748 = vrot.lane.b32.xlu1 %v9551_v19, %s8182_s23  ;;  %v9897_v60 = vpop.permute.xlu0 %3118 }
 0x314   : > { %4274 = vrot.lane.b32.xlu0 %v9731_v39, %s8184_s17  ;;  %v9901_v13 = vpop.permute.xlu1 %3094 }
 0x316   : > { %4002 = vrot.lane.b32.xlu1 %v9574_v38, %s8183_s24  ;;  %v9905_v48 = vpop.permute.xlu0 %3368 }
 0x317   : > { %13190 = vst [vmem:[#allocation14_spill] sm:$0xff] %v9905_v48 }
 0x318   : > { %4270 = vrot.lane.b32.xlu0 %v9703_v54, %s8184_s17  ;;  %v9909_v27 = vpop.permute.xlu1 %3344 }
 0x319   : > { %13191 = vst [vmem:[#allocation18_spill] sm:$0xff] %v9909_v27 }
 0x31a   : > { %3998 = vrot.lane.b32.xlu1 %v9551_v19, %s8183_s24  ;;  %v2750_v24 = vpop.permute.xlu0 %2749 }
 0x31c   : > { %4524 = vrot.lane.b32.xlu0 %v9731_v39, %s8185_s27  ;;  %v2726_v58 = vpop.permute.xlu1 %2725 }
 0x31e   : > { %4276 = vrot.lane.b32.xlu1 %v9749_v28, %s8184_s17  ;;  %v9917_v10 = vpop.permute.xlu0 %2652 }
 0x320   : > { %4266 = vrot.lane.b32.xlu0 %v9673_v21, %s8184_s17  ;;  %v9921_v11 = vpop.permute.xlu1 %2620 }
 0x322   : > { %v9923_v53 = vpop.permute.xlu0 %3120  ;;  %4272 = vrot.lane.b32.xlu1 %v9725_v33, %s8184_s17 }
 0x324   : > { %3778 = vrot.lane.b32.xlu0 %v9753_v15, %s8182_s23  ;;  %v9929_v22 = vpop.permute.xlu1 %3096 }
 0x326   : > { %v9931_v51 = vpop.permute.xlu0 %3370  ;;  %4526 = vrot.lane.b32.xlu1 %v9749_v28, %s8185_s27 }
 0x327   : > { %13192 = vst [vmem:[#allocation19_spill] sm:$0xff] %v9931_v51 }
 0x328   : > { %4028 = vrot.lane.b32.xlu0 %v9753_v15, %s8183_s24  ;;  %v9937_v43 = vpop.permute.xlu1 %3346 }
 0x329   : > { %13193 = vst [vmem:[#allocation26_spill] sm:$0xff] %v9937_v43 }
 0x32a   : > { %v2752_v50 = vpop.permute.xlu0 %2751  ;;  %4268 = vrot.lane.b32.xlu1 %v9695_v62, %s8184_s17 }
 0x32c   : > { %4520 = vrot.lane.b32.xlu0 %v9703_v54, %s8185_s27  ;;  %v2728_v3 = vpop.permute.xlu1 %2727 }
 0x32e   : > { %v9943_v46 = vpop.permute.xlu0 %2654  ;;  %4522 = vrot.lane.b32.xlu1 %v9725_v33, %s8185_s27 }
 0x330   : > { %4262 = vrot.lane.b32.xlu0 %v9643_v47, %s8184_s17  ;;  %v9949_v8 = vpop.permute.xlu1 %2622 }
 0x332   : > { %v9951_v29 = vpop.permute.xlu0 %3122  ;;  %4264 = vrot.lane.b32.xlu1 %v9665_v2, %s8184_s17 }
 0x334   : > { %4516 = vrot.lane.b32.xlu0 %v9673_v21, %s8185_s27  ;;  %v9957_v36 = vpop.permute.xlu1 %3098 }
 0x336   : > { %v9959_v57 = vpop.permute.xlu0 %3372  ;;  %4518 = vrot.lane.b32.xlu1 %v9695_v62, %s8185_s27  ;;  %v2785_v62 = vsel %vm429_vm0, %v2728_v3, %v2752_v50 }
 0x337   : > { %13194 = vst [vmem:[#allocation27_spill] sm:$0xff] %v9959_v57 }
 0x338   : > { %4278 = vrot.lane.b32.xlu0 %v9753_v15, %s8184_s17  ;;  %v9965_v6 = vpop.permute.xlu1 %3348 }
 0x339   : > { %13195 = vst [vmem:[#allocation15_spill] sm:$0xff] %v9965_v6  ;;  %v2761_v6 = vsel %vm429_vm0, %v2752_v50, %v2728_v3  ;;  %v2780_v3 = vsel %vm429_vm0, %v9789_v45, %v9785_v44 }
 0x33a   : > { %v2754_v48 = vpop.permute.xlu0 %2753  ;;  %4260 = vrot.lane.b32.xlu1 %v9635_v14, %s8184_s17 }
 0x33c   : > { %4528 = vrot.lane.b32.xlu0 %v9753_v15, %s8185_s27  ;;  %v2730_v27 = vpop.permute.xlu1 %2729 }
 0x33d   : > { %v2786_v51 = vsel %vm429_vm0, %v2730_v27, %v2754_v48  ;;  %v2762_v43 = vsel %vm429_vm0, %v2754_v48, %v2730_v27  ;;  %v2760_v48 = vsel %vm429_vm0, %v2750_v24, %v2726_v58  ;;  %v2784_v27 = vsel %vm429_vm0, %v2726_v58, %v2750_v24 }
 0x33e   : > { %v9973_v57 = vpop.permute.xlu0 %2656  ;;  %4514 = vrot.lane.b32.xlu1 %v9665_v2, %s8185_s27  ;;  %2852 = vmatprep.subr.mxu1 %v2762_v43  ;;  %v2758_v58 = vsel %vm429_vm0, %v9849_v63, %v9853_v55 }
 0x33f   : > { %7617 = vmatpush1.msk.msra.mxu1 %vm13089_vm1, %v2786_v51  ;;  %v2782_v51 = vsel %vm429_vm0, %v9853_v55, %v9849_v63  ;;  %v2756_v55 = vsel %vm429_vm0, %v9785_v44, %v9789_v45  ;;  %v2779_v44 = vsel %vm429_vm0, %v9765_v0, %v9759_v56 }
 0x340   : > { %4258 = vrot.lane.b32.xlu0 %v9613_v5, %s8184_s17  ;;  %2854 = vmatprep.subr.mxu1 %v2761_v6  ;;  %v9983_v54 = vpop.permute.xlu1 %3336  ;;  %v2759_v6 = vsel %vm429_vm0, %v9881_v61, %v9885_v7 }
 0x341   : > { %7618 = vmatpush1.msk.msra.mxu1 %vm13089_vm1, %v2785_v62  ;;  %v2783_v62 = vsel %vm429_vm0, %v9885_v7, %v9881_v61  ;;  %v2757_v61 = vsel %vm429_vm0, %v9817_v40, %v9821_v34  ;;  %v2781_v7 = vsel %vm429_vm0, %v9821_v34, %v9817_v40  ;;  %v2755_v40 = vsel %vm429_vm0, %v9759_v56, %v9765_v0  ;;  %v7609_v34 = vld [vmem:[%s13039_s1 + $0x280] sm:$0xff]  ;;  %v7610_v56 = vld [vmem:[%s13039_s1 + $0x288] sm:$0xff] }
 0x342   : > { %v9989_v43 = vpop.permute.xlu0 %3124  ;;  %4256 = vrot.lane.b32.xlu1 %v9606_v41, %s8184_s17  ;;  %2856 = vmatprep.subr.mxu1 %v2760_v48 }
 0x343   : > { %7619 = vmatpush1.msk.msra.mxu1 %vm13089_vm1, %v2784_v27 }
 0x344   : > { %4512 = vrot.lane.b32.xlu0 %v9643_v47, %s8185_s27  ;;  %2858 = vmatprep.subr.mxu1 %v2759_v6  ;;  %v10003_v24 = vpop.permute.xlu1 %3776  ;;  %v13197_v6 = vmov 0.0  }
 0x345   : > { %7620 = vmatpush1.msk.msra.mxu1 %vm13089_vm1, %v2783_v62 }
 0x346   : > { %v10013_v50 = vpop.permute.xlu0 %3374  ;;  %4510 = vrot.lane.b32.xlu1 %v9635_v14, %s8185_s27  ;;  %2860 = vmatprep.subr.mxu1 %v2758_v58  ;;  %v7611_v58 = vld [vmem:[%s13039_s1 + $0x290] sm:$0xff] }
 0x347   : > { %7621 = vmatpush1.msk.msra.mxu1 %vm13089_vm1, %v2782_v51 }
 0x348   : > { %4254 = vrot.lane.b32.xlu0 %v9581_v9, %s8184_s17  ;;  %2862 = vmatprep.subr.mxu1 %v2757_v61  ;;  %v10027_v63 = vpop.permute.xlu1 %3772 }
 0x349   : > { %7622 = vmatpush1.msk.msra.mxu1 %vm13089_vm1, %v2781_v7  ;;  %v7612_v7 = vld [vmem:[%s13039_s1 + $0x298] sm:$0xff] }
 0x34a   : > { %v10037_v48 = vpop.permute.xlu0 %3360  ;;  %4252 = vrot.lane.b32.xlu1 %v9574_v38, %s8184_s17  ;;  %2864 = vmatprep.subr.mxu1 %v2756_v55 }
 0x34b   : > { %7623 = vmatpush1.msk.msra.mxu1 %vm13089_vm1, %v2780_v3 }
 0x34c   : > { %4508 = vrot.lane.b32.xlu0 %v9613_v5, %s8185_s27  ;;  %2866 = vmatprep.subr.mxu1 %v2755_v40  ;;  %v10054_v45 = vpop.permute.xlu1 %4026 }
 0x34d   : > { %7624 = vmatpush1.msk.msra.mxu1 %vm13089_vm1, %v2779_v44 }
 0x34e   : > { %v10058_v27 = vpop.permute.xlu0 %3774  ;;  %4506 = vrot.lane.b32.xlu1 %v9606_v41, %s8185_s27  ;;  %7625 = vmatmul.mubr.msk.f32.vlgmr.msra.gmra.mxu1 %vm491_vm4, %v7609_v34  ;;  %v7863_v34 = vld [vmem:[%s13040_s2 + $0x70] sm:$0xff] }
 0x34f   : > { %2906 = vmatprep.mubr.f32.mxu1 %v13197_v6 }
 0x350   : > { %4250 = vrot.lane.b32.xlu0 %v9556_v26, %s8184_s17  ;;  %v10069_v0 = vpop.permute.xlu1 %3768 }
 0x352   : > { %v10071_v62 = vpop.permute.xlu0 %3770  ;;  %4248 = vrot.lane.b32.xlu1 %v9551_v19, %s8184_s17  ;;  %7626 = vmatmul.mubr.msk.f32.gmra.mxu1 %vm491_vm4, %v7610_v56 }
 0x353   : > { %2912 = vmatprep.mubr.f32.mxu1 %v13197_v6 }
 0x354   : > { %4504 = vrot.lane.b32.xlu0 %v9581_v9, %s8185_s27  ;;  %v10082_v51 = vpop.permute.xlu1 %4022 }
 0x355   : > { %13198 = vst [vmem:[#allocation20_spill] sm:$0xff] %v10082_v51  ;;  %v2663_v51 = vsel %vm13088_vm3, %v9917_v10, %v9921_v11 }
 0x356   : > { %v10084_v61 = vpop.permute.xlu0 %4024  ;;  %4502 = vrot.lane.b32.xlu1 %v9574_v38, %s8185_s27  ;;  %7627 = vmatmul.mubr.msk.f32.gmra.mxu1 %vm491_vm4, %v7611_v58 }
 0x357   : > { %13199 = vst [vmem:[#allocation21_spill] sm:$0xff] %v10084_v61  ;;  %2918 = vmatprep.mubr.f32.mxu1 %v13197_v6 }
 0x358   : > { %4500 = vrot.lane.b32.xlu0 %v9556_v26, %s8185_s27  ;;  %v2625_v55 = vpop.permute.xlu1 %2624 }
 0x359   : > { %v2689_v3 = vsel %vm13088_vm3, %v2625_v55, %v9973_v57  ;;  %v2665_v40 = vsel %vm13088_vm3, %v9973_v57, %v2625_v55  ;;  %v7864_v57 = vld [vmem:[%s13040_s2 + $0x78] sm:$0xff]  ;;  %v2664_v55 = vsel %vm13088_vm3, %v9943_v46, %v9949_v8 }
 0x35a   : > { %v10102_v44 = vpop.permute.xlu0 %3766  ;;  %4498 = vrot.lane.b32.xlu1 %v9551_v19, %s8185_s27  ;;  %7628 = vmatmul.mubr.msk.f32.gmra.mxu1 %vm491_vm4, %v7612_v7  ;;  %v7613_v7 = vld [vmem:[%s13039_s1 + $0x2a0] sm:$0xff] }
 0x35b   : > { %7633 = vmatprep.subr.msk.mxu0 %vm8495_vm5, %v2665_v40  ;;  %2924 = vmatprep.mubr.f32.mxu1 %v13197_v6  ;;  %v2688_v40 = vsel %vm13088_vm3, %v9949_v8, %v9943_v46  ;;  %v7861_v46 = vld [vmem:[%s13040_s2 + $0x60] sm:$0xff]  ;;  %v2687_v8 = vsel %vm13088_vm3, %v9921_v11, %v9917_v10  ;;  %v2662_v10 = vsel %vm13088_vm3, %v9889_v20, %v9893_v35 }
 0x35c   : > { %7634 = vmatpush1.msk.msra.mxu0 %vm8511_vm6, %v2689_v3  ;;  %4789 = vperm.xlu0 %8167, %v7863_v34   ;;  %v3101_v21 = vpop.permute.xlu1 %3100  ;;  %v3132_v11 = vsel %vm806_vm8, %v9951_v29, %v9957_v36 }
 0x35d   : > { %7635 = vmatprep.subr.msk.mxu0 %vm8495_vm5, %v2664_v55  ;;  %v3133_v3 = vsel %vm806_vm8, %v9989_v43, %v3101_v21  ;;  %v3157_v34 = vsel %vm806_vm8, %v3101_v21, %v9989_v43  ;;  %v2686_v55 = vsel %vm13088_vm3, %v9893_v35, %v9889_v20  ;;  %v2661_v20 = vsel %vm13088_vm3, %v9857_v37, %v9861_v16  ;;  %v7859_v35 = vld [vmem:[%s13040_s2 + $0x50] sm:$0xff] }
 0x35e   : > { %7636 = vmatpush1.msk.msra.mxu0 %vm8511_vm6, %v2688_v40  ;;  %v10132_v61 = vpop.permute.xlu0 %4020  ;;  %4794 = vperm.xlu1 %8168, %v7864_v57   ;;  %v7614_v40 = vld [vmem:[%s13039_s1 + $0x2a8] sm:$0xff] }
 0x35f   : > { %7629 = vmatmul.mubr.msk.f32.gmra.mxu1 %vm491_vm4, %v7613_v7  ;;  %7637 = vmatprep.subr.msk.mxu0 %vm8495_vm5, %v2663_v51  ;;  %v7862_v51 = vld [vmem:[%s13040_s2 + $0x68] sm:$0xff] }
 0x360   : > { %7665 = vmatprep.subr.msk.mxu1 %vm8552_vm9, %v3133_v3  ;;  %7638 = vmatpush1.msk.msra.mxu0 %vm8511_vm6, %v2687_v8  ;;  %v10150_v43 = vpop.permute.xlu1 %3764  ;;  %v3156_v3 = vsel %vm806_vm8, %v9957_v36, %v9951_v29  ;;  %v2685_v29 = vsel %vm13088_vm3, %v9861_v16, %v9857_v37  ;;  %v3131_v36 = vsel %vm806_vm8, %v9923_v53, %v9929_v22 }
 0x361   : > { %7666 = vmatpush1.msk.msra.mxu1 %vm8567_vm10, %v3157_v34  ;;  %4779 = vperm.xlu0 %8167, %v7861_v46   ;;  %v3155_v46 = vsel %vm806_vm8, %v9929_v22, %v9923_v53  ;;  %v2660_v16 = vsel %vm13088_vm3, %v9825_v25, %v9829_v49  ;;  %v3130_v53 = vsel %vm806_vm8, %v9897_v60, %v9901_v13  ;;  %v7860_v22 = vld [vmem:[%s13040_s2 + $0x58] sm:$0xff] }
 0x362   : > { %7639 = vmatprep.subr.msk.mxu0 %vm8495_vm5, %v2662_v10  ;;  %7667 = vmatprep.subr.msk.mxu1 %vm8552_vm9, %v3132_v11  ;;  %v10170_v7 = vpop.permute.xlu0 %3762  ;;  %v2684_v8 = vsel %vm13088_vm3, %v9829_v49, %v9825_v25  ;;  %v7615_v10 = vld [vmem:[%s13039_s1 + $0x2b0] sm:$0xff]  ;;  %v2659_v25 = vsel %vm13088_vm3, %v9793_v32, %v9797_v1  ;;  %v7857_v49 = vld [vmem:[%s13040_s2 + $0x40] sm:$0xff] }
 0x363   : > { %2930 = vmatprep.mubr.f32.mxu1 %v13197_v6  ;;  %7640 = vmatpush1.msk.msra.mxu0 %vm8511_vm6, %v2686_v55 }
 0x364   : > { %7668 = vmatpush1.msk.msra.mxu1 %vm8567_vm10, %v3156_v3  ;;  %4784 = vperm.xlu1 %8168, %v7862_v51   ;;  %v10189_v34 = vpop.permute.xlu1 %4018  ;;  %v3154_v51 = vsel %vm806_vm8, %v9901_v13, %v9897_v60  ;;  %v2683_v60 = vsel %vm13088_vm3, %v9797_v1, %v9793_v32  ;;  %v3129_v13 = vsel %vm806_vm8, %v9865_v30, %v9869_v59 }
 0x365   : > { %7630 = vmatmul.mubr.msk.f32.gmra.mxu1 %vm491_vm4, %v7614_v40  ;;  %7641 = vmatprep.subr.msk.mxu0 %vm8495_vm5, %v2661_v20  ;;  %v3153_v40 = vsel %vm806_vm8, %v9869_v59, %v9865_v30  ;;  %v2658_v1 = vsel %vm13088_vm3, %v9767_v23, %v9773_v42  ;;  %v3128_v30 = vsel %vm806_vm8, %v9833_v18, %v9837_v52  ;;  %v7858_v59 = vld [vmem:[%s13040_s2 + $0x48] sm:$0xff]  ;;  %v7616_v20 = vld [vmem:[%s13039_s1 + $0x2b8] sm:$0xff] }
 0x366   : > { %7669 = vmatprep.subr.msk.mxu1 %vm8552_vm9, %v3131_v36  ;;  %7642 = vmatpush1.msk.msra.mxu0 %vm8511_vm6, %v2685_v29  ;;  %v10207_v37 = vpop.permute.xlu0 %4016  ;;  %v2682_v3 = vsel %vm13088_vm3, %v9773_v42, %v9767_v23  ;;  %v3152_v23 = vsel %vm806_vm8, %v9837_v52, %v9833_v18  ;;  %v3127_v36 = vsel %vm806_vm8, %v9801_v12, %v9805_v17  ;;  %v7602_v52 = vld [vmem:[%s13039_s1 + $0x248] sm:$0xff]  ;;  %vm13221_vm3 = vmmov %vm13207_vm13 }
 0x367   : > { %7670 = vmatpush1.msk.msra.mxu1 %vm8567_vm10, %v3155_v46  ;;  %4769 = vperm.xlu0 %8167, %v7859_v35   ;;  %v7601_v35 = vld [vmem:[%s13039_s1 + $0x240] sm:$0xff]  ;;  %v3151_v18 = vsel %vm806_vm8, %v9805_v17, %v9801_v12  ;;  %v3150_v17 = vsel %vm806_vm8, %v9781_v31, %v9775_v4 }
 0x368   : > { %7643 = vmatprep.subr.msk.mxu0 %vm8495_vm5, %v2660_v16  ;;  %7671 = vmatprep.subr.msk.mxu1 %vm8552_vm9, %v3130_v53  ;;  %v10230_v11 = vpop.permute.xlu1 %3760  ;;  %v3126_v16 = vsel %vm806_vm8, %v9775_v4, %v9781_v31  ;;  %v7657_v12 = vld [vmem:[%s13039_s1 + $0x2c0] sm:$0xff]  ;;  %v7658_v4 = vld [vmem:[%s13039_s1 + $0x2c8] sm:$0xff] }
 0x369   : > { %2936 = vmatprep.mubr.f32.mxu1 %v13197_v6  ;;  %7644 = vmatpush1.msk.msra.mxu0 %vm8511_vm6, %v2684_v8 }
 0x36a   : > { %7672 = vmatpush1.msk.msra.mxu1 %vm8567_vm10, %v3154_v51  ;;  %4774 = vperm.xlu1 %8168, %v7860_v22   ;;  %v10246_v55 = vpop.permute.xlu0 %3758  ;;  %v7603_v22 = vld [vmem:[%s13039_s1 + $0x250] sm:$0xff]  ;;  %v13205_v51 = vld [vmem:[#allocation23_spill] sm:$0xff] }
 0x36b   : > { %7631 = vmatmul.mubr.msk.f32.gmra.mxu1 %vm491_vm4, %v7615_v10  ;;  %7645 = vmatprep.subr.msk.mxu0 %vm8495_vm5, %v2659_v25 }
 0x36c   : > { %7673 = vmatprep.subr.msk.mxu1 %vm8552_vm9, %v3129_v13  ;;  %7646 = vmatpush1.msk.msra.mxu0 %vm8511_vm6, %v2683_v60  ;;  %v10264_v32 = vpop.permute.xlu1 %4014 }
 0x36d   : > { %7674 = vmatpush1.msk.msra.mxu1 %vm8567_vm10, %v3153_v40  ;;  %4759 = vperm.xlu0 %8167, %v7857_v49   ;;  %v7605_v49 = vld [vmem:[%s13039_s1 + $0x260] sm:$0xff] }
 0x36e   : > { %7647 = vmatprep.subr.msk.mxu0 %vm8495_vm5, %v2658_v1  ;;  %7675 = vmatprep.subr.msk.mxu1 %vm8552_vm9, %v3128_v30  ;;  %v10290_v29 = vpop.permute.xlu0 %4012 }
 0x36f   : > { %2942 = vmatprep.mubr.f32.mxu1 %v13197_v6  ;;  %7648 = vmatpush1.msk.msra.mxu0 %vm8511_vm6, %v2682_v3 }
 0x370   : > { %7676 = vmatpush1.msk.msra.mxu1 %vm8567_vm10, %v3152_v23  ;;  %4764 = vperm.xlu1 %8168, %v7858_v59   ;;  %v10300_v42 = vpop.permute.xlu1 %3756  ;;  %v7662_v59 = vld [vmem:[%s13039_s1 + $0x2e8] sm:$0xff]  ;;  %v13214_v23 = vld [vmem:[#allocation19_spill] sm:$0xff] }
 0x371   : > { %7632 = vmatmul.mubr.msk.f32.gmra.mxu1 %vm491_vm4, %v7616_v20  ;;  %7649 = vmatmul.mubr.msk.f32.vlgmr.msra.gmra.mxu0 %vm491_vm4, %v7601_v35  ;;  %v13213_v35 = vld [vmem:[#allocation26_spill] sm:$0xff] }
 0x372   : > { %7677 = vmatprep.subr.msk.mxu1 %vm8552_vm9, %v3127_v36  ;;  %3043 = vmatprep.mubr.f32.mxu0 %v13197_v6  ;;  %v10316_v46 = vpop.permute.xlu0 %3754  ;;  %v3381_v36 = vsel %vm13207_vm13, %v13214_v23, %v13213_v35 }
 0x373   : > { %7678 = vmatpush1.msk.msra.mxu1 %vm8567_vm10, %v3151_v18  ;;  %3271 = vmatprep.mubr.f32.mxu1 %v13197_v6 }
 0x374   : > { %7679 = vmatprep.subr.msk.mxu1 %vm8552_vm9, %v3126_v16  ;;  %v10332_v53 = vpop.permute.xlu1 %4010  ;;  %v7663_v16 = vld [vmem:[%s13039_s1 + $0x2f0] sm:$0xff] }
 0x375   : > { %7680 = vmatpush1.msk.msra.mxu1 %vm8567_vm10, %v3150_v17  ;;  %7650 = vmatmul.mubr.msk.f32.gmra.mxu0 %vm491_vm4, %v7602_v52  ;;  %v13217_v17 = vld [vmem:[#allocation14_spill] sm:$0xff] }
 0x376   : > { %7681 = vmatmul.mubr.msk.f32.vlgmr.msra.gmra.mxu1 %vm491_vm4, %v7657_v12  ;;  %3635 = vmatprep.subr.mxu1 %v9753_v15  ;;  %v10342_v8 = vpop.permute.xlu0 %4008  ;;  %v13204_v15 = vld [vmem:[#allocation30_spill] sm:$0xff] }
 0x377   : > { %3636 = vmatpush1.msra.mxu1 %v9749_v28  ;;  %3049 = vmatprep.mubr.f32.mxu0 %v13197_v6  ;;  %v7604_v28 = vld [vmem:[%s13039_s1 + $0x258] sm:$0xff] }
 0x378   : > { %3637 = vmatprep.subr.mxu1 %v9731_v39  ;;  %3277 = vmatprep.mubr.f32.mxu1 %v13197_v6  ;;  %v10351_v31 = vpop.permute.xlu1 %3752  ;;  %v13206_v39 = vld [vmem:[#allocation22_spill] sm:$0xff] }
 0x379   : > { %3638 = vmatpush1.msra.mxu1 %v9725_v33  ;;  %7651 = vmatmul.mubr.msk.f32.gmra.mxu0 %vm491_vm4, %v7603_v22  ;;  %v7659_v33 = vld [vmem:[%s13039_s1 + $0x2d0] sm:$0xff]  ;;  %v13216_v12 = vld [vmem:[#allocation18_spill] sm:$0xff] }
 0x37a   : > { %7682 = vmatmul.mubr.msk.f32.gmra.mxu1 %vm491_vm4, %v7658_v4  ;;  %3639 = vmatprep.subr.mxu1 %v13204_v15  ;;  %v10360_v10 = vpop.permute.xlu0 %3750  ;;  %v3380_v22 = vsel %vm13207_vm13, %v13217_v17, %v13216_v12  ;;  %v7608_v4 = vld [vmem:[%s13039_s1 + $0x278] sm:$0xff] }
 0x37b   : > { %3640 = vmatpush1.msra.mxu1 %v13205_v51  ;;  %3055 = vmatprep.mubr.f32.mxu0 %v13197_v6  ;;  %v13219_v51 = vld [vmem:[#allocation31_spill] sm:$0xff] }
 0x37c   : > { %3641 = vmatprep.subr.mxu1 %v13206_v39  ;;  %3283 = vmatprep.mubr.f32.mxu1 %v13197_v6  ;;  %v3351_v25 = vpop.permute.xlu1 %3350 }
 0x37d   : > { %3642 = vmatpush1.msra.mxu1 %v9665_v2  ;;  %7652 = vmatmul.mubr.msk.f32.gmra.mxu0 %vm491_vm4, %v7604_v28  ;;  %v7660_v2 = vld [vmem:[%s13039_s1 + $0x2d8] sm:$0xff] }
 0x37e   : > { %7683 = vmatmul.mubr.msk.f32.gmra.mxu1 %vm491_vm4, %v7659_v33  ;;  %3643 = vmatprep.subr.mxu1 %v9643_v47  ;;  %v10376_v60 = vpop.permute.xlu0 %4004  ;;  %v13220_v33 = vld [vmem:[#allocation25_spill] sm:$0xff] }
 0x37f   : > { %3644 = vmatpush1.msra.mxu1 %v9635_v14  ;;  %3061 = vmatprep.mubr.f32.mxu0 %v13197_v6  ;;  %v7606_v14 = vld [vmem:[%s13039_s1 + $0x268] sm:$0xff]  ;;  %v3379_v39 = vsel %vm13207_vm13, %v13220_v33, %v13219_v51 }
 0x380   : > { %3645 = vmatprep.subr.mxu1 %v9613_v5  ;;  %3289 = vmatprep.mubr.f32.mxu1 %v13197_v6  ;;  %v10385_v13 = vpop.permute.xlu1 %4006  ;;  %v3383_v5 = vsel %vm13207_vm13, %v10013_v50, %v3351_v25 }
 0x381   : > { %3646 = vmatpush1.msra.mxu1 %v9606_v41  ;;  %7653 = vmatmul.mubr.msk.f32.gmra.mxu0 %vm491_vm4, %v7605_v49  ;;  %v7661_v41 = vld [vmem:[%s13039_s1 + $0x2e0] sm:$0xff]  ;;  %v3403_v49 = vsel %vm13221_vm3, %v13219_v51, %v13220_v33 }
 0x382   : > { %7684 = vmatmul.mubr.msk.f32.gmra.mxu1 %vm491_vm4, %v7660_v2  ;;  %3647 = vmatprep.subr.mxu1 %v9581_v9  ;;  %v10394_v47 = vpop.permute.xlu0 %4000  ;;  %v3407_v9 = vsel %vm13208_vm14, %v3351_v25, %v10013_v50  ;;  %v13211_v50 = vld [vmem:[#allocation27_spill] sm:$0xff]  ;;  %vm13212_vm14 = vmmov %vm13207_vm13  ;;  %v7664_v2 = vld [vmem:[%s13039_s1 + $0x2f8] sm:$0xff] }
 0x383   : > { %3648 = vmatpush1.msra.mxu1 %v9574_v38  ;;  %3067 = vmatprep.mubr.f32.mxu0 %v13197_v6 }
 0x384   : > { %3649 = vmatprep.subr.mxu1 %v9556_v26  ;;  %3295 = vmatprep.mubr.f32.mxu1 %v13197_v6  ;;  %v10407_v40 = vpop.permute.xlu1 %3748  ;;  %v13210_v26 = vld [vmem:[#allocation15_spill] sm:$0xff] }
 0x385   : > { %3650 = vmatpush1.msra.mxu1 %v9551_v19  ;;  %7654 = vmatmul.mubr.msk.f32.gmra.mxu0 %vm491_vm4, %v7606_v14  ;;  %v3382_v30 = vsel %vm13207_vm13, %v13211_v50, %v13210_v26  ;;  %v7607_v19 = vld [vmem:[%s13039_s1 + $0x270] sm:$0xff]  ;;  %v3406_v3 = vsel %vm13212_vm14, %v13210_v26, %v13211_v50  ;;  %vm13215_vm14 = vmmov %vm13207_vm13  ;;  %v13222_v14 = vld [vmem:[#allocation24_spill] sm:$0xff] }
 0x386   : > { %7685 = vmatmul.mubr.msk.f32.gmra.mxu1 %vm491_vm4, %v7661_v41  ;;  %7697 = vmatprep.subr.msk.mxu0 %vm8495_vm5, %v3383_v5  ;;  %v10414_v38 = vpop.permute.xlu0 %4274  ;;  %v3405_v52 = vsel %vm13215_vm14, %v13213_v35, %v13214_v23  ;;  %vm13218_vm14 = vmmov %vm13207_vm13  ;;  %v13223_v41 = vld [vmem:[#allocation17_spill] sm:$0xff]  ;;  %v13225_v50 = vld [vmem:[#allocation16_spill] sm:$0xff]  ;;  %v3376_v23 = vsel %vm13221_vm3, %v10037_v48, %v9983_v54 }
 0x387   : > { %7698 = vmatpush1.msk.msra.mxu0 %vm8483_vm2, %v3407_v9  ;;  %3073 = vmatprep.mubr.f32.mxu0 %v13197_v6  ;;  %v3404_v28 = vsel %vm13218_vm14, %v13216_v12, %v13217_v17  ;;  %vm13224_vm14 = vmmov %vm13221_vm3  ;;  %v3402_v26 = vsel %vm13221_vm3, %v13222_v14, %v13223_v41  ;;  %v7721_v35 = vld [vmem:[%s13039_s1 + $0x340] sm:$0xff]  ;;  %v7722_v17 = vld [vmem:[%s13039_s1 + $0x348] sm:$0xff] }
 0x388   : > { %7699 = vmatprep.subr.msk.mxu0 %vm8495_vm5, %v3382_v30  ;;  %3301 = vmatprep.mubr.f32.mxu1 %v13197_v6  ;;  %v10434_v20 = vpop.permute.xlu1 %4002  ;;  %v3378_v5 = vsel %vm13224_vm14, %v13223_v41, %v13222_v14  ;;  %v13226_v30 = vld [vmem:[#allocation13_spill] sm:$0xff]  ;;  %vm13227_vm13 = vmmov %vm13221_vm3 }
 0x389   : > { %7700 = vmatpush1.msk.msra.mxu0 %vm8483_vm2, %v3406_v3  ;;  %vm13228_vm14 = vmmov %vm13221_vm3 }
 0x38a   : > { %7655 = vmatmul.mubr.msk.f32.gmra.mxu0 %vm491_vm4, %v7607_v19  ;;  %7686 = vmatmul.mubr.msk.f32.gmra.mxu1 %vm491_vm4, %v7662_v59  ;;  %v10443_v18 = vpop.permute.xlu0 %4270  ;;  %v3377_v19 = vsel %vm13227_vm13, %v13226_v30, %v13225_v50  ;;  %v3401_v3 = vsel %vm13228_vm14, %v13225_v50, %v13226_v30  ;;  %vm13229_vm13 = vmmov %vm13221_vm3  ;;  %vm13230_vm14 = vcmask 1039360   ;;  %v13238_v50 = vld [vmem:[#allocation20_spill] sm:$0xff]  ;;  %v13239_v30 = vld [vmem:[#allocation21_spill] sm:$0xff] }
 0x38b   : > { %7701 = vmatprep.subr.msk.mxu0 %vm8495_vm5, %v3381_v36  ;;  %3079 = vmatprep.mubr.f32.mxu0 %v13197_v6  ;;  %v7689_v36 = vld [vmem:[%s13039_s1 + $0x300] sm:$0xff]  ;;  %vm13231_vm3 = vmmov %vm13230_vm14 }
 0x38c   : > { %7702 = vmatpush1.msk.msra.mxu0 %vm8483_vm2, %v3405_v52  ;;  %3307 = vmatprep.mubr.f32.mxu1 %v13197_v6  ;;  %v10463_v15 = vpop.permute.xlu1 %3998 }
 0x38d   : > { %7703 = vmatprep.subr.msk.mxu0 %vm8495_vm5, %v3380_v22  ;;  %v7690_v22 = vld [vmem:[%s13039_s1 + $0x308] sm:$0xff] }
 0x38e   : > { %7704 = vmatpush1.msk.msra.mxu0 %vm8483_vm2, %v3404_v28  ;;  %7687 = vmatmul.mubr.msk.f32.gmra.mxu1 %vm491_vm4, %v7663_v16  ;;  %v10476_v25 = vpop.permute.xlu0 %4524  ;;  %v3400_v16 = vsel %vm13229_vm13, %v9983_v54, %v10037_v48  ;;  %vm13233_vm13 = vmmov %vm13231_vm3 }
 0x38f   : > { %7656 = vmatmul.mubr.msk.f32.gmra.mxu0 %vm491_vm4, %v7608_v4  ;;  %7705 = vmatprep.subr.msk.mxu0 %vm8495_vm5, %v3379_v39  ;;  %v3818_v51 = vsel %vm13233_vm13, %v10058_v27, %v10027_v63  ;;  %v7723_v39 = vld [vmem:[%s13039_s1 + $0x350] sm:$0xff] }
 0x390   : > { %7706 = vmatpush1.msk.msra.mxu0 %vm8483_vm2, %v3403_v49  ;;  %3313 = vmatprep.mubr.f32.mxu1 %v13197_v6  ;;  %v10493_v9 = vpop.permute.xlu1 %4276 }
 0x391   : > { %7707 = vmatprep.subr.msk.mxu0 %vm8495_vm5, %v3378_v5  ;;  %3521 = vmatprep.mubr.f32.mxu0 %v13197_v6 }
 0x392   : > { %7708 = vmatpush1.msk.msra.mxu0 %vm8483_vm2, %v3402_v26  ;;  %7688 = vmatmul.mubr.msk.f32.gmra.mxu1 %vm491_vm4, %v7664_v2  ;;  %v10507_v59 = vpop.permute.xlu0 %4266  ;;  %v7691_v2 = vld [vmem:[%s13039_s1 + $0x310] sm:$0xff] }
 0x393   : > { %7709 = vmatprep.subr.msk.mxu0 %vm8495_vm5, %v3377_v19  ;;  %3683 = vmatprep.mubr.f32.mxu1 %v13197_v6 }
 0x394   : > { %7710 = vmatpush1.msk.msra.mxu0 %vm8483_vm2, %v3401_v3  ;;  %v10526_v52 = vpop.permute.xlu1 %4272 }
 0x395   : > { %7711 = vmatprep.subr.msk.mxu0 %vm8495_vm5, %v3376_v23 }
 0x396   : > { %7712 = vmatpush1.msk.msra.mxu0 %vm8483_vm2, %v3400_v16  ;;  %7729 = vmatmul.mubr.msk.f32.vlgmr.msra.gmra.mxu1 %vm491_vm4, %v7721_v35  ;;  %v3779_v12 = vpop.permute.xlu0 %3778 }
 0x397   : > { %7713 = vmatmul.mubr.msk.f32.vlgmr.msra.gmra.mxu0 %vm491_vm4, %v7689_v36  ;;  %3689 = vmatprep.mubr.f32.mxu1 %v13197_v6  ;;  %v3787_v54 = vsel %vm13230_vm14, %v10003_v24, %v3779_v12  ;;  %v3819_v48 = vsel %vm13231_vm3, %v3779_v12, %v10003_v24  ;;  %vm13234_vm14 = vmmov %vm13231_vm3  ;;  %vm13235_vm3 = vcmask 924672  }
 0x398   : > { %3527 = vmatprep.mubr.f32.mxu0 %v13197_v6  ;;  %7745 = vmatprep.subr.msk.mxu0 %vm8552_vm9, %v3819_v48  ;;  %v10551_v4 = vpop.permute.xlu1 %4526  ;;  %v3786_v33 = vsel %vm13234_vm14, %v10027_v63, %v10058_v27  ;;  %v3817_v63 = vsel %vm13233_vm13, %v10071_v62, %v10069_v0  ;;  %vm13236_vm14 = vmmov %vm13233_vm13 }
 0x399   : > { %7746 = vmatpush1.msk.msra.mxu0 %vm8535_vm7, %v3787_v54  ;;  %v3785_v14 = vsel %vm13236_vm14, %v10069_v0, %v10071_v62  ;;  %v7692_v0 = vld [vmem:[%s13039_s1 + $0x318] sm:$0xff]  ;;  %v3816_v62 = vsel %vm13233_vm13, %v10102_v44, %v10150_v43  ;;  %vm13240_vm14 = vmmov %vm13235_vm3 }
 0x39a   : > { %7730 = vmatmul.mubr.msk.f32.gmra.mxu1 %vm491_vm4, %v7722_v17  ;;  %v4029_v24 = vpop.permute.xlu0 %4028  ;;  %7747 = vmatprep.subr.msk.mxu0 %vm8552_vm9, %v3818_v51  ;;  %v4068_v19 = vsel %vm13240_vm14, %v13239_v30, %v13238_v50 }
 0x39b   : > { %7714 = vmatmul.mubr.msk.f32.gmra.mxu0 %vm491_vm4, %v7690_v22  ;;  %3695 = vmatprep.mubr.f32.mxu1 %v13197_v6  ;;  %v4069_v49 = vsel %vm13235_vm3, %v4029_v24, %v10054_v45  ;;  %v4037_v41 = vsel %vm13235_vm3, %v10054_v45, %v4029_v24  ;;  %v7724_v45 = vld [vmem:[%s13039_s1 + $0x358] sm:$0xff]  ;;  %vm13241_vm3 = vmmov %vm13233_vm13 }
 0x39c   : > { %3533 = vmatprep.mubr.f32.mxu0 %v13197_v6  ;;  %7748 = vmatpush1.msk.msra.mxu0 %vm8535_vm7, %v3786_v33  ;;  %v10580_v27 = vpop.permute.xlu1 %4268  ;;  %v3784_v35 = vsel %vm13241_vm3, %v10150_v43, %v10102_v44  ;;  %vm13242_vm13 = vmmov %vm13240_vm14  ;;  %v7725_v44 = vld [vmem:[%s13039_s1 + $0x360] sm:$0xff] }
 0x39d   : > { %7749 = vmatprep.subr.msk.mxu0 %vm8552_vm9, %v3817_v63  ;;  %7777 = vmatprep.subr.msk.mxu1 %vm8952_vm15, %v4069_v49  ;;  %v4036_v36 = vsel %vm13242_vm13, %v13238_v50, %v13239_v30  ;;  %v7693_v43 = vld [vmem:[%s13039_s1 + $0x320] sm:$0xff]  ;;  %vm13243_vm14 = vmmov %vm13241_vm3  ;;  %v13259_v30 = vld [vmem:[#allocation4_spill] sm:$0xff] }
 0x39e   : > { %7731 = vmatmul.mubr.msk.f32.gmra.mxu1 %vm491_vm4, %v7723_v39  ;;  %7750 = vmatpush1.msk.msra.mxu0 %vm8535_vm7, %v3785_v14  ;;  %v10594_v26 = vpop.permute.xlu0 %4520  ;;  %v3815_v16 = vsel %vm13243_vm14, %v10170_v7, %v10230_v11  ;;  %vm13244_vm3 = vmmov %vm13242_vm13 }
 0x39f   : > { %7715 = vmatmul.mubr.msk.f32.gmra.mxu0 %vm491_vm4, %v7691_v2  ;;  %3701 = vmatprep.mubr.f32.mxu1 %v13197_v6  ;;  %v4067_v12 = vsel %vm13244_vm3, %v10132_v61, %v10189_v34  ;;  %vm13245_vm13 = vmmov %vm13243_vm14 }
 0x3a0   : > { %3539 = vmatprep.mubr.f32.mxu0 %v13197_v6  ;;  %7778 = vmatpush1.msk.msra.mxu1 %vm8483_vm2, %v4037_v41  ;;  %v10613_v3 = vpop.permute.xlu1 %4522  ;;  %v3783_v54 = vsel %vm13245_vm13, %v10230_v11, %v10170_v7  ;;  %vm13246_vm14 = vmmov %vm13244_vm3  ;;  %v7726_v7 = vld [vmem:[%s13039_s1 + $0x368] sm:$0xff] }
 0x3a1   : > { %7751 = vmatprep.subr.msk.mxu0 %vm8552_vm9, %v3816_v62  ;;  %7779 = vmatprep.subr.msk.mxu1 %vm8952_vm15, %v4068_v19  ;;  %v4035_v22 = vsel %vm13246_vm14, %v10189_v34, %v10132_v61  ;;  %v7694_v11 = vld [vmem:[%s13039_s1 + $0x328] sm:$0xff]  ;;  %vm13247_vm3 = vmmov %vm13245_vm13  ;;  %v7737_v19 = vld [vmem:[%s13039_s1 + $0x380] sm:$0xff] }
 0x3a2   : > { %7732 = vmatmul.mubr.msk.f32.gmra.mxu1 %vm491_vm4, %v7724_v45  ;;  %7752 = vmatpush1.msk.msra.mxu0 %vm8535_vm7, %v3784_v35  ;;  %v10625_v23 = vpop.permute.xlu0 %4262  ;;  %v3814_v61 = vsel %vm13247_vm3, %v10246_v55, %v10300_v42  ;;  %vm13248_vm13 = vmmov %vm13246_vm14  ;;  %v7769_v35 = vld [vmem:[%s13039_s1 + $0x3c0] sm:$0xff] }
 0x3a3   : > { %7716 = vmatmul.mubr.msk.f32.gmra.mxu0 %vm491_vm4, %v7692_v0  ;;  %3707 = vmatprep.mubr.f32.mxu1 %v13197_v6  ;;  %v4066_v34 = vsel %vm13248_vm13, %v10207_v37, %v10264_v32  ;;  %vm13249_vm14 = vmmov %vm13247_vm3 }
 0x3a4   : > { %3545 = vmatprep.mubr.f32.mxu0 %v13197_v6  ;;  %7780 = vmatpush1.msk.msra.mxu1 %vm8483_vm2, %v4036_v36  ;;  %v10647_v17 = vpop.permute.xlu1 %4264  ;;  %v3782_v24 = vsel %vm13249_vm14, %v10300_v42, %v10246_v55  ;;  %vm13250_vm1 = vmmov %vm13248_vm13  ;;  %v3813_v55 = vsel %vm13247_vm3, %v10316_v46, %v10351_v31 }
 0x3a5   : > { %7753 = vmatprep.subr.msk.mxu0 %vm8552_vm9, %v3815_v16  ;;  %7781 = vmatprep.subr.msk.mxu1 %vm8952_vm15, %v4067_v12  ;;  %v4034_v33 = vsel %vm13250_vm1, %v10264_v32, %v10207_v37  ;;  %vm13251_vm13 = vmmov %vm13250_vm1  ;;  %v7695_v37 = vld [vmem:[%s13039_s1 + $0x330] sm:$0xff]  ;;  %v4033_v2 = vsel %vm13250_vm1, %v10332_v53, %v10290_v29  ;;  %v4318_v16 = vsel %vm1980_vm12, %v10414_v38, %v10526_v52  ;;  %v7738_v12 = vld [vmem:[%s13039_s1 + $0x388] sm:$0xff] }
 0x3a6   : > { %7733 = vmatmul.mubr.msk.f32.gmra.mxu1 %vm491_vm4, %v7725_v44  ;;  %7754 = vmatpush1.msk.msra.mxu0 %vm8535_vm7, %v3783_v54  ;;  %v10659_v48 = vpop.permute.xlu0 %4516  ;;  %v4065_v42 = vsel %vm13251_vm13, %v10290_v29, %v10332_v53  ;;  %v7727_v32 = vld [vmem:[%s13039_s1 + $0x370] sm:$0xff]  ;;  %vm13252_vm14 = vmmov %vm13247_vm3  ;;  %v3812_v29 = vsel %vm13247_vm3, %v10360_v10, %v10407_v40  ;;  %v4032_v53 = vsel %vm13250_vm1, %v10385_v13, %v10342_v8 }
 0x3a7   : > { %7717 = vmatmul.mubr.msk.f32.gmra.mxu0 %vm491_vm4, %v7693_v43  ;;  %3713 = vmatprep.mubr.f32.mxu1 %v13197_v6  ;;  %v3781_v63 = vsel %vm13252_vm14, %v10351_v31, %v10316_v46  ;;  %vm13253_vm13 = vmmov %vm13250_vm1 }
 0x3a8   : > { %3551 = vmatprep.mubr.f32.mxu0 %v13197_v6  ;;  %7782 = vmatpush1.msk.msra.mxu1 %vm8483_vm2, %v4035_v22  ;;  %v10681_v51 = vpop.permute.xlu1 %4518  ;;  %v4064_v46 = vsel %vm13253_vm13, %v10342_v8, %v10385_v13  ;;  %vm13254_vm14 = vmmov %vm13247_vm3  ;;  %v7728_v13 = vld [vmem:[%s13039_s1 + $0x378] sm:$0xff]  ;;  %v4317_v22 = vsel %vm1980_vm12, %v10443_v18, %v10580_v27 }
 0x3a9   : > { %7755 = vmatprep.subr.msk.mxu0 %vm8552_vm9, %v3814_v61  ;;  %7783 = vmatprep.subr.msk.mxu1 %vm8952_vm15, %v4066_v34  ;;  %v3780_v31 = vsel %vm13254_vm14, %v10407_v40, %v10360_v10  ;;  %vm13255_vm3 = vmmov %vm13250_vm1  ;;  %v7696_v10 = vld [vmem:[%s13039_s1 + $0x338] sm:$0xff]  ;;  %vm13257_vm14 = vcmask 908288  }
 0x3aa   : > { %7734 = vmatmul.mubr.msk.f32.gmra.mxu1 %vm491_vm4, %v7726_v7  ;;  %7756 = vmatpush1.msk.msra.mxu0 %vm8535_vm7, %v3782_v24  ;;  %v4279_v39 = vpop.permute.xlu0 %4278  ;;  %v4063_v8 = vsel %vm13255_vm3, %v10376_v60, %v10434_v20  ;;  %vm13256_vm13 = vmmov %vm13250_vm1 }
 0x3ab   : > { %7718 = vmatmul.mubr.msk.f32.gmra.mxu0 %vm491_vm4, %v7694_v11  ;;  %7784 = vmatpush1.msk.msra.mxu1 %vm8483_vm2, %v4034_v33  ;;  %v4031_v40 = vsel %vm13256_vm13, %v10434_v20, %v10376_v60  ;;  %v4319_v45 = vsel %vm1980_vm12, %v4279_v39, %v10493_v9  ;;  %v4062_v60 = vsel %vm13250_vm1, %v10394_v47, %v10463_v15  ;;  %vm13258_vm3 = vmmov %vm13250_vm1  ;;  %vm13260_vm13 = vcmp.lt.s32.totalorder %v13259_v30, 240 }
 0x3ac   : > { %7757 = vmatprep.subr.msk.mxu0 %vm8552_vm9, %v3813_v55  ;;  %7785 = vmatprep.subr.msk.mxu1 %vm8952_vm15, %v4065_v42  ;;  %v10715_v49 = vpop.permute.xlu1 %4260  ;;  %v4030_v50 = vsel %vm13258_vm3, %v10463_v15, %v10394_v47  ;;  %vm13262_vm1 = vmmov %vm13257_vm14  ;;  %v4287_v44 = vsel %vm1980_vm12, %v10493_v9, %v4279_v39  ;;  %v7770_v9 = vld [vmem:[%s13039_s1 + $0x3c8] sm:$0xff]  ;;  %v4316_v11 = vsel %vm1980_vm12, %v10507_v59, %v10647_v17  ;;  %v7740_v42 = vld [vmem:[%s13039_s1 + $0x398] sm:$0xff] }
 0x3ad   : > { %3557 = vmatprep.mubr.f32.mxu0 %v13197_v6  ;;  %3719 = vmatprep.mubr.f32.mxu1 %v13197_v6  ;;  %vm13264_vm3 = vmmov %vm13260_vm13  ;;  %v4536_v61 = vsel %vm13262_vm1, %v10613_v3, %v10476_v25  ;;  %v4283_v39 = vsel %vm1980_vm12, %v10715_v49, %v10625_v23 }
 0x3ae   : > { %7758 = vmatpush1.msk.msra.mxu0 %vm8535_vm7, %v3781_v63  ;;  %7786 = vmatpush1.msk.msra.mxu1 %vm8483_vm2, %v4033_v2  ;;  %v4529_v14 = vpop.permute.xlu0 %4528 }
 0x3af   : > { %7719 = vmatmul.mubr.msk.f32.gmra.mxu0 %vm491_vm4, %v7695_v37  ;;  %7735 = vmatmul.mubr.msk.f32.gmra.mxu1 %vm491_vm4, %v7727_v32  ;;  %v4569_v20 = vsel %vm13257_vm14, %v4529_v14, %v10551_v4  ;;  %v4537_v36 = vsel %vm13262_vm1, %v10551_v4, %v4529_v14  ;;  %vm13263_vm14 = vmmov %vm13260_vm13  ;;  %v4286_v4 = vsel %vm1980_vm12, %v10526_v52, %v10414_v38  ;;  %v7772_v37 = vld [vmem:[%s13039_s1 + $0x3d8] sm:$0xff]  ;;  %v7741_v14 = vld [vmem:[%s13039_s1 + $0x3a0] sm:$0xff] }
 0x3b0   : > { %7759 = vmatprep.subr.msk.mxu0 %vm8552_vm9, %v3812_v29  ;;  %7787 = vmatprep.subr.msk.mxu1 %vm8952_vm15, %v4064_v46  ;;  %v10747_v41 = vpop.permute.xlu1 %4514  ;;  %v4285_v38 = vsel %vm1980_vm12, %v10580_v27, %v10443_v18  ;;  %v4284_v18 = vsel %vm1980_vm12, %v10647_v17, %v10507_v59  ;;  %v4315_v59 = vsel %vm1980_vm12, %v10625_v23, %v10715_v49  ;;  %v7773_v29 = vld [vmem:[%s13039_s1 + $0x3e0] sm:$0xff] }
 0x3b1   : > { %7760 = vmatpush1.msk.msra.mxu0 %vm8535_vm7, %v3780_v31  ;;  %7788 = vmatpush1.msk.msra.mxu1 %vm8483_vm2, %v4032_v53 }
 0x3b2   : > { %7789 = vmatprep.subr.msk.mxu1 %vm8952_vm15, %v4063_v8  ;;  %3563 = vmatprep.mubr.f32.mxu0 %v13197_v6  ;;  %v10770_v0 = vpop.permute.xlu0 %4258 }
 0x3b3   : > { %3725 = vmatprep.mubr.f32.mxu1 %v13197_v6  ;;  %7790 = vmatpush1.msk.msra.mxu1 %vm8483_vm2, %v4031_v40  ;;  %v7774_v40 = vld [vmem:[%s13039_s1 + $0x3e8] sm:$0xff] }
 0x3b4   : > { %7720 = vmatmul.mubr.msk.f32.gmra.mxu0 %vm491_vm4, %v7696_v10  ;;  %7736 = vmatmul.mubr.msk.f32.gmra.mxu1 %vm491_vm4, %v7728_v13  ;;  %v10782_v62 = vpop.permute.xlu1 %4256  ;;  %v7742_v13 = vld [vmem:[%s13039_s1 + $0x3a8] sm:$0xff] }
 0x3b5   : > { %7791 = vmatprep.subr.msk.mxu1 %vm8952_vm15, %v4062_v60  ;;  %7809 = vmatprep.subr.msk.mxu0 %vm13260_vm13, %v4319_v45  ;;  %vm13265_vm13 = vmmov %vm13262_vm1  ;;  %v4314_v33 = vsel %vm1980_vm12, %v10770_v0, %v10782_v62  ;;  %v4282_v23 = vsel %vm1980_vm12, %v10782_v62, %v10770_v0 }
 0x3b6   : > { %7792 = vmatpush1.msk.msra.mxu1 %vm8483_vm2, %v4030_v50  ;;  %3933 = vmatprep.mubr.f32.mxu0 %v13197_v6  ;;  %v10800_v47 = vpop.permute.xlu0 %4512  ;;  %v4568_v7 = vsel %vm13265_vm13, %v10476_v25, %v10613_v3  ;;  %v7739_v25 = vld [vmem:[%s13039_s1 + $0x390] sm:$0xff]  ;;  %vm13268_vm13 = vmmov %vm13262_vm1 }
 0x3b7   : > { %4183 = vmatprep.mubr.f32.mxu1 %v13197_v6  ;;  %7833 = vmatprep.subr.msk.mxu1 %vm9164_vm11, %v4569_v20  ;;  %v7771_v3 = vld [vmem:[%s13039_s1 + $0x3d0] sm:$0xff]  ;;  %v4535_v24 = vsel %vm13268_vm13, %v10681_v51, %v10594_v26 }
 0x3b8   : > { %7761 = vmatmul.mubr.msk.f32.vlgmr.msra.gmra.mxu0 %vm491_vm4, %v7737_v19  ;;  %7793 = vmatmul.mubr.msk.f32.vlgmr.msra.gmra.mxu1 %vm491_vm4, %v7769_v35  ;;  %v4511_v43 = vpop.permute.xlu1 %4510  ;;  %v7743_v50 = vld [vmem:[%s13039_s1 + $0x3b0] sm:$0xff] }
 0x3b9   : > { %4386 = vmatpush1.msra.mxu0 %v4287_v44  ;;  %3939 = vmatprep.mubr.f32.mxu0 %v13197_v6  ;;  %v7775_v19 = vld [vmem:[%s13039_s1 + $0x3f0] sm:$0xff]  ;;  %v7801_v44 = vld [vmem:[%s13039_s1 + $0x400] sm:$0xff] }
 0x3ba   : > { %7810 = vmatprep.subr.msk.mxu0 %vm13263_vm14, %v4318_v16  ;;  %4189 = vmatprep.mubr.f32.mxu1 %v13197_v6  ;;  %v10827_v54 = vpop.permute.xlu0 %4254  ;;  %vm13266_vm14 = vmmov %vm13264_vm3  ;;  %v7802_v16 = vld [vmem:[%s13039_s1 + $0x408] sm:$0xff] }
 0x3bb   : > { %4388 = vmatpush1.msra.mxu0 %v4286_v4  ;;  %7834 = vmatpush1.msk.msra.mxu1 %vm8535_vm7, %v4537_v36  ;;  %v7776_v36 = vld [vmem:[%s13039_s1 + $0x3f8] sm:$0xff]  ;;  %v7803_v4 = vld [vmem:[%s13039_s1 + $0x410] sm:$0xff] }
 0x3bc   : > { %7811 = vmatprep.subr.msk.mxu0 %vm13264_vm3, %v4317_v22  ;;  %7762 = vmatmul.mubr.msk.f32.gmra.mxu0 %vm491_vm4, %v7738_v12  ;;  %v4253_v52 = vpop.permute.xlu1 %4252  ;;  %vm13267_vm3 = vmmov %vm13262_vm1  ;;  %v7826_v12 = vld [vmem:[%s13039_s1 + $0x448] sm:$0xff]  ;;  %v7828_v22 = vld [vmem:[%s13039_s1 + $0x458] sm:$0xff] }
 0x3bd   : > { %7794 = vmatmul.mubr.msk.f32.gmra.mxu1 %vm491_vm4, %v7770_v9  ;;  %4390 = vmatpush1.msra.mxu0 %v4285_v38  ;;  %v4567_v34 = vsel %vm13267_vm3, %v10594_v26, %v10681_v51  ;;  %vm13269_vm1 = vmmov %vm13266_vm14  ;;  %v4534_v51 = vsel %vm13267_vm3, %v10747_v41, %v10659_v48  ;;  %v4313_v2 = vsel %vm1980_vm12, %v10827_v54, %v4253_v52  ;;  %v7827_v9 = vld [vmem:[%s13039_s1 + $0x450] sm:$0xff]  ;;  %v7805_v38 = vld [vmem:[%s13039_s1 + $0x420] sm:$0xff] }
 0x3be   : > { %7835 = vmatprep.subr.msk.mxu1 %vm9164_vm11, %v4568_v7  ;;  %7812 = vmatprep.subr.msk.mxu0 %vm13266_vm14, %v4316_v11  ;;  %v4509_v27 = vpop.permute.xlu0 %4508  ;;  %vm13270_vm14 = vmmov %vm13267_vm3  ;;  %v4281_v31 = vsel %vm1980_vm12, %v4253_v52, %v10827_v54  ;;  %v7804_v54 = vld [vmem:[%s13039_s1 + $0x418] sm:$0xff]  ;;  %v7829_v52 = vld [vmem:[%s13039_s1 + $0x460] sm:$0xff] }
 0x3bf   : > { %7836 = vmatpush1.msk.msra.mxu1 %vm8535_vm7, %v4536_v61  ;;  %4392 = vmatpush1.msra.mxu0 %v4284_v18  ;;  %v4566_v26 = vsel %vm13270_vm14, %v10659_v48, %v10747_v41  ;;  %vm13271_vm13 = vmmov %vm13269_vm1  ;;  %v7806_v7 = vld [vmem:[%s13039_s1 + $0x428] sm:$0xff]  ;;  %v7807_v61 = vld [vmem:[%s13039_s1 + $0x430] sm:$0xff] }
 0x3c0   : > { %7837 = vmatprep.subr.msk.mxu1 %vm9164_vm11, %v4567_v34  ;;  %3945 = vmatprep.mubr.f32.mxu0 %v13197_v6  ;;  %v4507_v17 = vpop.permute.xlu1 %4506  ;;  %v7830_v11 = vld [vmem:[%s13039_s1 + $0x468] sm:$0xff]  ;;  %v7831_v18 = vld [vmem:[%s13039_s1 + $0x470] sm:$0xff]  ;;  %v7832_v34 = vld [vmem:[%s13039_s1 + $0x478] sm:$0xff] }
 0x3c1   : > { %4195 = vmatprep.mubr.f32.mxu1 %v13197_v6  ;;  %7813 = vmatprep.subr.msk.mxu0 %vm13269_vm1, %v4315_v59  ;;  %vm13272_vm1 = vmmov %vm13267_vm3 }
 0x3c2   : > { %7838 = vmatpush1.msk.msra.mxu1 %vm8535_vm7, %v4535_v24  ;;  %7763 = vmatmul.mubr.msk.f32.gmra.mxu0 %vm491_vm4, %v7739_v25  ;;  %v4251_v55 = vpop.permute.xlu0 %4250  ;;  %v4565_v48 = vsel %vm13272_vm1, %v10800_v47, %v4511_v43  ;;  %vm13273_vm14 = vmmov %vm13272_vm1  ;;  %v4532_v41 = vsel %vm13272_vm1, %v4507_v17, %v4509_v27 }
 0x3c3   : > { %7795 = vmatmul.mubr.msk.f32.gmra.mxu1 %vm491_vm4, %v7771_v3  ;;  %4394 = vmatpush1.msra.mxu0 %v4283_v39  ;;  %v4533_v49 = vsel %vm13273_vm14, %v4511_v43, %v10800_v47  ;;  %vm13274_vm3 = vmmov %vm13272_vm1  ;;  %v7744_v47 = vld [vmem:[%s13039_s1 + $0x3b8] sm:$0xff]  ;;  %v7825_v43 = vld [vmem:[%s13039_s1 + $0x440] sm:$0xff] }
 0x3c4   : > { %7839 = vmatprep.subr.msk.mxu1 %vm9164_vm11, %v4566_v26  ;;  %7814 = vmatprep.subr.msk.mxu0 %vm13271_vm13, %v4314_v33  ;;  %v4249_v32 = vpop.permute.xlu1 %4248  ;;  %v4564_v63 = vsel %vm13274_vm3, %v4509_v27, %v4507_v17  ;;  %vm13275_vm14 = vmmov %vm13272_vm1  ;;  %v7808_v27 = vld [vmem:[%s13039_s1 + $0x438] sm:$0xff] }
 0x3c5   : > { %7840 = vmatpush1.msk.msra.mxu1 %vm8535_vm7, %v4534_v51  ;;  %4396 = vmatpush1.msra.mxu0 %v4282_v23  ;;  %v4312_v8 = vsel %vm1980_vm12, %v4251_v55, %v4249_v32  ;;  %vm13276_vm3 = vmmov %vm13271_vm13  ;;  %v4280_v0 = vsel %vm1980_vm12, %v4249_v32, %v4251_v55 }
 0x3c6   : > { %3951 = vmatprep.mubr.f32.mxu0 %v13197_v6  ;;  %4201 = vmatprep.mubr.f32.mxu1 %v13197_v6  ;;  %v4505_v46 = vpop.permute.xlu0 %4504 }
 0x3c7   : > { %7764 = vmatmul.mubr.msk.f32.gmra.mxu0 %vm491_vm4, %v7740_v42  ;;  %7796 = vmatmul.mubr.msk.f32.gmra.mxu1 %vm491_vm4, %v7772_v37 }
 0x3c8   : > { %7841 = vmatprep.subr.msk.mxu1 %vm9164_vm11, %v4565_v48  ;;  %3957 = vmatprep.mubr.f32.mxu0 %v13197_v6  ;;  %v4503_v53 = vpop.permute.xlu1 %4502 }
 0x3c9   : > { %7842 = vmatpush1.msk.msra.mxu1 %vm8535_vm7, %v4533_v49  ;;  %4207 = vmatprep.mubr.f32.mxu1 %v13197_v6  ;;  %v4563_v10 = vsel %vm13275_vm14, %v4505_v46, %v4503_v53  ;;  %vm13278_vm14 = vmmov %vm13272_vm1 }
 0x3ca   : > { %7815 = vmatprep.subr.msk.mxu0 %vm13271_vm13, %v4313_v2  ;;  %7843 = vmatprep.subr.msk.mxu1 %vm9164_vm11, %v4564_v63  ;;  %vm13277_vm13 = vmmov %vm13272_vm1  ;;  %v4501_v20 = vpop.permute.xlu0 %4500 }
 0x3cb   : > { %7765 = vmatmul.mubr.msk.f32.gmra.mxu0 %vm491_vm4, %v7741_v14  ;;  %7797 = vmatmul.mubr.msk.f32.gmra.mxu1 %vm491_vm4, %v7773_v29  ;;  %v4531_v60 = vsel %vm13277_vm13, %v4503_v53, %v4505_v46 }
 0x3cc   : > { %4398 = vmatpush1.msra.mxu0 %v4281_v31  ;;  %3963 = vmatprep.mubr.f32.mxu0 %v13197_v6  ;;  %v4499_v45 = vpop.permute.xlu1 %4498 }
 0x3cd   : > { %4213 = vmatprep.mubr.f32.mxu1 %v13197_v6  ;;  %7844 = vmatpush1.msk.msra.mxu1 %vm8535_vm7, %v4532_v41  ;;  %v4562_v62 = vsel %vm13272_vm1, %v4501_v20, %v4499_v45  ;;  %v4530_v35 = vsel %vm13278_vm14, %v4499_v45, %v4501_v20 }
 0x3ce   : > { %7816 = vmatprep.subr.msk.mxu0 %vm13276_vm3, %v4312_v8  ;;  %7845 = vmatprep.subr.msk.mxu1 %vm9164_vm11, %v4563_v10 }
 0x3cf   : > { %7766 = vmatmul.mubr.msk.f32.gmra.mxu0 %vm491_vm4, %v7742_v13  ;;  %7798 = vmatmul.mubr.msk.f32.gmra.mxu1 %vm491_vm4, %v7774_v40 }
 0x3d0   : > { %3969 = vmatprep.mubr.f32.mxu0 %v13197_v6  ;;  %4219 = vmatprep.mubr.f32.mxu1 %v13197_v6 }
 0x3d1   : > { %4400 = vmatpush1.msra.mxu0 %v4280_v0  ;;  %7846 = vmatpush1.msk.msra.mxu1 %vm8535_vm7, %v4531_v60 }
 0x3d2   : > { %7847 = vmatprep.subr.msk.mxu1 %vm9164_vm11, %v4562_v62 }
 0x3d3   : > { %7767 = vmatmul.mubr.msk.f32.gmra.mxu0 %vm491_vm4, %v7743_v50  ;;  %7799 = vmatmul.mubr.msk.f32.gmra.mxu1 %vm491_vm4, %v7775_v19 }
 0x3d4   : > { %3975 = vmatprep.mubr.f32.mxu0 %v13197_v6  ;;  %4225 = vmatprep.mubr.f32.mxu1 %v13197_v6 }
 0x3d5   : > { %7848 = vmatpush1.msk.msra.mxu1 %vm8535_vm7, %v4530_v35 }
 0x3d7   : > { %7768 = vmatmul.mubr.msk.f32.gmra.mxu0 %vm491_vm4, %v7744_v47  ;;  %7800 = vmatmul.mubr.msk.f32.gmra.mxu1 %vm491_vm4, %v7776_v36 }
 0x3d8   : > { %4433 = vmatprep.mubr.f32.mxu0 %v13197_v6  ;;  %4683 = vmatprep.mubr.f32.mxu1 %v13197_v6 }
 0x3db   : > { %7817 = vmatmul.mubr.msk.f32.vlgmr.msra.gmra.mxu0 %vm491_vm4, %v7801_v44  ;;  %7849 = vmatmul.mubr.msk.f32.vlgmr.msra.gmra.mxu1 %vm491_vm4, %v7825_v43 }
 0x3dc   : > { %4439 = vmatprep.mubr.f32.mxu0 %v13197_v6  ;;  %4689 = vmatprep.mubr.f32.mxu1 %v13197_v6 }
 0x3df   : > { %7818 = vmatmul.mubr.msk.f32.gmra.mxu0 %vm491_vm4, %v7802_v16  ;;  %7850 = vmatmul.mubr.msk.f32.gmra.mxu1 %vm491_vm4, %v7826_v12 }
 0x3e0   : > { %4445 = vmatprep.mubr.f32.mxu0 %v13197_v6  ;;  %4695 = vmatprep.mubr.f32.mxu1 %v13197_v6 }
 0x3e3   : > { %7819 = vmatmul.mubr.msk.f32.gmra.mxu0 %vm491_vm4, %v7803_v4  ;;  %7851 = vmatmul.mubr.msk.f32.gmra.mxu1 %vm491_vm4, %v7827_v9 }
 0x3e4   : > { %4451 = vmatprep.mubr.f32.mxu0 %v13197_v6  ;;  %4701 = vmatprep.mubr.f32.mxu1 %v13197_v6 }
 0x3e7   : > { %7820 = vmatmul.mubr.msk.f32.gmra.mxu0 %vm491_vm4, %v7804_v54  ;;  %7852 = vmatmul.mubr.msk.f32.gmra.mxu1 %vm491_vm4, %v7828_v22 }
 0x3e8   : > { %4457 = vmatprep.mubr.f32.mxu0 %v13197_v6  ;;  %4707 = vmatprep.mubr.f32.mxu1 %v13197_v6 }
 0x3eb   : > { %7821 = vmatmul.mubr.msk.f32.gmra.mxu0 %vm491_vm4, %v7805_v38  ;;  %7853 = vmatmul.mubr.msk.f32.gmra.mxu1 %vm491_vm4, %v7829_v52 }
 0x3ec   : > { %4463 = vmatprep.mubr.f32.mxu0 %v13197_v6  ;;  %4713 = vmatprep.mubr.f32.mxu1 %v13197_v6 }
 0x3ef   : > { %7822 = vmatmul.mubr.msk.f32.gmra.mxu0 %vm491_vm4, %v7806_v7  ;;  %7854 = vmatmul.mubr.msk.f32.gmra.mxu1 %vm491_vm4, %v7830_v11 }
 0x3f0   : > { %4469 = vmatprep.mubr.f32.mxu0 %v13197_v6  ;;  %4719 = vmatprep.mubr.f32.mxu1 %v13197_v6 }
 0x3f3   : > { %7823 = vmatmul.mubr.msk.f32.gmra.mxu0 %vm491_vm4, %v7807_v61  ;;  %7855 = vmatmul.mubr.msk.f32.gmra.mxu1 %vm491_vm4, %v7831_v18 }
 0x3f4   : > { %4475 = vmatprep.mubr.f32.mxu0 %v13197_v6  ;;  %4725 = vmatprep.mubr.f32.mxu1 %v13197_v6 }
 0x3f7   : > { %7824 = vmatmul.mubr.msk.f32.gmra.mxu0 %vm491_vm4, %v7808_v27  ;;  %7856 = vmatmul.mubr.msk.f32.gmra.mxu1 %vm491_vm4, %v7832_v34 }
 0x3f8   : > { %5191 = vmatprep.mubr.f32.mxu0 %v13197_v6  ;;  %5328 = vmatprep.mubr.f32.mxu1 %v13197_v6 }
 0x40e   : > { %v2902_v25 = vpop.f32.mrf.mxu1 }
 0x410   : > { %v11073_v59 = vpop.f32.mrf.mxu1 }
 0x412   : > { %v2908_v3 = vpop.f32.mrf.mxu1 }
 0x414   : > { %v11075_v17 = vpop.f32.mrf.mxu1 }
 0x416   : > { %v2914_v24 = vpop.f32.mrf.mxu1 }
 0x418   : > { %v11077_v33 = vpop.f32.mrf.mxu1 }
 0x41a   : > { %v2920_v39 = vpop.f32.mrf.mxu1 }
 0x41c   : > { %v11079_v55 = vpop.f32.mrf.mxu1 }
 0x41d   : > { %13279 = vst [vmem:[#allocation28_spill] sm:$0xff] %v11079_v55 }
 0x41f   : > { %v2926_v26 = vpop.f32.mrf.mxu1 }
 0x421   : > { %v11081_v51 = vpop.f32.mrf.mxu1 }
 0x425   : > { %v2932_v23 = vpop.f32.mrf.mxu1 }
 0x427   : > { %v11083_v42 = vpop.f32.mrf.mxu1 }
 0x42b   : > { %v2938_v37 = vpop.f32.mrf.mxu1 }
 0x42d   : > { %v11085_v32 = vpop.f32.mrf.mxu1 }
 0x431   : > { %v2944_v48 = vpop.f32.mrf.mxu1  ;;  %v3039_v49 = vpop.f32.mrf.mxu0 }
 0x432   : > { %v3040_v2 = vadd.f32 %v3039_v49, %v2902_v25 }
 0x433   : > { %v11087_v63 = vpop.f32.mrf.mxu1  ;;  %v11089_v14 = vpop.f32.mrf.mxu0 }
 0x435   : > { %v3045_v29 = vpop.f32.mrf.mxu0 }
 0x436   : > { %v3046_v46 = vadd.f32 %v3045_v29, %v2908_v3  ;;  %v3273_v53 = vpop.f32.mrf.mxu1 }
 0x437   : > { %v11091_v31 = vadd.f32 %v3273_v53, %v3040_v2  ;;  %v11093_v41 = vpop.f32.mrf.mxu0 }
 0x438   : > { %v11095_v8 = vpop.f32.mrf.mxu1 }
 0x439   : > { %v3051_v10 = vpop.f32.mrf.mxu0 }
 0x43a   : > { %v3052_v13 = vadd.f32 %v3051_v10, %v2914_v24  ;;  %v3279_v40 = vpop.f32.mrf.mxu1 }
 0x43b   : > { %v3322_v45 = vadd.f32 %v3279_v40, %v3046_v46  ;;  %v11097_v0 = vpop.f32.mrf.mxu0 }
 0x43c   : > { %v11099_v60 = vpop.f32.mrf.mxu1 }
 0x43d   : > { %v3057_v20 = vpop.f32.mrf.mxu0 }
 0x43e   : > { %v3058_v62 = vadd.f32 %v3057_v20, %v2920_v39  ;;  %v3285_v50 = vpop.f32.mrf.mxu1 }
 0x43f   : > { %v3324_v19 = vadd.f32 %v3285_v50, %v3052_v13  ;;  %v11101_v35 = vpop.f32.mrf.mxu0 }
 0x440   : > { %13280 = vst [vmem:[#allocation29_spill] sm:$0xff] %v11101_v35  ;;  %v11103_v47 = vpop.f32.mrf.mxu1 }
 0x441   : > { %v3063_v36 = vpop.f32.mrf.mxu0 }
 0x442   : > { %v3064_v44 = vadd.f32 %v3063_v36, %v2926_v26  ;;  %v3291_v43 = vpop.f32.mrf.mxu1 }
 0x443   : > { %v3326_v16 = vadd.f32 %v3291_v43, %v3058_v62  ;;  %v11105_v12 = vpop.f32.mrf.mxu0 }
 0x444   : > { %v11107_v4 = vpop.f32.mrf.mxu1 }
 0x445   : > { %13281 = vst [vmem:[#allocation32_spill] sm:$0xff] %v11107_v4  ;;  %v3069_v9 = vpop.f32.mrf.mxu0 }
 0x446   : > { %v3070_v54 = vadd.f32 %v3069_v9, %v2932_v23  ;;  %v3297_v22 = vpop.f32.mrf.mxu1 }
 0x447   : > { %v3328_v38 = vadd.f32 %v3297_v22, %v3064_v44  ;;  %v11109_v52 = vpop.f32.mrf.mxu0 }
 0x448   : > { %v11111_v7 = vpop.f32.mrf.mxu1 }
 0x44a   : > { %v3075_v11 = vpop.f32.mrf.mxu0  ;;  %v3303_v61 = vpop.f32.mrf.mxu1 }
 0x44b   : > { %v3076_v18 = vadd.f32 %v3075_v11, %v2938_v37  ;;  %v3330_v27 = vadd.f32 %v3303_v61, %v3070_v54 }
 0x44c   : > { %v11113_v34 = vpop.f32.mrf.mxu0  ;;  %v11115_v25 = vpop.f32.mrf.mxu1 }
 0x44e   : > { %v3309_v3 = vpop.f32.mrf.mxu1 }
 0x44f   : > { %v3081_v24 = vpop.f32.mrf.mxu0  ;;  %v3332_v39 = vadd.f32 %v3309_v3, %v3076_v18 }
 0x450   : > { %v3082_v26 = vadd.f32 %v3081_v24, %v2944_v48  ;;  %v11117_v49 = vpop.f32.mrf.mxu1 }
 0x451   : > { %v11121_v46 = vpop.f32.mrf.mxu0 }
 0x452   : > { %v3315_v23 = vpop.f32.mrf.mxu1 }
 0x453   : > { %v3334_v2 = vadd.f32 %v3315_v23, %v3082_v26 }
 0x454   : > { %v11119_v29 = vpop.f32.mrf.mxu1 }
 0x456   : > { %v11123_v53 = vpop.f32.mrf.mxu1 }
 0x457   : > { %v11125_v37 = vpop.f32.mrf.mxu0 }
 0x458   : > { %v11127_v10 = vpop.f32.mrf.mxu1 }
 0x459   : > { %v11129_v13 = vpop.f32.mrf.mxu0 }
 0x45a   : > { %v3691_v40 = vpop.f32.mrf.mxu1 }
 0x45b   : > { %v3529_v20 = vpop.f32.mrf.mxu0 }
 0x45c   : > { %v3572_v62 = vadd.f32 %v3529_v20, %v3322_v45  ;;  %v11131_v48 = vpop.f32.mrf.mxu1 }
 0x45d   : > { %v11133_v50 = vpop.f32.mrf.mxu0 }
 0x45e   : > { %v11135_v36 = vadd.f32 %v3691_v40, %v3572_v62  ;;  %v3697_v44 = vpop.f32.mrf.mxu1 }
 0x45f   : > { %v3535_v43 = vpop.f32.mrf.mxu0 }
 0x460   : > { %v3574_v9 = vadd.f32 %v3535_v43, %v3324_v19  ;;  %v11137_v54 = vpop.f32.mrf.mxu1 }
 0x461   : > { %v11139_v22 = vpop.f32.mrf.mxu0 }
 0x462   : > { %v11141_v11 = vadd.f32 %v3697_v44, %v3574_v9  ;;  %v3703_v61 = vpop.f32.mrf.mxu1 }
 0x463   : > { %v3541_v18 = vpop.f32.mrf.mxu0 }
 0x464   : > { %v3576_v3 = vadd.f32 %v3541_v18, %v3326_v16  ;;  %v11143_v24 = vpop.f32.mrf.mxu1 }
 0x465   : > { %13282 = vst [vmem:[#allocation33_spill] sm:$0xff] %v11143_v24  ;;  %v11145_v45 = vpop.f32.mrf.mxu0 }
 0x466   : > { %13283 = vst [vmem:[#allocation30_spill] sm:$0xff] %v11145_v45  ;;  %v11147_v26 = vadd.f32 %v3703_v61, %v3576_v3  ;;  %v3709_v23 = vpop.f32.mrf.mxu1  ;;  %v3072_v45 = vadd.f32 %v11109_v52, %v11083_v42  ;;  %v3042_v42 = vadd.f32 %v11089_v14, %v11073_v59 }
 0x467   : > { %v3547_v40 = vpop.f32.mrf.mxu0 }
 0x468   : > { %13284 = vst [vmem:[#allocation23_spill] sm:$0xff] %v11147_v26  ;;  %v3578_v20 = vadd.f32 %v3547_v40, %v3328_v38  ;;  %v3711_v62 = vpop.f32.mrf.mxu1 }
 0x469   : > { %v3549_v19 = vpop.f32.mrf.mxu0 }
 0x46a   : > { %v3740_v43 = vadd.f32 %v3709_v23, %v3578_v20  ;;  %v3715_v15 = vpop.f32.mrf.mxu1 }
 0x46b   : > { %v3553_v30 = vpop.f32.mrf.mxu0 }
 0x46c   : > { %v3580_v5 = vadd.f32 %v3553_v30, %v3330_v27  ;;  %v3717_v44 = vpop.f32.mrf.mxu1 }
 0x46d   : > { %v3555_v9 = vpop.f32.mrf.mxu0 }
 0x46e   : > { %v3742_v28 = vadd.f32 %v3715_v15, %v3580_v5 }
 0x46f   : > { %v3559_v1 = vpop.f32.mrf.mxu0  ;;  %v3721_v16 = vpop.f32.mrf.mxu1 }
 0x470   : > { %v3582_v18 = vadd.f32 %v3559_v1, %v3332_v39 }
 0x471   : > { %v3561_v57 = vpop.f32.mrf.mxu0  ;;  %v11149_v21 = vpop.f32.mrf.mxu1 }
 0x472   : > { %v11151_v61 = vadd.f32 %v3721_v16, %v3582_v18  ;;  %v3066_v18 = vadd.f32 %v11105_v12, %v11081_v51  ;;  %v3331_v51 = vadd.f32 %v11115_v25, %v3072_v45  ;;  %v3321_v45 = vadd.f32 %v11095_v8, %v3042_v42 }
 0x474   : > { %v3565_v3 = vpop.f32.mrf.mxu0  ;;  %v3727_v58 = vpop.f32.mrf.mxu1  ;;  %v3329_v6 = vadd.f32 %v11111_v7, %v3066_v18  ;;  %v3078_v7 = vadd.f32 %v11113_v34, %v11085_v32  ;;  %v3570_v32 = vadd.f32 %v11125_v37, %v11091_v31 }
 0x475   : > { %v3584_v38 = vadd.f32 %v3565_v3, %v3334_v2 }
 0x476   : > { %v3567_v40 = vpop.f32.mrf.mxu0  ;;  %v11153_v56 = vpop.f32.mrf.mxu1  ;;  %v3579_v4 = vadd.f32 %v3549_v19, %v3329_v6  ;;  %v3333_v19 = vadd.f32 %v11117_v49, %v3078_v7  ;;  %v3048_v49 = vadd.f32 %v11093_v41, %v11075_v17 }
 0x477   : > { %v11155_v23 = vadd.f32 %v3727_v58, %v3584_v38 }
 0x478   : > { %v11157_v30 = vpop.f32.mrf.mxu0  ;;  %v11159_v27 = vpop.f32.mrf.mxu1  ;;  %v3741_v18 = vadd.f32 %v3711_v62, %v3579_v4  ;;  %v3323_v37 = vadd.f32 %v11099_v60, %v3048_v49 }
 0x47a   : > { %v11161_v5 = vpop.f32.mrf.mxu0  ;;  %v11163_v1 = vpop.f32.mrf.mxu1 }
 0x47c   : > { %v11165_v15 = vpop.f32.mrf.mxu0 }
 0x47d   : > { %v11167_v39 = vpop.f32.mrf.mxu1 }
 0x47e   : > { %v11169_v20 = vpop.f32.mrf.mxu0 }
 0x47f   : > { %v11171_v2 = vpop.f32.mrf.mxu1 }
 0x482   : > { %v11173_v16 = vpop.f32.mrf.mxu0 }
 0x483   : > { %v11175_v58 = vpop.f32.mrf.mxu1 }
 0x484   : > { %13285 = vst [vmem:[#allocation22_spill] sm:$0xff] %v11175_v58  ;;  %v11179_v3 = vpop.f32.mrf.mxu0 }
 0x485   : > { %13286 = vst [vmem:[#allocation15_spill] sm:$0xff] %v11179_v3  ;;  %v11181_v38 = vpop.f32.mrf.mxu1  ;;  %v11195_v3 = vpop.permute.xlu0 %4789 }
 0x486   : > { %13290 = vst [vmem:[#allocation18_spill] sm:$0xff] %v11195_v3  ;;  %v3084_v3 = vadd.f32 %v11121_v46, %v11087_v63  ;;  %v3571_v63 = vadd.f32 %v11129_v13, %v3321_v45  ;;  %v3573_v13 = vadd.f32 %v11133_v50, %v3323_v37 }
 0x487   : > { %v11184_v26 = vpop.f32.mrf.mxu0  ;;  %v11186_v24 = vpop.f32.mrf.mxu1 }
 0x488   : > { %13287 = vst [vmem:[#allocation27_spill] sm:$0xff] %v11184_v26  ;;  %13288 = vst [vmem:[#allocation26_spill] sm:$0xff] %v11186_v24  ;;  %v3581_v26 = vadd.f32 %v3555_v9, %v3331_v51  ;;  %v3335_v8 = vadd.f32 %v11119_v29, %v3084_v3  ;;  %v3733_v7 = vadd.f32 %v11127_v10, %v3571_v63 }
 0x489   : > { %v11190_v35 = vpop.f32.mrf.mxu0  ;;  %v11192_v55 = vpop.f32.mrf.mxu1 }
 0x48a   : > { %13289 = vst [vmem:[#allocation19_spill] sm:$0xff] %v11192_v55  ;;  %v3743_v62 = vadd.f32 %v3717_v44, %v3581_v26  ;;  %v11221_v44 = vpop.permute.xlu1 %4794  ;;  %v3585_v41 = vadd.f32 %v3567_v40, %v3335_v8  ;;  %v3983_v40 = vadd.f32 %v11161_v5, %v3733_v7 }
 0x48b   : > { %v3959_v12 = vpop.f32.mrf.mxu0  ;;  %v4209_v58 = vpop.f32.mrf.mxu1 }
 0x48c   : > { %v3990_v24 = vadd.f32 %v3959_v12, %v3740_v43  ;;  %v3583_v43 = vadd.f32 %v3561_v57, %v3333_v19  ;;  %v3732_v57 = vadd.f32 %v11123_v53, %v3570_v32  ;;  %v3735_v19 = vadd.f32 %v11131_v48, %v3573_v13 }
 0x48d   : > { %v3961_v6 = vpop.f32.mrf.mxu0  ;;  %v4211_v52 = vpop.f32.mrf.mxu1  ;;  %v3984_v32 = vadd.f32 %v11165_v15, %v11135_v36 }
 0x48e   : > { %v11202_v55 = vadd.f32 %v4209_v58, %v3990_v24  ;;  %v3991_v25 = vadd.f32 %v3961_v6, %v3741_v18  ;;  %v11213_v58 = vpop.permute.xlu0 %4779  ;;  %v3745_v17 = vadd.f32 %v11149_v21, %v3583_v43  ;;  %v3982_v60 = vadd.f32 %v11157_v30, %v3732_v57  ;;  %v11240_v30 = vpop.permute.xlu1 %4784 }
 0x48f   : > { %v3965_v4 = vpop.f32.mrf.mxu0  ;;  %v4215_v34 = vpop.f32.mrf.mxu1  ;;  %v3747_v21 = vadd.f32 %v11153_v56, %v3585_v41 }
 0x490   : > { %v11209_v59 = vadd.f32 %v4211_v52, %v3991_v25  ;;  %v3992_v14 = vadd.f32 %v3965_v4, %v3742_v28  ;;  %v4232_v45 = vadd.f32 %v11159_v27, %v3982_v60  ;;  %v4234_v27 = vadd.f32 %v11167_v39, %v3984_v32  ;;  %v13293_v32 = vld [vmem:[#allocation28_spill] sm:$0xff] }
 0x491   : > { %v3967_v24 = vpop.f32.mrf.mxu0  ;;  %v4217_v9 = vpop.f32.mrf.mxu1 }
 0x492   : > { %v11217_v46 = vadd.f32 %v4215_v34, %v3992_v14  ;;  %v3993_v31 = vadd.f32 %v3967_v24, %v3743_v62  ;;  %v11232_v52 = vpop.permute.xlu0 %4769  ;;  %v4233_v62 = vadd.f32 %v11163_v1, %v3983_v40  ;;  %v11253_v1 = vpop.permute.xlu1 %4774 }
 0x493   : > { %v3971_v26 = vpop.f32.mrf.mxu0  ;;  %v4221_v28 = vpop.f32.mrf.mxu1 }
 0x494   : > { %v11224_v51 = vadd.f32 %v4217_v9, %v3993_v31  ;;  %v3994_v29 = vadd.f32 %v3971_v26, %v11151_v61 }
 0x495   : > { %v3973_v3 = vpop.f32.mrf.mxu0  ;;  %v4223_v12 = vpop.f32.mrf.mxu1 }
 0x496   : > { %v11230_v53 = vadd.f32 %v4221_v28, %v3994_v29  ;;  %v3995_v18 = vadd.f32 %v3973_v3, %v3745_v17  ;;  %v4760_v24 = vpop.permute.xlu0 %4759 }
 0x497   : > { %v3977_v42 = vpop.f32.mrf.mxu0  ;;  %v4227_v6 = vpop.f32.mrf.mxu1 }
 0x498   : > { %v11236_v61 = vadd.f32 %v4223_v12, %v3995_v18  ;;  %v3996_v50 = vadd.f32 %v3977_v42, %v11155_v23  ;;  %v3985_v23 = vadd.f32 %v11169_v20, %v3735_v19  ;;  %v3054_v20 = vadd.f32 %v11097_v0, %v11077_v33  ;;  %v4765_v0 = vpop.permute.xlu1 %4764 }
 0x499   : > { %v3979_v10 = vpop.f32.mrf.mxu0  ;;  %v4229_v25 = vpop.f32.mrf.mxu1  ;;  %v3986_v18 = vadd.f32 %v11173_v16, %v11141_v11 }
 0x49a   : > { %v11245_v4 = vadd.f32 %v4227_v6, %v3996_v50  ;;  %v3997_v56 = vadd.f32 %v3979_v10, %v3747_v21  ;;  %v4235_v63 = vadd.f32 %v11171_v2, %v3985_v23  ;;  %v3325_v39 = vadd.f32 %v11103_v47, %v3054_v20  ;;  %v13292_v50 = vld [vmem:[#allocation22_spill] sm:$0xff] }
 0x49b   : > { %v4435_v34 = vpop.f32.mrf.mxu0  ;;  %v4685_v5 = vpop.f32.mrf.mxu1  ;;  %v4236_v19 = vadd.f32 %v13292_v50, %v3986_v18 }
 0x49c   : > { %v11249_v43 = vadd.f32 %v4229_v25, %v3997_v56  ;;  %v4482_v48 = vadd.f32 %v4435_v34, %v4232_v45  ;;  %v3575_v12 = vadd.f32 %v11139_v22, %v3325_v39  ;;  %v13291_v22 = vld [vmem:[#allocation15_spill] sm:$0xff]  ;;  %v13294_v56 = vld [vmem:[#allocation29_spill] sm:$0xff] }
 0x49d   : > { %v4437_v14 = vpop.f32.mrf.mxu0  ;;  %v4687_v49 = vpop.f32.mrf.mxu1  ;;  %v3060_v34 = vadd.f32 %v13294_v56, %v13293_v32 }
 0x49e   : > { %v4483_v9 = vadd.f32 %v4437_v14, %v4233_v62  ;;  %v4732_v8 = vadd.f32 %v4685_v5, %v4482_v48  ;;  %v3737_v47 = vadd.f32 %v11137_v54, %v3575_v12  ;;  %v13295_v48 = vld [vmem:[#allocation32_spill] sm:$0xff] }
 0x49f   : > { %v4441_v36 = vpop.f32.mrf.mxu0  ;;  %v4691_v15 = vpop.f32.mrf.mxu1  ;;  %v3327_v14 = vadd.f32 %v13295_v48, %v3060_v34 }
 0x4a0   : > { %v4797_v31 = vadd.f32 %v4760_v24, %v4732_v8  ;;  %v4484_v37 = vadd.f32 %v4441_v36, %v4234_v27  ;;  %v4733_v57 = vadd.f32 %v4687_v49, %v4483_v9  ;;  %v3987_v21 = vadd.f32 %v13291_v22, %v3737_v47  ;;  %v13297_v8 = vld [vmem:[#allocation33_spill] sm:$0xff] }
 0x4a1   : > { %v4443_v26 = vpop.f32.mrf.mxu0  ;;  %v4693_v29 = vpop.f32.mrf.mxu1 }
 0x4a2   : > { %vm4813_vm3 = vcmp.ge.f32.partialorder %v4797_v31, 0.0  ;;  %v4829_v28 = vmul.f32 0.2, %v4797_v31  ;;  %v4798_v17 = vadd.f32 %v4760_v24, %v4733_v57  ;;  %v4485_v41 = vadd.f32 %v4443_v26, %v4235_v63  ;;  %v13299_v63 = vld [vmem:[#allocation27_spill] sm:$0xff] }
 0x4a3   : > { %v4734_v3 = vadd.f32 %v4691_v15, %v4484_v37  ;;  %v4447_v6 = vpop.f32.mrf.mxu0  ;;  %v4697_v25 = vpop.f32.mrf.mxu1  ;;  %v4237_v11 = vadd.f32 %v11181_v38, %v3987_v21  ;;  %v13296_v38 = vld [vmem:[#allocation30_spill] sm:$0xff]  ;;  %v13298_v15 = vld [vmem:[#allocation23_spill] sm:$0xff] }
 0x4a4   : > { %v11258_v13 = vsel %vm4813_vm3, %v4797_v31, %v4829_v28  ;;  %vm4814_vm13 = vcmp.ge.f32.partialorder %v4798_v17, 0.0  ;;  %v4830_v2 = vmul.f32 0.2, %v4798_v17  ;;  %v4735_v33 = vadd.f32 %v4693_v29, %v4485_v41  ;;  %v13300_v28 = vld [vmem:[#allocation26_spill] sm:$0xff] }
 0x4a5   : > { %5030 = vrot.lane.b32.xlu0 %v11258_v13, %s8178_s19  ;;  %v4799_v60 = vadd.f32 %v4765_v0, %v4734_v3  ;;  %v4449_v54 = vpop.f32.mrf.mxu0  ;;  %v4486_v45 = vadd.f32 %v4447_v6, %v4236_v19  ;;  %v4699_v23 = vpop.f32.mrf.mxu1  ;;  %v3577_v24 = vadd.f32 %v13296_v38, %v3327_v14  ;;  %v3988_v31 = vadd.f32 %v13299_v63, %v13298_v15 }
 0x4a6   : > { %v11263_v7 = vsel %vm4814_vm13, %v4798_v17, %v4830_v2  ;;  %v4800_v42 = vadd.f32 %v4765_v0, %v4735_v33  ;;  %v4487_v62 = vadd.f32 %v4449_v54, %v4237_v11 }
 0x4a7   : > { %5006 = vrot.lane.b32.xlu1 %v11263_v7, %s8178_s19  ;;  %v4831_v40 = vmul.f32 0.2, %v4799_v60  ;;  %vm4815_vm1 = vcmp.ge.f32.partialorder %v4799_v60, 0.0  ;;  %v4736_v49 = vadd.f32 %v4697_v25, %v4486_v45  ;;  %v3739_v36 = vadd.f32 %v13297_v8, %v3577_v24  ;;  %v4453_v57 = vpop.f32.mrf.mxu0  ;;  %v4703_v29 = vpop.f32.mrf.mxu1 }
 0x4a8   : > { %v4832_v10 = vmul.f32 0.2, %v4800_v42  ;;  %vm4816_vm14 = vcmp.ge.f32.partialorder %v4800_v42, 0.0  ;;  %v4737_v27 = vadd.f32 %v4699_v23, %v4487_v62  ;;  %v4238_v17 = vadd.f32 %v13300_v28, %v3988_v31 }
 0x4a9   : > { %4933 = vrot.lane.b32.xlu0 %v11258_v13, %s8179_s20  ;;  %v11281_v16 = vsel %vm4815_vm1, %v4799_v60, %v4831_v40  ;;  %v4801_v9 = vadd.f32 %v11232_v52, %v4736_v49  ;;  %v3989_v20 = vadd.f32 %v11190_v35, %v3739_v36  ;;  %v4455_v39 = vpop.f32.mrf.mxu0  ;;  %v4705_v0 = vpop.f32.mrf.mxu1 }
 0x4aa   : > { %v11287_v5 = vsel %vm4816_vm14, %v4800_v42, %v4832_v10  ;;  %v4802_v37 = vadd.f32 %v11232_v52, %v4737_v27  ;;  %v13301_v52 = vld [vmem:[#allocation19_spill] sm:$0xff]  ;;  %v4488_v12 = vadd.f32 %v4453_v57, %v4238_v17 }
 0x4ab   : > { %4901 = vrot.lane.b32.xlu1 %v11263_v7, %s8179_s20  ;;  %v4833_v26 = vmul.f32 0.2, %v4801_v9  ;;  %vm4817_vm3 = vcmp.ge.f32.partialorder %v4801_v9, 0.0  ;;  %v4239_v2 = vadd.f32 %v13301_v52, %v3989_v20  ;;  %v4459_v6 = vpop.f32.mrf.mxu0  ;;  %v4709_v50 = vpop.f32.mrf.mxu1 }
 0x4ac   : > { %v4834_v41 = vmul.f32 0.2, %v4802_v37  ;;  %vm4818_vm13 = vcmp.ge.f32.partialorder %v4802_v37, 0.0  ;;  %v4738_v60 = vadd.f32 %v4703_v29, %v4488_v12 }
 0x4ad   : > { %5401 = vrot.lane.b32.xlu0 %v11258_v13, %s8180_s21  ;;  %v11313_v3 = vsel %vm4817_vm3, %v4801_v9, %v4833_v26  ;;  %v4489_v33 = vadd.f32 %v4455_v39, %v4239_v2  ;;  %v4461_v40 = vpop.f32.mrf.mxu0  ;;  %v4711_v25 = vpop.f32.mrf.mxu1 }
 0x4ae   : > { %v11317_v35 = vsel %vm4818_vm13, %v4802_v37, %v4834_v41  ;;  %v4803_v18 = vadd.f32 %v11253_v1, %v4738_v60  ;;  %v4491_v54 = vadd.f32 %v4461_v40, %v11209_v59 }
 0x4af   : > { %5377 = vrot.lane.b32.xlu1 %v11263_v7, %s8180_s21  ;;  %v4739_v47 = vadd.f32 %v4705_v0, %v4489_v33  ;;  %v4465_v59 = vpop.f32.mrf.mxu0  ;;  %v4715_v23 = vpop.f32.mrf.mxu1 }
 0x4b0   : > { %v4835_v22 = vmul.f32 0.2, %v4803_v18  ;;  %vm4819_vm1 = vcmp.ge.f32.partialorder %v4803_v18, 0.0  ;;  %v4741_v45 = vadd.f32 %v4711_v25, %v4491_v54 }
 0x4b1   : > { %5032 = vrot.lane.b32.xlu0 %v11281_v16, %s8178_s19  ;;  %v4804_v42 = vadd.f32 %v11253_v1, %v4739_v47  ;;  %v4490_v1 = vadd.f32 %v4459_v6, %v11202_v55  ;;  %v4467_v62 = vpop.f32.mrf.mxu0  ;;  %v4717_v38 = vpop.f32.mrf.mxu1 }
 0x4b2   : > { %v11335_v19 = vsel %vm4819_vm1, %v4803_v18, %v4835_v22  ;;  %v4806_v32 = vadd.f32 %v11213_v58, %v4741_v45  ;;  %v4493_v49 = vadd.f32 %v4467_v62, %v11224_v51 }
 0x4b3   : > { %5008 = vrot.lane.b32.xlu1 %v11287_v5, %s8178_s19  ;;  %v4836_v21 = vmul.f32 0.2, %v4804_v42  ;;  %vm4820_vm14 = vcmp.ge.f32.partialorder %v4804_v42, 0.0  ;;  %v4740_v11 = vadd.f32 %v4709_v50, %v4490_v1  ;;  %v4471_v51 = vpop.f32.mrf.mxu0  ;;  %v4721_v63 = vpop.f32.mrf.mxu1 }
 0x4b4   : > { %v4838_v34 = vmul.f32 0.2, %v4806_v32  ;;  %vm4822_vm13 = vcmp.ge.f32.partialorder %v4806_v32, 0.0  ;;  %v4743_v27 = vadd.f32 %v4717_v38, %v4493_v49 }
 0x4b5   : > { %4935 = vrot.lane.b32.xlu0 %v11281_v16, %s8179_s20  ;;  %v11340_v10 = vsel %vm4820_vm14, %v4804_v42, %v4836_v21  ;;  %v4805_v55 = vadd.f32 %v11213_v58, %v4740_v11  ;;  %v4492_v58 = vadd.f32 %v4465_v59, %v11217_v46  ;;  %v4473_v15 = vpop.f32.mrf.mxu0  ;;  %v4723_v20 = vpop.f32.mrf.mxu1 }
 0x4b6   : > { %v11364_v14 = vsel %vm4822_vm13, %v4806_v32, %v4838_v34  ;;  %v4808_v9 = vadd.f32 %v11240_v30, %v4743_v27  ;;  %v4495_v57 = vadd.f32 %v4473_v15, %v11236_v61 }
 0x4b7   : > { %4903 = vrot.lane.b32.xlu1 %v11287_v5, %s8179_s20  ;;  %v4837_v56 = vmul.f32 0.2, %v4805_v55  ;;  %vm4821_vm3 = vcmp.ge.f32.partialorder %v4805_v55, 0.0  ;;  %13302 = vst [vmem:[#allocation14_spill] sm:$0xff] %v11364_v14  ;;  %v4742_v24 = vadd.f32 %v4715_v23, %v4492_v58  ;;  %v4477_v61 = vpop.f32.mrf.mxu0  ;;  %v4727_v2 = vpop.f32.mrf.mxu1 }
 0x4b8   : > { %v4840_v36 = vmul.f32 0.2, %v4808_v9  ;;  %vm4824_vm14 = vcmp.ge.f32.partialorder %v4808_v9, 0.0  ;;  %v4745_v28 = vadd.f32 %v4723_v20, %v4495_v57  ;;  %v4496_v33 = vadd.f32 %v4477_v61, %v11245_v4 }
 0x4b9   : > { %5403 = vrot.lane.b32.xlu0 %v11281_v16, %s8180_s21  ;;  %v11359_v48 = vsel %vm4821_vm3, %v4805_v55, %v4837_v56  ;;  %v4807_v46 = vadd.f32 %v11240_v30, %v4742_v24  ;;  %v4494_v30 = vadd.f32 %v4471_v51, %v11230_v53  ;;  %v13305_v53 = vld [vmem:[#allocation18_spill] sm:$0xff]  ;;  %v4479_v52 = vpop.f32.mrf.mxu0  ;;  %v4729_v47 = vpop.f32.mrf.mxu1 }
 0x4ba   : > { %v11388_v37 = vsel %vm4824_vm14, %v4808_v9, %v4840_v36  ;;  %v4810_v41 = vadd.f32 %v13305_v53, %v4745_v28  ;;  %v4497_v60 = vadd.f32 %v4479_v52, %v11249_v43  ;;  %v4746_v18 = vadd.f32 %v4727_v2, %v4496_v33 }
 0x4bb   : > { %5379 = vrot.lane.b32.xlu1 %v11287_v5, %s8180_s21  ;;  %v4839_v8 = vmul.f32 0.2, %v4807_v46  ;;  %vm4823_vm1 = vcmp.ge.f32.partialorder %v4807_v46, 0.0  ;;  %13304 = vst [vmem:[#allocation25_spill] sm:$0xff] %v11388_v37  ;;  %v4744_v26 = vadd.f32 %v4721_v63, %v4494_v30 }
 0x4bc   : > { %v4842_v29 = vmul.f32 0.2, %v4810_v41  ;;  %vm4826_vm13 = vcmp.ge.f32.partialorder %v4810_v41, 0.0  ;;  %v4747_v42 = vadd.f32 %v4729_v47, %v4497_v60  ;;  %v4811_v4 = vadd.f32 %v11221_v44, %v4746_v18 }
 0x4bd   : > { %5653 = vrot.lane.b32.xlu0 %v11281_v16, %s8181_s22  ;;  %v11383_v31 = vsel %vm4823_vm1, %v4807_v46, %v4839_v8  ;;  %v4809_v17 = vadd.f32 %v13305_v53, %v4744_v26 }
 0x4be   : > { %13303 = vst [vmem:[#allocation31_spill] sm:$0xff] %v11383_v31  ;;  %v11412_v0 = vsel %vm4826_vm13, %v4810_v41, %v4842_v29  ;;  %v4812_v6 = vadd.f32 %v11221_v44, %v4747_v42  ;;  %v4843_v43 = vmul.f32 0.2, %v4811_v4  ;;  %vm4827_vm1 = vcmp.ge.f32.partialorder %v4811_v4, 0.0 }
 0x4bf   : > { %5629 = vrot.lane.b32.xlu1 %v11287_v5, %s8181_s22  ;;  %v4841_v39 = vmul.f32 0.2, %v4809_v17  ;;  %vm4825_vm3 = vcmp.ge.f32.partialorder %v4809_v17, 0.0 }
 0x4c0   : > { %v4844_v22 = vmul.f32 0.2, %v4812_v6  ;;  %vm4828_vm14 = vcmp.ge.f32.partialorder %v4812_v6, 0.0  ;;  %v11431_v21 = vsel %vm4827_vm1, %v4811_v4, %v4843_v43 }
 0x4c1   : > { %5034 = vrot.lane.b32.xlu0 %v11313_v3, %s8178_s19  ;;  %v11407_v12 = vsel %vm4825_vm3, %v4809_v17, %v4841_v39  ;;  %vm13314_vm3 = vcmask 7168  }
 0x4c2   : > { %v11435_v40 = vsel %vm4828_vm14, %v4812_v6, %v4844_v22  ;;  %vm13316_vm13 = vmmov %vm13314_vm3 }
 0x4c3   : > { %5010 = vrot.lane.b32.xlu1 %v11317_v35, %s8178_s19  ;;  %vm13318_vm1 = vmmov %vm13314_vm3 }
 0x4c4   : > { %vm13320_vm14 = vmmov %vm13318_vm1 }
 0x4c5   : > { %4937 = vrot.lane.b32.xlu0 %v11313_v3, %s8179_s20 }
 0x4c7   : > { %4905 = vrot.lane.b32.xlu1 %v11317_v35, %s8179_s20 }
 0x4c9   : > { %5405 = vrot.lane.b32.xlu0 %v11313_v3, %s8180_s21 }
 0x4cb   : > { %5381 = vrot.lane.b32.xlu1 %v11317_v35, %s8180_s21 }
 0x4cd   : > { %5655 = vrot.lane.b32.xlu0 %v11313_v3, %s8181_s22 }
 0x4cf   : > { %5631 = vrot.lane.b32.xlu1 %v11317_v35, %s8181_s22 }
 0x4d1   : > { %5036 = vrot.lane.b32.xlu0 %v11335_v19, %s8178_s19 }
 0x4d3   : > { %5012 = vrot.lane.b32.xlu1 %v11340_v10, %s8178_s19 }
 0x4d5   : > { %4939 = vrot.lane.b32.xlu0 %v11335_v19, %s8179_s20 }
 0x4d7   : > { %4907 = vrot.lane.b32.xlu1 %v11340_v10, %s8179_s20 }
 0x4d9   : > { %5407 = vrot.lane.b32.xlu0 %v11335_v19, %s8180_s21 }
 0x4db   : > { %5383 = vrot.lane.b32.xlu1 %v11340_v10, %s8180_s21 }
 0x4dd   : > { %5657 = vrot.lane.b32.xlu0 %v11335_v19, %s8181_s22 }
 0x4df   : > { %5633 = vrot.lane.b32.xlu1 %v11340_v10, %s8181_s22 }
 0x4e1   : > { %5038 = vrot.lane.b32.xlu0 %v11359_v48, %s8178_s19 }
 0x4e3   : > { %5014 = vrot.lane.b32.xlu1 %v11364_v14, %s8178_s19 }
 0x4e5   : > { %4941 = vrot.lane.b32.xlu0 %v11359_v48, %s8179_s20 }
 0x4e7   : > { %4909 = vrot.lane.b32.xlu1 %v11364_v14, %s8179_s20 }
 0x4e9   : > { %5409 = vrot.lane.b32.xlu0 %v11359_v48, %s8180_s21 }
 0x4eb   : > { %5385 = vrot.lane.b32.xlu1 %v11364_v14, %s8180_s21 }
 0x4ed   : > { %5659 = vrot.lane.b32.xlu0 %v11359_v48, %s8181_s22 }
 0x4ef   : > { %5635 = vrot.lane.b32.xlu1 %v11364_v14, %s8181_s22 }
 0x4f1   : > { %5040 = vrot.lane.b32.xlu0 %v11383_v31, %s8178_s19 }
 0x4f3   : > { %5016 = vrot.lane.b32.xlu1 %v11388_v37, %s8178_s19 }
 0x4f5   : > { %4943 = vrot.lane.b32.xlu0 %v11383_v31, %s8179_s20 }
 0x4f7   : > { %4911 = vrot.lane.b32.xlu1 %v11388_v37, %s8179_s20 }
 0x4f9   : > { %5411 = vrot.lane.b32.xlu0 %v11383_v31, %s8180_s21 }
 0x4fb   : > { %5387 = vrot.lane.b32.xlu1 %v11388_v37, %s8180_s21 }
 0x4fd   : > { %5661 = vrot.lane.b32.xlu0 %v11383_v31, %s8181_s22 }
 0x4ff   : > { %5637 = vrot.lane.b32.xlu1 %v11388_v37, %s8181_s22 }
 0x501   : > { %5042 = vrot.lane.b32.xlu0 %v11407_v12, %s8178_s19 }
 0x503   : > { %5018 = vrot.lane.b32.xlu1 %v11412_v0, %s8178_s19 }
 0x505   : > { %4945 = vrot.lane.b32.xlu0 %v11407_v12, %s8179_s20 }
 0x507   : > { %4913 = vrot.lane.b32.xlu1 %v11412_v0, %s8179_s20 }
 0x509   : > { %5413 = vrot.lane.b32.xlu0 %v11407_v12, %s8180_s21 }
 0x50b   : > { %5389 = vrot.lane.b32.xlu1 %v11412_v0, %s8180_s21 }
 0x50d   : > { %5663 = vrot.lane.b32.xlu0 %v11407_v12, %s8181_s22 }
 0x50f   : > { %5639 = vrot.lane.b32.xlu1 %v11412_v0, %s8181_s22 }
 0x511   : > { %5044 = vrot.lane.b32.xlu0 %v11431_v21, %s8178_s19 }
 0x513   : > { %5020 = vrot.lane.b32.xlu1 %v11435_v40, %s8178_s19 }
 0x515   : > { %4947 = vrot.lane.b32.xlu0 %v11431_v21, %s8179_s20 }
 0x517   : > { %v11441_v44 = vpop.permute.xlu0 %5030  ;;  %5627 = vrot.lane.b32.xlu1 %v11263_v7, %s8181_s22 }
 0x519   : > { %5415 = vrot.lane.b32.xlu0 %v11431_v21, %s8180_s21  ;;  %v11447_v50 = vpop.permute.xlu1 %5006 }
 0x51b   : > { %v11449_v1 = vpop.permute.xlu0 %4933  ;;  %6067 = vrot.lane.b32.xlu1 %v11431_v21, %s8182_s23 }
 0x51d   : > { %5665 = vrot.lane.b32.xlu0 %v11431_v21, %s8181_s22  ;;  %v11455_v54 = vpop.permute.xlu1 %4901 }
 0x51f   : > { %v11457_v25 = vpop.permute.xlu0 %5401  ;;  %6063 = vrot.lane.b32.xlu1 %v11407_v12, %s8182_s23 }
 0x521   : > { %5651 = vrot.lane.b32.xlu0 %v11258_v13, %s8181_s22  ;;  %v11463_v11 = vpop.permute.xlu1 %5377 }
 0x523   : > { %6317 = vrot.lane.b32.xlu1 %v11431_v21, %s8183_s24  ;;  %v11467_v45 = vpop.permute.xlu0 %5032 }
 0x525   : > { %6065 = vrot.lane.b32.xlu0 %v11412_v0, %s8182_s23  ;;  %v11471_v55 = vpop.permute.xlu1 %5008 }
 0x527   : > { %6059 = vrot.lane.b32.xlu1 %v11383_v31, %s8182_s23  ;;  %v11475_v32 = vpop.permute.xlu0 %4935 }
 0x529   : > { %6061 = vrot.lane.b32.xlu0 %v11388_v37, %s8182_s23  ;;  %v11479_v59 = vpop.permute.xlu1 %4903 }
 0x52b   : > { %6313 = vrot.lane.b32.xlu1 %v11407_v12, %s8183_s24  ;;  %v11483_v56 = vpop.permute.xlu0 %5403 }
 0x52d   : > { %6315 = vrot.lane.b32.xlu0 %v11412_v0, %s8183_s24  ;;  %v11487_v34 = vpop.permute.xlu1 %5379 }
 0x52f   : > { %4915 = vrot.lane.b32.xlu1 %v11435_v40, %s8179_s20  ;;  %v11491_v62 = vpop.permute.xlu0 %5653  ;;  %s12995_s20 = scalar_lea.vmem %s13041_s3, %s8131_s15 }
 0x530   : > { %13306 = vst [vmem:[#allocation24_spill] sm:$0xff] %v11491_v62 }
 0x531   : > { %6057 = vrot.lane.b32.xlu0 %v11364_v14, %s8182_s23  ;;  %v11495_v23 = vpop.permute.xlu1 %5629 }
 0x532   : > { %13307 = vst [vmem:[#allocation17_spill] sm:$0xff] %v11495_v23 }
 0x533   : > { %5391 = vrot.lane.b32.xlu1 %v11435_v40, %s8180_s21  ;;  %v11499_v58 = vpop.permute.xlu0 %5034 }
 0x535   : > { %6311 = vrot.lane.b32.xlu0 %v11388_v37, %s8183_s24  ;;  %v11503_v49 = vpop.permute.xlu1 %5010 }
 0x537   : > { %6055 = vrot.lane.b32.xlu1 %v11359_v48, %s8182_s23  ;;  %v11507_v38 = vpop.permute.xlu0 %4937 }
 0x539   : > { %6053 = vrot.lane.b32.xlu0 %v11340_v10, %s8182_s23  ;;  %v11511_v24 = vpop.permute.xlu1 %4905 }
 0x53b   : > { %6309 = vrot.lane.b32.xlu1 %v11383_v31, %s8183_s24  ;;  %v11515_v27 = vpop.permute.xlu0 %5405 }
 0x53d   : > { %6307 = vrot.lane.b32.xlu0 %v11364_v14, %s8183_s24  ;;  %v11519_v46 = vpop.permute.xlu1 %5381 }
 0x53f   : > { %6051 = vrot.lane.b32.xlu1 %v11335_v19, %s8182_s23  ;;  %v11523_v9 = vpop.permute.xlu0 %5655 }
 0x540   : > { %13308 = vst [vmem:[#allocation16_spill] sm:$0xff] %v11523_v9 }
 0x541   : > { %6049 = vrot.lane.b32.xlu0 %v11317_v35, %s8182_s23  ;;  %v11527_v51 = vpop.permute.xlu1 %5631 }
 0x542   : > { %13309 = vst [vmem:[#allocation13_spill] sm:$0xff] %v11527_v51 }
 0x543   : > { %6305 = vrot.lane.b32.xlu1 %v11359_v48, %s8183_s24  ;;  %v11531_v8 = vpop.permute.xlu0 %5036 }
 0x545   : > { %6303 = vrot.lane.b32.xlu0 %v11340_v10, %s8183_s24  ;;  %v11535_v36 = vpop.permute.xlu1 %5012 }
 0x547   : > { %6047 = vrot.lane.b32.xlu1 %v11313_v3, %s8182_s23  ;;  %v11539_v15 = vpop.permute.xlu0 %4939 }
 0x549   : > { %6045 = vrot.lane.b32.xlu0 %v11287_v5, %s8182_s23  ;;  %v11543_v63 = vpop.permute.xlu1 %4907 }
 0x54b   : > { %6301 = vrot.lane.b32.xlu1 %v11335_v19, %s8183_s24  ;;  %v11547_v30 = vpop.permute.xlu0 %5407 }
 0x54d   : > { %6299 = vrot.lane.b32.xlu0 %v11317_v35, %s8183_s24  ;;  %v11551_v57 = vpop.permute.xlu1 %5383 }
 0x54f   : > { %6043 = vrot.lane.b32.xlu1 %v11281_v16, %s8182_s23  ;;  %v11555_v20 = vpop.permute.xlu0 %5657 }
 0x550   : > { %13310 = vst [vmem:[#allocation20_spill] sm:$0xff] %v11555_v20 }
 0x551   : > { %6041 = vrot.lane.b32.xlu0 %v11263_v7, %s8182_s23  ;;  %v11559_v26 = vpop.permute.xlu1 %5633 }
 0x552   : > { %13311 = vst [vmem:[#allocation21_spill] sm:$0xff] %v11559_v26 }
 0x553   : > { %5641 = vrot.lane.b32.xlu1 %v11435_v40, %s8181_s22  ;;  %v11563_v28 = vpop.permute.xlu0 %5038 }
 0x555   : > { %6295 = vrot.lane.b32.xlu0 %v11287_v5, %s8183_s24  ;;  %v11567_v53 = vpop.permute.xlu1 %5014 }
 0x557   : > { %6297 = vrot.lane.b32.xlu1 %v11313_v3, %s8183_s24  ;;  %v11571_v17 = vpop.permute.xlu0 %4941 }
 0x559   : > { %6291 = vrot.lane.b32.xlu0 %v11263_v7, %s8183_s24  ;;  %v11575_v41 = vpop.permute.xlu1 %4909 }
 0x55b   : > { %6039 = vrot.lane.b32.xlu1 %v11258_v13, %s8182_s23  ;;  %v11579_v61 = vpop.permute.xlu0 %5409 }
 0x55d   : > { %6565 = vrot.lane.b32.xlu0 %v11412_v0, %s8184_s17  ;;  %v11583_v39 = vpop.permute.xlu1 %5385 }
 0x55f   : > { %6293 = vrot.lane.b32.xlu1 %v11281_v16, %s8183_s24  ;;  %v11587_v29 = vpop.permute.xlu0 %5659 }
 0x560   : > { %13312 = vst [vmem:[#allocation15_spill] sm:$0xff] %v11587_v29 }
 0x561   : > { %6561 = vrot.lane.b32.xlu0 %v11388_v37, %s8184_s17  ;;  %v11591_v52 = vpop.permute.xlu1 %5635 }
 0x562   : > { %13313 = vst [vmem:[#allocation22_spill] sm:$0xff] %v11591_v52 }
 0x563   : > { %6289 = vrot.lane.b32.xlu1 %v11258_v13, %s8183_s24  ;;  %v5041_v2 = vpop.permute.xlu0 %5040 }
 0x565   : > { %6815 = vrot.lane.b32.xlu0 %v11412_v0, %s8185_s27  ;;  %v5017_v33 = vpop.permute.xlu1 %5016 }
 0x567   : > { %6567 = vrot.lane.b32.xlu1 %v11431_v21, %s8184_s17  ;;  %v11599_v60 = vpop.permute.xlu0 %4943 }
 0x569   : > { %6557 = vrot.lane.b32.xlu0 %v11364_v14, %s8184_s17  ;;  %v11603_v47 = vpop.permute.xlu1 %4911 }
 0x56b   : > { %v5412_v18 = vpop.permute.xlu0 %5411  ;;  %6563 = vrot.lane.b32.xlu1 %v11407_v12, %s8184_s17 }
 0x56d   : > { %6069 = vrot.lane.b32.xlu0 %v11435_v40, %s8182_s23  ;;  %v5388_v42 = vpop.permute.xlu1 %5387 }
 0x56e   : > { %v11610_v4 = vsel %vm806_vm8, %v5412_v18, %v5388_v42  ;;  %v11613_v6 = vsel %vm806_vm8, %v5388_v42, %v5412_v18 }
 0x56f   : > { %v5662_v43 = vpop.permute.xlu0 %5661  ;;  %6817 = vrot.lane.b32.xlu1 %v11431_v21, %s8185_s27 }
 0x571   : > { %6319 = vrot.lane.b32.xlu0 %v11435_v40, %s8183_s24  ;;  %v5638_v22 = vpop.permute.xlu1 %5637 }
 0x572   : > { %v11620_v62 = vsel %vm13314_vm3, %v5662_v43, %v5638_v22  ;;  %v11623_v23 = vsel %vm13316_vm13, %v5638_v22, %v5662_v43 }
 0x573   : > { %13315 = vst [vmem:[#allocation28_spill] sm:$0xff] %v11620_v62  ;;  %13317 = vst [vmem:[#allocation29_spill] sm:$0xff] %v11623_v23  ;;  %v5043_v9 = vpop.permute.xlu0 %5042  ;;  %6559 = vrot.lane.b32.xlu1 %v11383_v31, %s8184_s17 }
 0x575   : > { %6811 = vrot.lane.b32.xlu0 %v11388_v37, %s8185_s27  ;;  %v5019_v18 = vpop.permute.xlu1 %5018 }
 0x577   : > { %v11629_v42 = vpop.permute.xlu0 %4945  ;;  %6813 = vrot.lane.b32.xlu1 %v11407_v12, %s8185_s27 }
 0x579   : > { %6553 = vrot.lane.b32.xlu0 %v11340_v10, %s8184_s17  ;;  %v11635_v51 = vpop.permute.xlu1 %4913 }
 0x57b   : > { %v11637_v43 = vpop.permute.xlu0 %5413  ;;  %6555 = vrot.lane.b32.xlu1 %v11359_v48, %s8184_s17 }
 0x57d   : > { %6807 = vrot.lane.b32.xlu0 %v11364_v14, %s8185_s27  ;;  %v11643_v22 = vpop.permute.xlu1 %5389 }
 0x57f   : > { %v5664_v20 = vpop.permute.xlu0 %5663  ;;  %6809 = vrot.lane.b32.xlu1 %v11383_v31, %s8185_s27 }
 0x581   : > { %6549 = vrot.lane.b32.xlu0 %v11317_v35, %s8184_s17  ;;  %v5640_v26 = vpop.permute.xlu1 %5639 }
 0x582   : > { %v11650_v29 = vsel %vm13318_vm1, %v5664_v20, %v5640_v26  ;;  %v11653_v52 = vsel %vm13320_vm14, %v5640_v26, %v5664_v20  ;;  %v13322_v20 = vld [vmem:[#allocation3_spill] sm:$0xff]  ;;  %v5052_v26 = vsel %vm429_vm0, %v5043_v9, %v5019_v18 }
 0x583   : > { %13319 = vst [vmem:[#allocation32_spill] sm:$0xff] %v11650_v29  ;;  %13321 = vst [vmem:[#allocation30_spill] sm:$0xff] %v11653_v52  ;;  %v5045_v23 = vpop.permute.xlu0 %5044  ;;  %6551 = vrot.lane.b32.xlu1 %v11335_v19, %s8184_s17  ;;  %vm13323_vm3 = vcmp.ge.s32.totalorder %v13322_v20, 16  ;;  %v5076_v52 = vsel %vm429_vm0, %v5019_v18, %v5043_v9  ;;  %v5074_v9 = vsel %vm429_vm0, %v11567_v53, %v11563_v28 }
 0x584   : > { %vm13324_vm13 = vmmov %vm13323_vm3 }
 0x585   : > { %6803 = vrot.lane.b32.xlu0 %v11340_v10, %s8185_s27  ;;  %v5021_v62 = vpop.permute.xlu1 %5020  ;;  %vm13325_vm1 = vmmov %vm13323_vm3 }
 0x586   : > { %v5077_v14 = vsel %vm429_vm0, %v5021_v62, %v5045_v23  ;;  %v5053_v31 = vsel %vm429_vm0, %v5045_v23, %v5021_v62  ;;  %v5051_v62 = vsel %vm429_vm0, %v5041_v2, %v5017_v33  ;;  %v5075_v23 = vsel %vm429_vm0, %v5017_v33, %v5041_v2  ;;  %vm13326_vm14 = vmmov %vm13325_vm1 }
 0x587   : > { %v11661_v37 = vpop.permute.xlu0 %4947  ;;  %6805 = vrot.lane.b32.xlu1 %v11359_v48, %s8185_s27  ;;  %5143 = vmatprep.subr.mxu0 %v5053_v31  ;;  %v5049_v2 = vsel %vm429_vm0, %v11531_v8, %v11535_v36  ;;  %v5073_v33 = vsel %vm429_vm0, %v11535_v36, %v11531_v8  ;;  %v5047_v36 = vsel %vm429_vm0, %v11467_v45, %v11471_v55 }
 0x588   : > { %7881 = vmatpush1.msk.msra.mxu0 %vm13323_vm3, %v5077_v14  ;;  %v5050_v14 = vsel %vm429_vm0, %v11563_v28, %v11567_v53  ;;  %vm13327_vm3 = vmmov %vm13325_vm1  ;;  %v5048_v28 = vsel %vm429_vm0, %v11499_v58, %v11503_v49  ;;  %v5072_v53 = vsel %vm429_vm0, %v11503_v49, %v11499_v58 }
 0x589   : > { %6545 = vrot.lane.b32.xlu0 %v11287_v5, %s8184_s17  ;;  %5145 = vmatprep.subr.mxu0 %v5052_v26  ;;  %v5628_v29 = vpop.permute.xlu1 %5627  ;;  %v5071_v26 = vsel %vm429_vm0, %v11471_v55, %v11467_v45  ;;  %v7873_v45 = vld [vmem:[%s13039_s1 + $0x4c0] sm:$0xff]  ;;  %v5070_v55 = vsel %vm429_vm0, %v11447_v50, %v11441_v44 }
 0x58a   : > { %7882 = vmatpush1.msk.msra.mxu0 %vm13324_vm13, %v5076_v52  ;;  %vm13328_vm13 = vmmov %vm13325_vm1 }
 0x58b   : > { %v11675_v31 = vpop.permute.xlu0 %5415  ;;  %6547 = vrot.lane.b32.xlu1 %v11313_v3, %s8184_s17  ;;  %5147 = vmatprep.subr.mxu0 %v5051_v62 }
 0x58c   : > { %7883 = vmatpush1.msk.msra.mxu0 %vm13325_vm1, %v5075_v23  ;;  %vm13329_vm1 = vcmask 7168   ;;  %v5046_v23 = vsel %vm429_vm0, %v11441_v44, %v11447_v50  ;;  %v13334_v50 = vmov 0.0  }
 0x58d   : > { %6569 = vrot.lane.b32.xlu0 %v11435_v40, %s8184_s17  ;;  %5149 = vmatprep.subr.mxu0 %v5050_v14  ;;  %v11689_v52 = vpop.permute.xlu1 %6067 }
 0x58e   : > { %7884 = vmatpush1.msk.msra.mxu0 %vm13326_vm14, %v5074_v9  ;;  %vm13330_vm14 = vmmov %vm13329_vm1 }
 0x58f   : > { %v11699_v18 = vpop.permute.xlu0 %5665  ;;  %6801 = vrot.lane.b32.xlu1 %v11335_v19, %s8185_s27  ;;  %5151 = vmatprep.subr.mxu0 %v5049_v2  ;;  %v7874_v2 = vld [vmem:[%s13039_s1 + $0x4c8] sm:$0xff] }
 0x590   : > { %7885 = vmatpush1.msk.msra.mxu0 %vm13327_vm3, %v5073_v33 }
 0x591   : > { %6819 = vrot.lane.b32.xlu0 %v11435_v40, %s8185_s27  ;;  %5153 = vmatprep.subr.mxu0 %v5048_v28  ;;  %v6064_v8 = vpop.permute.xlu1 %6063 }
 0x592   : > { %7886 = vmatpush1.msk.msra.mxu0 %vm13328_vm13, %v5072_v53  ;;  %vm13331_vm13 = vmmov %vm13327_vm3 }
 0x593   : > { %v5652_v62 = vpop.permute.xlu0 %5651  ;;  %6543 = vrot.lane.b32.xlu1 %v11281_v16, %s8184_s17  ;;  %5155 = vmatprep.subr.mxu0 %v5047_v36 }
 0x594   : > { %v11724_v58 = vsel %vm13329_vm1, %v5652_v62, %v5628_v29  ;;  %v11727_v49 = vsel %vm13330_vm14, %v5628_v29, %v5652_v62  ;;  %7887 = vmatpush1.msk.msra.mxu0 %vm13327_vm3, %v5071_v26  ;;  %vm13332_vm1 = vcmask 1039360  }
 0x595   : > { %6799 = vrot.lane.b32.xlu0 %v11317_v35, %s8185_s27  ;;  %5157 = vmatprep.subr.mxu0 %v5046_v23  ;;  %v11742_v29 = vpop.permute.xlu1 %6317  ;;  %vm13333_vm14 = vmmov %vm13332_vm1 }
 0x596   : > { %7888 = vmatpush1.msk.msra.mxu0 %vm13331_vm13, %v5070_v55  ;;  %vm13335_vm0 = vmmov %vm13332_vm1  ;;  %vm13337_vm13 = vcmask 924672  }
 0x597   : > { %v6066_v14 = vpop.permute.xlu0 %6065  ;;  %6797 = vrot.lane.b32.xlu1 %v11313_v3, %s8185_s27  ;;  %7889 = vmatmul.mubr.msk.f32.vlgmr.msra.gmra.mxu0 %vm491_vm4, %v7873_v45  ;;  %vm13336_vm3 = vmmov %vm13335_vm0  ;;  %v7876_v45 = vld [vmem:[%s13039_s1 + $0x4d8] sm:$0xff] }
 0x598   : > { %v11750_v9 = vsel %vm13332_vm1, %v6064_v8, %v6066_v14  ;;  %v11753_v44 = vsel %vm13333_vm14, %v6066_v14, %v6064_v8  ;;  %5197 = vmatprep.mubr.f32.mxu0 %v13334_v50  ;;  %v7875_v8 = vld [vmem:[%s13039_s1 + $0x4d0] sm:$0xff]  ;;  %vm13339_vm1 = vmmov %vm13337_vm13  ;;  %vm13341_vm14 = vcmask 138240  }
 0x599   : > { %6541 = vrot.lane.b32.xlu0 %v11263_v7, %s8184_s17  ;;  %v6060_v20 = vpop.permute.xlu1 %6059 }
 0x59b   : > { %v6062_v33 = vpop.permute.xlu0 %6061  ;;  %6539 = vrot.lane.b32.xlu1 %v11258_v13, %s8184_s17  ;;  %7890 = vmatmul.mubr.msk.f32.gmra.mxu0 %vm491_vm4, %v7874_v2 }
 0x59c   : > { %v11765_v28 = vsel %vm13335_vm0, %v6060_v20, %v6062_v33  ;;  %v11768_v53 = vsel %vm13336_vm3, %v6062_v33, %v6060_v20  ;;  %5203 = vmatprep.mubr.f32.mxu0 %v13334_v50  ;;  %vm13342_vm0 = vmmov %vm13341_vm14  ;;  %v8122_v20 = vld [vmem:[%s13040_s2 + $0x88] sm:$0xff] }
 0x59d   : > { %6795 = vrot.lane.b32.xlu0 %v11287_v5, %s8185_s27  ;;  %v6314_v36 = vpop.permute.xlu1 %6313  ;;  %vm13344_vm3 = vmmov %vm13342_vm0 }
 0x59f   : > { %v6316_v26 = vpop.permute.xlu0 %6315  ;;  %6793 = vrot.lane.b32.xlu1 %v11281_v16, %s8185_s27  ;;  %7891 = vmatmul.mubr.msk.f32.gmra.mxu0 %vm491_vm4, %v7875_v8 }
 0x5a0   : > { %v11780_v62 = vsel %vm13337_vm13, %v6314_v36, %v6316_v26  ;;  %v11783_v23 = vsel %vm13339_vm1, %v6316_v26, %v6314_v36  ;;  %5209 = vmatprep.mubr.f32.mxu0 %v13334_v50  ;;  %v4955_v36 = vsel %vm13344_vm3, %v11629_v42, %v11635_v51  ;;  %vm13346_vm13 = vmmov %vm13342_vm0 }
 0x5a1   : > { %13338 = vst [vmem:[#allocation33_spill] sm:$0xff] %v11780_v62  ;;  %13340 = vst [vmem:[#allocation23_spill] sm:$0xff] %v11783_v23  ;;  %6791 = vrot.lane.b32.xlu0 %v11263_v7, %s8185_s27  ;;  %v4916_v55 = vpop.permute.xlu1 %4915 }
 0x5a2   : > { %v4956_v14 = vsel %vm13341_vm14, %v11661_v37, %v4916_v55  ;;  %v4980_v2 = vsel %vm13342_vm0, %v4916_v55, %v11661_v37  ;;  %v8121_v37 = vld [vmem:[%s13040_s2 + $0x80] sm:$0xff]  ;;  %vm13347_vm1 = vmmov %vm13342_vm0 }
 0x5a3   : > { %v11798_v33 = vpop.permute.xlu0 %6057  ;;  %6789 = vrot.lane.b32.xlu1 %v11258_v13, %s8185_s27  ;;  %7892 = vmatmul.mubr.msk.f32.gmra.mxu0 %vm491_vm4, %v7876_v45  ;;  %v7877_v45 = vld [vmem:[%s13039_s1 + $0x4e0] sm:$0xff]  ;;  %vm13348_vm14 = vmmov %vm13342_vm0 }
 0x5a4   : > { %7897 = vmatprep.subr.msk.mxu1 %vm8495_vm5, %v4956_v14  ;;  %5215 = vmatprep.mubr.f32.mxu0 %v13334_v50  ;;  %v4979_v14 = vsel %vm13346_vm13, %v11635_v51, %v11629_v42  ;;  %v8124_v51 = vld [vmem:[%s13040_s2 + $0x98] sm:$0xff]  ;;  %v4978_v42 = vsel %vm13348_vm14, %v11603_v47, %v11599_v60  ;;  %vm13351_vm3 = vmmov %vm13342_vm0 }
 0x5a5   : > { %7898 = vmatpush1.msk.msra.mxu1 %vm8511_vm6, %v4980_v2  ;;  %7055 = vperm.xlu0 %8167, %v8122_v20   ;;  %v5392_v55 = vpop.permute.xlu1 %5391  ;;  %v4954_v2 = vsel %vm13347_vm1, %v11599_v60, %v11603_v47  ;;  %v4953_v60 = vsel %vm13342_vm0, %v11571_v17, %v11575_v41  ;;  %v8123_v47 = vld [vmem:[%s13040_s2 + $0x90] sm:$0xff]  ;;  %vm13352_vm13 = vmmov %vm13342_vm0 }
 0x5a6   : > { %7899 = vmatprep.subr.msk.mxu1 %vm8495_vm5, %v4955_v36  ;;  %v5424_v62 = vsel %vm806_vm8, %v11675_v31, %v5392_v55  ;;  %v5448_v20 = vsel %vm806_vm8, %v5392_v55, %v11675_v31  ;;  %v5423_v36 = vsel %vm806_vm8, %v11637_v43, %v11643_v22  ;;  %vm13353_vm1 = vmmov %vm13342_vm0 }
 0x5a7   : > { %7900 = vmatpush1.msk.msra.mxu1 %vm8511_vm6, %v4979_v14  ;;  %v11831_v23 = vpop.permute.xlu0 %6311  ;;  %7050 = vperm.xlu1 %8168, %v8121_v37   ;;  %v7878_v14 = vld [vmem:[%s13039_s1 + $0x4e8] sm:$0xff]  ;;  %vm13354_vm14 = vmmov %vm13342_vm0 }
 0x5a8   : > { %7893 = vmatmul.mubr.msk.f32.gmra.mxu0 %vm491_vm4, %v7877_v45  ;;  %7901 = vmatprep.subr.msk.mxu1 %vm8495_vm5, %v4954_v2  ;;  %v5447_v2 = vsel %vm806_vm8, %v11643_v22, %v11637_v43  ;;  %v4976_v43 = vsel %vm13353_vm1, %v11543_v63, %v11539_v15  ;;  %vm13357_vm1 = vmmov %vm13342_vm0 }
 0x5a9   : > { %7929 = vmatprep.subr.msk.mxu0 %vm8552_vm9, %v5424_v62  ;;  %7902 = vmatpush1.msk.msra.mxu1 %vm8511_vm6, %v4978_v42  ;;  %v11846_v37 = vpop.permute.xlu1 %6055  ;;  %v4977_v62 = vsel %vm13351_vm3, %v11575_v41, %v11571_v17  ;;  %v4952_v17 = vsel %vm13352_vm13, %v11539_v15, %v11543_v63  ;;  %v8126_v41 = vld [vmem:[%s13040_s2 + $0xa8] sm:$0xff]  ;;  %v4951_v15 = vsel %vm13354_vm14, %v11507_v38, %v11511_v24  ;;  %vm13355_vm3 = vmmov %vm13342_vm0 }
 0x5aa   : > { %7930 = vmatpush1.msk.msra.mxu0 %vm8567_vm10, %v5448_v20  ;;  %7065 = vperm.xlu0 %8167, %v8124_v51   ;;  %v5421_v63 = vsel %vm806_vm8, %v11579_v61, %v11583_v39  ;;  %v4975_v51 = vsel %vm13342_vm0, %v11511_v24, %v11507_v38  ;;  %v4950_v38 = vsel %vm13355_vm3, %v11475_v32, %v11479_v59  ;;  %v8128_v24 = vld [vmem:[%s13040_s2 + $0xb8] sm:$0xff]  ;;  %vm13356_vm13 = vmmov %vm13342_vm0 }
 0x5ab   : > { %7903 = vmatprep.subr.msk.mxu1 %vm8495_vm5, %v4953_v60  ;;  %7931 = vmatprep.subr.msk.mxu0 %vm8552_vm9, %v5423_v36  ;;  %v11866_v45 = vpop.permute.xlu0 %6053  ;;  %v5445_v36 = vsel %vm806_vm8, %v11583_v39, %v11579_v61  ;;  %v4974_v61 = vsel %vm13356_vm13, %v11479_v59, %v11475_v32  ;;  %v5420_v39 = vsel %vm806_vm8, %v11547_v30, %v11551_v57  ;;  %vm13358_vm14 = vmmov %vm13342_vm0 }
 0x5ac   : > { %5221 = vmatprep.mubr.f32.mxu0 %v13334_v50  ;;  %7904 = vmatpush1.msk.msra.mxu1 %vm8511_vm6, %v4977_v62  ;;  %v4949_v59 = vsel %vm13357_vm1, %v11449_v1, %v11455_v54  ;;  %v4973_v62 = vsel %vm13358_vm14, %v11455_v54, %v11449_v1  ;;  %v5443_v1 = vsel %vm806_vm8, %v11519_v46, %v11515_v27 }
 0x5ad   : > { %7932 = vmatpush1.msk.msra.mxu0 %vm8567_vm10, %v5447_v2  ;;  %7060 = vperm.xlu1 %8168, %v8123_v47   ;;  %v11885_v20 = vpop.permute.xlu1 %6309  ;;  %v5444_v47 = vsel %vm806_vm8, %v11551_v57, %v11547_v30  ;;  %v5419_v30 = vsel %vm806_vm8, %v11515_v27, %v11519_v46  ;;  %v8127_v57 = vld [vmem:[%s13040_s2 + $0xb0] sm:$0xff]  ;;  %v7865_v2 = vld [vmem:[%s13039_s1 + $0x480] sm:$0xff]  ;;  %v5442_v27 = vsel %vm806_vm8, %v11487_v34, %v11483_v56  ;;  %v7866_v46 = vld [vmem:[%s13039_s1 + $0x488] sm:$0xff] }
 0x5ae   : > { %7894 = vmatmul.mubr.msk.f32.gmra.mxu0 %vm491_vm4, %v7878_v14  ;;  %7905 = vmatprep.subr.msk.mxu1 %vm8495_vm5, %v4952_v17  ;;  %v7880_v14 = vld [vmem:[%s13039_s1 + $0x4f8] sm:$0xff] }
 0x5af   : > { %7933 = vmatprep.subr.msk.mxu0 %vm8552_vm9, %v11610_v4  ;;  %7906 = vmatpush1.msk.msra.mxu1 %vm8511_vm6, %v4976_v43  ;;  %v11898_v22 = vpop.permute.xlu0 %6307  ;;  %v8125_v4 = vld [vmem:[%s13040_s2 + $0xa0] sm:$0xff]  ;;  %v5417_v43 = vsel %vm806_vm8, %v11457_v25, %v11463_v11 }
 0x5b0   : > { %7934 = vmatpush1.msk.msra.mxu0 %vm8567_vm10, %v11613_v6  ;;  %7075 = vperm.xlu0 %8167, %v8126_v41   ;;  %v7879_v6 = vld [vmem:[%s13039_s1 + $0x4f0] sm:$0xff]  ;;  %v5418_v41 = vsel %vm806_vm8, %v11483_v56, %v11487_v34  ;;  %v7921_v56 = vld [vmem:[%s13039_s1 + $0x500] sm:$0xff]  ;;  %v5441_v34 = vsel %vm806_vm8, %v11463_v11, %v11457_v25  ;;  %v7922_v25 = vld [vmem:[%s13039_s1 + $0x508] sm:$0xff] }
 0x5b1   : > { %7907 = vmatprep.subr.msk.mxu1 %vm8495_vm5, %v4951_v15  ;;  %7935 = vmatprep.subr.msk.mxu0 %vm8552_vm9, %v5421_v63  ;;  %v11922_v42 = vpop.permute.xlu1 %6051  ;;  %v7867_v63 = vld [vmem:[%s13039_s1 + $0x490] sm:$0xff] }
 0x5b2   : > { %5227 = vmatprep.mubr.f32.mxu0 %v13334_v50  ;;  %7908 = vmatpush1.msk.msra.mxu1 %vm8511_vm6, %v4975_v51  ;;  %v13360_v51 = vld [vmem:[#allocation31_spill] sm:$0xff] }
 0x5b3   : > { %7936 = vmatpush1.msk.msra.mxu0 %vm8567_vm10, %v5445_v36  ;;  %7070 = vperm.xlu1 %8168, %v8125_v4   ;;  %v11938_v60 = vpop.permute.xlu0 %6049  ;;  %v7869_v36 = vld [vmem:[%s13039_s1 + $0x4a0] sm:$0xff] }
 0x5b4   : > { %7895 = vmatmul.mubr.msk.f32.gmra.mxu0 %vm491_vm4, %v7879_v6  ;;  %7909 = vmatprep.subr.msk.mxu1 %vm8495_vm5, %v4950_v38 }
 0x5b5   : > { %7937 = vmatprep.subr.msk.mxu0 %vm8552_vm9, %v5420_v39  ;;  %7910 = vmatpush1.msk.msra.mxu1 %vm8511_vm6, %v4974_v61  ;;  %v11956_v32 = vpop.permute.xlu1 %6305 }
 0x5b6   : > { %7938 = vmatpush1.msk.msra.mxu0 %vm8567_vm10, %v5444_v47  ;;  %7085 = vperm.xlu0 %8167, %v8128_v24  }
 0x5b7   : > { %7911 = vmatprep.subr.msk.mxu1 %vm8495_vm5, %v4949_v59  ;;  %7939 = vmatprep.subr.msk.mxu0 %vm8552_vm9, %v5419_v30  ;;  %v11982_v17 = vpop.permute.xlu0 %6303  ;;  %v13366_v59 = vld [vmem:[#allocation30_spill] sm:$0xff] }
 0x5b8   : > { %5233 = vmatprep.mubr.f32.mxu0 %v13334_v50  ;;  %7912 = vmatpush1.msk.msra.mxu1 %vm8511_vm6, %v4973_v62  ;;  %vm13362_vm6 = vcmask 7168   ;;  %v7927_v62 = vld [vmem:[%s13039_s1 + $0x530] sm:$0xff] }
 0x5b9   : > { %7940 = vmatpush1.msk.msra.mxu0 %vm8567_vm10, %v5443_v1  ;;  %7080 = vperm.xlu1 %8168, %v8127_v57   ;;  %v11992_v54 = vpop.permute.xlu1 %6047  ;;  %vm13363_vm8 = vmmov %vm13362_vm6  ;;  %v13367_v57 = vld [vmem:[#allocation28_spill] sm:$0xff]  ;;  %v13370_v1 = vld [vmem:[#allocation15_spill] sm:$0xff] }
 0x5ba   : > { %7896 = vmatmul.mubr.msk.f32.gmra.mxu0 %vm491_vm4, %v7880_v14  ;;  %7913 = vmatmul.mubr.msk.f32.vlgmr.msra.gmra.mxu1 %vm491_vm4, %v7865_v2  ;;  %v13368_v14 = vld [vmem:[#allocation29_spill] sm:$0xff]  ;;  %v13369_v2 = vld [vmem:[#allocation22_spill] sm:$0xff]  ;;  %vm13372_vm0 = vmmov %vm13362_vm6 }
 0x5bb   : > { %7941 = vmatprep.subr.msk.mxu0 %vm8552_vm9, %v5418_v41  ;;  %5334 = vmatprep.mubr.f32.mxu1 %v13334_v50  ;;  %v12008_v26 = vpop.permute.xlu0 %6045  ;;  %vm13375_vm3 = vmmov %vm13372_vm0 }
 0x5bc   : > { %7942 = vmatpush1.msk.msra.mxu0 %vm8567_vm10, %v5442_v27  ;;  %5562 = vmatprep.mubr.f32.mxu0 %v13334_v50  ;;  %v7872_v27 = vld [vmem:[%s13039_s1 + $0x4b8] sm:$0xff]  ;;  %vm13376_vm13 = vmmov %vm13372_vm0 }
 0x5bd   : > { %7943 = vmatprep.subr.msk.mxu0 %vm8552_vm9, %v5417_v43  ;;  %v12024_v15 = vpop.permute.xlu1 %6301  ;;  %v5695_v43 = vsel %vm13372_vm0, %v13369_v2, %v13370_v1  ;;  %vm13379_vm1 = vmmov %vm13372_vm0 }
 0x5be   : > { %7944 = vmatpush1.msk.msra.mxu0 %vm8567_vm10, %v5441_v34  ;;  %7914 = vmatmul.mubr.msk.f32.gmra.mxu1 %vm491_vm4, %v7866_v46  ;;  %vm13371_vm10 = vmmov %vm13362_vm6  ;;  %v13374_v34 = vld [vmem:[#allocation20_spill] sm:$0xff] }
 0x5bf   : > { %7945 = vmatmul.mubr.msk.f32.vlgmr.msra.gmra.mxu0 %vm491_vm4, %v7921_v56  ;;  %5926 = vmatprep.subr.mxu0 %v11435_v40  ;;  %v12034_v4 = vpop.permute.xlu0 %6299  ;;  %v13359_v40 = vld [vmem:[#allocation25_spill] sm:$0xff]  ;;  %v5671_v41 = vsel %vm13371_vm10, %v13370_v1, %v13369_v2  ;;  %vm13380_vm14 = vmmov %vm13372_vm0  ;;  %vm13385_vm10 = vcmask 1039360  }
 0x5c0   : > { %5927 = vmatpush1.msra.mxu0 %v11431_v21  ;;  %5340 = vmatprep.mubr.f32.mxu1 %v13334_v50  ;;  %v7868_v21 = vld [vmem:[%s13039_s1 + $0x498] sm:$0xff]  ;;  %v13373_v56 = vld [vmem:[#allocation21_spill] sm:$0xff] }
 0x5c1   : > { %5928 = vmatprep.subr.mxu0 %v11412_v0  ;;  %5568 = vmatprep.mubr.f32.mxu0 %v13334_v50  ;;  %v12043_v11 = vpop.permute.xlu1 %6043  ;;  %v13361_v0 = vld [vmem:[#allocation14_spill] sm:$0xff] }
 0x5c2   : > { %5929 = vmatpush1.msra.mxu0 %v11407_v12  ;;  %7915 = vmatmul.mubr.msk.f32.gmra.mxu1 %vm491_vm4, %v7867_v63  ;;  %v7923_v12 = vld [vmem:[%s13039_s1 + $0x510] sm:$0xff]  ;;  %v5670_v63 = vsel %vm13375_vm3, %v13374_v34, %v13373_v56 }
 0x5c3   : > { %7946 = vmatmul.mubr.msk.f32.gmra.mxu0 %vm491_vm4, %v7922_v25  ;;  %5930 = vmatprep.subr.mxu0 %v13359_v40  ;;  %v12052_v55 = vpop.permute.xlu0 %6041  ;;  %v5694_v40 = vsel %vm13376_vm13, %v13373_v56, %v13374_v34 }
 0x5c4   : > { %5931 = vmatpush1.msra.mxu0 %v13360_v51  ;;  %5346 = vmatprep.mubr.f32.mxu1 %v13334_v50  ;;  %v13377_v51 = vld [vmem:[#allocation13_spill] sm:$0xff] }
 0x5c5   : > { %5932 = vmatprep.subr.mxu0 %v13361_v0  ;;  %5574 = vmatprep.mubr.f32.mxu0 %v13334_v50  ;;  %v5642_v6 = vpop.permute.xlu1 %5641 }
 0x5c6   : > { %5933 = vmatpush1.msra.mxu0 %v11359_v48  ;;  %7916 = vmatmul.mubr.msk.f32.gmra.mxu1 %vm491_vm4, %v7868_v21  ;;  %v7924_v48 = vld [vmem:[%s13039_s1 + $0x518] sm:$0xff] }
 0x5c7   : > { %7947 = vmatmul.mubr.msk.f32.gmra.mxu0 %vm491_vm4, %v7923_v12  ;;  %5934 = vmatprep.subr.mxu0 %v11340_v10  ;;  %v12068_v38 = vpop.permute.xlu0 %6295  ;;  %v7928_v21 = vld [vmem:[%s13039_s1 + $0x538] sm:$0xff]  ;;  %v13378_v12 = vld [vmem:[#allocation16_spill] sm:$0xff] }
 0x5c8   : > { %5935 = vmatpush1.msra.mxu0 %v11335_v19  ;;  %5352 = vmatprep.mubr.f32.mxu1 %v13334_v50  ;;  %v7870_v19 = vld [vmem:[%s13039_s1 + $0x4a8] sm:$0xff]  ;;  %v5669_v0 = vsel %vm13379_vm1, %v13378_v12, %v13377_v51 }
 0x5c9   : > { %5936 = vmatprep.subr.mxu0 %v11317_v35  ;;  %5580 = vmatprep.mubr.f32.mxu0 %v13334_v50  ;;  %v12077_v24 = vpop.permute.xlu1 %6297  ;;  %v5674_v35 = vsel %vm13362_vm6, %v11699_v18, %v5642_v6  ;;  %vm13383_vm6 = vmmov %vm13372_vm0 }
 0x5ca   : > { %5937 = vmatpush1.msra.mxu0 %v11313_v3  ;;  %7917 = vmatmul.mubr.msk.f32.gmra.mxu1 %vm491_vm4, %v7869_v36  ;;  %v7925_v3 = vld [vmem:[%s13039_s1 + $0x520] sm:$0xff]  ;;  %v5693_v36 = vsel %vm13380_vm14, %v13377_v51, %v13378_v12  ;;  %v13396_v12 = vld [vmem:[#allocation33_spill] sm:$0xff] }
 0x5cb   : > { %7948 = vmatmul.mubr.msk.f32.gmra.mxu0 %vm491_vm4, %v7924_v48  ;;  %5938 = vmatprep.subr.mxu0 %v11287_v5  ;;  %v12086_v10 = vpop.permute.xlu0 %6291  ;;  %v5698_v5 = vsel %vm13363_vm8, %v5642_v6, %v11699_v18  ;;  %v13365_v18 = vld [vmem:[#allocation32_spill] sm:$0xff]  ;;  %v13381_v48 = vld [vmem:[#allocation17_spill] sm:$0xff]  ;;  %vm13384_vm8 = vmmov %vm13372_vm0  ;;  %vm13388_vm0 = vcmask 924672  }
 0x5cc   : > { %5939 = vmatpush1.msra.mxu0 %v11281_v16  ;;  %5358 = vmatprep.mubr.f32.mxu1 %v13334_v50  ;;  %vm13389_vm3 = vmmov %vm13388_vm0  ;;  %v7957_v51 = vld [vmem:[%s13039_s1 + $0x560] sm:$0xff] }
 0x5cd   : > { %5940 = vmatprep.subr.mxu0 %v11263_v7  ;;  %5586 = vmatprep.mubr.f32.mxu0 %v13334_v50  ;;  %v12099_v61 = vpop.permute.xlu1 %6039  ;;  %v7871_v7 = vld [vmem:[%s13039_s1 + $0x4b0] sm:$0xff]  ;;  %vm13394_vm14 = vmmov %vm13388_vm0 }
 0x5ce   : > { %5941 = vmatpush1.msra.mxu0 %v11258_v13  ;;  %7918 = vmatmul.mubr.msk.f32.gmra.mxu1 %vm491_vm4, %v7870_v19  ;;  %v7926_v13 = vld [vmem:[%s13039_s1 + $0x528] sm:$0xff] }
 0x5cf   : > { %7949 = vmatmul.mubr.msk.f32.gmra.mxu0 %vm491_vm4, %v7925_v3  ;;  %7961 = vmatprep.subr.msk.mxu1 %vm8495_vm5, %v5674_v35  ;;  %v12106_v16 = vpop.permute.xlu0 %6565  ;;  %v13382_v19 = vld [vmem:[#allocation24_spill] sm:$0xff] }
 0x5d0   : > { %7962 = vmatpush1.msk.msra.mxu1 %vm8483_vm2, %v5698_v5  ;;  %5364 = vmatprep.mubr.f32.mxu1 %v13334_v50  ;;  %v5668_v35 = vsel %vm13383_vm6, %v13382_v19, %v13381_v48  ;;  %v5692_v5 = vsel %vm13384_vm8, %v13381_v48, %v13382_v19 }
 0x5d1   : > { %7963 = vmatprep.subr.msk.mxu1 %vm8495_vm5, %v13365_v18  ;;  %5592 = vmatprep.mubr.f32.mxu0 %v13334_v50  ;;  %v12121_v47 = vpop.permute.xlu1 %6293 }
 0x5d2   : > { %7964 = vmatpush1.msk.msra.mxu1 %vm8483_vm2, %v13366_v59 }
 0x5d3   : > { %7919 = vmatmul.mubr.msk.f32.gmra.mxu1 %vm491_vm4, %v7871_v7  ;;  %7950 = vmatmul.mubr.msk.f32.gmra.mxu0 %vm491_vm4, %v7926_v13  ;;  %v12128_v30 = vpop.permute.xlu0 %6561  ;;  %v7985_v7 = vld [vmem:[%s13039_s1 + $0x580] sm:$0xff] }
 0x5d4   : > { %7965 = vmatprep.subr.msk.mxu1 %vm8495_vm5, %v13367_v57  ;;  %5370 = vmatprep.mubr.f32.mxu1 %v13334_v50  ;;  %v7953_v13 = vld [vmem:[%s13039_s1 + $0x540] sm:$0xff]  ;;  %v7986_v57 = vld [vmem:[%s13039_s1 + $0x588] sm:$0xff] }
 0x5d5   : > { %7966 = vmatpush1.msk.msra.mxu1 %vm8483_vm2, %v13368_v14  ;;  %5598 = vmatprep.mubr.f32.mxu0 %v13334_v50  ;;  %v12147_v46 = vpop.permute.xlu1 %6289  ;;  %v8090_v14 = vld [vmem:[%s13039_s1 + $0x688] sm:$0xff] }
 0x5d6   : > { %7967 = vmatprep.subr.msk.mxu1 %vm8495_vm5, %v5671_v41  ;;  %v7955_v41 = vld [vmem:[%s13039_s1 + $0x550] sm:$0xff] }
 0x5d7   : > { %7968 = vmatpush1.msk.msra.mxu1 %vm8483_vm2, %v5695_v43  ;;  %7951 = vmatmul.mubr.msk.f32.gmra.mxu0 %vm491_vm4, %v7927_v62  ;;  %v12160_v25 = vpop.permute.xlu0 %6815 }
 0x5d8   : > { %7920 = vmatmul.mubr.msk.f32.gmra.mxu1 %vm491_vm4, %v7872_v27  ;;  %7969 = vmatprep.subr.msk.mxu1 %vm8495_vm5, %v5670_v63  ;;  %v13393_v63 = vld [vmem:[#allocation23_spill] sm:$0xff] }
 0x5d9   : > { %7970 = vmatpush1.msk.msra.mxu1 %vm8483_vm2, %v5694_v40  ;;  %5604 = vmatprep.mubr.f32.mxu0 %v13334_v50  ;;  %v12177_v6 = vpop.permute.xlu1 %6567 }
 0x5da   : > { %7971 = vmatprep.subr.msk.mxu1 %vm8495_vm5, %v5669_v0  ;;  %5812 = vmatprep.mubr.f32.mxu1 %v13334_v50 }
 0x5db   : > { %7972 = vmatpush1.msk.msra.mxu1 %vm8483_vm2, %v5693_v36  ;;  %7952 = vmatmul.mubr.msk.f32.gmra.mxu0 %vm491_vm4, %v7928_v21  ;;  %v12191_v3 = vpop.permute.xlu0 %6557 }
 0x5dc   : > { %7973 = vmatprep.subr.msk.mxu1 %vm8495_vm5, %v5668_v35  ;;  %5974 = vmatprep.mubr.f32.mxu0 %v13334_v50 }
 0x5dd   : > { %7974 = vmatpush1.msk.msra.mxu1 %vm8483_vm2, %v5692_v5  ;;  %v12207_v18 = vpop.permute.xlu1 %6563 }
 0x5de   : > { %7975 = vmatprep.subr.msk.mxu1 %vm8495_vm5, %v11724_v58  ;;  %vm13386_vm5 = vmmov %vm13385_vm10 }
 0x5df   : > { %7976 = vmatpush1.msk.msra.mxu1 %vm8483_vm2, %v11727_v49  ;;  %7993 = vmatmul.mubr.msk.f32.vlgmr.msra.gmra.mxu0 %vm491_vm4, %v7985_v7  ;;  %v6070_v59 = vpop.permute.xlu0 %6069  ;;  %v7954_v49 = vld [vmem:[%s13039_s1 + $0x548] sm:$0xff]  ;;  %vm13391_vm13 = vmmov %vm13386_vm5 }
 0x5e0   : > { %7977 = vmatmul.mubr.msk.f32.vlgmr.msra.gmra.mxu1 %vm491_vm4, %v7953_v13  ;;  %5980 = vmatprep.mubr.f32.mxu0 %v13334_v50  ;;  %v6078_v62 = vsel %vm13385_vm10, %v11689_v52, %v6070_v59  ;;  %v6110_v58 = vsel %vm13386_vm5, %v6070_v59, %v11689_v52  ;;  %v7987_v52 = vld [vmem:[%s13039_s1 + $0x590] sm:$0xff]  ;;  %vm13392_vm1 = vmmov %vm13386_vm5 }
 0x5e1   : > { %5818 = vmatprep.mubr.f32.mxu1 %v13334_v50  ;;  %8009 = vmatprep.subr.msk.mxu1 %vm8552_vm9, %v6110_v58  ;;  %v12231_v8 = vpop.permute.xlu1 %6817  ;;  %v6075_v34 = vsel %vm13392_vm1, %v11846_v37, %v11798_v33  ;;  %vm13395_vm6 = vmmov %vm13392_vm1 }
 0x5e2   : > { %8010 = vmatpush1.msk.msra.mxu1 %vm8535_vm7, %v6078_v62  ;;  %v6106_v21 = vsel %vm13395_vm6, %v11866_v45, %v11922_v42  ;;  %vm13397_vm8 = vmmov %vm13392_vm1  ;;  %v7991_v62 = vld [vmem:[%s13039_s1 + $0x5b0] sm:$0xff] }
 0x5e3   : > { %7994 = vmatmul.mubr.msk.f32.gmra.mxu0 %vm491_vm4, %v7986_v57  ;;  %v6320_v2 = vpop.permute.xlu0 %6319  ;;  %8011 = vmatprep.subr.msk.mxu1 %vm8552_vm9, %v11753_v44  ;;  %v6074_v36 = vsel %vm13397_vm8, %v11922_v42, %v11866_v45  ;;  %vm13398_vm10 = vmmov %vm13388_vm0  ;;  %v7990_v42 = vld [vmem:[%s13039_s1 + $0x5a8] sm:$0xff] }
 0x5e4   : > { %7978 = vmatmul.mubr.msk.f32.gmra.mxu1 %vm491_vm4, %v7954_v49  ;;  %5986 = vmatprep.mubr.f32.mxu0 %v13334_v50  ;;  %v6360_v1 = vsel %vm13388_vm0, %v6320_v2, %v11742_v29  ;;  %v6328_v27 = vsel %vm13389_vm3, %v11742_v29, %v6320_v2  ;;  %v7988_v29 = vld [vmem:[%s13039_s1 + $0x598] sm:$0xff]  ;;  %v6326_v48 = vsel %vm13398_vm10, %v11885_v20, %v11831_v23  ;;  %vm13399_vm5 = vmmov %vm13392_vm1  ;;  %v8001_v2 = vld [vmem:[%s13039_s1 + $0x5c0] sm:$0xff] }
 0x5e5   : > { %5824 = vmatprep.mubr.f32.mxu1 %v13334_v50  ;;  %8012 = vmatpush1.msk.msra.mxu1 %vm8535_vm7, %v11750_v9  ;;  %v12253_v44 = vpop.permute.xlu1 %6559  ;;  %v6107_v9 = vsel %vm13391_vm13, %v11798_v33, %v11846_v37  ;;  %v7989_v33 = vld [vmem:[%s13039_s1 + $0x5a0] sm:$0xff]  ;;  %v6358_v37 = vsel %vm13394_vm14, %v11831_v23, %v11885_v20  ;;  %v6105_v45 = vsel %vm13399_vm5, %v11938_v60, %v11992_v54  ;;  %v7958_v20 = vld [vmem:[%s13039_s1 + $0x568] sm:$0xff]  ;;  %vm13400_vm3 = vmmov %vm13388_vm0 }
 0x5e6   : > { %8013 = vmatprep.subr.msk.mxu1 %vm8552_vm9, %v11768_v53  ;;  %8041 = vmatprep.subr.msk.mxu0 %vm8952_vm15, %v6360_v1  ;;  %v6357_v23 = vsel %vm13388_vm0, %v11898_v22, %v11956_v32  ;;  %v6325_v5 = vsel %vm13400_vm3, %v11956_v32, %v11898_v22  ;;  %vm13401_vm13 = vmmov %vm13392_vm1 }
 0x5e7   : > { %7995 = vmatmul.mubr.msk.f32.gmra.mxu0 %vm491_vm4, %v7987_v52  ;;  %8014 = vmatpush1.msk.msra.mxu1 %vm8535_vm7, %v11765_v28  ;;  %v12266_v56 = vpop.permute.xlu0 %6811  ;;  %v7956_v28 = vld [vmem:[%s13039_s1 + $0x558] sm:$0xff]  ;;  %v6073_v7 = vsel %vm13401_vm13, %v11992_v54, %v11938_v60  ;;  %vm13402_vm1 = vmmov %vm13388_vm0  ;;  %v7959_v54 = vld [vmem:[%s13039_s1 + $0x570] sm:$0xff] }
 0x5e8   : > { %7979 = vmatmul.mubr.msk.f32.gmra.mxu1 %vm491_vm4, %v7955_v41  ;;  %5992 = vmatprep.mubr.f32.mxu0 %v13334_v50  ;;  %v6356_v22 = vsel %vm13402_vm1, %v11982_v17, %v12024_v15  ;;  %vm13403_vm14 = vmmov %vm13399_vm5  ;;  %v6353_v49 = vsel %vm13402_vm1, %v12086_v10, %v12147_v46  ;;  %v8002_v41 = vld [vmem:[%s13039_s1 + $0x5c8] sm:$0xff] }
 0x5e9   : > { %5830 = vmatprep.mubr.f32.mxu1 %v13334_v50  ;;  %8042 = vmatpush1.msk.msra.mxu0 %vm8483_vm2, %v6328_v27  ;;  %v12282_v53 = vpop.permute.xlu1 %6813  ;;  %v6104_v60 = vsel %vm13403_vm14, %v12008_v26, %v12043_v11  ;;  %vm13404_vm6 = vmmov %vm13399_vm5  ;;  %v13413_v27 = vld [vmem:[#allocation4_spill] sm:$0xff] }
 0x5ea   : > { %8015 = vmatprep.subr.msk.mxu1 %vm8552_vm9, %v6107_v9  ;;  %8043 = vmatprep.subr.msk.mxu0 %vm8952_vm15, %v13393_v63  ;;  %v6072_v32 = vsel %vm13404_vm6, %v12043_v11, %v12008_v26  ;;  %vm13405_vm8 = vmmov %vm13388_vm0  ;;  %v6608_v63 = vsel %vm1980_vm12, %v12128_v30, %v12253_v44 }
 0x5eb   : > { %7996 = vmatmul.mubr.msk.f32.gmra.mxu0 %vm491_vm4, %v7988_v29  ;;  %8016 = vmatpush1.msk.msra.mxu1 %vm8535_vm7, %v6075_v34  ;;  %v12295_v40 = vpop.permute.xlu0 %6553  ;;  %v6324_v57 = vsel %vm13405_vm8, %v12024_v15, %v11982_v17  ;;  %vm13406_vm10 = vmmov %vm13399_vm5  ;;  %v6609_v29 = vsel %vm1980_vm12, %v12106_v16, %v12207_v18 }
 0x5ec   : > { %7980 = vmatmul.mubr.msk.f32.gmra.mxu1 %vm491_vm4, %v7956_v28  ;;  %5998 = vmatprep.mubr.f32.mxu0 %v13334_v50  ;;  %v6103_v26 = vsel %vm13406_vm10, %v12052_v55, %v12099_v61  ;;  %vm13407_vm5 = vmmov %vm13388_vm0  ;;  %v8034_v28 = vld [vmem:[%s13039_s1 + $0x608] sm:$0xff] }
 0x5ed   : > { %5836 = vmatprep.mubr.f32.mxu1 %v13334_v50  ;;  %8044 = vmatpush1.msk.msra.mxu0 %vm8483_vm2, %v13396_v12  ;;  %v12315_v0 = vpop.permute.xlu1 %6555  ;;  %v6355_v11 = vsel %vm13407_vm5, %v12034_v4, %v12077_v24  ;;  %vm13408_vm0 = vmmov %vm13404_vm6  ;;  %vm13416_vm6 = vcmask 908288  }
 0x5ee   : > { %8017 = vmatprep.subr.msk.mxu1 %vm8552_vm9, %v6106_v21  ;;  %8045 = vmatprep.subr.msk.mxu0 %vm8952_vm15, %v6358_v37  ;;  %v6071_v15 = vsel %vm13408_vm0, %v12099_v61, %v12052_v55  ;;  %vm13409_vm3 = vmmov %vm13402_vm1  ;;  %v7960_v55 = vld [vmem:[%s13039_s1 + $0x578] sm:$0xff] }
 0x5ef   : > { %7997 = vmatmul.mubr.msk.f32.gmra.mxu0 %vm491_vm4, %v7989_v33  ;;  %8018 = vmatpush1.msk.msra.mxu1 %vm8535_vm7, %v6074_v36  ;;  %v12330_v19 = vpop.permute.xlu0 %6807  ;;  %v6323_v31 = vsel %vm13409_vm3, %v12077_v24, %v12034_v4  ;;  %vm13411_vm13 = vmmov %vm13402_vm1  ;;  %v6576_v33 = vsel %vm1980_vm12, %v12253_v44, %v12128_v30  ;;  %v8035_v30 = vld [vmem:[%s13039_s1 + $0x610] sm:$0xff]  ;;  %v6607_v44 = vsel %vm1980_vm12, %v12191_v3, %v12315_v0 }
 0x5f0   : > { %7981 = vmatmul.mubr.msk.f32.gmra.mxu1 %vm491_vm4, %v7957_v51  ;;  %8046 = vmatpush1.msk.msra.mxu0 %vm8483_vm2, %v6326_v48  ;;  %v6322_v4 = vsel %vm13411_vm13, %v12121_v47, %v12068_v38  ;;  %vm13412_vm14 = vmmov %vm13402_vm1  ;;  %v8004_v51 = vld [vmem:[%s13039_s1 + $0x5d8] sm:$0xff]  ;;  %v6575_v48 = vsel %vm1980_vm12, %v12315_v0, %v12191_v3 }
 0x5f1   : > { %5842 = vmatprep.mubr.f32.mxu1 %v13334_v50  ;;  %8019 = vmatprep.subr.msk.mxu1 %vm8552_vm9, %v6105_v45  ;;  %v12350_v35 = vpop.permute.xlu1 %6809  ;;  %vm13417_vm8 = vmmov %vm13416_vm6  ;;  %v8036_v3 = vld [vmem:[%s13039_s1 + $0x618] sm:$0xff] }
 0x5f2   : > { %8047 = vmatprep.subr.msk.mxu0 %vm8952_vm15, %v6357_v23  ;;  %6004 = vmatprep.mubr.f32.mxu0 %v13334_v50  ;;  %vm13420_vm5 = vmmov %vm13416_vm6 }
 0x5f3   : > { %8020 = vmatpush1.msk.msra.mxu1 %vm8535_vm7, %v6073_v7  ;;  %8048 = vmatpush1.msk.msra.mxu0 %vm8483_vm2, %v6325_v5  ;;  %v12365_v13 = vpop.permute.xlu0 %6549  ;;  %vm13422_vm3 = vmmov %vm13420_vm5 }
 0x5f4   : > { %7982 = vmatmul.mubr.msk.f32.gmra.mxu1 %vm491_vm4, %v7958_v20  ;;  %7998 = vmatmul.mubr.msk.f32.gmra.mxu0 %vm491_vm4, %v7990_v42  ;;  %v6827_v45 = vsel %vm13422_vm3, %v12282_v53, %v12160_v25 }
 0x5f5   : > { %8021 = vmatprep.subr.msk.mxu1 %vm8552_vm9, %v6104_v60  ;;  %8049 = vmatprep.subr.msk.mxu0 %vm8952_vm15, %v6356_v22  ;;  %v12385_v59 = vpop.permute.xlu1 %6551 }
 0x5f6   : > { %5848 = vmatprep.mubr.f32.mxu1 %v13334_v50  ;;  %8022 = vmatpush1.msk.msra.mxu1 %vm8535_vm7, %v6072_v32  ;;  %v6606_v23 = vsel %vm1980_vm12, %v12295_v40, %v12385_v59  ;;  %v6574_v20 = vsel %vm1980_vm12, %v12385_v59, %v12295_v40  ;;  %v8037_v40 = vld [vmem:[%s13039_s1 + $0x620] sm:$0xff] }
 0x5f7   : > { %8050 = vmatpush1.msk.msra.mxu0 %vm8483_vm2, %v6324_v57  ;;  %8023 = vmatprep.subr.msk.mxu1 %vm8552_vm9, %v6103_v26  ;;  %v12403_v17 = vpop.permute.xlu0 %6803  ;;  %vm13410_vm9 = vmmov %vm13402_vm1  ;;  %v8007_v57 = vld [vmem:[%s13039_s1 + $0x5f0] sm:$0xff] }
 0x5f8   : > { %7983 = vmatmul.mubr.msk.f32.gmra.mxu1 %vm491_vm4, %v7959_v54  ;;  %8051 = vmatprep.subr.msk.mxu0 %vm8952_vm15, %v6355_v11  ;;  %v6354_v58 = vsel %vm13410_vm9, %v12068_v38, %v12121_v47  ;;  %v7992_v38 = vld [vmem:[%s13039_s1 + $0x5b8] sm:$0xff]  ;;  %v6321_v47 = vsel %vm13412_vm14, %v12147_v46, %v12086_v10  ;;  %v8033_v10 = vld [vmem:[%s13039_s1 + $0x600] sm:$0xff]  ;;  %vm13423_vm9 = vmmov %vm13422_vm3 }
 0x5f9   : > { %6010 = vmatprep.mubr.f32.mxu0 %v13334_v50  ;;  %8024 = vmatpush1.msk.msra.mxu1 %vm8535_vm7, %v6071_v15  ;;  %v12423_v61 = vpop.permute.xlu1 %6805  ;;  %v6858_v0 = vsel %vm13423_vm9, %v12266_v56, %v12350_v35  ;;  %vm13425_vm1 = vmmov %vm13422_vm3 }
 0x5fa   : > { %8052 = vmatpush1.msk.msra.mxu0 %vm8483_vm2, %v6323_v31  ;;  %5854 = vmatprep.mubr.f32.mxu1 %v13334_v50  ;;  %v6826_v5 = vsel %vm13425_vm1, %v12350_v35, %v12266_v56  ;;  %vm13426_vm14 = vmmov %vm13425_vm1  ;;  %v8006_v56 = vld [vmem:[%s13039_s1 + $0x5e8] sm:$0xff] }
 0x5fb   : > { %7999 = vmatmul.mubr.msk.f32.gmra.mxu0 %vm491_vm4, %v7991_v62  ;;  %8053 = vmatprep.subr.msk.mxu0 %vm8952_vm15, %v6354_v58  ;;  %v12437_v24 = vpop.permute.xlu0 %6545  ;;  %v6857_v7 = vsel %vm13426_vm14, %v12330_v19, %v12423_v61  ;;  %vm13434_vm3 = vmmov %vm13425_vm1 }
 0x5fc   : > { %8054 = vmatpush1.msk.msra.mxu0 %vm8483_vm2, %v6322_v4  ;;  %7984 = vmatmul.mubr.msk.f32.gmra.mxu1 %vm491_vm4, %v7960_v55  ;;  %v8008_v55 = vld [vmem:[%s13039_s1 + $0x5f8] sm:$0xff]  ;;  %vm13435_vm9 = vmmov %vm13425_vm1 }
 0x5fd   : > { %8055 = vmatprep.subr.msk.mxu0 %vm8952_vm15, %v6353_v49  ;;  %6016 = vmatprep.mubr.f32.mxu0 %v13334_v50  ;;  %v12457_v52 = vpop.permute.xlu1 %6547 }
 0x5fe   : > { %8056 = vmatpush1.msk.msra.mxu0 %vm8483_vm2, %v6321_v47  ;;  %6224 = vmatprep.mubr.f32.mxu1 %v13334_v50  ;;  %vm13414_vm2 = vcmp.lt.s32.totalorder %v13413_v27, 240  ;;  %v6605_v22 = vsel %vm1980_vm12, %v12365_v13, %v12457_v52  ;;  %v6573_v35 = vsel %vm1980_vm12, %v12457_v52, %v12365_v13  ;;  %v8038_v13 = vld [vmem:[%s13039_s1 + $0x628] sm:$0xff]  ;;  %v8040_v47 = vld [vmem:[%s13039_s1 + $0x638] sm:$0xff] }
 0x5ff   : > { %8000 = vmatmul.mubr.msk.f32.gmra.mxu0 %vm491_vm4, %v7992_v38  ;;  %v6570_v1 = vpop.permute.xlu0 %6569  ;;  %vm13415_vm15 = vmmov %vm13414_vm2  ;;  %v8092_v27 = vld [vmem:[%s13039_s1 + $0x698] sm:$0xff] }
 0x600   : > { %8025 = vmatmul.mubr.msk.f32.vlgmr.msra.gmra.mxu1 %vm491_vm4, %v8001_v2  ;;  %6474 = vmatprep.mubr.f32.mxu0 %v13334_v50  ;;  %v6578_v46 = vsel %vm1980_vm12, %v12177_v6, %v6570_v1  ;;  %v6610_v39 = vsel %vm1980_vm12, %v6570_v1, %v12177_v6  ;;  %v6577_v6 = vsel %vm1980_vm12, %v12207_v18, %v12106_v16  ;;  %v8003_v16 = vld [vmem:[%s13039_s1 + $0x5d0] sm:$0xff]  ;;  %vm13418_vm10 = vmmov %vm13414_vm2  ;;  %v8065_v2 = vld [vmem:[%s13039_s1 + $0x640] sm:$0xff] }
 0x601   : > { %6230 = vmatprep.mubr.f32.mxu1 %v13334_v50  ;;  %8073 = vmatprep.subr.msk.mxu1 %vm13414_vm2, %v6610_v39  ;;  %v12478_v43 = vpop.permute.xlu1 %6801  ;;  %vm13421_vm0 = vmmov %vm13414_vm2  ;;  %v8089_v1 = vld [vmem:[%s13039_s1 + $0x680] sm:$0xff]  ;;  %v8091_v39 = vld [vmem:[%s13039_s1 + $0x690] sm:$0xff] }
 0x602   : > { %6677 = vmatpush1.msra.mxu1 %v6578_v46  ;;  %vm13424_vm13 = vmmov %vm13421_vm0  ;;  %v8067_v46 = vld [vmem:[%s13039_s1 + $0x650] sm:$0xff] }
 0x603   : > { %8057 = vmatmul.mubr.msk.f32.vlgmr.msra.gmra.mxu0 %vm491_vm4, %v8033_v10  ;;  %v6820_v9 = vpop.permute.xlu0 %6819  ;;  %8074 = vmatprep.subr.msk.mxu1 %vm13415_vm15, %v6609_v29  ;;  %vm13427_vm2 = vmmov %vm13421_vm0  ;;  %v8066_v10 = vld [vmem:[%s13039_s1 + $0x648] sm:$0xff]  ;;  %v8093_v29 = vld [vmem:[%s13039_s1 + $0x6a0] sm:$0xff] }
 0x604   : > { %8026 = vmatmul.mubr.msk.f32.gmra.mxu1 %vm491_vm4, %v8002_v41  ;;  %6480 = vmatprep.mubr.f32.mxu0 %v13334_v50  ;;  %v6860_v34 = vsel %vm13416_vm6, %v6820_v9, %v12231_v8  ;;  %v6828_v37 = vsel %vm13417_vm8, %v12231_v8, %v6820_v9  ;;  %v6859_v8 = vsel %vm13420_vm5, %v12160_v25, %v12282_v53  ;;  %v8005_v25 = vld [vmem:[%s13039_s1 + $0x5e0] sm:$0xff]  ;;  %vm13428_vm15 = vmmov %vm13425_vm1  ;;  %v8068_v41 = vld [vmem:[%s13039_s1 + $0x658] sm:$0xff] }
 0x605   : > { %6236 = vmatprep.mubr.f32.mxu1 %v13334_v50  ;;  %6679 = vmatpush1.msra.mxu1 %v6577_v6  ;;  %v12503_v18 = vpop.permute.xlu1 %6543  ;;  %v6825_v32 = vsel %vm13428_vm15, %v12423_v61, %v12330_v19  ;;  %vm13429_vm6 = vmmov %vm13425_vm1  ;;  %v8070_v9 = vld [vmem:[%s13039_s1 + $0x668] sm:$0xff] }
 0x606   : > { %8075 = vmatprep.subr.msk.mxu1 %vm13418_vm10, %v6608_v63  ;;  %8097 = vmatprep.subr.msk.mxu0 %vm9164_vm11, %v6860_v34  ;;  %v6604_v54 = vsel %vm1980_vm12, %v12437_v24, %v12503_v18  ;;  %v6856_v59 = vsel %vm13429_vm6, %v12403_v17, %v12478_v43  ;;  %vm13430_vm8 = vmmov %vm13421_vm0  ;;  %v6572_v26 = vsel %vm1980_vm12, %v12503_v18, %v12437_v24  ;;  %v8094_v6 = vld [vmem:[%s13039_s1 + $0x6a8] sm:$0xff]  ;;  %v8095_v34 = vld [vmem:[%s13039_s1 + $0x6b0] sm:$0xff] }
 0x607   : > { %8058 = vmatmul.mubr.msk.f32.gmra.mxu0 %vm491_vm4, %v8034_v28  ;;  %6681 = vmatpush1.msra.mxu1 %v6576_v33  ;;  %v12532_v12 = vpop.permute.xlu0 %6799  ;;  %vm13431_vm10 = vmmov %vm13425_vm1  ;;  %v8071_v28 = vld [vmem:[%s13039_s1 + $0x670] sm:$0xff]  ;;  %v8072_v63 = vld [vmem:[%s13039_s1 + $0x678] sm:$0xff] }
 0x608   : > { %8027 = vmatmul.mubr.msk.f32.gmra.mxu1 %vm491_vm4, %v8003_v16  ;;  %6486 = vmatprep.mubr.f32.mxu0 %v13334_v50  ;;  %v6824_v15 = vsel %vm13431_vm10, %v12478_v43, %v12403_v17  ;;  %vm13432_vm5 = vmmov %vm13425_vm1  ;;  %v8039_v17 = vld [vmem:[%s13039_s1 + $0x630] sm:$0xff]  ;;  %v8069_v43 = vld [vmem:[%s13039_s1 + $0x660] sm:$0xff] }
 0x609   : > { %6242 = vmatprep.mubr.f32.mxu1 %v13334_v50  ;;  %8098 = vmatpush1.msk.msra.mxu0 %vm8535_vm7, %v6828_v37  ;;  %v12534_v36 = vpop.permute.xlu1 %6797  ;;  %v8096_v16 = vld [vmem:[%s13039_s1 + $0x6b8] sm:$0xff] }
 0x60a   : > { %8076 = vmatprep.subr.msk.mxu1 %vm13421_vm0, %v6607_v44  ;;  %8099 = vmatprep.subr.msk.mxu0 %vm9164_vm11, %v6859_v8  ;;  %v6855_v31 = vsel %vm13432_vm5, %v12532_v12, %v12534_v36 }
 0x60b   : > { %8059 = vmatmul.mubr.msk.f32.gmra.mxu0 %vm491_vm4, %v8035_v30  ;;  %6683 = vmatpush1.msra.mxu1 %v6575_v48  ;;  %v6542_v42 = vpop.permute.xlu0 %6541 }
 0x60c   : > { %8028 = vmatmul.mubr.msk.f32.gmra.mxu1 %vm491_vm4, %v8004_v51  ;;  %6492 = vmatprep.mubr.f32.mxu0 %v13334_v50 }
 0x60d   : > { %6248 = vmatprep.mubr.f32.mxu1 %v13334_v50  ;;  %8100 = vmatpush1.msk.msra.mxu0 %vm8535_vm7, %v6827_v45  ;;  %v6540_v53 = vpop.permute.xlu1 %6539 }
 0x60e   : > { %8077 = vmatprep.subr.msk.mxu1 %vm13424_vm13, %v6606_v23  ;;  %8101 = vmatprep.subr.msk.mxu0 %vm9164_vm11, %v6858_v0  ;;  %v6603_v11 = vsel %vm1980_vm12, %v6542_v42, %v6540_v53  ;;  %v6571_v62 = vsel %vm1980_vm12, %v6540_v53, %v6542_v42  ;;  %vm13433_vm12 = vmmov %vm13425_vm1 }
 0x60f   : > { %8060 = vmatmul.mubr.msk.f32.gmra.mxu0 %vm491_vm4, %v8036_v3  ;;  %6685 = vmatpush1.msra.mxu1 %v6574_v20  ;;  %v6796_v19 = vpop.permute.xlu0 %6795  ;;  %v6823_v58 = vsel %vm13433_vm12, %v12534_v36, %v12532_v12  ;;  %vm13436_vm13 = vmmov %vm13425_vm1 }
 0x610   : > { %8029 = vmatmul.mubr.msk.f32.gmra.mxu1 %vm491_vm4, %v8005_v25  ;;  %6498 = vmatprep.mubr.f32.mxu0 %v13334_v50 }
 0x611   : > { %6254 = vmatprep.mubr.f32.mxu1 %v13334_v50  ;;  %8102 = vmatpush1.msk.msra.mxu0 %vm8535_vm7, %v6826_v5  ;;  %v6794_v60 = vpop.permute.xlu1 %6793 }
 0x612   : > { %8078 = vmatprep.subr.msk.mxu1 %vm13427_vm2, %v6605_v22  ;;  %8103 = vmatprep.subr.msk.mxu0 %vm9164_vm11, %v6857_v7  ;;  %v6854_v4 = vsel %vm13434_vm3, %v6796_v19, %v6794_v60  ;;  %v6822_v24 = vsel %vm13435_vm9, %v6794_v60, %v6796_v19  ;;  %vm7248_vm2 = vcmask 1046528  }
 0x613   : > { %8061 = vmatmul.mubr.msk.f32.gmra.mxu0 %vm491_vm4, %v8037_v40  ;;  %6687 = vmatpush1.msra.mxu1 %v6573_v35  ;;  %v6792_v49 = vpop.permute.xlu0 %6791 }
 0x614   : > { %8030 = vmatmul.mubr.msk.f32.gmra.mxu1 %vm491_vm4, %v8006_v56  ;;  %6504 = vmatprep.mubr.f32.mxu0 %v13334_v50 }
 0x615   : > { %8104 = vmatpush1.msk.msra.mxu0 %vm8535_vm7, %v6825_v32  ;;  %8079 = vmatprep.subr.msk.mxu1 %vm13430_vm8, %v6604_v54  ;;  %v6790_v61 = vpop.permute.xlu1 %6789 }
 0x616   : > { %8105 = vmatprep.subr.msk.mxu0 %vm9164_vm11, %v6856_v59  ;;  %6260 = vmatprep.mubr.f32.mxu1 %v13334_v50  ;;  %v6853_v38 = vsel %vm13436_vm13, %v6792_v49, %v6790_v61  ;;  %v6821_v52 = vsel %vm13425_vm1, %v6790_v61, %v6792_v49 }
 0x617   : > { %8062 = vmatmul.mubr.msk.f32.gmra.mxu0 %vm491_vm4, %v8038_v13  ;;  %6689 = vmatpush1.msra.mxu1 %v6572_v26 }
 0x618   : > { %8106 = vmatpush1.msk.msra.mxu0 %vm8535_vm7, %v6824_v15  ;;  %8031 = vmatmul.mubr.msk.f32.gmra.mxu1 %vm491_vm4, %v8007_v57 }
 0x619   : > { %8080 = vmatprep.subr.msk.mxu1 %vm13421_vm0, %v6603_v11  ;;  %8107 = vmatprep.subr.msk.mxu0 %vm9164_vm11, %v6855_v31 }
 0x61a   : > { %6510 = vmatprep.mubr.f32.mxu0 %v13334_v50  ;;  %6691 = vmatpush1.msra.mxu1 %v6571_v62 }
 0x61b   : > { %8108 = vmatpush1.msk.msra.mxu0 %vm8535_vm7, %v6823_v58  ;;  %6266 = vmatprep.mubr.f32.mxu1 %v13334_v50 }
 0x61c   : > { %8063 = vmatmul.mubr.msk.f32.gmra.mxu0 %vm491_vm4, %v8039_v17  ;;  %8032 = vmatmul.mubr.msk.f32.gmra.mxu1 %vm491_vm4, %v8008_v55 }
 0x61d   : > { %8109 = vmatprep.subr.msk.mxu0 %vm9164_vm11, %v6854_v4  ;;  %6516 = vmatprep.mubr.f32.mxu0 %v13334_v50 }
 0x61e   : > { %8110 = vmatpush1.msk.msra.mxu0 %vm8535_vm7, %v6822_v24  ;;  %6724 = vmatprep.mubr.f32.mxu1 %v13334_v50 }
 0x61f   : > { %8111 = vmatprep.subr.msk.mxu0 %vm9164_vm11, %v6853_v38 }
 0x620   : > { %8064 = vmatmul.mubr.msk.f32.gmra.mxu0 %vm491_vm4, %v8040_v47  ;;  %8081 = vmatmul.mubr.msk.f32.vlgmr.msra.gmra.mxu1 %vm491_vm4, %v8065_v2 }
 0x621   : > { %8112 = vmatpush1.msk.msra.mxu0 %vm8535_vm7, %v6821_v52  ;;  %6974 = vmatprep.mubr.f32.mxu0 %v13334_v50 }
 0x622   : > { %6730 = vmatprep.mubr.f32.mxu1 %v13334_v50 }
 0x624   : > { %8113 = vmatmul.mubr.msk.f32.vlgmr.msra.gmra.mxu0 %vm491_vm4, %v8089_v1  ;;  %8082 = vmatmul.mubr.msk.f32.gmra.mxu1 %vm491_vm4, %v8066_v10 }
 0x625   : > { %6980 = vmatprep.mubr.f32.mxu0 %v13334_v50  ;;  %6736 = vmatprep.mubr.f32.mxu1 %v13334_v50 }
 0x628   : > { %8114 = vmatmul.mubr.msk.f32.gmra.mxu0 %vm491_vm4, %v8090_v14  ;;  %8083 = vmatmul.mubr.msk.f32.gmra.mxu1 %vm491_vm4, %v8067_v46 }
 0x629   : > { %6986 = vmatprep.mubr.f32.mxu0 %v13334_v50  ;;  %6742 = vmatprep.mubr.f32.mxu1 %v13334_v50 }
 0x62c   : > { %8115 = vmatmul.mubr.msk.f32.gmra.mxu0 %vm491_vm4, %v8091_v39  ;;  %8084 = vmatmul.mubr.msk.f32.gmra.mxu1 %vm491_vm4, %v8068_v41 }
 0x62d   : > { %6992 = vmatprep.mubr.f32.mxu0 %v13334_v50  ;;  %6748 = vmatprep.mubr.f32.mxu1 %v13334_v50 }
 0x630   : > { %8116 = vmatmul.mubr.msk.f32.gmra.mxu0 %vm491_vm4, %v8092_v27  ;;  %8085 = vmatmul.mubr.msk.f32.gmra.mxu1 %vm491_vm4, %v8069_v43 }
 0x631   : > { %6998 = vmatprep.mubr.f32.mxu0 %v13334_v50  ;;  %6754 = vmatprep.mubr.f32.mxu1 %v13334_v50 }
 0x634   : > { %8117 = vmatmul.mubr.msk.f32.gmra.mxu0 %vm491_vm4, %v8093_v29  ;;  %8086 = vmatmul.mubr.msk.f32.gmra.mxu1 %vm491_vm4, %v8070_v9 }
 0x635   : > { %7004 = vmatprep.mubr.f32.mxu0 %v13334_v50  ;;  %6760 = vmatprep.mubr.f32.mxu1 %v13334_v50 }
 0x638   : > { %8118 = vmatmul.mubr.msk.f32.gmra.mxu0 %vm491_vm4, %v8094_v6  ;;  %8087 = vmatmul.mubr.msk.f32.gmra.mxu1 %vm491_vm4, %v8071_v28 }
 0x639   : > { %7010 = vmatprep.mubr.f32.mxu0 %v13334_v50  ;;  %6766 = vmatprep.mubr.f32.mxu1 %v13334_v50 }
 0x63c   : > { %8119 = vmatmul.mubr.msk.f32.gmra.mxu0 %vm491_vm4, %v8095_v34  ;;  %8088 = vmatmul.mubr.msk.f32.gmra.mxu1 %vm491_vm4, %v8072_v63 }
 0x63d   : > { %7016 = vmatprep.mubr.f32.mxu0 %v13334_v50 }
 0x640   : > { %8120 = vmatmul.mubr.msk.f32.gmra.mxu0 %vm491_vm4, %v8096_v16 }
 0x657   : > { %v5193_v18 = vpop.f32.mrf.mxu0 }
 0x659   : > { %v5195_v33 = vpop.f32.mrf.mxu0 }
 0x65b   : > { %v5199_v37 = vpop.f32.mrf.mxu0 }
 0x65d   : > { %v5201_v21 = vpop.f32.mrf.mxu0 }
 0x65f   : > { %v5205_v30 = vpop.f32.mrf.mxu0 }
 0x661   : > { %v5207_v8 = vpop.f32.mrf.mxu0 }
 0x663   : > { %v5211_v44 = vpop.f32.mrf.mxu0 }
 0x665   : > { %v5213_v51 = vpop.f32.mrf.mxu0 }
 0x668   : > { %v5217_v12 = vpop.f32.mrf.mxu0 }
 0x66a   : > { %v5219_v36 = vpop.f32.mrf.mxu0 }
 0x66e   : > { %v5223_v48 = vpop.f32.mrf.mxu0 }
 0x670   : > { %v5225_v45 = vpop.f32.mrf.mxu0 }
 0x674   : > { %v5229_v3 = vpop.f32.mrf.mxu0 }
 0x676   : > { %v5231_v50 = vpop.f32.mrf.mxu0 }
 0x67a   : > { %v5235_v0 = vpop.f32.mrf.mxu0  ;;  %v5330_v23 = vpop.f32.mrf.mxu1 }
 0x67b   : > { %v5331_v25 = vadd.f32 %v5330_v23, %v5193_v18 }
 0x67c   : > { %v5237_v53 = vpop.f32.mrf.mxu0  ;;  %v5332_v20 = vpop.f32.mrf.mxu1 }
 0x67d   : > { %v5333_v42 = vadd.f32 %v5332_v20, %v5195_v33 }
 0x67e   : > { %v5336_v5 = vpop.f32.mrf.mxu1 }
 0x67f   : > { %v5337_v40 = vadd.f32 %v5336_v5, %v5199_v37  ;;  %v5564_v7 = vpop.f32.mrf.mxu0 }
 0x680   : > { %v12755_v22 = vadd.f32 %v5564_v7, %v5331_v25  ;;  %v5338_v56 = vpop.f32.mrf.mxu1 }
 0x681   : > { %v5339_v35 = vadd.f32 %v5338_v56, %v5201_v21  ;;  %v5566_v60 = vpop.f32.mrf.mxu0 }
 0x682   : > { %v12757_v32 = vadd.f32 %v5566_v60, %v5333_v42  ;;  %v5342_v54 = vpop.f32.mrf.mxu1 }
 0x683   : > { %v5343_v13 = vadd.f32 %v5342_v54, %v5205_v30  ;;  %v5570_v59 = vpop.f32.mrf.mxu0 }
 0x684   : > { %v12759_v19 = vadd.f32 %v5570_v59, %v5337_v40  ;;  %v5344_v57 = vpop.f32.mrf.mxu1 }
 0x685   : > { %v5345_v26 = vadd.f32 %v5344_v57, %v5207_v8  ;;  %v5572_v11 = vpop.f32.mrf.mxu0 }
 0x686   : > { %v12761_v15 = vadd.f32 %v5572_v11, %v5339_v35  ;;  %v5348_v62 = vpop.f32.mrf.mxu1 }
 0x687   : > { %v5349_v31 = vadd.f32 %v5348_v62, %v5211_v44  ;;  %v5576_v17 = vpop.f32.mrf.mxu0 }
 0x688   : > { %v12763_v55 = vadd.f32 %v5576_v17, %v5343_v13  ;;  %v5350_v61 = vpop.f32.mrf.mxu1 }
 0x689   : > { %v5351_v58 = vadd.f32 %v5350_v61, %v5213_v51  ;;  %v5578_v4 = vpop.f32.mrf.mxu0 }
 0x68a   : > { %v12765_v24 = vadd.f32 %v5578_v4, %v5345_v26  ;;  %v5354_v49 = vpop.f32.mrf.mxu1 }
 0x68b   : > { %v5355_v38 = vadd.f32 %v5354_v49, %v5217_v12  ;;  %v5582_v47 = vpop.f32.mrf.mxu0 }
 0x68c   : > { %v12767_v2 = vadd.f32 %v5582_v47, %v5349_v31  ;;  %v5356_v52 = vpop.f32.mrf.mxu1 }
 0x68d   : > { %v5357_v1 = vadd.f32 %v5356_v52, %v5219_v36  ;;  %v5584_v10 = vpop.f32.mrf.mxu0 }
 0x68e   : > { %v12769_v14 = vadd.f32 %v5584_v10, %v5351_v58  ;;  %v5360_v46 = vpop.f32.mrf.mxu1 }
 0x68f   : > { %v5361_v39 = vadd.f32 %v5360_v46, %v5223_v48  ;;  %v5588_v41 = vpop.f32.mrf.mxu0 }
 0x690   : > { %v12771_v27 = vadd.f32 %v5588_v41, %v5355_v38  ;;  %v5362_v43 = vpop.f32.mrf.mxu1 }
 0x691   : > { %v5363_v29 = vadd.f32 %v5362_v43, %v5225_v45  ;;  %v5590_v9 = vpop.f32.mrf.mxu0 }
 0x692   : > { %v12773_v6 = vadd.f32 %v5590_v9, %v5357_v1 }
 0x693   : > { %v5366_v28 = vpop.f32.mrf.mxu1  ;;  %v5594_v34 = vpop.f32.mrf.mxu0 }
 0x694   : > { %v5367_v63 = vadd.f32 %v5366_v28, %v5229_v3  ;;  %v12775_v16 = vadd.f32 %v5594_v34, %v5361_v39 }
 0x695   : > { %v5368_v18 = vpop.f32.mrf.mxu1  ;;  %v5596_v33 = vpop.f32.mrf.mxu0 }
 0x696   : > { %v5369_v37 = vadd.f32 %v5368_v18, %v5231_v50  ;;  %v12777_v21 = vadd.f32 %v5596_v33, %v5363_v29 }
 0x697   : > { %v5600_v30 = vpop.f32.mrf.mxu0 }
 0x698   : > { %v5372_v8 = vpop.f32.mrf.mxu1  ;;  %v12779_v44 = vadd.f32 %v5600_v30, %v5367_v63 }
 0x699   : > { %v5373_v51 = vadd.f32 %v5372_v8, %v5235_v0  ;;  %v5602_v12 = vpop.f32.mrf.mxu0 }
 0x69a   : > { %v5374_v36 = vpop.f32.mrf.mxu1  ;;  %v12781_v48 = vadd.f32 %v5602_v12, %v5369_v37 }
 0x69b   : > { %v5375_v45 = vadd.f32 %v5374_v36, %v5237_v53  ;;  %v5606_v23 = vpop.f32.mrf.mxu0 }
 0x69c   : > { %v12783_v25 = vadd.f32 %v5606_v23, %v5373_v51 }
 0x69d   : > { %v5608_v3 = vpop.f32.mrf.mxu0 }
 0x69e   : > { %v12785_v20 = vadd.f32 %v5608_v3, %v5375_v45 }
 0x69f   : > { %v5976_v42 = vpop.f32.mrf.mxu0 }
 0x6a0   : > { %v5814_v50 = vpop.f32.mrf.mxu1 }
 0x6a1   : > { %v12787_v5 = vpop.f32.mrf.mxu0 }
 0x6a2   : > { %v5816_v40 = vpop.f32.mrf.mxu1 }
 0x6a3   : > { %v12789_v7 = vpop.f32.mrf.mxu0 }
 0x6a4   : > { %v5820_v56 = vpop.f32.mrf.mxu1 }
 0x6a5   : > { %v12791_v0 = vpop.f32.mrf.mxu0 }
 0x6a6   : > { %v5822_v35 = vpop.f32.mrf.mxu1 }
 0x6a7   : > { %v12793_v60 = vpop.f32.mrf.mxu0 }
 0x6a8   : > { %v5826_v53 = vpop.f32.mrf.mxu1 }
 0x6a9   : > { %v12795_v54 = vpop.f32.mrf.mxu0 }
 0x6aa   : > { %v5828_v13 = vpop.f32.mrf.mxu1 }
 0x6ab   : > { %v12797_v59 = vpop.f32.mrf.mxu0 }
 0x6ac   : > { %v5832_v57 = vpop.f32.mrf.mxu1 }
 0x6ad   : > { %v12799_v26 = vpop.f32.mrf.mxu0 }
 0x6ae   : > { %v5834_v11 = vpop.f32.mrf.mxu1 }
 0x6af   : > { %v12801_v62 = vpop.f32.mrf.mxu0 }
 0x6b0   : > { %v5838_v31 = vpop.f32.mrf.mxu1 }
 0x6b1   : > { %v12803_v17 = vpop.f32.mrf.mxu0 }
 0x6b2   : > { %v12805_v61 = vpop.f32.mrf.mxu1 }
 0x6b4   : > { %v12807_v58 = vpop.f32.mrf.mxu1  ;;  %v12809_v4 = vpop.f32.mrf.mxu0 }
 0x6b6   : > { %v12811_v49 = vpop.f32.mrf.mxu1  ;;  %v12813_v38 = vpop.f32.mrf.mxu0 }
 0x6b8   : > { %v12815_v47 = vpop.f32.mrf.mxu1 }
 0x6ba   : > { %v12817_v52 = vpop.f32.mrf.mxu1 }
 0x6bb   : > { %v12819_v1 = vpop.f32.mrf.mxu0 }
 0x6bc   : > { %13437 = vst [vmem:[#allocation27_spill] sm:$0xff] %v12819_v1  ;;  %v12821_v10 = vpop.f32.mrf.mxu1 }
 0x6bd   : > { %v12823_v46 = vpop.f32.mrf.mxu0 }
 0x6be   : > { %13438 = vst [vmem:[#allocation26_spill] sm:$0xff] %v12823_v46  ;;  %v12825_v39 = vpop.f32.mrf.mxu1 }
 0x6bf   : > { %v12827_v41 = vpop.f32.mrf.mxu0 }
 0x6c0   : > { %13439 = vst [vmem:[#allocation19_spill] sm:$0xff] %v12827_v41  ;;  %v6226_v43 = vpop.f32.mrf.mxu1 }
 0x6c1   : > { %v12829_v29 = vpop.f32.mrf.mxu0 }
 0x6c2   : > { %13440 = vst [vmem:[#allocation18_spill] sm:$0xff] %v12829_v29  ;;  %v6228_v9 = vpop.f32.mrf.mxu1 }
 0x6c3   : > { %v6476_v28 = vpop.f32.mrf.mxu0 }
 0x6c4   : > { %v6232_v34 = vpop.f32.mrf.mxu1 }
 0x6c5   : > { %v12831_v63 = vpop.f32.mrf.mxu0 }
 0x6c6   : > { %v12833_v18 = vpop.f32.mrf.mxu1 }
 0x6c7   : > { %v12835_v33 = vpop.f32.mrf.mxu0 }
 0x6c8   : > { %v12837_v37 = vpop.f32.mrf.mxu1 }
 0x6c9   : > { %v12839_v30 = vpop.f32.mrf.mxu0 }
 0x6ca   : > { %13441 = vst [vmem:[#allocation3_spill] sm:$0xff] %v12839_v30  ;;  %v12841_v8 = vpop.f32.mrf.mxu1 }
 0x6cb   : > { %v12843_v51 = vpop.f32.mrf.mxu0 }
 0x6cc   : > { %13442 = vst [vmem:[#allocation6_spill] sm:$0xff] %v12843_v51  ;;  %v12845_v12 = vpop.f32.mrf.mxu1 }
 0x6cd   : > { %13443 = vst [vmem:[#allocation7_spill] sm:$0xff] %v12845_v12  ;;  %v12847_v36 = vpop.f32.mrf.mxu0  ;;  %v12880_v12 = vld [vmem:[%s8247_s18 + $0x8] sm:$0xff] }
 0x6ce   : > { %13444 = vst [vmem:[#allocation9_spill] sm:$0xff] %v12847_v36  ;;  %v12849_v45 = vpop.f32.mrf.mxu1  ;;  %v5861_v36 = vadd.f32 %v5814_v50, %v12755_v22  ;;  %v5864_v22 = vadd.f32 %v5822_v35, %v12761_v15  ;;  %v5865_v50 = vadd.f32 %v5826_v53, %v12763_v55  ;;  %v5869_v15 = vadd.f32 %v5838_v31, %v12771_v27 }
 0x6cf   : > { %13445 = vst [vmem:[#allocation10_spill] sm:$0xff] %v12849_v45  ;;  %v12851_v23 = vpop.f32.mrf.mxu0  ;;  %v5870_v27 = vadd.f32 %v12805_v61, %v12773_v6  ;;  %v5872_v6 = vadd.f32 %v12811_v49, %v12777_v21  ;;  %v5876_v21 = vadd.f32 %v12825_v39, %v12785_v20 }
 0x6d0   : > { %13446 = vst [vmem:[#allocation25_spill] sm:$0xff] %v12851_v23  ;;  %v12853_v3 = vpop.f32.mrf.mxu1  ;;  %v5862_v23 = vadd.f32 %v5816_v40, %v12757_v32  ;;  %v12887_v32 = vld [vmem:[%s8247_s18 + $0x10] sm:$0xff]  ;;  %v12890_v40 = vld [vmem:[%s8247_s18 + $0x18] sm:$0xff] }
 0x6d1   : > { %13447 = vst [vmem:[#allocation31_spill] sm:$0xff] %v12853_v3  ;;  %v12855_v29 = vpop.f32.mrf.mxu0 }
 0x6d2   : > { %13448 = vst [vmem:[#allocation14_spill] sm:$0xff] %v12855_v29  ;;  %v12857_v41 = vpop.f32.mrf.mxu1 }
 0x6d3   : > { %13449 = vst [vmem:[#allocation5_spill] sm:$0xff] %v12857_v41  ;;  %v12859_v30 = vpop.f32.mrf.mxu0  ;;  %v6023_v41 = vadd.f32 %v5976_v42, %v5861_v36  ;;  %v6024_v42 = vadd.f32 %v12787_v5, %v5862_v23 }
 0x6d4   : > { %13450 = vst [vmem:[#allocation32_spill] sm:$0xff] %v12859_v30  ;;  %v12861_v51 = vpop.f32.mrf.mxu1  ;;  %v5863_v30 = vadd.f32 %v5820_v56, %v12759_v19  ;;  %v5866_v19 = vadd.f32 %v5828_v13, %v12765_v24  ;;  %v5867_v56 = vadd.f32 %v5832_v57, %v12767_v2  ;;  %v7202_v2 = vrot.slane %v12887_v32, 7 }
 0x6d5   : > { %13451 = vst [vmem:[#allocation30_spill] sm:$0xff] %v12861_v51  ;;  %v12864_v46 = vpop.f32.mrf.mxu0  ;;  %v12877_v51 = vld [vmem:[%s8247_s18] sm:$0xff]  ;;  %v6273_v36 = vadd.f32 %v6226_v43, %v6023_v41  ;;  %v6274_v24 = vadd.f32 %v6228_v9, %v6024_v42  ;;  %v7203_v13 = vrot.slane %v12890_v40, 7  ;;  %v6026_v57 = vadd.f32 %v12791_v0, %v5864_v22 }
 0x6d6   : > { %13452 = vst [vmem:[#allocation28_spill] sm:$0xff] %v12864_v46  ;;  %v12866_v1 = vpop.f32.mrf.mxu1  ;;  %v7200_v53 = vrot.slane %v12877_v51, 7  ;;  %v6025_v5 = vadd.f32 %v12789_v7, %v5863_v30  ;;  %v6028_v7 = vadd.f32 %v12795_v54, %v5866_v19  ;;  %v6029_v43 = vadd.f32 %v12797_v59, %v5867_v56  ;;  %v13458_v42 = vld [vmem:[#allocation27_spill] sm:$0xff]  ;;  %v13459_v56 = vld [vmem:[#allocation26_spill] sm:$0xff] }
 0x6d7   : > { %v12869_v45 = vpop.f32.mrf.mxu0  ;;  %v6523_v9 = vadd.f32 %v6476_v28, %v6273_v36  ;;  %v6031_v0 = vadd.f32 %v12801_v62, %v5869_v15  ;;  %v5873_v54 = vadd.f32 %v12815_v47, %v12779_v44  ;;  %v5874_v59 = vadd.f32 %v12817_v52, %v12781_v48  ;;  %v13460_v15 = vld [vmem:[#allocation19_spill] sm:$0xff] }
 0x6d8   : > { %13453 = vst [vmem:[#allocation29_spill] sm:$0xff] %v12869_v45  ;;  %v12871_v29 = vpop.f32.mrf.mxu1  ;;  %v5868_v45 = vadd.f32 %v5834_v11, %v12769_v14  ;;  %v6027_v14 = vadd.f32 %v12793_v60, %v5865_v50  ;;  %v6275_v30 = vadd.f32 %v6232_v34, %v6025_v5  ;;  %v5871_v60 = vadd.f32 %v12807_v58, %v12775_v16  ;;  %v7051_v50 = vpop.permute.xlu1 %7050  ;;  %v13461_v5 = vld [vmem:[#allocation18_spill] sm:$0xff] }
 0x6d9   : > { %v12874_v3 = vpop.f32.mrf.mxu0  ;;  %v6524_v28 = vadd.f32 %v12831_v63, %v6274_v24  ;;  %v6032_v62 = vadd.f32 %v12803_v17, %v5870_v27  ;;  %v5875_v16 = vadd.f32 %v12821_v10, %v12783_v25  ;;  %v6276_v58 = vadd.f32 %v12833_v18, %v6026_v57  ;;  %v13456_v25 = vld [vmem:[#allocation7_spill] sm:$0xff] }
 0x6da   : > { %13454 = vst [vmem:[#allocation22_spill] sm:$0xff] %v12874_v3  ;;  %v12884_v46 = vpop.f32.mrf.mxu1  ;;  %v12896_v3 = vld [vmem:[%s8247_s18 + $0x20] sm:$0xff]  ;;  %v6030_v23 = vadd.f32 %v12799_v26, %v5868_v45  ;;  %v6525_v44 = vadd.f32 %v12835_v33, %v6275_v30  ;;  %v6277_v48 = vadd.f32 %v12837_v37, %v6027_v14  ;;  %v6278_v47 = vadd.f32 %v12841_v8, %v6028_v7  ;;  %v13457_v45 = vld [vmem:[#allocation10_spill] sm:$0xff]  ;;  %v13465_v30 = vld [vmem:[#allocation9_spill] sm:$0xff] }
 0x6db   : > { %13455 = vst [vmem:[#allocation15_spill] sm:$0xff] %v12884_v46  ;;  %v7201_v46 = vrot.slane %v12880_v12, 7  ;;  %v7204_v41 = vrot.slane %v12896_v3, 7  ;;  %v6033_v17 = vadd.f32 %v12809_v4, %v5871_v60  ;;  %v6034_v63 = vadd.f32 %v12813_v38, %v5872_v6  ;;  %v13462_v38 = vld [vmem:[#allocation3_spill] sm:$0xff] }
 0x6dc   : > { %v12900_v55 = vpop.f32.mrf.mxu0  ;;  %v12902_v35 = vpop.f32.mrf.mxu1  ;;  %v6279_v10 = vadd.f32 %v13456_v25, %v6029_v43  ;;  %v6280_v20 = vadd.f32 %v13457_v45, %v6030_v23  ;;  %v6035_v19 = vadd.f32 %v13458_v42, %v5873_v54  ;;  %v6036_v33 = vadd.f32 %v13459_v56, %v5874_v59  ;;  %v13463_v57 = vld [vmem:[#allocation31_spill] sm:$0xff]  ;;  %v13464_v43 = vld [vmem:[#allocation6_spill] sm:$0xff] }
 0x6dd   : > { %v12951_v8 = vadd.f32 %v13460_v15, %v5875_v16  ;;  %v12954_v4 = vadd.f32 %v13461_v5, %v5876_v21  ;;  %v6526_v24 = vadd.f32 %v13462_v38, %v6276_v58  ;;  %v6281_v14 = vadd.f32 %v13463_v57, %v6031_v0  ;;  %v13467_v59 = vld [vmem:[#allocation14_spill] sm:$0xff]  ;;  %v7056_v58 = vpop.permute.xlu0 %7055  ;;  %v13471_v15 = vld [vmem:[#allocation28_spill] sm:$0xff] }
 0x6de   : > { %v12913_v11 = vpop.f32.mrf.mxu0  ;;  %v12915_v31 = vpop.f32.mrf.mxu1  ;;  %v6528_v23 = vadd.f32 %v13465_v30, %v6278_v47  ;;  %v6285_v38 = vadd.f32 %v12871_v29, %v6035_v19 }
 0x6e0   : > { %v12926_v61 = vpop.f32.mrf.mxu0  ;;  %v6726_v22 = vpop.f32.mrf.mxu1 }
 0x6e1   : > { %v6773_v26 = vadd.f32 %v6726_v22, %v6523_v9  ;;  %v6527_v9 = vadd.f32 %v13464_v43, %v6277_v48  ;;  %v13466_v22 = vld [vmem:[#allocation25_spill] sm:$0xff]  ;;  %v13474_v29 = vld [vmem:[#allocation22_spill] sm:$0xff] }
 0x6e2   : > { %v12939_v49 = vpop.f32.mrf.mxu0  ;;  %v6728_v34 = vpop.f32.mrf.mxu1  ;;  %v6529_v54 = vadd.f32 %v13466_v22, %v6279_v10  ;;  %v13473_v43 = vld [vmem:[#allocation15_spill] sm:$0xff] }
 0x6e3   : > { %v6774_v52 = vadd.f32 %v6728_v34, %v6524_v28  ;;  %v6530_v28 = vadd.f32 %v13467_v59, %v6280_v20 }
 0x6e4   : > { %v6976_v39 = vpop.f32.mrf.mxu0  ;;  %v6732_v18 = vpop.f32.mrf.mxu1 }
 0x6e5   : > { %v7023_v36 = vadd.f32 %v6976_v39, %v6773_v26  ;;  %v6775_v37 = vadd.f32 %v6732_v18, %v6525_v44  ;;  %v13468_v26 = vld [vmem:[#allocation5_spill] sm:$0xff]  ;;  %v13469_v39 = vld [vmem:[#allocation32_spill] sm:$0xff]  ;;  %v13470_v18 = vld [vmem:[#allocation30_spill] sm:$0xff] }
 0x6e6   : > { %v6978_v27 = vpop.f32.mrf.mxu0  ;;  %v6734_v7 = vpop.f32.mrf.mxu1  ;;  %v6282_v16 = vadd.f32 %v13468_v26, %v6032_v62  ;;  %v6531_v48 = vadd.f32 %v13469_v39, %v6281_v14  ;;  %v6283_v47 = vadd.f32 %v13470_v18, %v6033_v17 }
 0x6e7   : > { %v7088_v60 = vadd.f32 %v7051_v50, %v7023_v36  ;;  %v7024_v6 = vadd.f32 %v6978_v27, %v6774_v52  ;;  %v6776_v21 = vadd.f32 %v6734_v7, %v6526_v24  ;;  %v6284_v52 = vadd.f32 %v12866_v1, %v6034_v63  ;;  %v7061_v14 = vpop.permute.xlu1 %7060  ;;  %v13472_v27 = vld [vmem:[#allocation29_spill] sm:$0xff] }
 0x6e8   : > { %v6982_v34 = vpop.f32.mrf.mxu0  ;;  %v6738_v44 = vpop.f32.mrf.mxu1  ;;  %v6532_v5 = vadd.f32 %v13471_v15, %v6282_v16  ;;  %v6533_v7 = vadd.f32 %v13472_v27, %v6283_v47  ;;  %v12972_v16 = vadd.f32 %v12900_v55, %v6285_v38 }
 0x6e9   : > { %vm7104_vm4 = vcmp.ge.f32.partialorder %v7088_v60, 0.0  ;;  %v7120_v0 = vmul.f32 0.2, %v7088_v60  ;;  %v7089_v25 = vadd.f32 %v7051_v50, %v7024_v6  ;;  %v7025_v45 = vadd.f32 %v6982_v34, %v6775_v37 }
 0x6ea   : > { %v6777_v42 = vadd.f32 %v6738_v44, %v6527_v9  ;;  %v6984_v10 = vpop.f32.mrf.mxu0  ;;  %v6740_v56 = vpop.f32.mrf.mxu1  ;;  %v6286_v9 = vadd.f32 %v13473_v43, %v6036_v33  ;;  %v6534_v19 = vadd.f32 %v13474_v29, %v6284_v52 }
 0x6eb   : > { %v7136_v20 = vsel %vm7104_vm4, %v7088_v60, %v7120_v0  ;;  %vm7105_vm7 = vcmp.ge.f32.partialorder %v7089_v25, 0.0  ;;  %v7121_v62 = vmul.f32 0.2, %v7089_v25  ;;  %v7090_v36 = vadd.f32 %v7056_v58, %v7025_v45  ;;  %v7066_v33 = vpop.permute.xlu0 %7065 }
 0x6ec   : > { %7152 = vst [vmem:[#allocation2 + $0x30] sm:$0xff] %v7136_v20  ;;  %v7026_v50 = vadd.f32 %v6984_v10, %v6776_v21  ;;  %v6778_v37 = vadd.f32 %v6740_v56, %v6528_v23  ;;  %v6988_v24 = vpop.f32.mrf.mxu0  ;;  %v6744_v57 = vpop.f32.mrf.mxu1  ;;  %v6287_v45 = vadd.f32 %v12902_v35, %v12951_v8  ;;  %v12977_v39 = vadd.f32 %v12913_v11, %v6286_v9 }
 0x6ed   : > { %v7137_v17 = vsel %vm7105_vm7, %v7089_v25, %v7121_v62  ;;  %vm7106_vm11 = vcmp.ge.f32.partialorder %v7090_v36, 0.0  ;;  %v7122_v1 = vmul.f32 0.2, %v7090_v36  ;;  %v7027_v63 = vadd.f32 %v6988_v24, %v6777_v42 }
 0x6ee   : > { %7153 = vst [vmem:[#allocation2] sm:$0xff] %v7137_v17  ;;  %v7091_v30 = vadd.f32 %v7056_v58, %v7026_v50  ;;  %v6779_v60 = vadd.f32 %v6744_v57, %v6529_v54  ;;  %v6990_v6 = vpop.f32.mrf.mxu0  ;;  %v6746_v22 = vpop.f32.mrf.mxu1  ;;  %v12981_v20 = vadd.f32 %v12915_v31, %v12954_v4  ;;  %v6537_v24 = vadd.f32 %v12926_v61, %v6287_v45 }
 0x6ef   : > { %v7138_v59 = vsel %vm7106_vm11, %v7090_v36, %v7122_v1  ;;  %v7092_v23 = vadd.f32 %v7061_v14, %v7027_v63  ;;  %v7028_v26 = vadd.f32 %v6990_v6, %v6778_v37  ;;  %v6780_v34 = vadd.f32 %v6746_v22, %v6530_v28  ;;  %v7071_v36 = vpop.permute.xlu1 %7070 }
 0x6f0   : > { %7154 = vst [vmem:[#allocation2 + $0x58] sm:$0xff] %v7138_v59  ;;  %vm7107_vm14 = vcmp.ge.f32.partialorder %v7091_v30, 0.0  ;;  %v7123_v21 = vmul.f32 0.2, %v7091_v30  ;;  %v6994_v44 = vpop.f32.mrf.mxu0  ;;  %v6750_v0 = vpop.f32.mrf.mxu1 }
 0x6f1   : > { %vm7108_vm15 = vcmp.ge.f32.partialorder %v7092_v23, 0.0  ;;  %v7124_v54 = vmul.f32 0.2, %v7092_v23  ;;  %v7093_v58 = vadd.f32 %v7061_v14, %v7028_v26  ;;  %v7029_v25 = vadd.f32 %v6994_v44, %v6779_v60 }
 0x6f2   : > { %v7139_v55 = vsel %vm7107_vm14, %v7091_v30, %v7123_v21  ;;  %v6781_v18 = vadd.f32 %v6750_v0, %v6531_v48  ;;  %v6996_v47 = vpop.f32.mrf.mxu0  ;;  %v6752_v52 = vpop.f32.mrf.mxu1 }
 0x6f3   : > { %v7168_v42 = vld [vmem:[#allocation2 + $0x30] sm:$0xfe]  ;;  %7155 = vst [vmem:[#allocation2 + $0x18] sm:$0xff] %v7139_v55  ;;  %v7140_v28 = vsel %vm7108_vm15, %v7092_v23, %v7124_v54  ;;  %vm7109_vm6 = vcmp.ge.f32.partialorder %v7093_v58, 0.0  ;;  %v7125_v10 = vmul.f32 0.2, %v7093_v58  ;;  %v7094_v56 = vadd.f32 %v7066_v33, %v7029_v25 }
 0x6f4   : > { %v7216_v35 = vadd.f32 %v7200_v53, %v7168_v42  ;;  %7156 = vst [vmem:[#allocation2 + $0x50] sm:$0xff] %v7140_v28  ;;  %v7030_v11 = vadd.f32 %v6996_v47, %v6780_v34  ;;  %v6782_v8 = vadd.f32 %v6752_v52, %v6532_v5  ;;  %v7000_v62 = vpop.f32.mrf.mxu0  ;;  %v6756_v48 = vpop.f32.mrf.mxu1 }
 0x6f5   : > { %v7169_v15 = vld [vmem:[#allocation2] sm:$0xfe]  ;;  %v7141_v38 = vsel %vm7109_vm6, %v7093_v58, %v7125_v10  ;;  %vm7110_vm8 = vcmp.ge.f32.partialorder %v7094_v56, 0.0  ;;  %v7126_v50 = vmul.f32 0.2, %v7094_v56  ;;  %v7031_v37 = vadd.f32 %v7000_v62, %v6781_v18  ;;  %v7076_v34 = vpop.permute.xlu0 %7075  ;;  %v7081_v28 = vpop.permute.xlu1 %7080 }
 0x6f6   : > { %v7217_v31 = vadd.f32 %v7201_v46, %v7169_v15  ;;  %7157 = vst [vmem:[#allocation2 + $0x68] sm:$0xff] %v7141_v38  ;;  %v7095_v4 = vadd.f32 %v7066_v33, %v7030_v11  ;;  %v6783_v57 = vadd.f32 %v6756_v48, %v6533_v7  ;;  %v7002_v14 = vpop.f32.mrf.mxu0  ;;  %v6758_v17 = vpop.f32.mrf.mxu1  ;;  %v7249_v1 = vrot.slane %v7216_v35, 1 }
 0x6f7   : > { %v7170_v5 = vld [vmem:[#allocation2 + $0x58] sm:$0x1]  ;;  %v7142_v63 = vsel %vm7110_vm8, %v7094_v56, %v7126_v50  ;;  %v7096_v27 = vadd.f32 %v7071_v36, %v7031_v37  ;;  %v7032_v43 = vadd.f32 %v7002_v14, %v6782_v8  ;;  %v6784_v30 = vadd.f32 %v6758_v17, %v6534_v19 }
 0x6f8   : > { %v7218_v9 = vadd.f32 %v7200_v53, %v7170_v5  ;;  %7158 = vst [vmem:[#allocation2 + $0x8] sm:$0xff] %v7142_v63  ;;  %vm7111_vm10 = vcmp.ge.f32.partialorder %v7095_v4, 0.0  ;;  %v7127_v61 = vmul.f32 0.2, %v7095_v4  ;;  %v7006_v60 = vpop.f32.mrf.mxu0  ;;  %v6762_v6 = vpop.f32.mrf.mxu1  ;;  %v7252_v59 = vrot.slane %v7217_v31, 1  ;;  %v7189_v63 = vld [vmem:[%s8247_s18 + $0x28] sm:$0xff] }
 0x6f9   : > { %vm7112_vm5 = vcmp.ge.f32.partialorder %v7096_v27, 0.0  ;;  %v7128_v22 = vmul.f32 0.2, %v7096_v27  ;;  %v7097_v7 = vadd.f32 %v7071_v36, %v7032_v43  ;;  %v7033_v29 = vadd.f32 %v7006_v60, %v6783_v57 }
 0x6fa   : > { %v7250_v23 = vrot.slane %v7218_v9, 1  ;;  %v7171_v51 = vld [vmem:[#allocation2 + $0x18] sm:$0x1]  ;;  %v7143_v53 = vsel %vm7111_vm10, %v7095_v4, %v7127_v61  ;;  %v6785_v26 = vadd.f32 %v6762_v6, %v12972_v16  ;;  %v7008_v21 = vpop.f32.mrf.mxu0  ;;  %v6764_v19 = vpop.f32.mrf.mxu1  ;;  %v6538_v10 = vadd.f32 %v12939_v49, %v12981_v20 }
 0x6fb   : > { %v7219_v44 = vadd.f32 %v7201_v46, %v7171_v51  ;;  %v7172_v0 = vld [vmem:[#allocation2 + $0x50] sm:$0xfe]  ;;  %7159 = vst [vmem:[#allocation2 + $0x48] sm:$0xff] %v7143_v53  ;;  %v7144_v33 = vsel %vm7112_vm5, %v7096_v27, %v7128_v22  ;;  %vm7113_vm0 = vcmp.ge.f32.partialorder %v7097_v7, 0.0  ;;  %v7129_v54 = vmul.f32 0.2, %v7097_v7  ;;  %v7086_v9 = vpop.permute.xlu0 %7085 }
 0x6fc   : > { %v7251_v58 = vsel %vm7248_vm2, %v7249_v1, %v7250_v23  ;;  %v7220_v25 = vadd.f32 %v7202_v2, %v7172_v0  ;;  %7160 = vst [vmem:[#allocation2 + $0x40] sm:$0xff] %v7144_v33  ;;  %v7098_v16 = vadd.f32 %v7076_v34, %v7033_v29  ;;  %v7034_v45 = vadd.f32 %v7008_v21, %v6784_v30  ;;  %v7012_v55 = vpop.f32.mrf.mxu0  ;;  %v6768_v18 = vpop.f32.mrf.mxu1 }
 0x6fd   : > { %7281 = vst [vmem:[%s12995_s20] sm:$0xff] %v7251_v58  ;;  %v7253_v47 = vrot.slane %v7219_v44, 1  ;;  %v7173_v12 = vld [vmem:[#allocation2 + $0x68] sm:$0xfe]  ;;  %v7145_v46 = vsel %vm7113_vm0, %v7097_v7, %v7129_v54  ;;  %v6786_v52 = vadd.f32 %v6764_v19, %v12977_v39  ;;  %v7035_v42 = vadd.f32 %v7012_v55, %v6785_v26  ;;  %v7190_v19 = vld [vmem:[%s8247_s18 + $0x30] sm:$0xff] }
 0x6fe   : > { %v7255_v56 = vrot.slane %v7220_v25, 1  ;;  %7161 = vst [vmem:[#allocation2 + $0x20] sm:$0xff] %v7145_v46  ;;  %vm7114_vm12 = vcmp.ge.f32.partialorder %v7098_v16, 0.0  ;;  %v7130_v35 = vmul.f32 0.2, %v7098_v16  ;;  %v7014_v11 = vpop.f32.mrf.mxu0  ;;  %v7099_v48 = vadd.f32 %v7076_v34, %v7034_v45  ;;  %v6770_v38 = vpop.f32.mrf.mxu1  ;;  %v7191_v25 = vld [vmem:[%s8247_s18 + $0x38] sm:$0xff] }
 0x6ff   : > { %v7254_v8 = vsel %vm7248_vm2, %v7252_v59, %v7253_v47  ;;  %v7174_v62 = vld [vmem:[#allocation2 + $0x8] sm:$0x1]  ;;  %v7100_v36 = vadd.f32 %v7081_v28, %v7035_v42  ;;  %v6787_v15 = vadd.f32 %v6768_v18, %v6537_v24  ;;  %v7221_v39 = vadd.f32 %v7203_v13, %v7173_v12 }
 0x700   : > { %7282 = vst [vmem:[%s12995_s20 + $0x8] sm:$0xff] %v7254_v8  ;;  %v7222_v50 = vadd.f32 %v7202_v2, %v7174_v62  ;;  %v7146_v49 = vsel %vm7114_vm12, %v7098_v16, %v7130_v35  ;;  %v7036_v20 = vadd.f32 %v7014_v11, %v6786_v52  ;;  %v7018_v37 = vpop.f32.mrf.mxu0  ;;  %vm7115_vm3 = vcmp.ge.f32.partialorder %v7099_v48, 0.0 }
 0x701   : > { %7162 = vst [vmem:[#allocation2 + $0x10] sm:$0xff] %v7146_v49  ;;  %v7131_v31 = vmul.f32 0.2, %v7099_v48  ;;  %vm7116_vm9 = vcmp.ge.f32.partialorder %v7100_v36, 0.0  ;;  %v7132_v4 = vmul.f32 0.2, %v7100_v36  ;;  %v6788_v17 = vadd.f32 %v6770_v38, %v6538_v10 }
 0x702   : > { %v7256_v57 = vrot.slane %v7222_v50, 1  ;;  %v7175_v14 = vld [vmem:[#allocation2 + $0x48] sm:$0x1]  ;;  %v7101_v24 = vadd.f32 %v7081_v28, %v7036_v20  ;;  %v7037_v1 = vadd.f32 %v7018_v37, %v6787_v15  ;;  %v7020_v5 = vpop.f32.mrf.mxu0  ;;  %v7258_v60 = vrot.slane %v7221_v39, 1 }
 0x703   : > { %v7223_v32 = vadd.f32 %v7203_v13, %v7175_v14  ;;  %v7176_v2 = vld [vmem:[#allocation2 + $0x40] sm:$0xfe]  ;;  %v7147_v27 = vsel %vm7115_vm3, %v7099_v48, %v7131_v31  ;;  %v7148_v43 = vsel %vm7116_vm9, %v7100_v36, %v7132_v4  ;;  %v7038_v7 = vadd.f32 %v7020_v5, %v6788_v17 }
 0x704   : > { %v7257_v61 = vsel %vm7248_vm2, %v7255_v56, %v7256_v57  ;;  %7163 = vst [vmem:[#allocation2 + $0x38] sm:$0xff] %v7147_v27  ;;  %7164 = vst [vmem:[#allocation2 + $0x60] sm:$0xff] %v7148_v43  ;;  %vm7117_vm13 = vcmp.ge.f32.partialorder %v7101_v24, 0.0  ;;  %v7133_v30 = vmul.f32 0.2, %v7101_v24  ;;  %v7102_v22 = vadd.f32 %v7086_v9, %v7037_v1 }
 0x705   : > { %7283 = vst [vmem:[%s12995_s20 + $0x10] sm:$0xff] %v7257_v61  ;;  %v7259_v6 = vrot.slane %v7223_v32, 1  ;;  %v7224_v40 = vadd.f32 %v7204_v41, %v7176_v2  ;;  %v7205_v13 = vrot.slane %v7189_v63, 7  ;;  %v7177_v23 = vld [vmem:[#allocation2 + $0x20] sm:$0xfe]  ;;  %v7103_v53 = vadd.f32 %v7086_v9, %v7038_v7 }
 0x706   : > { %v7149_v29 = vsel %vm7117_vm13, %v7101_v24, %v7133_v30  ;;  %vm7118_vm1 = vcmp.ge.f32.partialorder %v7102_v22, 0.0  ;;  %v7134_v51 = vmul.f32 0.2, %v7102_v22  ;;  %v7206_v55 = vrot.slane %v7190_v19, 7 }
 0x707   : > { %v7260_v59 = vsel %vm7248_vm2, %v7258_v60, %v7259_v6  ;;  %7165 = vst [vmem:[#allocation2 + $0x70] sm:$0xff] %v7149_v29  ;;  %vm7119_vm4 = vcmp.ge.f32.partialorder %v7103_v53, 0.0  ;;  %v7135_v44 = vmul.f32 0.2, %v7103_v53  ;;  %v7225_v0 = vadd.f32 %v7205_v13, %v7177_v23 }
 0x708   : > { %7284 = vst [vmem:[%s12995_s20 + $0x18] sm:$0xff] %v7260_v59  ;;  %v7178_v26 = vld [vmem:[#allocation2 + $0x10] sm:$0x1]  ;;  %v7150_v34 = vsel %vm7118_vm1, %v7102_v22, %v7134_v51  ;;  %v7261_v33 = vrot.slane %v7224_v40, 1  ;;  %v7207_v12 = vrot.slane %v7191_v25, 7 }
 0x709   : > { %v7226_v21 = vadd.f32 %v7204_v41, %v7178_v26  ;;  %7166 = vst [vmem:[#allocation2 + $0x78] sm:$0xff] %v7150_v34  ;;  %v7151_v16 = vsel %vm7119_vm4, %v7103_v53, %v7135_v44  ;;  %v7264_v41 = vrot.slane %v7225_v0, 1 }
 0x70a   : > { %7167 = vst [vmem:[#allocation2 + $0x28] sm:$0xff] %v7151_v16 }
 0x70b   : > { %v7262_v54 = vrot.slane %v7226_v21, 1  ;;  %v7179_v58 = vld [vmem:[#allocation2 + $0x38] sm:$0x1]  ;;  %v7180_v3 = vld [vmem:[#allocation2 + $0x60] sm:$0xfe] }
 0x70c   : > { %v7227_v45 = vadd.f32 %v7205_v13, %v7179_v58  ;;  %v7228_v42 = vadd.f32 %v7206_v55, %v7180_v3 }
 0x70d   : > { %v7263_v18 = vsel %vm7248_vm2, %v7261_v33, %v7262_v54 }
 0x70e   : > { %7285 = vst [vmem:[%s12995_s20 + $0x20] sm:$0xff] %v7263_v18  ;;  %v7265_v47 = vrot.slane %v7227_v45, 1  ;;  %v7181_v46 = vld [vmem:[#allocation2 + $0x70] sm:$0xfe]  ;;  %v7267_v11 = vrot.slane %v7228_v42, 1 }
 0x70f   : > { %v7229_v10 = vadd.f32 %v7207_v12, %v7181_v46 }
 0x710   : > { %v7266_v52 = vsel %vm7248_vm2, %v7264_v41, %v7265_v47  ;;  %v7182_v28 = vld [vmem:[#allocation2 + $0x78] sm:$0x1] }
 0x711   : > { %7286 = vst [vmem:[%s12995_s20 + $0x28] sm:$0xff] %v7266_v52  ;;  %v7230_v56 = vadd.f32 %v7206_v55, %v7182_v28  ;;  %v7183_v35 = vld [vmem:[#allocation2 + $0x28] sm:$0x1]  ;;  %v7270_v48 = vrot.slane %v7229_v10, 1 }
 0x712   : > { %v7231_v62 = vadd.f32 %v7207_v12, %v7183_v35 }
 0x713   : > { %v7268_v8 = vrot.slane %v7230_v56, 1 }
 0x714   : > { %v7271_v15 = vrot.slane %v7231_v62, 1 }
 0x715   : > { %v7269_v36 = vsel %vm7248_vm2, %v7267_v11, %v7268_v8 }
 0x716   : > { %7287 = vst [vmem:[%s12995_s20 + $0x30] sm:$0xff] %v7269_v36  ;;  %v7272_v38 = vsel %vm7248_vm2, %v7270_v48, %v7271_v15 }
 0x717   : > { %7288 = vst [vmem:[%s12995_s20 + $0x38] sm:$0xff] %v7272_v38 }
 0x718 PF: > { %s13_s12 = sadd.s32 1, %s8175_s12  }
 0x719   : > { %p10_p4 = scmp.ge.s32.totalorder %s13_s12, 4  }
 0x71b   :  { %12 = sbr.rel (!%p10_p4) target bundleno = 1 (0x1), region = 90 }

</bundles_post_ra>
